<compile_context>
chip_gen: v7x
topology: tpu7x:2x2x1
jax: 0.10.0
libtpu: 0.0.40
codegen_flags: <defaults>
</compile_context>

<pallas_src>
import numpy as np
import jax
import jax.numpy as jnp
from jax import lax
from jax.experimental import pallas as pl
from jax.experimental.pallas import tpu as pltpu

# ---- constants implied by the PyTorch module __init__ ----
BANDS = 4                  # delta, theta, alpha, beta
FEAT_DIM = 32              # MultiScale1DBlock out_ch
SPAT_DIM = 32              # SpatialSpectralBlock out_ch
BP_DIM = 8
GCN_H = 128
HEADS = 4
NUM_CLASSES = 2
KERNELS_1D = (50, 100, 200)
K_TIME = 20
BN_EPS = 1e-5
NEG_SLOPE = 0.2            # GATConv leaky_relu slope
TOTAL_DIM = FEAT_DIM + SPAT_DIM + BP_DIM   # 72
TOTAL_PAD = 128            # lane-aligned (zero padded) feature width
CLS_PAD = 128              # lane-aligned (zero padded) classifier output width

# rows of the stacked (BIAS_ROWS, 128) f32 bias operand
(IDX_BBP, IDX_BG1, IDX_BSKIP, IDX_BN1S, IDX_BN1B,
 IDX_BN2S, IDX_BN2B, IDX_BG2, IDX_BC1, IDX_BC2) = range(10)
BIAS_ROWS = 16


def _round_up(x, m):
    return ((x + m - 1) // m) * m


def _vmem_limit_bytes():
    """Generation-aware scoped-VMEM limit (v5e/v6e: 128 MiB phys, v7x: 64 MiB)."""
    default = 48 * 1024 * 1024
    try:
        info = pltpu.get_tpu_info()
        for name in ("vmem_capacity_bytes", "vmem_size_bytes", "vmem_bytes"):
            cap = getattr(info, name, None)
            if isinstance(cap, (int, np.integer)) and cap > 0:
                return max(32 * 1024 * 1024, min(int(cap) * 3 // 4, 96 * 1024 * 1024))
    except Exception:
        pass
    return default


# ---------------- elementwise helpers (lower cleanly on Mosaic) -------------
def _gelu(x):
    # tanh-approx GELU (transcendental on the EUP slot); <=~1e-3 abs deviation from
    # the exact erf GELU used by torch.nn.GELU() -- well inside test tolerance.
    return 0.5 * x * (1.0 + jnp.tanh(0.7978845608028654 * (x + 0.044715 * x * x * x)))


def _elu(x):
    return jnp.where(x > 0, x, jnp.exp(x) - 1.0)


def _sigmoid(x):
    return 1.0 / (1.0 + jnp.exp(-x))


# ---------------- the fused Pallas kernel (one graph per grid step) ---------
def fused_forward_kernel(
        xp1_ref, xp2_ref, bp_ref, adjb_ref,
        m1_ref, a1_ref, mse1_ref, mse2_ref,
        m2_ref, a2_ref, sse1_ref, sse2_ref,
        wbp_ref, ca1_ref, ca2_ref,
        wg1_ref, asrc1_ref, adstf1_ref,
        wskip_ref,
        wg2_ref, asrc2_ref, adstf2_ref,
        wc1_ref, wc2_ref,
        bias_ref,
        out_ref,
        feat_sc):
    f32 = jnp.float32
    bf16 = jnp.bfloat16
    C = feat_sc.shape[0]   # nodes (EEG channels) per graph

    def mm(a, b):
        # bf16 MXU operands, f32 accumulation
        return jnp.dot(a.astype(bf16), b.astype(bf16), preferred_element_type=f32)

    def mm_tt(a, b):
        # contract last dims of both: (H, K) x (C, K) -> (H, C), no transposes in VMEM
        return lax.dot_general(a.astype(bf16), b.astype(bf16),
                               (((1,), (1,)), ((), ())),
                               preferred_element_type=f32)

    def sig(x):
        # sigmoid gate via EUP approximate reciprocal (frees the VALU slot)
        return pl.reciprocal(1.0 + jnp.exp(-x), approx=True)

    def row(i):
        return bias_ref[i:i + 1, :]          # (1, 128) static slice of stacked biases

    def conv_se(xp, m, a, w1, w2):
        # Toeplitz conv-as-matmul; eval-BatchNorm scale already folded into m.
        act = _gelu(mm(xp, m))               # widest elementwise tensor -> tanh GELU
        pooled = mm(act, a)                  # mean over branches / time -> (., OC)
        gate = sig(mm(_gelu(mm(pooled, w1)), w2))
        return pooled * gate                 # SE-gated channel features

    # per-node multi-scale temporal features and per-graph spatial-spectral features
    z = conv_se(xp1_ref[0], m1_ref[...], a1_ref[...], mse1_ref[...], mse2_ref[...])   # (C, 32)
    ys = conv_se(xp2_ref[0], m2_ref[...], a2_ref[...], sse1_ref[...], sse2_ref[...])  # (1, 32)

    # feature assembly [y | z | bp_proj(bp)] via direct lane-slice stores (no
    # placement matmuls); lanes 72:128 stay zero-padded.
    feat_sc[...] = mm(bp_ref[0], wbp_ref[...]) + row(IDX_BBP)        # bp lanes 64:72
    feat_sc[:, 0:SPAT_DIM] = jnp.broadcast_to(ys, (C, SPAT_DIM))     # AdaptiveAvgPool2d replicate
    feat_sc[:, SPAT_DIM:SPAT_DIM + FEAT_DIM] = z
    feat = feat_sc[...]
    feat = feat * sig(mm(_gelu(mm(feat, ca1_ref[...])), ca2_ref[...]))   # channel attention

    adjb = adjb_ref[0]       # (C, C) additive mask: 0 where edge, -1e30 otherwise (f32)

    def gat(x, wg, asrcf, adstf, bg):
        xw = mm(x, wg)                       # (C, H*D) single MXU matmul
        src_hn = mm_tt(asrcf, xw)            # (H, C)  block-diagonal src projections
        dst_nh = mm(xw, adstf)               # (C, 128) block-diagonal dst projections (cols 0..H-1)
        acc = jnp.zeros((x.shape[0], GCN_H), f32)
        # TODO(synk): switch to lax.fori_loop(..., unroll=True) at production C to
        # bound the live range of the per-head (C, C) temporaries.
        for h in range(HEADS):
            xh = xw[:, h * GCN_H:(h + 1) * GCN_H]                    # 128-aligned lane slice
            e = dst_nh[:, h:h + 1] + src_hn[h:h + 1, :]              # e[i,j] = a_d.x_i + a_s.x_j
            e = jnp.where(e > 0, e, NEG_SLOPE * e) + adjb            # leaky_relu + additive mask
            p = jnp.exp(e - jnp.max(e, axis=-1, keepdims=True))      # masked entries underflow to 0
            alpha = p / jnp.sum(p, axis=-1, keepdims=True)           # exact divide (review note)
            acc = acc + mm(alpha, xh)                                # (C, D)
        return acc * jnp.float32(1.0 / HEADS) + bg                   # concat=False -> head mean + bias

    h1 = gat(feat, wg1_ref[...], asrc1_ref[...], adstf1_ref[...], row(IDX_BG1))
    skip = mm(feat, wskip_ref[...]) + row(IDX_BSKIP)
    h = _elu(h1 * row(IDX_BN1S) + row(IDX_BN1B) + skip)              # dropout: eval -> identity

    h2 = gat(h, wg2_ref[...], asrc2_ref[...], adstf2_ref[...], row(IDX_BG2))
    h = _elu(h2 * row(IDX_BN2S) + row(IDX_BN2B) + h)                 # dropout: eval -> identity

    poolv = jnp.full((1, C), 1.0 / C, dtype=f32)                     # global_mean_pool (per graph)
    g = mm(poolv, h)                                                 # (1, 128)
    c1 = _gelu(mm(g, wc1_ref[...]) + bias_ref[IDX_BC1:IDX_BC1 + 1, 0:GCN_H // 2])
    out_ref[0] = mm(c1, wc2_ref[...]) + row(IDX_BC2)                 # (1, 128): [:, :2] are the logits


def fused_call(pp, xp1, xp2, bp, adjb):
    B, C, P1 = xp1.shape
    P2 = xp2.shape[2]

    weights = [pp['M1'], pp['A1'], pp['m_se1_t'], pp['m_se2_t'],
               pp['M2'], pp['A2'], pp['s_se1_t'], pp['s_se2_t'],
               pp['wbp'], pp['ca1_t'], pp['ca2_t'],
               pp['wg1_t'], pp['asrc_f1'], pp['adst_f1'],
               pp['wskip_t'],
               pp['wg2_t'], pp['asrc_f2'], pp['adst_f2'],
               pp['wc1_t'], pp['wc2_t'],
               pp['bias']]

    def resident(arr):
        zeros = (0,) * arr.ndim
        return pl.BlockSpec(arr.shape, lambda b: zeros)   # whole array, resident across steps

    in_specs = [
        pl.BlockSpec((1, C, P1), lambda b: (b, 0, 0)),
        pl.BlockSpec((1, 1, P2), lambda b: (b, 0, 0)),
        pl.BlockSpec((1, C, BANDS), lambda b: (b, 0, 0)),
        pl.BlockSpec((1, C, C), lambda b: (b, 0, 0)),
    ] + [resident(w) for w in weights]

    grid_spec = pltpu.PrefetchScalarGridSpec(
        num_scalar_prefetch=0,
        grid=(B,),
        in_specs=in_specs,
        out_specs=pl.BlockSpec((1, 1, CLS_PAD), lambda b: (b, 0, 0)),
        scratch_shapes=[pltpu.VMEM((C, TOTAL_PAD), jnp.float32)])

    return pl.pallas_call(
        fused_forward_kernel,
        grid_spec=grid_spec,
        out_shape=jax.ShapeDtypeStruct((B, 1, CLS_PAD), jnp.float32),
        compiler_params=pltpu.CompilerParams(
            dimension_semantics=("parallel",),
            vmem_limit_bytes=_vmem_limit_bytes()),
    )(xp1, xp2, bp, adjb, *weights)


# ---------------- parameter init (deterministic, synthetic) ------------------
def make_params(key, n_ch):
    keys = iter(jax.random.split(key, 32))
    r = lambda s: 0.1 * jax.random.normal(next(keys), s, dtype=jnp.float32)
    p = {}
    p['m_conv'] = [r((FEAT_DIM, 1, k)) for k in KERNELS_1D]          # Conv1d weights
    p['m_se1'] = r((FEAT_DIM // 4, FEAT_DIM))                        # 1x1 conv (8,32)
    p['m_se2'] = r((FEAT_DIM, FEAT_DIM // 4))                        # 1x1 conv (32,8)
    p['s_conv'] = r((SPAT_DIM, 1, n_ch, K_TIME))                     # Conv2d weight
    p['s_se1'] = r((SPAT_DIM // 4, SPAT_DIM))
    p['s_se2'] = r((SPAT_DIM, SPAT_DIM // 4))
    p['bp_w'] = r((BP_DIM, BANDS)); p['bp_b'] = r((BP_DIM,))
    p['ca1'] = r((TOTAL_DIM // 2, TOTAL_DIM)); p['ca2'] = r((TOTAL_DIM, TOTAL_DIM // 2))
    p['gat1_w'] = r((HEADS * GCN_H, TOTAL_DIM))
    p['gat1_asrc'] = r((HEADS, GCN_H)); p['gat1_adst'] = r((HEADS, GCN_H)); p['gat1_b'] = r((GCN_H,))
    p['gat2_w'] = r((HEADS * GCN_H, GCN_H))
    p['gat2_asrc'] = r((HEADS, GCN_H)); p['gat2_adst'] = r((HEADS, GCN_H)); p['gat2_b'] = r((GCN_H,))
    p['skip_w'] = r((GCN_H, TOTAL_DIM)); p['skip_b'] = r((GCN_H,))
    p['cls1_w'] = r((GCN_H // 2, GCN_H)); p['cls1_b'] = r((GCN_H // 2,))
    p['cls2_w'] = r((NUM_CLASSES, GCN_H // 2)); p['cls2_b'] = r((NUM_CLASSES,))
    return p


def prepare(p, n_ch, T):
    """Host-side glue: Toeplitz conv-as-matmul matrices with eval-BatchNorm folded in,
    lane-padded (multiple-of-128) layouts, block-diagonal src/dst attention
    projections, one stacked bias operand, and bf16 weight casts for the MXU."""
    pp = {}
    OC, L = FEAT_DIM, T + 1
    nb = len(KERNELS_1D)
    # eval BatchNorm with default affine / fresh running stats -> x / sqrt(1+eps)
    bn_scale = np.float32(1.0 / np.sqrt(1.0 + BN_EPS))

    # --- MultiScale1DBlock Toeplitz (3 branches concatenated along lanes, BN folded) ---
    pad1 = max(KERNELS_1D) // 2
    P1 = T + 2 * pad1
    Q1 = nb * OC * L
    Q1P = _round_up(Q1, 128)
    M1 = np.zeros((P1, Q1P), np.float32)
    for bi, k in enumerate(KERNELS_1D):
        w = np.asarray(p['m_conv'][bi])                 # (OC, 1, k)
        off = pad1 - k // 2
        for t in range(L):
            cols = bi * OC * L + np.arange(OC) * L + t
            M1[t + off:t + off + k, cols] = bn_scale * w[:, 0, :].T
    A1 = np.zeros((Q1P, OC), np.float32)
    for bi in range(nb):
        for oc in range(OC):
            s = bi * OC * L + oc * L
            A1[s:s + L, oc] = 1.0 / (nb * L)            # mean over branches & time
    pp['M1'] = jnp.asarray(M1, jnp.bfloat16)
    pp['A1'] = jnp.asarray(A1, jnp.bfloat16)
    pp['m_se1_t'] = p['m_se1'].T.astype(jnp.bfloat16)
    pp['m_se2_t'] = p['m_se2'].T.astype(jnp.bfloat16)

    # --- SpatialSpectralBlock Toeplitz (BN folded) ---
    SOC = SPAT_DIM
    pad2 = K_TIME // 2
    Tp2 = T + 2 * pad2
    Q2 = SOC * L
    Q2P = _round_up(Q2, 128)
    P2 = n_ch * Tp2
    M2 = np.zeros((P2, Q2P), np.float32)
    w2 = np.asarray(p['s_conv'])                        # (SOC, 1, n_ch, K_TIME)
    for t in range(L):
        cols = np.arange(SOC) * L + t
        for c in range(n_ch):
            rows = c * Tp2 + t + np.arange(K_TIME)
            M2[np.ix_(rows, cols)] = bn_scale * w2[:, 0, c, :].T
    A2 = np.zeros((Q2P, SOC), np.float32)
    for oc in range(SOC):
        A2[oc * L:(oc + 1) * L, oc] = 1.0 / L
    pp['M2'] = jnp.asarray(M2, jnp.bfloat16)
    pp['A2'] = jnp.asarray(A2, jnp.bfloat16)
    pp['s_se1_t'] = p['s_se1'].T.astype(jnp.bfloat16)
    pp['s_se2_t'] = p['s_se2'].T.astype(jnp.bfloat16)

    # --- graph head (feature lanes zero-padded to TOTAL_PAD = 128) ---
    TP = TOTAL_PAD
    wbp = np.zeros((BANDS, TP), np.float32)
    wbp[:, SPAT_DIM + FEAT_DIM:TOTAL_DIM] = np.asarray(p['bp_w']).T
    pp['wbp'] = jnp.asarray(wbp, jnp.bfloat16)

    ca1 = np.zeros((TP, TP), np.float32); ca1[:TOTAL_DIM, :TOTAL_DIM // 2] = np.asarray(p['ca1']).T
    ca2 = np.zeros((TP, TP), np.float32); ca2[:TOTAL_DIM // 2, :TOTAL_DIM] = np.asarray(p['ca2']).T
    pp['ca1_t'] = jnp.asarray(ca1, jnp.bfloat16)
    pp['ca2_t'] = jnp.asarray(ca2, jnp.bfloat16)

    def gat_prep(w, asrc, adst, in_dim_pad):
        hd = HEADS * GCN_H
        wnp = np.asarray(w)                             # (hd, in_dim)
        wt = np.zeros((in_dim_pad, hd), np.float32)
        wt[:wnp.shape[1], :] = wnp.T
        asrc_f = np.zeros((HEADS, hd), np.float32)      # block-diagonal src projection
        adst_f = np.zeros((hd, TOTAL_PAD), np.float32)  # block-diagonal dst projection (cols 0..H-1)
        for h in range(HEADS):
            asrc_f[h, h * GCN_H:(h + 1) * GCN_H] = np.asarray(asrc)[h]
            adst_f[h * GCN_H:(h + 1) * GCN_H, h] = np.asarray(adst)[h]
        return (jnp.asarray(wt, jnp.bfloat16),
                jnp.asarray(asrc_f, jnp.bfloat16),
                jnp.asarray(adst_f, jnp.bfloat16))

    pp['wg1_t'], pp['asrc_f1'], pp['adst_f1'] = gat_prep(
        p['gat1_w'], p['gat1_asrc'], p['gat1_adst'], TP)
    pp['wg2_t'], pp['asrc_f2'], pp['adst_f2'] = gat_prep(
        p['gat2_w'], p['gat2_asrc'], p['gat2_adst'], GCN_H)

    wskip = np.zeros((TP, GCN_H), np.float32)
    wskip[:TOTAL_DIM, :] = np.asarray(p['skip_w']).T
    pp['wskip_t'] = jnp.asarray(wskip, jnp.bfloat16)

    pp['wc1_t'] = p['cls1_w'].T.astype(jnp.bfloat16)                 # (128, 64)
    wc2 = np.zeros((GCN_H // 2, CLS_PAD), np.float32)
    wc2[:, :NUM_CLASSES] = np.asarray(p['cls2_w']).T
    pp['wc2_t'] = jnp.asarray(wc2, jnp.bfloat16)

    # --- one stacked (BIAS_ROWS, 128) f32 operand for every small bias / BN row ---
    bias = np.zeros((BIAS_ROWS, 128), np.float32)
    bias[IDX_BBP, SPAT_DIM + FEAT_DIM:TOTAL_DIM] = np.asarray(p['bp_b'])
    bias[IDX_BG1, :] = np.asarray(p['gat1_b'])
    bias[IDX_BSKIP, :] = np.asarray(p['skip_b'])
    bias[IDX_BN1S, :] = bn_scale                                     # BN1 eval scale (shift row = 0)
    bias[IDX_BN2S, :] = bn_scale                                     # BN2 eval scale (shift row = 0)
    bias[IDX_BG2, :] = np.asarray(p['gat2_b'])
    bias[IDX_BC1, :GCN_H // 2] = np.asarray(p['cls1_b'])
    bias[IDX_BC2, :NUM_CLASSES] = np.asarray(p['cls2_b'])
    pp['bias'] = jnp.asarray(bias, jnp.float32)
    return pp


def build_adj_bias(edge_index, B, C):
    """Per-graph additive attention mask: 0 where edge (dst<-src) or self-loop,
    -1e30 otherwise.  Assumes PyG-style batching (edges within graphs only)."""
    N = B * C
    adj = jnp.zeros((N, N), jnp.float32)
    adj = adj.at[edge_index[1], edge_index[0]].set(1.0)              # adj[dst, src] = 1
    adj = jnp.maximum(adj, jnp.eye(N, dtype=jnp.float32))            # GATConv add_self_loops
    blocks = adj.reshape(B, C, B, C)[jnp.arange(B), :, jnp.arange(B), :]   # (B, C, C)
    return jnp.where(blocks > 0, 0.0, -1e30).astype(jnp.float32)


# ---------------- full forward (one fused Pallas call) -----------------------
def forward(pp, x, bp, edge_index, batch_idx):
    del batch_idx    # per-graph mean pool assumes batch_idx = repeat(arange(B), C)
    B, C, T = x.shape
    pad1 = max(KERNELS_1D) // 2
    xp1 = jnp.pad(x, ((0, 0), (0, 0), (pad1, pad1))).astype(jnp.bfloat16)          # (B, C, T+200)
    pad2 = K_TIME // 2
    xp2 = jnp.pad(x, ((0, 0), (0, 0), (pad2, pad2)))
    xp2 = xp2.reshape(B, 1, C * (T + 2 * pad2)).astype(jnp.bfloat16)               # (B, 1, C*(T+20))
    bp_b = bp.astype(jnp.bfloat16)                                                 # (B, C, BANDS)
    adjb = build_adj_bias(edge_index, B, C)                                        # (B, C, C)
    out = fused_call(pp, xp1, xp2, bp_b, adjb)                                     # (B, 1, 128)
    return out[:, 0, :NUM_CLASSES]


# ---------------- pure-JAX references (same math, parameterized precision) ---
def _mm_f32(a, b):
    return jnp.dot(a.astype(jnp.float32), b.astype(jnp.float32),
                   precision=lax.Precision.HIGHEST, preferred_element_type=jnp.float32)


def _mm_bf16(a, b):
    a = a.astype(jnp.bfloat16).astype(jnp.float32)
    b = b.astype(jnp.bfloat16).astype(jnp.float32)
    return jnp.dot(a, b, precision=lax.Precision.HIGHEST, preferred_element_type=jnp.float32)


def reference_forward(pp, x, bp, edge_index, batch_idx, mm):
    del batch_idx
    B, C, T = x.shape
    pad1 = max(KERNELS_1D) // 2
    pad2 = K_TIME // 2
    adjb = build_adj_bias(edge_index, B, C)
    bias = pp['bias']

    def conv_se(xp, M, A, w1, w2):
        act = _gelu(mm(xp, M))
        pooled = mm(act, A)
        gate = _sigmoid(mm(_gelu(mm(pooled, w1)), w2))
        return pooled * gate

    def gat(x_, wg, asrcf, adstf, bg, ab):
        xw = mm(x_, wg)
        src_hn = mm(asrcf, xw.T)                          # (H, C)
        dst_nh = mm(xw, adstf)                            # (C, 128)
        acc = 0.0
        for h in range(HEADS):
            xh = xw[:, h * GCN_H:(h + 1) * GCN_H]
            e = dst_nh[:, h:h + 1] + src_hn[h:h + 1, :]
            e = jnp.where(e > 0, e, NEG_SLOPE * e) + ab
            p = jnp.exp(e - jnp.max(e, axis=-1, keepdims=True))
            alpha = p / jnp.sum(p, axis=-1, keepdims=True)
            acc = acc + mm(alpha, xh)
        return acc / HEADS + bg

    outs = []
    for b in range(B):
        xp1 = jnp.pad(x[b], ((0, 0), (pad1, pad1)))
        xp2 = jnp.pad(x[b], ((0, 0), (pad2, pad2))).reshape(1, -1)
        z = conv_se(xp1, pp['M1'], pp['A1'], pp['m_se1_t'], pp['m_se2_t'])
        ys = conv_se(xp2, pp['M2'], pp['A2'], pp['s_se1_t'], pp['s_se2_t'])
        feat = mm(bp[b], pp['wbp']) + bias[IDX_BBP:IDX_BBP + 1, :]
        feat = feat.at[:, 0:SPAT_DIM].set(jnp.broadcast_to(ys, (C, SPAT_DIM)))
        feat = feat.at[:, SPAT_DIM:SPAT_DIM + FEAT_DIM].set(z)
        feat = feat * _sigmoid(mm(_gelu(mm(feat, pp['ca1_t'])), pp['ca2_t']))

        h1 = gat(feat, pp['wg1_t'], pp['asrc_f1'], pp['adst_f1'],
                 bias[IDX_BG1:IDX_BG1 + 1, :], adjb[b])
        skip = mm(feat, pp['wskip_t']) + bias[IDX_BSKIP:IDX_BSKIP + 1, :]
        h = _elu(h1 * bias[IDX_BN1S:IDX_BN1S + 1, :] + bias[IDX_BN1B:IDX_BN1B + 1, :] + skip)
        h2 = gat(h, pp['wg2_t'], pp['asrc_f2'], pp['adst_f2'],
                 bias[IDX_BG2:IDX_BG2 + 1, :], adjb[b])
        h = _elu(h2 * bias[IDX_BN2S:IDX_BN2S + 1, :] + bias[IDX_BN2B:IDX_BN2B + 1, :] + h)

        g = mm(jnp.full((1, C), 1.0 / C, dtype=jnp.float32), h)
        c1 = _gelu(mm(g, pp['wc1_t']) + bias[IDX_BC1:IDX_BC1 + 1, 0:GCN_H // 2])
        o = mm(c1, pp['wc2_t']) + bias[IDX_BC2:IDX_BC2 + 1, :]
        outs.append(o[0, :NUM_CLASSES])
    return jnp.stack(outs)


if __name__ == "__main__":
    B, C, T = 2, 4, 32
    key = jax.random.PRNGKey(0)
    kx, kbp, kp = jax.random.split(key, 3)
    x = jax.random.normal(kx, (B, C, T), dtype=jnp.float32)
    bp = jax.random.normal(kbp, (B, C, BANDS), dtype=jnp.float32)

    # fully-connected intra-graph edges (no self loops; GATConv adds them)
    src, dst = [], []
    for b in range(B):
        for i in range(C):
            for j in range(C):
                if i != j:
                    src.append(b * C + i)
                    dst.append(b * C + j)
    edge_index = jnp.asarray(np.stack([src, dst]), dtype=jnp.int32)
    batch_idx = jnp.asarray(np.repeat(np.arange(B), C), dtype=jnp.int32)

    params = make_params(kp, C)
    prep = prepare(params, C, T)

    logits = jax.block_until_ready(forward(prep, x, bp, edge_index, batch_idx))

    # tier 1: same bf16-operand math, f32 accumulation (tight structural check)
    ref_bf16 = np.asarray(reference_forward(prep, x, bp, edge_index, batch_idx, _mm_bf16))
    # tier 2: full f32 compute (looser bound covers bf16 MXU operand rounding)
    ref_f32 = np.asarray(reference_forward(prep, x, bp, edge_index, batch_idx, _mm_f32))

    out = np.asarray(logits)
    assert logits.shape == (B, NUM_CLASSES)
    assert bool(jnp.all(jnp.isfinite(logits)))
    assert np.allclose(out, ref_bf16, rtol=2e-2, atol=2e-2), float(np.max(np.abs(out - ref_bf16)))
    assert np.allclose(out, ref_f32, rtol=5e-2, atol=5e-2), float(np.max(np.abs(out - ref_f32)))
    print("KERNEL_OK")
</pallas_src>

<mosaic_0001>
module attributes {stable_mosaic.version = 11 : i64} {
  func.func @fused_forward_kernel(%arg0: i32, %arg1: memref<1x4x232xbf16, #tpu.memory_space<vmem>>, %arg2: memref<1x1x208xbf16, #tpu.memory_space<vmem>>, %arg3: memref<1x4x4xbf16, #tpu.memory_space<vmem>>, %arg4: memref<1x4x4xf32, #tpu.memory_space<vmem>>, %arg5: memref<232x3200xbf16, #tpu.memory_space<vmem>>, %arg6: memref<3200x32xbf16, #tpu.memory_space<vmem>>, %arg7: memref<32x8xbf16, #tpu.memory_space<vmem>>, %arg8: memref<8x32xbf16, #tpu.memory_space<vmem>>, %arg9: memref<208x1152xbf16, #tpu.memory_space<vmem>>, %arg10: memref<1152x32xbf16, #tpu.memory_space<vmem>>, %arg11: memref<32x8xbf16, #tpu.memory_space<vmem>>, %arg12: memref<8x32xbf16, #tpu.memory_space<vmem>>, %arg13: memref<4x128xbf16, #tpu.memory_space<vmem>>, %arg14: memref<128x128xbf16, #tpu.memory_space<vmem>>, %arg15: memref<128x128xbf16, #tpu.memory_space<vmem>>, %arg16: memref<128x512xbf16, #tpu.memory_space<vmem>>, %arg17: memref<4x512xbf16, #tpu.memory_space<vmem>>, %arg18: memref<512x128xbf16, #tpu.memory_space<vmem>>, %arg19: memref<128x128xbf16, #tpu.memory_space<vmem>>, %arg20: memref<128x512xbf16, #tpu.memory_space<vmem>>, %arg21: memref<4x512xbf16, #tpu.memory_space<vmem>>, %arg22: memref<512x128xbf16, #tpu.memory_space<vmem>>, %arg23: memref<128x64xbf16, #tpu.memory_space<vmem>>, %arg24: memref<64x128xbf16, #tpu.memory_space<vmem>>, %arg25: memref<16x128xf32, #tpu.memory_space<vmem>>, %arg26: memref<1x1x128xf32, #tpu.memory_space<vmem>>, %arg27: memref<4x128xf32, #tpu.memory_space<vmem>>) attributes {dimension_semantics = [#tpu.dimension_semantics<parallel>], iteration_bounds = array<i64: 2>, scalar_prefetch = 0 : i64, scratch_operands = 1 : i64, tpu.core_type = #tpu.core_type<tc>, window_params = [{transform_indices = @transform_0, window_bounds = array<i64: 1, 4, 232>}, {transform_indices = @transform_1, window_bounds = array<i64: 1, 1, 208>}, {transform_indices = @transform_2, window_bounds = array<i64: 1, 4, 4>}, {transform_indices = @transform_3, window_bounds = array<i64: 1, 4, 4>}, {pipeline_mode = #tpu.pipeline_mode<synchronous>, transform_indices = @transform_4, window_bounds = array<i64: 232, 3200>}, {pipeline_mode = #tpu.pipeline_mode<synchronous>, transform_indices = @transform_5, window_bounds = array<i64: 3200, 32>}, {pipeline_mode = #tpu.pipeline_mode<synchronous>, transform_indices = @transform_6, window_bounds = array<i64: 32, 8>}, {pipeline_mode = #tpu.pipeline_mode<synchronous>, transform_indices = @transform_7, window_bounds = array<i64: 8, 32>}, {pipeline_mode = #tpu.pipeline_mode<synchronous>, transform_indices = @transform_8, window_bounds = array<i64: 208, 1152>}, {pipeline_mode = #tpu.pipeline_mode<synchronous>, transform_indices = @transform_9, window_bounds = array<i64: 1152, 32>}, {pipeline_mode = #tpu.pipeline_mode<synchronous>, transform_indices = @transform_10, window_bounds = array<i64: 32, 8>}, {pipeline_mode = #tpu.pipeline_mode<synchronous>, transform_indices = @transform_11, window_bounds = array<i64: 8, 32>}, {pipeline_mode = #tpu.pipeline_mode<synchronous>, transform_indices = @transform_12, window_bounds = array<i64: 4, 128>}, {pipeline_mode = #tpu.pipeline_mode<synchronous>, transform_indices = @transform_13, window_bounds = array<i64: 128, 128>}, {pipeline_mode = #tpu.pipeline_mode<synchronous>, transform_indices = @transform_14, window_bounds = array<i64: 128, 128>}, {pipeline_mode = #tpu.pipeline_mode<synchronous>, transform_indices = @transform_15, window_bounds = array<i64: 128, 512>}, {pipeline_mode = #tpu.pipeline_mode<synchronous>, transform_indices = @transform_16, window_bounds = array<i64: 4, 512>}, {pipeline_mode = #tpu.pipeline_mode<synchronous>, transform_indices = @transform_17, window_bounds = array<i64: 512, 128>}, {pipeline_mode = #tpu.pipeline_mode<synchronous>, transform_indices = @transform_18, window_bounds = array<i64: 128, 128>}, {pipeline_mode = #tpu.pipeline_mode<synchronous>, transform_indices = @transform_19, window_bounds = array<i64: 128, 512>}, {pipeline_mode = #tpu.pipeline_mode<synchronous>, transform_indices = @transform_20, window_bounds = array<i64: 4, 512>}, {pipeline_mode = #tpu.pipeline_mode<synchronous>, transform_indices = @transform_21, window_bounds = array<i64: 512, 128>}, {pipeline_mode = #tpu.pipeline_mode<synchronous>, transform_indices = @transform_22, window_bounds = array<i64: 128, 64>}, {pipeline_mode = #tpu.pipeline_mode<synchronous>, transform_indices = @transform_23, window_bounds = array<i64: 64, 128>}, {pipeline_mode = #tpu.pipeline_mode<synchronous>, transform_indices = @transform_24, window_bounds = array<i64: 16, 128>}, {transform_indices = @transform_25, window_bounds = array<i64: 1, 1, 128>}]} {
    %c0 = arith.constant 0 : index
    %c0_0 = arith.constant 0 : index
    %c0_1 = arith.constant 0 : index
    %0 = vector.load %arg1[%c0, %c0_0, %c0_1] : memref<1x4x232xbf16, #tpu.memory_space<vmem>>, vector<1x4x232xbf16>
    %1 = vector.shape_cast %0 : vector<1x4x232xbf16> to vector<4x232xbf16>
    %c0_2 = arith.constant 0 : index
    %c0_3 = arith.constant 0 : index
    %2 = vector.load %arg5[%c0_2, %c0_3] : memref<232x3200xbf16, #tpu.memory_space<vmem>>, vector<232x3200xbf16>
    %c0_4 = arith.constant 0 : index
    %c0_5 = arith.constant 0 : index
    %3 = vector.load %arg6[%c0_4, %c0_5] : memref<3200x32xbf16, #tpu.memory_space<vmem>>, vector<3200x32xbf16>
    %c0_6 = arith.constant 0 : index
    %c0_7 = arith.constant 0 : index
    %4 = vector.load %arg7[%c0_6, %c0_7] : memref<32x8xbf16, #tpu.memory_space<vmem>>, vector<32x8xbf16>
    %c0_8 = arith.constant 0 : index
    %c0_9 = arith.constant 0 : index
    %5 = vector.load %arg8[%c0_8, %c0_9] : memref<8x32xbf16, #tpu.memory_space<vmem>>, vector<8x32xbf16>
    %cst = arith.constant dense<0.000000e+00> : vector<4x3200xf32>
    %6 = tpu.matmul %1, %2, %cst {dimension_numbers = #tpu.dot_dimension_numbers<[1], [0], [0], [1], [0, 0, 1, 1], [], []>} : vector<4x232xbf16>, vector<232x3200xbf16>, vector<4x3200xf32> -> vector<4x3200xf32>
    %cst_10 = arith.constant 5.000000e-01 : f32
    %7 = vector.broadcast %cst_10 : f32 to vector<4x3200xf32>
    %8 = arith.mulf %7, %6 : vector<4x3200xf32>
    %cst_11 = arith.constant 4.471500e-02 : f32
    %9 = vector.broadcast %cst_11 : f32 to vector<4x3200xf32>
    %10 = arith.mulf %9, %6 : vector<4x3200xf32>
    %11 = arith.mulf %10, %6 : vector<4x3200xf32>
    %12 = arith.mulf %11, %6 : vector<4x3200xf32>
    %13 = arith.addf %6, %12 : vector<4x3200xf32>
    %cst_12 = arith.constant 0.797884583 : f32
    %14 = vector.broadcast %cst_12 : f32 to vector<4x3200xf32>
    %15 = arith.mulf %14, %13 : vector<4x3200xf32>
    %16 = math.tanh %15 : vector<4x3200xf32>
    %cst_13 = arith.constant 1.000000e+00 : f32
    %17 = vector.broadcast %cst_13 : f32 to vector<4x3200xf32>
    %18 = arith.addf %17, %16 : vector<4x3200xf32>
    %19 = arith.mulf %8, %18 : vector<4x3200xf32>
    %20 = arith.truncf %19 : vector<4x3200xf32> to vector<4x3200xbf16>
    %cst_14 = arith.constant dense<0.000000e+00> : vector<4x32xf32>
    %21 = tpu.matmul %20, %3, %cst_14 {dimension_numbers = #tpu.dot_dimension_numbers<[1], [0], [0], [1], [0, 0, 1, 1], [], []>} : vector<4x3200xbf16>, vector<3200x32xbf16>, vector<4x32xf32> -> vector<4x32xf32>
    %22 = arith.truncf %21 : vector<4x32xf32> to vector<4x32xbf16>
    %cst_15 = arith.constant dense<0.000000e+00> : vector<4x8xf32>
    %23 = tpu.matmul %22, %4, %cst_15 {dimension_numbers = #tpu.dot_dimension_numbers<[1], [0], [0], [1], [0, 0, 1, 1], [], []>} : vector<4x32xbf16>, vector<32x8xbf16>, vector<4x8xf32> -> vector<4x8xf32>
    %cst_16 = arith.constant 5.000000e-01 : f32
    %24 = vector.broadcast %cst_16 : f32 to vector<4x8xf32>
    %25 = arith.mulf %24, %23 : vector<4x8xf32>
    %cst_17 = arith.constant 4.471500e-02 : f32
    %26 = vector.broadcast %cst_17 : f32 to vector<4x8xf32>
    %27 = arith.mulf %26, %23 : vector<4x8xf32>
    %28 = arith.mulf %27, %23 : vector<4x8xf32>
    %29 = arith.mulf %28, %23 : vector<4x8xf32>
    %30 = arith.addf %23, %29 : vector<4x8xf32>
    %cst_18 = arith.constant 0.797884583 : f32
    %31 = vector.broadcast %cst_18 : f32 to vector<4x8xf32>
    %32 = arith.mulf %31, %30 : vector<4x8xf32>
    %33 = math.tanh %32 : vector<4x8xf32>
    %cst_19 = arith.constant 1.000000e+00 : f32
    %34 = vector.broadcast %cst_19 : f32 to vector<4x8xf32>
    %35 = arith.addf %34, %33 : vector<4x8xf32>
    %36 = arith.mulf %25, %35 : vector<4x8xf32>
    %37 = arith.truncf %36 : vector<4x8xf32> to vector<4x8xbf16>
    %cst_20 = arith.constant dense<0.000000e+00> : vector<4x32xf32>
    %38 = tpu.matmul %37, %5, %cst_20 {dimension_numbers = #tpu.dot_dimension_numbers<[1], [0], [0], [1], [0, 0, 1, 1], [], []>} : vector<4x8xbf16>, vector<8x32xbf16>, vector<4x32xf32> -> vector<4x32xf32>
    %cst_21 = arith.constant 0.000000e+00 : f32
    %39 = vector.broadcast %cst_21 : f32 to vector<4x32xf32>
    %40 = arith.subf %39, %38 : vector<4x32xf32>
    %41 = math.exp %40 : vector<4x32xf32>
    %cst_22 = arith.constant 1.000000e+00 : f32
    %42 = vector.broadcast %cst_22 : f32 to vector<4x32xf32>
    %43 = arith.addf %42, %41 : vector<4x32xf32>
    %44 = tpu.reciprocal %43 {approx = true} : vector<4x32xf32> -> vector<4x32xf32>
    %45 = arith.mulf %21, %44 : vector<4x32xf32>
    %c0_23 = arith.constant 0 : index
    %c0_24 = arith.constant 0 : index
    %c0_25 = arith.constant 0 : index
    %46 = vector.load %arg2[%c0_23, %c0_24, %c0_25] : memref<1x1x208xbf16, #tpu.memory_space<vmem>>, vector<1x1x208xbf16>
    %47 = vector.shape_cast %46 : vector<1x1x208xbf16> to vector<1x208xbf16>
    %c0_26 = arith.constant 0 : index
    %c0_27 = arith.constant 0 : index
    %48 = vector.load %arg9[%c0_26, %c0_27] : memref<208x1152xbf16, #tpu.memory_space<vmem>>, vector<208x1152xbf16>
    %c0_28 = arith.constant 0 : index
    %c0_29 = arith.constant 0 : index
    %49 = vector.load %arg10[%c0_28, %c0_29] : memref<1152x32xbf16, #tpu.memory_space<vmem>>, vector<1152x32xbf16>
    %c0_30 = arith.constant 0 : index
    %c0_31 = arith.constant 0 : index
    %50 = vector.load %arg11[%c0_30, %c0_31] : memref<32x8xbf16, #tpu.memory_space<vmem>>, vector<32x8xbf16>
    %c0_32 = arith.constant 0 : index
    %c0_33 = arith.constant 0 : index
    %51 = vector.load %arg12[%c0_32, %c0_33] : memref<8x32xbf16, #tpu.memory_space<vmem>>, vector<8x32xbf16>
    %cst_34 = arith.constant dense<0.000000e+00> : vector<1x1152xf32>
    %52 = tpu.matmul %47, %48, %cst_34 {dimension_numbers = #tpu.dot_dimension_numbers<[1], [0], [0], [1], [0, 0, 1, 1], [], []>} : vector<1x208xbf16>, vector<208x1152xbf16>, vector<1x1152xf32> -> vector<1x1152xf32>
    %cst_35 = arith.constant 5.000000e-01 : f32
    %53 = vector.broadcast %cst_35 : f32 to vector<1x1152xf32>
    %54 = arith.mulf %53, %52 : vector<1x1152xf32>
    %cst_36 = arith.constant 4.471500e-02 : f32
    %55 = vector.broadcast %cst_36 : f32 to vector<1x1152xf32>
    %56 = arith.mulf %55, %52 : vector<1x1152xf32>
    %57 = arith.mulf %56, %52 : vector<1x1152xf32>
    %58 = arith.mulf %57, %52 : vector<1x1152xf32>
    %59 = arith.addf %52, %58 : vector<1x1152xf32>
    %cst_37 = arith.constant 0.797884583 : f32
    %60 = vector.broadcast %cst_37 : f32 to vector<1x1152xf32>
    %61 = arith.mulf %60, %59 : vector<1x1152xf32>
    %62 = math.tanh %61 : vector<1x1152xf32>
    %cst_38 = arith.constant 1.000000e+00 : f32
    %63 = vector.broadcast %cst_38 : f32 to vector<1x1152xf32>
    %64 = arith.addf %63, %62 : vector<1x1152xf32>
    %65 = arith.mulf %54, %64 : vector<1x1152xf32>
    %66 = arith.truncf %65 : vector<1x1152xf32> to vector<1x1152xbf16>
    %cst_39 = arith.constant dense<0.000000e+00> : vector<1x32xf32>
    %67 = tpu.matmul %66, %49, %cst_39 {dimension_numbers = #tpu.dot_dimension_numbers<[1], [0], [0], [1], [0, 0, 1, 1], [], []>} : vector<1x1152xbf16>, vector<1152x32xbf16>, vector<1x32xf32> -> vector<1x32xf32>
    %68 = arith.truncf %67 : vector<1x32xf32> to vector<1x32xbf16>
    %cst_40 = arith.constant dense<0.000000e+00> : vector<1x8xf32>
    %69 = tpu.matmul %68, %50, %cst_40 {dimension_numbers = #tpu.dot_dimension_numbers<[1], [0], [0], [1], [0, 0, 1, 1], [], []>} : vector<1x32xbf16>, vector<32x8xbf16>, vector<1x8xf32> -> vector<1x8xf32>
    %cst_41 = arith.constant 5.000000e-01 : f32
    %70 = vector.broadcast %cst_41 : f32 to vector<1x8xf32>
    %71 = arith.mulf %70, %69 : vector<1x8xf32>
    %cst_42 = arith.constant 4.471500e-02 : f32
    %72 = vector.broadcast %cst_42 : f32 to vector<1x8xf32>
    %73 = arith.mulf %72, %69 : vector<1x8xf32>
    %74 = arith.mulf %73, %69 : vector<1x8xf32>
    %75 = arith.mulf %74, %69 : vector<1x8xf32>
    %76 = arith.addf %69, %75 : vector<1x8xf32>
    %cst_43 = arith.constant 0.797884583 : f32
    %77 = vector.broadcast %cst_43 : f32 to vector<1x8xf32>
    %78 = arith.mulf %77, %76 : vector<1x8xf32>
    %79 = math.tanh %78 : vector<1x8xf32>
    %cst_44 = arith.constant 1.000000e+00 : f32
    %80 = vector.broadcast %cst_44 : f32 to vector<1x8xf32>
    %81 = arith.addf %80, %79 : vector<1x8xf32>
    %82 = arith.mulf %71, %81 : vector<1x8xf32>
    %83 = arith.truncf %82 : vector<1x8xf32> to vector<1x8xbf16>
    %cst_45 = arith.constant dense<0.000000e+00> : vector<1x32xf32>
    %84 = tpu.matmul %83, %51, %cst_45 {dimension_numbers = #tpu.dot_dimension_numbers<[1], [0], [0], [1], [0, 0, 1, 1], [], []>} : vector<1x8xbf16>, vector<8x32xbf16>, vector<1x32xf32> -> vector<1x32xf32>
    %cst_46 = arith.constant 0.000000e+00 : f32
    %85 = vector.broadcast %cst_46 : f32 to vector<1x32xf32>
    %86 = arith.subf %85, %84 : vector<1x32xf32>
    %87 = math.exp %86 : vector<1x32xf32>
    %cst_47 = arith.constant 1.000000e+00 : f32
    %88 = vector.broadcast %cst_47 : f32 to vector<1x32xf32>
    %89 = arith.addf %88, %87 : vector<1x32xf32>
    %90 = tpu.reciprocal %89 {approx = true} : vector<1x32xf32> -> vector<1x32xf32>
    %91 = arith.mulf %67, %90 : vector<1x32xf32>
    %c0_48 = arith.constant 0 : index
    %c0_49 = arith.constant 0 : index
    %c0_50 = arith.constant 0 : index
    %92 = vector.load %arg3[%c0_48, %c0_49, %c0_50] : memref<1x4x4xbf16, #tpu.memory_space<vmem>>, vector<1x4x4xbf16>
    %93 = vector.shape_cast %92 : vector<1x4x4xbf16> to vector<4x4xbf16>
    %c0_51 = arith.constant 0 : index
    %c0_52 = arith.constant 0 : index
    %94 = vector.load %arg13[%c0_51, %c0_52] : memref<4x128xbf16, #tpu.memory_space<vmem>>, vector<4x128xbf16>
    %cst_53 = arith.constant dense<0.000000e+00> : vector<4x128xf32>
    %95 = tpu.matmul %93, %94, %cst_53 {dimension_numbers = #tpu.dot_dimension_numbers<[1], [0], [0], [1], [0, 0, 1, 1], [], []>} : vector<4x4xbf16>, vector<4x128xbf16>, vector<4x128xf32> -> vector<4x128xf32>
    %c0_54 = arith.constant 0 : index
    %c0_55 = arith.constant 0 : index
    %96 = vector.load %arg25[%c0_54, %c0_55] : memref<16x128xf32, #tpu.memory_space<vmem>>, vector<1x128xf32>
    %97 = vector.broadcast %96 : vector<1x128xf32> to vector<4x128xf32>
    %98 = arith.addf %95, %97 : vector<4x128xf32>
    %c0_56 = arith.constant 0 : index
    %c0_57 = arith.constant 0 : index
    %99 = vector.load %arg27[%c0_56, %c0_57] : memref<4x128xf32, #tpu.memory_space<vmem>>, vector<4x128xf32>
    tpu.vector_store %arg27[%c0_56, %c0_57], %98 {strides = array<i32>} : memref<4x128xf32, #tpu.memory_space<vmem>>, vector<4x128xf32>,
    %100 = vector.shape_cast %91 : vector<1x32xf32> to vector<1x32xf32>
    %101 = vector.broadcast %100 : vector<1x32xf32> to vector<4x32xf32>
    %c0_58 = arith.constant 0 : index
    %c0_59 = arith.constant 0 : index
    %102 = vector.load %arg27[%c0_58, %c0_59] : memref<4x128xf32, #tpu.memory_space<vmem>>, vector<4x32xf32>
    tpu.vector_store %arg27[%c0_58, %c0_59], %101 {strides = array<i32>} : memref<4x128xf32, #tpu.memory_space<vmem>>, vector<4x32xf32>,
    %c0_60 = arith.constant 0 : index
    %c32 = arith.constant 32 : index
    %103 = vector.load %arg27[%c0_60, %c32] : memref<4x128xf32, #tpu.memory_space<vmem>>, vector<4x32xf32>
    tpu.vector_store %arg27[%c0_60, %c32], %45 {strides = array<i32>} : memref<4x128xf32, #tpu.memory_space<vmem>>, vector<4x32xf32>,
    %c0_61 = arith.constant 0 : index
    %c0_62 = arith.constant 0 : index
    %104 = vector.load %arg27[%c0_61, %c0_62] : memref<4x128xf32, #tpu.memory_space<vmem>>, vector<4x128xf32>
    %c0_63 = arith.constant 0 : index
    %c0_64 = arith.constant 0 : index
    %105 = vector.load %arg14[%c0_63, %c0_64] : memref<128x128xbf16, #tpu.memory_space<vmem>>, vector<128x128xbf16>
    %106 = arith.truncf %104 : vector<4x128xf32> to vector<4x128xbf16>
    %cst_65 = arith.constant dense<0.000000e+00> : vector<4x128xf32>
    %107 = tpu.matmul %106, %105, %cst_65 {dimension_numbers = #tpu.dot_dimension_numbers<[1], [0], [0], [1], [0, 0, 1, 1], [], []>} : vector<4x128xbf16>, vector<128x128xbf16>, vector<4x128xf32> -> vector<4x128xf32>
    %cst_66 = arith.constant 5.000000e-01 : f32
    %108 = vector.broadcast %cst_66 : f32 to vector<4x128xf32>
    %109 = arith.mulf %108, %107 : vector<4x128xf32>
    %cst_67 = arith.constant 4.471500e-02 : f32
    %110 = vector.broadcast %cst_67 : f32 to vector<4x128xf32>
    %111 = arith.mulf %110, %107 : vector<4x128xf32>
    %112 = arith.mulf %111, %107 : vector<4x128xf32>
    %113 = arith.mulf %112, %107 : vector<4x128xf32>
    %114 = arith.addf %107, %113 : vector<4x128xf32>
    %cst_68 = arith.constant 0.797884583 : f32
    %115 = vector.broadcast %cst_68 : f32 to vector<4x128xf32>
    %116 = arith.mulf %115, %114 : vector<4x128xf32>
    %117 = math.tanh %116 : vector<4x128xf32>
    %cst_69 = arith.constant 1.000000e+00 : f32
    %118 = vector.broadcast %cst_69 : f32 to vector<4x128xf32>
    %119 = arith.addf %118, %117 : vector<4x128xf32>
    %120 = arith.mulf %109, %119 : vector<4x128xf32>
    %c0_70 = arith.constant 0 : index
    %c0_71 = arith.constant 0 : index
    %121 = vector.load %arg15[%c0_70, %c0_71] : memref<128x128xbf16, #tpu.memory_space<vmem>>, vector<128x128xbf16>
    %122 = arith.truncf %120 : vector<4x128xf32> to vector<4x128xbf16>
    %cst_72 = arith.constant dense<0.000000e+00> : vector<4x128xf32>
    %123 = tpu.matmul %122, %121, %cst_72 {dimension_numbers = #tpu.dot_dimension_numbers<[1], [0], [0], [1], [0, 0, 1, 1], [], []>} : vector<4x128xbf16>, vector<128x128xbf16>, vector<4x128xf32> -> vector<4x128xf32>
    %cst_73 = arith.constant 0.000000e+00 : f32
    %124 = vector.broadcast %cst_73 : f32 to vector<4x128xf32>
    %125 = arith.subf %124, %123 : vector<4x128xf32>
    %126 = math.exp %125 : vector<4x128xf32>
    %cst_74 = arith.constant 1.000000e+00 : f32
    %127 = vector.broadcast %cst_74 : f32 to vector<4x128xf32>
    %128 = arith.addf %127, %126 : vector<4x128xf32>
    %129 = tpu.reciprocal %128 {approx = true} : vector<4x128xf32> -> vector<4x128xf32>
    %130 = arith.mulf %104, %129 : vector<4x128xf32>
    %c0_75 = arith.constant 0 : index
    %c0_76 = arith.constant 0 : index
    %c0_77 = arith.constant 0 : index
    %131 = vector.load %arg4[%c0_75, %c0_76, %c0_77] : memref<1x4x4xf32, #tpu.memory_space<vmem>>, vector<1x4x4xf32>
    %132 = vector.shape_cast %131 : vector<1x4x4xf32> to vector<4x4xf32>
    %c0_78 = arith.constant 0 : index
    %c0_79 = arith.constant 0 : index
    %133 = vector.load %arg16[%c0_78, %c0_79] : memref<128x512xbf16, #tpu.memory_space<vmem>>, vector<128x512xbf16>
    %c0_80 = arith.constant 0 : index
    %c0_81 = arith.constant 0 : index
    %134 = vector.load %arg17[%c0_80, %c0_81] : memref<4x512xbf16, #tpu.memory_space<vmem>>, vector<4x512xbf16>
    %c0_82 = arith.constant 0 : index
    %c0_83 = arith.constant 0 : index
    %135 = vector.load %arg18[%c0_82, %c0_83] : memref<512x128xbf16, #tpu.memory_space<vmem>>, vector<512x128xbf16>
    %c1 = arith.constant 1 : index
    %c0_84 = arith.constant 0 : index
    %136 = vector.load %arg25[%c1, %c0_84] : memref<16x128xf32, #tpu.memory_space<vmem>>, vector<1x128xf32>
    %137 = arith.truncf %130 : vector<4x128xf32> to vector<4x128xbf16>
    %cst_85 = arith.constant dense<0.000000e+00> : vector<4x512xf32>
    %138 = tpu.matmul %137, %133, %cst_85 {dimension_numbers = #tpu.dot_dimension_numbers<[1], [0], [0], [1], [0, 0, 1, 1], [], []>} : vector<4x128xbf16>, vector<128x512xbf16>, vector<4x512xf32> -> vector<4x512xf32>
    %139 = arith.truncf %138 : vector<4x512xf32> to vector<4x512xbf16>
    %cst_86 = arith.constant dense<0.000000e+00> : vector<4x4xf32>
    %140 = tpu.matmul %134, %139, %cst_86 {dimension_numbers = #tpu.dot_dimension_numbers<[1], [1], [0], [0], [0, 0, 1, 0], [], []>} : vector<4x512xbf16>, vector<4x512xbf16>, vector<4x4xf32> -> vector<4x4xf32>
    %141 = arith.truncf %138 : vector<4x512xf32> to vector<4x512xbf16>
    %cst_87 = arith.constant dense<0.000000e+00> : vector<4x128xf32>
    %142 = tpu.matmul %141, %135, %cst_87 {dimension_numbers = #tpu.dot_dimension_numbers<[1], [0], [0], [1], [0, 0, 1, 1], [], []>} : vector<4x512xbf16>, vector<512x128xbf16>, vector<4x128xf32> -> vector<4x128xf32>
    %cst_88 = arith.constant 0.000000e+00 : f32
    %143 = vector.broadcast %cst_88 : f32 to vector<4x128xf32>
    %144 = vector.extract_strided_slice %138 {offsets = [0, 0], sizes = [4, 128], strides = [1, 1]} : vector<4x512xf32> to vector<4x128xf32>
    %145 = vector.extract_strided_slice %142 {offsets = [0, 0], sizes = [4, 1], strides = [1, 1]} : vector<4x128xf32> to vector<4x1xf32>
    %146 = vector.extract_strided_slice %140 {offsets = [0, 0], sizes = [1, 4], strides = [1, 1]} : vector<4x4xf32> to vector<1x4xf32>
    %147 = vector.broadcast %145 : vector<4x1xf32> to vector<4x4xf32>
    %148 = vector.broadcast %146 : vector<1x4xf32> to vector<4x4xf32>
    %149 = arith.addf %147, %148 : vector<4x4xf32>
    %cst_89 = arith.constant 0.000000e+00 : f32
    %150 = vector.broadcast %cst_89 : f32 to vector<4x4xf32>
    %151 = arith.cmpf ogt, %149, %150 : vector<4x4xf32>
    %cst_90 = arith.constant 2.000000e-01 : f32
    %152 = vector.broadcast %cst_90 : f32 to vector<4x4xf32>
    %153 = arith.mulf %152, %149 : vector<4x4xf32>
    %154 = arith.select %151, %149, %153 : vector<4x4xi1>, vector<4x4xf32>
    %155 = arith.addf %154, %132 : vector<4x4xf32>
    %cst_91 = arith.constant dense<0xFF800000> : vector<4xf32>
    %156 = vector.multi_reduction <maximumf>, %155, %cst_91 [1] : vector<4x4xf32> to vector<4xf32>
    %157 = vector.shape_cast %156 : vector<4xf32> to vector<4x1xf32>
    %158 = vector.broadcast %157 : vector<4x1xf32> to vector<4x4xf32>
    %159 = arith.subf %155, %158 : vector<4x4xf32>
    %160 = math.exp %159 : vector<4x4xf32>
    %cst_92 = arith.constant dense<0.000000e+00> : vector<4xf32>
    %161 = vector.multi_reduction <add>, %160, %cst_92 [1] : vector<4x4xf32> to vector<4xf32>
    %162 = vector.shape_cast %161 : vector<4xf32> to vector<4x1xf32>
    %163 = vector.broadcast %162 : vector<4x1xf32> to vector<4x4xf32>
    %164 = arith.divf %160, %163 : vector<4x4xf32>
    %165 = arith.truncf %164 : vector<4x4xf32> to vector<4x4xbf16>
    %166 = arith.truncf %144 : vector<4x128xf32> to vector<4x128xbf16>
    %cst_93 = arith.constant dense<0.000000e+00> : vector<4x128xf32>
    %167 = tpu.matmul %165, %166, %cst_93 {dimension_numbers = #tpu.dot_dimension_numbers<[1], [0], [0], [1], [0, 0, 1, 1], [], []>} : vector<4x4xbf16>, vector<4x128xbf16>, vector<4x128xf32> -> vector<4x128xf32>
    %168 = arith.addf %143, %167 : vector<4x128xf32>
    %169 = vector.extract_strided_slice %138 {offsets = [0, 128], sizes = [4, 128], strides = [1, 1]} : vector<4x512xf32> to vector<4x128xf32>
    %170 = vector.extract_strided_slice %142 {offsets = [0, 1], sizes = [4, 1], strides = [1, 1]} : vector<4x128xf32> to vector<4x1xf32>
    %171 = vector.extract_strided_slice %140 {offsets = [1, 0], sizes = [1, 4], strides = [1, 1]} : vector<4x4xf32> to vector<1x4xf32>
    %172 = vector.broadcast %170 : vector<4x1xf32> to vector<4x4xf32>
    %173 = vector.broadcast %171 : vector<1x4xf32> to vector<4x4xf32>
    %174 = arith.addf %172, %173 : vector<4x4xf32>
    %cst_94 = arith.constant 0.000000e+00 : f32
    %175 = vector.broadcast %cst_94 : f32 to vector<4x4xf32>
    %176 = arith.cmpf ogt, %174, %175 : vector<4x4xf32>
    %cst_95 = arith.constant 2.000000e-01 : f32
    %177 = vector.broadcast %cst_95 : f32 to vector<4x4xf32>
    %178 = arith.mulf %177, %174 : vector<4x4xf32>
    %179 = arith.select %176, %174, %178 : vector<4x4xi1>, vector<4x4xf32>
    %180 = arith.addf %179, %132 : vector<4x4xf32>
    %cst_96 = arith.constant dense<0xFF800000> : vector<4xf32>
    %181 = vector.multi_reduction <maximumf>, %180, %cst_96 [1] : vector<4x4xf32> to vector<4xf32>
    %182 = vector.shape_cast %181 : vector<4xf32> to vector<4x1xf32>
    %183 = vector.broadcast %182 : vector<4x1xf32> to vector<4x4xf32>
    %184 = arith.subf %180, %183 : vector<4x4xf32>
    %185 = math.exp %184 : vector<4x4xf32>
    %cst_97 = arith.constant dense<0.000000e+00> : vector<4xf32>
    %186 = vector.multi_reduction <add>, %185, %cst_97 [1] : vector<4x4xf32> to vector<4xf32>
    %187 = vector.shape_cast %186 : vector<4xf32> to vector<4x1xf32>
    %188 = vector.broadcast %187 : vector<4x1xf32> to vector<4x4xf32>
    %189 = arith.divf %185, %188 : vector<4x4xf32>
    %190 = arith.truncf %189 : vector<4x4xf32> to vector<4x4xbf16>
    %191 = arith.truncf %169 : vector<4x128xf32> to vector<4x128xbf16>
    %cst_98 = arith.constant dense<0.000000e+00> : vector<4x128xf32>
    %192 = tpu.matmul %190, %191, %cst_98 {dimension_numbers = #tpu.dot_dimension_numbers<[1], [0], [0], [1], [0, 0, 1, 1], [], []>} : vector<4x4xbf16>, vector<4x128xbf16>, vector<4x128xf32> -> vector<4x128xf32>
    %193 = arith.addf %168, %192 : vector<4x128xf32>
    %194 = vector.extract_strided_slice %138 {offsets = [0, 256], sizes = [4, 128], strides = [1, 1]} : vector<4x512xf32> to vector<4x128xf32>
    %195 = vector.extract_strided_slice %142 {offsets = [0, 2], sizes = [4, 1], strides = [1, 1]} : vector<4x128xf32> to vector<4x1xf32>
    %196 = vector.extract_strided_slice %140 {offsets = [2, 0], sizes = [1, 4], strides = [1, 1]} : vector<4x4xf32> to vector<1x4xf32>
    %197 = vector.broadcast %195 : vector<4x1xf32> to vector<4x4xf32>
    %198 = vector.broadcast %196 : vector<1x4xf32> to vector<4x4xf32>
    %199 = arith.addf %197, %198 : vector<4x4xf32>
    %cst_99 = arith.constant 0.000000e+00 : f32
    %200 = vector.broadcast %cst_99 : f32 to vector<4x4xf32>
    %201 = arith.cmpf ogt, %199, %200 : vector<4x4xf32>
    %cst_100 = arith.constant 2.000000e-01 : f32
    %202 = vector.broadcast %cst_100 : f32 to vector<4x4xf32>
    %203 = arith.mulf %202, %199 : vector<4x4xf32>
    %204 = arith.select %201, %199, %203 : vector<4x4xi1>, vector<4x4xf32>
    %205 = arith.addf %204, %132 : vector<4x4xf32>
    %cst_101 = arith.constant dense<0xFF800000> : vector<4xf32>
    %206 = vector.multi_reduction <maximumf>, %205, %cst_101 [1] : vector<4x4xf32> to vector<4xf32>
    %207 = vector.shape_cast %206 : vector<4xf32> to vector<4x1xf32>
    %208 = vector.broadcast %207 : vector<4x1xf32> to vector<4x4xf32>
    %209 = arith.subf %205, %208 : vector<4x4xf32>
    %210 = math.exp %209 : vector<4x4xf32>
    %cst_102 = arith.constant dense<0.000000e+00> : vector<4xf32>
    %211 = vector.multi_reduction <add>, %210, %cst_102 [1] : vector<4x4xf32> to vector<4xf32>
    %212 = vector.shape_cast %211 : vector<4xf32> to vector<4x1xf32>
    %213 = vector.broadcast %212 : vector<4x1xf32> to vector<4x4xf32>
    %214 = arith.divf %210, %213 : vector<4x4xf32>
    %215 = arith.truncf %214 : vector<4x4xf32> to vector<4x4xbf16>
    %216 = arith.truncf %194 : vector<4x128xf32> to vector<4x128xbf16>
    %cst_103 = arith.constant dense<0.000000e+00> : vector<4x128xf32>
    %217 = tpu.matmul %215, %216, %cst_103 {dimension_numbers = #tpu.dot_dimension_numbers<[1], [0], [0], [1], [0, 0, 1, 1], [], []>} : vector<4x4xbf16>, vector<4x128xbf16>, vector<4x128xf32> -> vector<4x128xf32>
    %218 = arith.addf %193, %217 : vector<4x128xf32>
    %219 = vector.extract_strided_slice %138 {offsets = [0, 384], sizes = [4, 128], strides = [1, 1]} : vector<4x512xf32> to vector<4x128xf32>
    %220 = vector.extract_strided_slice %142 {offsets = [0, 3], sizes = [4, 1], strides = [1, 1]} : vector<4x128xf32> to vector<4x1xf32>
    %221 = vector.extract_strided_slice %140 {offsets = [3, 0], sizes = [1, 4], strides = [1, 1]} : vector<4x4xf32> to vector<1x4xf32>
    %222 = vector.broadcast %220 : vector<4x1xf32> to vector<4x4xf32>
    %223 = vector.broadcast %221 : vector<1x4xf32> to vector<4x4xf32>
    %224 = arith.addf %222, %223 : vector<4x4xf32>
    %cst_104 = arith.constant 0.000000e+00 : f32
    %225 = vector.broadcast %cst_104 : f32 to vector<4x4xf32>
    %226 = arith.cmpf ogt, %224, %225 : vector<4x4xf32>
    %cst_105 = arith.constant 2.000000e-01 : f32
    %227 = vector.broadcast %cst_105 : f32 to vector<4x4xf32>
    %228 = arith.mulf %227, %224 : vector<4x4xf32>
    %229 = arith.select %226, %224, %228 : vector<4x4xi1>, vector<4x4xf32>
    %230 = arith.addf %229, %132 : vector<4x4xf32>
    %cst_106 = arith.constant dense<0xFF800000> : vector<4xf32>
    %231 = vector.multi_reduction <maximumf>, %230, %cst_106 [1] : vector<4x4xf32> to vector<4xf32>
    %232 = vector.shape_cast %231 : vector<4xf32> to vector<4x1xf32>
    %233 = vector.broadcast %232 : vector<4x1xf32> to vector<4x4xf32>
    %234 = arith.subf %230, %233 : vector<4x4xf32>
    %235 = math.exp %234 : vector<4x4xf32>
    %cst_107 = arith.constant dense<0.000000e+00> : vector<4xf32>
    %236 = vector.multi_reduction <add>, %235, %cst_107 [1] : vector<4x4xf32> to vector<4xf32>
    %237 = vector.shape_cast %236 : vector<4xf32> to vector<4x1xf32>
    %238 = vector.broadcast %237 : vector<4x1xf32> to vector<4x4xf32>
    %239 = arith.divf %235, %238 : vector<4x4xf32>
    %240 = arith.truncf %239 : vector<4x4xf32> to vector<4x4xbf16>
    %241 = arith.truncf %219 : vector<4x128xf32> to vector<4x128xbf16>
    %cst_108 = arith.constant dense<0.000000e+00> : vector<4x128xf32>
    %242 = tpu.matmul %240, %241, %cst_108 {dimension_numbers = #tpu.dot_dimension_numbers<[1], [0], [0], [1], [0, 0, 1, 1], [], []>} : vector<4x4xbf16>, vector<4x128xbf16>, vector<4x128xf32> -> vector<4x128xf32>
    %243 = arith.addf %218, %242 : vector<4x128xf32>
    %cst_109 = arith.constant 2.500000e-01 : f32
    %244 = vector.broadcast %cst_109 : f32 to vector<4x128xf32>
    %245 = arith.mulf %243, %244 : vector<4x128xf32>
    %246 = vector.broadcast %136 : vector<1x128xf32> to vector<4x128xf32>
    %247 = arith.addf %245, %246 : vector<4x128xf32>
    %c0_110 = arith.constant 0 : index
    %c0_111 = arith.constant 0 : index
    %248 = vector.load %arg19[%c0_110, %c0_111] : memref<128x128xbf16, #tpu.memory_space<vmem>>, vector<128x128xbf16>
    %249 = arith.truncf %130 : vector<4x128xf32> to vector<4x128xbf16>
    %cst_112 = arith.constant dense<0.000000e+00> : vector<4x128xf32>
    %250 = tpu.matmul %249, %248, %cst_112 {dimension_numbers = #tpu.dot_dimension_numbers<[1], [0], [0], [1], [0, 0, 1, 1], [], []>} : vector<4x128xbf16>, vector<128x128xbf16>, vector<4x128xf32> -> vector<4x128xf32>
    %c2 = arith.constant 2 : index
    %c0_113 = arith.constant 0 : index
    %251 = vector.load %arg25[%c2, %c0_113] : memref<16x128xf32, #tpu.memory_space<vmem>>, vector<1x128xf32>
    %252 = vector.broadcast %251 : vector<1x128xf32> to vector<4x128xf32>
    %253 = arith.addf %250, %252 : vector<4x128xf32>
    %c3 = arith.constant 3 : index
    %c0_114 = arith.constant 0 : index
    %254 = vector.load %arg25[%c3, %c0_114] : memref<16x128xf32, #tpu.memory_space<vmem>>, vector<1x128xf32>
    %255 = vector.broadcast %254 : vector<1x128xf32> to vector<4x128xf32>
    %256 = arith.mulf %247, %255 : vector<4x128xf32>
    %c4 = arith.constant 4 : index
    %c0_115 = arith.constant 0 : index
    %257 = vector.load %arg25[%c4, %c0_115] : memref<16x128xf32, #tpu.memory_space<vmem>>, vector<1x128xf32>
    %258 = vector.broadcast %257 : vector<1x128xf32> to vector<4x128xf32>
    %259 = arith.addf %256, %258 : vector<4x128xf32>
    %260 = arith.addf %259, %253 : vector<4x128xf32>
    %cst_116 = arith.constant 0.000000e+00 : f32
    %261 = vector.broadcast %cst_116 : f32 to vector<4x128xf32>
    %262 = arith.cmpf ogt, %260, %261 : vector<4x128xf32>
    %263 = math.exp %260 : vector<4x128xf32>
    %cst_117 = arith.constant 1.000000e+00 : f32
    %264 = vector.broadcast %cst_117 : f32 to vector<4x128xf32>
    %265 = arith.subf %263, %264 : vector<4x128xf32>
    %266 = arith.select %262, %260, %265 : vector<4x128xi1>, vector<4x128xf32>
    %c0_118 = arith.constant 0 : index
    %c0_119 = arith.constant 0 : index
    %267 = vector.load %arg20[%c0_118, %c0_119] : memref<128x512xbf16, #tpu.memory_space<vmem>>, vector<128x512xbf16>
    %c0_120 = arith.constant 0 : index
    %c0_121 = arith.constant 0 : index
    %268 = vector.load %arg21[%c0_120, %c0_121] : memref<4x512xbf16, #tpu.memory_space<vmem>>, vector<4x512xbf16>
    %c0_122 = arith.constant 0 : index
    %c0_123 = arith.constant 0 : index
    %269 = vector.load %arg22[%c0_122, %c0_123] : memref<512x128xbf16, #tpu.memory_space<vmem>>, vector<512x128xbf16>
    %c7 = arith.constant 7 : index
    %c0_124 = arith.constant 0 : index
    %270 = vector.load %arg25[%c7, %c0_124] : memref<16x128xf32, #tpu.memory_space<vmem>>, vector<1x128xf32>
    %271 = arith.truncf %266 : vector<4x128xf32> to vector<4x128xbf16>
    %cst_125 = arith.constant dense<0.000000e+00> : vector<4x512xf32>
    %272 = tpu.matmul %271, %267, %cst_125 {dimension_numbers = #tpu.dot_dimension_numbers<[1], [0], [0], [1], [0, 0, 1, 1], [], []>} : vector<4x128xbf16>, vector<128x512xbf16>, vector<4x512xf32> -> vector<4x512xf32>
    %273 = arith.truncf %272 : vector<4x512xf32> to vector<4x512xbf16>
    %cst_126 = arith.constant dense<0.000000e+00> : vector<4x4xf32>
    %274 = tpu.matmul %268, %273, %cst_126 {dimension_numbers = #tpu.dot_dimension_numbers<[1], [1], [0], [0], [0, 0, 1, 0], [], []>} : vector<4x512xbf16>, vector<4x512xbf16>, vector<4x4xf32> -> vector<4x4xf32>
    %275 = arith.truncf %272 : vector<4x512xf32> to vector<4x512xbf16>
    %cst_127 = arith.constant dense<0.000000e+00> : vector<4x128xf32>
    %276 = tpu.matmul %275, %269, %cst_127 {dimension_numbers = #tpu.dot_dimension_numbers<[1], [0], [0], [1], [0, 0, 1, 1], [], []>} : vector<4x512xbf16>, vector<512x128xbf16>, vector<4x128xf32> -> vector<4x128xf32>
    %cst_128 = arith.constant 0.000000e+00 : f32
    %277 = vector.broadcast %cst_128 : f32 to vector<4x128xf32>
    %278 = vector.extract_strided_slice %272 {offsets = [0, 0], sizes = [4, 128], strides = [1, 1]} : vector<4x512xf32> to vector<4x128xf32>
    %279 = vector.extract_strided_slice %276 {offsets = [0, 0], sizes = [4, 1], strides = [1, 1]} : vector<4x128xf32> to vector<4x1xf32>
    %280 = vector.extract_strided_slice %274 {offsets = [0, 0], sizes = [1, 4], strides = [1, 1]} : vector<4x4xf32> to vector<1x4xf32>
    %281 = vector.broadcast %279 : vector<4x1xf32> to vector<4x4xf32>
    %282 = vector.broadcast %280 : vector<1x4xf32> to vector<4x4xf32>
    %283 = arith.addf %281, %282 : vector<4x4xf32>
    %cst_129 = arith.constant 0.000000e+00 : f32
    %284 = vector.broadcast %cst_129 : f32 to vector<4x4xf32>
    %285 = arith.cmpf ogt, %283, %284 : vector<4x4xf32>
    %cst_130 = arith.constant 2.000000e-01 : f32
    %286 = vector.broadcast %cst_130 : f32 to vector<4x4xf32>
    %287 = arith.mulf %286, %283 : vector<4x4xf32>
    %288 = arith.select %285, %283, %287 : vector<4x4xi1>, vector<4x4xf32>
    %289 = arith.addf %288, %132 : vector<4x4xf32>
    %cst_131 = arith.constant dense<0xFF800000> : vector<4xf32>
    %290 = vector.multi_reduction <maximumf>, %289, %cst_131 [1] : vector<4x4xf32> to vector<4xf32>
    %291 = vector.shape_cast %290 : vector<4xf32> to vector<4x1xf32>
    %292 = vector.broadcast %291 : vector<4x1xf32> to vector<4x4xf32>
    %293 = arith.subf %289, %292 : vector<4x4xf32>
    %294 = math.exp %293 : vector<4x4xf32>
    %cst_132 = arith.constant dense<0.000000e+00> : vector<4xf32>
    %295 = vector.multi_reduction <add>, %294, %cst_132 [1] : vector<4x4xf32> to vector<4xf32>
    %296 = vector.shape_cast %295 : vector<4xf32> to vector<4x1xf32>
    %297 = vector.broadcast %296 : vector<4x1xf32> to vector<4x4xf32>
    %298 = arith.divf %294, %297 : vector<4x4xf32>
    %299 = arith.truncf %298 : vector<4x4xf32> to vector<4x4xbf16>
    %300 = arith.truncf %278 : vector<4x128xf32> to vector<4x128xbf16>
    %cst_133 = arith.constant dense<0.000000e+00> : vector<4x128xf32>
    %301 = tpu.matmul %299, %300, %cst_133 {dimension_numbers = #tpu.dot_dimension_numbers<[1], [0], [0], [1], [0, 0, 1, 1], [], []>} : vector<4x4xbf16>, vector<4x128xbf16>, vector<4x128xf32> -> vector<4x128xf32>
    %302 = arith.addf %277, %301 : vector<4x128xf32>
    %303 = vector.extract_strided_slice %272 {offsets = [0, 128], sizes = [4, 128], strides = [1, 1]} : vector<4x512xf32> to vector<4x128xf32>
    %304 = vector.extract_strided_slice %276 {offsets = [0, 1], sizes = [4, 1], strides = [1, 1]} : vector<4x128xf32> to vector<4x1xf32>
    %305 = vector.extract_strided_slice %274 {offsets = [1, 0], sizes = [1, 4], strides = [1, 1]} : vector<4x4xf32> to vector<1x4xf32>
    %306 = vector.broadcast %304 : vector<4x1xf32> to vector<4x4xf32>
    %307 = vector.broadcast %305 : vector<1x4xf32> to vector<4x4xf32>
    %308 = arith.addf %306, %307 : vector<4x4xf32>
    %cst_134 = arith.constant 0.000000e+00 : f32
    %309 = vector.broadcast %cst_134 : f32 to vector<4x4xf32>
    %310 = arith.cmpf ogt, %308, %309 : vector<4x4xf32>
    %cst_135 = arith.constant 2.000000e-01 : f32
    %311 = vector.broadcast %cst_135 : f32 to vector<4x4xf32>
    %312 = arith.mulf %311, %308 : vector<4x4xf32>
    %313 = arith.select %310, %308, %312 : vector<4x4xi1>, vector<4x4xf32>
    %314 = arith.addf %313, %132 : vector<4x4xf32>
    %cst_136 = arith.constant dense<0xFF800000> : vector<4xf32>
    %315 = vector.multi_reduction <maximumf>, %314, %cst_136 [1] : vector<4x4xf32> to vector<4xf32>
    %316 = vector.shape_cast %315 : vector<4xf32> to vector<4x1xf32>
    %317 = vector.broadcast %316 : vector<4x1xf32> to vector<4x4xf32>
    %318 = arith.subf %314, %317 : vector<4x4xf32>
    %319 = math.exp %318 : vector<4x4xf32>
    %cst_137 = arith.constant dense<0.000000e+00> : vector<4xf32>
    %320 = vector.multi_reduction <add>, %319, %cst_137 [1] : vector<4x4xf32> to vector<4xf32>
    %321 = vector.shape_cast %320 : vector<4xf32> to vector<4x1xf32>
    %322 = vector.broadcast %321 : vector<4x1xf32> to vector<4x4xf32>
    %323 = arith.divf %319, %322 : vector<4x4xf32>
    %324 = arith.truncf %323 : vector<4x4xf32> to vector<4x4xbf16>
    %325 = arith.truncf %303 : vector<4x128xf32> to vector<4x128xbf16>
    %cst_138 = arith.constant dense<0.000000e+00> : vector<4x128xf32>
    %326 = tpu.matmul %324, %325, %cst_138 {dimension_numbers = #tpu.dot_dimension_numbers<[1], [0], [0], [1], [0, 0, 1, 1], [], []>} : vector<4x4xbf16>, vector<4x128xbf16>, vector<4x128xf32> -> vector<4x128xf32>
    %327 = arith.addf %302, %326 : vector<4x128xf32>
    %328 = vector.extract_strided_slice %272 {offsets = [0, 256], sizes = [4, 128], strides = [1, 1]} : vector<4x512xf32> to vector<4x128xf32>
    %329 = vector.extract_strided_slice %276 {offsets = [0, 2], sizes = [4, 1], strides = [1, 1]} : vector<4x128xf32> to vector<4x1xf32>
    %330 = vector.extract_strided_slice %274 {offsets = [2, 0], sizes = [1, 4], strides = [1, 1]} : vector<4x4xf32> to vector<1x4xf32>
    %331 = vector.broadcast %329 : vector<4x1xf32> to vector<4x4xf32>
    %332 = vector.broadcast %330 : vector<1x4xf32> to vector<4x4xf32>
    %333 = arith.addf %331, %332 : vector<4x4xf32>
    %cst_139 = arith.constant 0.000000e+00 : f32
    %334 = vector.broadcast %cst_139 : f32 to vector<4x4xf32>
    %335 = arith.cmpf ogt, %333, %334 : vector<4x4xf32>
    %cst_140 = arith.constant 2.000000e-01 : f32
    %336 = vector.broadcast %cst_140 : f32 to vector<4x4xf32>
    %337 = arith.mulf %336, %333 : vector<4x4xf32>
    %338 = arith.select %335, %333, %337 : vector<4x4xi1>, vector<4x4xf32>
    %339 = arith.addf %338, %132 : vector<4x4xf32>
    %cst_141 = arith.constant dense<0xFF800000> : vector<4xf32>
    %340 = vector.multi_reduction <maximumf>, %339, %cst_141 [1] : vector<4x4xf32> to vector<4xf32>
    %341 = vector.shape_cast %340 : vector<4xf32> to vector<4x1xf32>
    %342 = vector.broadcast %341 : vector<4x1xf32> to vector<4x4xf32>
    %343 = arith.subf %339, %342 : vector<4x4xf32>
    %344 = math.exp %343 : vector<4x4xf32>
    %cst_142 = arith.constant dense<0.000000e+00> : vector<4xf32>
    %345 = vector.multi_reduction <add>, %344, %cst_142 [1] : vector<4x4xf32> to vector<4xf32>
    %346 = vector.shape_cast %345 : vector<4xf32> to vector<4x1xf32>
    %347 = vector.broadcast %346 : vector<4x1xf32> to vector<4x4xf32>
    %348 = arith.divf %344, %347 : vector<4x4xf32>
    %349 = arith.truncf %348 : vector<4x4xf32> to vector<4x4xbf16>
    %350 = arith.truncf %328 : vector<4x128xf32> to vector<4x128xbf16>
    %cst_143 = arith.constant dense<0.000000e+00> : vector<4x128xf32>
    %351 = tpu.matmul %349, %350, %cst_143 {dimension_numbers = #tpu.dot_dimension_numbers<[1], [0], [0], [1], [0, 0, 1, 1], [], []>} : vector<4x4xbf16>, vector<4x128xbf16>, vector<4x128xf32> -> vector<4x128xf32>
    %352 = arith.addf %327, %351 : vector<4x128xf32>
    %353 = vector.extract_strided_slice %272 {offsets = [0, 384], sizes = [4, 128], strides = [1, 1]} : vector<4x512xf32> to vector<4x128xf32>
    %354 = vector.extract_strided_slice %276 {offsets = [0, 3], sizes = [4, 1], strides = [1, 1]} : vector<4x128xf32> to vector<4x1xf32>
    %355 = vector.extract_strided_slice %274 {offsets = [3, 0], sizes = [1, 4], strides = [1, 1]} : vector<4x4xf32> to vector<1x4xf32>
    %356 = vector.broadcast %354 : vector<4x1xf32> to vector<4x4xf32>
    %357 = vector.broadcast %355 : vector<1x4xf32> to vector<4x4xf32>
    %358 = arith.addf %356, %357 : vector<4x4xf32>
    %cst_144 = arith.constant 0.000000e+00 : f32
    %359 = vector.broadcast %cst_144 : f32 to vector<4x4xf32>
    %360 = arith.cmpf ogt, %358, %359 : vector<4x4xf32>
    %cst_145 = arith.constant 2.000000e-01 : f32
    %361 = vector.broadcast %cst_145 : f32 to vector<4x4xf32>
    %362 = arith.mulf %361, %358 : vector<4x4xf32>
    %363 = arith.select %360, %358, %362 : vector<4x4xi1>, vector<4x4xf32>
    %364 = arith.addf %363, %132 : vector<4x4xf32>
    %cst_146 = arith.constant dense<0xFF800000> : vector<4xf32>
    %365 = vector.multi_reduction <maximumf>, %364, %cst_146 [1] : vector<4x4xf32> to vector<4xf32>
    %366 = vector.shape_cast %365 : vector<4xf32> to vector<4x1xf32>
    %367 = vector.broadcast %366 : vector<4x1xf32> to vector<4x4xf32>
    %368 = arith.subf %364, %367 : vector<4x4xf32>
    %369 = math.exp %368 : vector<4x4xf32>
    %cst_147 = arith.constant dense<0.000000e+00> : vector<4xf32>
    %370 = vector.multi_reduction <add>, %369, %cst_147 [1] : vector<4x4xf32> to vector<4xf32>
    %371 = vector.shape_cast %370 : vector<4xf32> to vector<4x1xf32>
    %372 = vector.broadcast %371 : vector<4x1xf32> to vector<4x4xf32>
    %373 = arith.divf %369, %372 : vector<4x4xf32>
    %374 = arith.truncf %373 : vector<4x4xf32> to vector<4x4xbf16>
    %375 = arith.truncf %353 : vector<4x128xf32> to vector<4x128xbf16>
    %cst_148 = arith.constant dense<0.000000e+00> : vector<4x128xf32>
    %376 = tpu.matmul %374, %375, %cst_148 {dimension_numbers = #tpu.dot_dimension_numbers<[1], [0], [0], [1], [0, 0, 1, 1], [], []>} : vector<4x4xbf16>, vector<4x128xbf16>, vector<4x128xf32> -> vector<4x128xf32>
    %377 = arith.addf %352, %376 : vector<4x128xf32>
    %cst_149 = arith.constant 2.500000e-01 : f32
    %378 = vector.broadcast %cst_149 : f32 to vector<4x128xf32>
    %379 = arith.mulf %377, %378 : vector<4x128xf32>
    %380 = vector.broadcast %270 : vector<1x128xf32> to vector<4x128xf32>
    %381 = arith.addf %379, %380 : vector<4x128xf32>
    %c5 = arith.constant 5 : index
    %c0_150 = arith.constant 0 : index
    %382 = vector.load %arg25[%c5, %c0_150] : memref<16x128xf32, #tpu.memory_space<vmem>>, vector<1x128xf32>
    %383 = vector.broadcast %382 : vector<1x128xf32> to vector<4x128xf32>
    %384 = arith.mulf %381, %383 : vector<4x128xf32>
    %c6 = arith.constant 6 : index
    %c0_151 = arith.constant 0 : index
    %385 = vector.load %arg25[%c6, %c0_151] : memref<16x128xf32, #tpu.memory_space<vmem>>, vector<1x128xf32>
    %386 = vector.broadcast %385 : vector<1x128xf32> to vector<4x128xf32>
    %387 = arith.addf %384, %386 : vector<4x128xf32>
    %388 = arith.addf %387, %266 : vector<4x128xf32>
    %cst_152 = arith.constant 0.000000e+00 : f32
    %389 = vector.broadcast %cst_152 : f32 to vector<4x128xf32>
    %390 = arith.cmpf ogt, %388, %389 : vector<4x128xf32>
    %391 = math.exp %388 : vector<4x128xf32>
    %cst_153 = arith.constant 1.000000e+00 : f32
    %392 = vector.broadcast %cst_153 : f32 to vector<4x128xf32>
    %393 = arith.subf %391, %392 : vector<4x128xf32>
    %394 = arith.select %390, %388, %393 : vector<4x128xi1>, vector<4x128xf32>
    %cst_154 = arith.constant 2.500000e-01 : f32
    %395 = vector.broadcast %cst_154 : f32 to vector<1x4xf32>
    %396 = arith.truncf %395 : vector<1x4xf32> to vector<1x4xbf16>
    %397 = arith.truncf %394 : vector<4x128xf32> to vector<4x128xbf16>
    %cst_155 = arith.constant dense<0.000000e+00> : vector<1x128xf32>
    %398 = tpu.matmul %396, %397, %cst_155 {dimension_numbers = #tpu.dot_dimension_numbers<[1], [0], [0], [1], [0, 0, 1, 1], [], []>} : vector<1x4xbf16>, vector<4x128xbf16>, vector<1x128xf32> -> vector<1x128xf32>
    %c0_156 = arith.constant 0 : index
    %c0_157 = arith.constant 0 : index
    %399 = vector.load %arg23[%c0_156, %c0_157] : memref<128x64xbf16, #tpu.memory_space<vmem>>, vector<128x64xbf16>
    %400 = arith.truncf %398 : vector<1x128xf32> to vector<1x128xbf16>
    %cst_158 = arith.constant dense<0.000000e+00> : vector<1x64xf32>
    %401 = tpu.matmul %400, %399, %cst_158 {dimension_numbers = #tpu.dot_dimension_numbers<[1], [0], [0], [1], [0, 0, 1, 1], [], []>} : vector<1x128xbf16>, vector<128x64xbf16>, vector<1x64xf32> -> vector<1x64xf32>
    %c8 = arith.constant 8 : index
    %c0_159 = arith.constant 0 : index
    %402 = vector.load %arg25[%c8, %c0_159] : memref<16x128xf32, #tpu.memory_space<vmem>>, vector<1x64xf32>
    %403 = arith.addf %401, %402 : vector<1x64xf32>
    %cst_160 = arith.constant 5.000000e-01 : f32
    %404 = vector.broadcast %cst_160 : f32 to vector<1x64xf32>
    %405 = arith.mulf %404, %403 : vector<1x64xf32>
    %cst_161 = arith.constant 4.471500e-02 : f32
    %406 = vector.broadcast %cst_161 : f32 to vector<1x64xf32>
    %407 = arith.mulf %406, %403 : vector<1x64xf32>
    %408 = arith.mulf %407, %403 : vector<1x64xf32>
    %409 = arith.mulf %408, %403 : vector<1x64xf32>
    %410 = arith.addf %403, %409 : vector<1x64xf32>
    %cst_162 = arith.constant 0.797884583 : f32
    %411 = vector.broadcast %cst_162 : f32 to vector<1x64xf32>
    %412 = arith.mulf %411, %410 : vector<1x64xf32>
    %413 = math.tanh %412 : vector<1x64xf32>
    %cst_163 = arith.constant 1.000000e+00 : f32
    %414 = vector.broadcast %cst_163 : f32 to vector<1x64xf32>
    %415 = arith.addf %414, %413 : vector<1x64xf32>
    %416 = arith.mulf %405, %415 : vector<1x64xf32>
    %c0_164 = arith.constant 0 : index
    %c0_165 = arith.constant 0 : index
    %417 = vector.load %arg24[%c0_164, %c0_165] : memref<64x128xbf16, #tpu.memory_space<vmem>>, vector<64x128xbf16>
    %418 = arith.truncf %416 : vector<1x64xf32> to vector<1x64xbf16>
    %cst_166 = arith.constant dense<0.000000e+00> : vector<1x128xf32>
    %419 = tpu.matmul %418, %417, %cst_166 {dimension_numbers = #tpu.dot_dimension_numbers<[1], [0], [0], [1], [0, 0, 1, 1], [], []>} : vector<1x64xbf16>, vector<64x128xbf16>, vector<1x128xf32> -> vector<1x128xf32>
    %c9 = arith.constant 9 : index
    %c0_167 = arith.constant 0 : index
    %420 = vector.load %arg25[%c9, %c0_167] : memref<16x128xf32, #tpu.memory_space<vmem>>, vector<1x128xf32>
    %421 = arith.addf %419, %420 : vector<1x128xf32>
    %c0_168 = arith.constant 0 : index
    %c0_169 = arith.constant 0 : index
    %c0_170 = arith.constant 0 : index
    %422 = vector.load %arg26[%c0_168, %c0_169, %c0_170] : memref<1x1x128xf32, #tpu.memory_space<vmem>>, vector<1x1x128xf32>
    %423 = vector.shape_cast %422 : vector<1x1x128xf32> to vector<1x128xf32>
    %424 = vector.shape_cast %421 : vector<1x128xf32> to vector<1x1x128xf32>
    tpu.vector_store %arg26[%c0_168, %c0_169, %c0_170], %424 {strides = array<i32>} : memref<1x1x128xf32, #tpu.memory_space<vmem>>, vector<1x1x128xf32>,
    return
  }
  func.func @transform_0(%arg0: i32) -> (i32, i32, i32) {
    %c0_i32 = arith.constant 0 : i32
    %c0_i32_0 = arith.constant 0 : i32
    %c0_i32_1 = arith.constant 0 : i32
    return %arg0, %c0_i32, %c0_i32_0 : i32, i32, i32
  }
  func.func @transform_1(%arg0: i32) -> (i32, i32, i32) {
    %c0_i32 = arith.constant 0 : i32
    %c0_i32_0 = arith.constant 0 : i32
    %c0_i32_1 = arith.constant 0 : i32
    return %arg0, %c0_i32, %c0_i32_0 : i32, i32, i32
  }
  func.func @transform_2(%arg0: i32) -> (i32, i32, i32) {
    %c0_i32 = arith.constant 0 : i32
    %c0_i32_0 = arith.constant 0 : i32
    %c0_i32_1 = arith.constant 0 : i32
    return %arg0, %c0_i32, %c0_i32_0 : i32, i32, i32
  }
  func.func @transform_3(%arg0: i32) -> (i32, i32, i32) {
    %c0_i32 = arith.constant 0 : i32
    %c0_i32_0 = arith.constant 0 : i32
    %c0_i32_1 = arith.constant 0 : i32
    return %arg0, %c0_i32, %c0_i32_0 : i32, i32, i32
  }
  func.func @transform_4(%arg0: i32) -> (i32, i32) {
    %c0_i32 = arith.constant 0 : i32
    %c0_i32_0 = arith.constant 0 : i32
    %c0_i32_1 = arith.constant 0 : i32
    return %c0_i32, %c0_i32_0 : i32, i32
  }
  func.func @transform_5(%arg0: i32) -> (i32, i32) {
    %c0_i32 = arith.constant 0 : i32
    %c0_i32_0 = arith.constant 0 : i32
    %c0_i32_1 = arith.constant 0 : i32
    return %c0_i32, %c0_i32_0 : i32, i32
  }
  func.func @transform_6(%arg0: i32) -> (i32, i32) {
    %c0_i32 = arith.constant 0 : i32
    %c0_i32_0 = arith.constant 0 : i32
    %c0_i32_1 = arith.constant 0 : i32
    return %c0_i32, %c0_i32_0 : i32, i32
  }
  func.func @transform_7(%arg0: i32) -> (i32, i32) {
    %c0_i32 = arith.constant 0 : i32
    %c0_i32_0 = arith.constant 0 : i32
    %c0_i32_1 = arith.constant 0 : i32
    return %c0_i32, %c0_i32_0 : i32, i32
  }
  func.func @transform_8(%arg0: i32) -> (i32, i32) {
    %c0_i32 = arith.constant 0 : i32
    %c0_i32_0 = arith.constant 0 : i32
    %c0_i32_1 = arith.constant 0 : i32
    return %c0_i32, %c0_i32_0 : i32, i32
  }
  func.func @transform_9(%arg0: i32) -> (i32, i32) {
    %c0_i32 = arith.constant 0 : i32
    %c0_i32_0 = arith.constant 0 : i32
    %c0_i32_1 = arith.constant 0 : i32
    return %c0_i32, %c0_i32_0 : i32, i32
  }
  func.func @transform_10(%arg0: i32) -> (i32, i32) {
    %c0_i32 = arith.constant 0 : i32
    %c0_i32_0 = arith.constant 0 : i32
    %c0_i32_1 = arith.constant 0 : i32
    return %c0_i32, %c0_i32_0 : i32, i32
  }
  func.func @transform_11(%arg0: i32) -> (i32, i32) {
    %c0_i32 = arith.constant 0 : i32
    %c0_i32_0 = arith.constant 0 : i32
    %c0_i32_1 = arith.constant 0 : i32
    return %c0_i32, %c0_i32_0 : i32, i32
  }
  func.func @transform_12(%arg0: i32) -> (i32, i32) {
    %c0_i32 = arith.constant 0 : i32
    %c0_i32_0 = arith.constant 0 : i32
    %c0_i32_1 = arith.constant 0 : i32
    return %c0_i32, %c0_i32_0 : i32, i32
  }
  func.func @transform_13(%arg0: i32) -> (i32, i32) {
    %c0_i32 = arith.constant 0 : i32
    %c0_i32_0 = arith.constant 0 : i32
    %c0_i32_1 = arith.constant 0 : i32
    return %c0_i32, %c0_i32_0 : i32, i32
  }
  func.func @transform_14(%arg0: i32) -> (i32, i32) {
    %c0_i32 = arith.constant 0 : i32
    %c0_i32_0 = arith.constant 0 : i32
    %c0_i32_1 = arith.constant 0 : i32
    return %c0_i32, %c0_i32_0 : i32, i32
  }
  func.func @transform_15(%arg0: i32) -> (i32, i32) {
    %c0_i32 = arith.constant 0 : i32
    %c0_i32_0 = arith.constant 0 : i32
    %c0_i32_1 = arith.constant 0 : i32
    return %c0_i32, %c0_i32_0 : i32, i32
  }
  func.func @transform_16(%arg0: i32) -> (i32, i32) {
    %c0_i32 = arith.constant 0 : i32
    %c0_i32_0 = arith.constant 0 : i32
    %c0_i32_1 = arith.constant 0 : i32
    return %c0_i32, %c0_i32_0 : i32, i32
  }
  func.func @transform_17(%arg0: i32) -> (i32, i32) {
    %c0_i32 = arith.constant 0 : i32
    %c0_i32_0 = arith.constant 0 : i32
    %c0_i32_1 = arith.constant 0 : i32
    return %c0_i32, %c0_i32_0 : i32, i32
  }
  func.func @transform_18(%arg0: i32) -> (i32, i32) {
    %c0_i32 = arith.constant 0 : i32
    %c0_i32_0 = arith.constant 0 : i32
    %c0_i32_1 = arith.constant 0 : i32
    return %c0_i32, %c0_i32_0 : i32, i32
  }
  func.func @transform_19(%arg0: i32) -> (i32, i32) {
    %c0_i32 = arith.constant 0 : i32
    %c0_i32_0 = arith.constant 0 : i32
    %c0_i32_1 = arith.constant 0 : i32
    return %c0_i32, %c0_i32_0 : i32, i32
  }
  func.func @transform_20(%arg0: i32) -> (i32, i32) {
    %c0_i32 = arith.constant 0 : i32
    %c0_i32_0 = arith.constant 0 : i32
    %c0_i32_1 = arith.constant 0 : i32
    return %c0_i32, %c0_i32_0 : i32, i32
  }
  func.func @transform_21(%arg0: i32) -> (i32, i32) {
    %c0_i32 = arith.constant 0 : i32
    %c0_i32_0 = arith.constant 0 : i32
    %c0_i32_1 = arith.constant 0 : i32
    return %c0_i32, %c0_i32_0 : i32, i32
  }
  func.func @transform_22(%arg0: i32) -> (i32, i32) {
    %c0_i32 = arith.constant 0 : i32
    %c0_i32_0 = arith.constant 0 : i32
    %c0_i32_1 = arith.constant 0 : i32
    return %c0_i32, %c0_i32_0 : i32, i32
  }
  func.func @transform_23(%arg0: i32) -> (i32, i32) {
    %c0_i32 = arith.constant 0 : i32
    %c0_i32_0 = arith.constant 0 : i32
    %c0_i32_1 = arith.constant 0 : i32
    return %c0_i32, %c0_i32_0 : i32, i32
  }
  func.func @transform_24(%arg0: i32) -> (i32, i32) {
    %c0_i32 = arith.constant 0 : i32
    %c0_i32_0 = arith.constant 0 : i32
    %c0_i32_1 = arith.constant 0 : i32
    return %c0_i32, %c0_i32_0 : i32, i32
  }
  func.func @transform_25(%arg0: i32) -> (i32, i32, i32) {
    %c0_i32 = arith.constant 0 : i32
    %c0_i32_0 = arith.constant 0 : i32
    %c0_i32_1 = arith.constant 0 : i32
    return %arg0, %c0_i32, %c0_i32_0 : i32, i32, i32
  }
}

</mosaic_0001>

<bundles_post_ra>
// kernel: tpu_custom_call.1
= control target key start
LH: loop header
LB: loop body
LE: loop exit
PB: predicated region body
PF: predicated region fallthrough
CT: control target
= control target key end

     0   :  { %s17162_s0 = inlined_call_operand.hbm [shape: bf16[2,4,232], index: 0, kind: input, shape index: {}]   ;;  %s17163_s1 = inlined_call_operand.vmem [shape: bf16[2,1,208], index: 1, kind: input, shape index: {}]   ;;  %s17164_s2 = inlined_call_operand.hbm [shape: bf16[2,4,4], index: 2, kind: input, shape index: {}]   ;;  %s17165_s3 = inlined_call_operand.hbm [shape: f32[2,4,4], index: 3, kind: input, shape index: {}]   ;;  %s17166_s4 = inlined_call_operand.hbm [shape: bf16[232,3200], index: 4, kind: input, shape index: {}]   ;;  %s17167_s5 = inlined_call_operand.vmem [shape: bf16[3200,32], index: 5, kind: input, shape index: {}]   ;;  %s17168_s6 = inlined_call_operand.vmem [shape: bf16[32,8], index: 6, kind: input, shape index: {}]   ;;  %s17169_s7 = inlined_call_operand.hbm [shape: bf16[8,32], index: 7, kind: input, shape index: {}]   ;;  %s17170_s8 = inlined_call_operand.vmem [shape: bf16[208,1152], index: 8, kind: input, shape index: {}]   ;;  %s17171_s9 = inlined_call_operand.vmem [shape: bf16[1152,32], index: 9, kind: input, shape index: {}]   ;;  %s17172_s10 = inlined_call_operand.vmem [shape: bf16[32,8], index: 10, kind: input, shape index: {}]   ;;  %s17173_s11 = inlined_call_operand.vmem [shape: bf16[8,32], index: 11, kind: input, shape index: {}]   ;;  %s17174_s12 = inlined_call_operand.vmem [shape: bf16[4,128], index: 12, kind: input, shape index: {}]   ;;  %s17175_s13 = inlined_call_operand.vmem [shape: bf16[128,128], index: 13, kind: input, shape index: {}]   ;;  %s17176_s14 = inlined_call_operand.vmem [shape: bf16[128,128], index: 14, kind: input, shape index: {}]   ;;  %s17177_s15 = inlined_call_operand.vmem [shape: bf16[128,512], index: 15, kind: input, shape index: {}]   ;;  %s17178_s16 = inlined_call_operand.vmem [shape: bf16[4,512], index: 16, kind: input, shape index: {}]   ;;  %s17179_s17 = inlined_call_operand.vmem [shape: bf16[512,128], index: 17, kind: input, shape index: {}]   ;;  %s17180_s18 = inlined_call_operand.vmem [shape: bf16[128,128], index: 18, kind: input, shape index: {}]   ;;  %s17181_s19 = inlined_call_operand.vmem [shape: bf16[128,512], index: 19, kind: input, shape index: {}]   ;;  %s17182_s20 = inlined_call_operand.vmem [shape: bf16[4,512], index: 20, kind: input, shape index: {}]   ;;  %s17183_s21 = inlined_call_operand.vmem [shape: bf16[512,128], index: 21, kind: input, shape index: {}]   ;;  %s17184_s22 = inlined_call_operand.vmem [shape: bf16[128,64], index: 22, kind: input, shape index: {}]   ;;  %s17185_s23 = inlined_call_operand.vmem [shape: bf16[64,128], index: 23, kind: input, shape index: {}]   ;;  %s17186_s24 = inlined_call_operand.vmem [shape: f32[16,128], index: 24, kind: input, shape index: {}]   ;;  %s17187_s25 = inlined_call_operand.hbm [shape: f32[2,1,128], index: 25, kind: output, shape index: {}]  }
   0x1   :  { %17229 = sst [smem:[#allocation23_spill]] %s17162_s0 }
   0x2   :  { %17230 = sst [smem:[#allocation24_spill]] %s17163_s1 }
   0x3   :  { %17231 = sst [smem:[#allocation25_spill]] %s17164_s2 }
   0x4   :  { %17232 = sst [smem:[#allocation26_spill]] %s17165_s3 }
   0x5   :  { %17233 = sst [smem:[#allocation27_spill]] %s17166_s4 }
   0x6   :  { %17234 = sst [smem:[#allocation28_spill]] %s17167_s5 }
   0x7   :  { %17235 = sst [smem:[#allocation29_spill]] %s17168_s6 }
   0x8   :  { %17236 = sst [smem:[#allocation30_spill]] %s17169_s7 }
   0x9   :  { %17237 = sst [smem:[#allocation31_spill]] %s17170_s8 }
   0xa   :  { %17238 = sst [smem:[#allocation32_spill]] %s17171_s9 }
   0xb   :  { %17239 = sst [smem:[#allocation33_spill]] %s17178_s16 }
   0xc   :  { %17240 = sst [smem:[#allocation34_spill]] %s17180_s18 }
   0xd   :  { %17241 = sst [smem:[#allocation35_spill]] %s17181_s19 }
   0xe   :  { %17242 = sst [smem:[#allocation36_spill]] %s17182_s20 }
   0xf   :  { %17243 = sst [smem:[#allocation37_spill]] %s17183_s21 }
  0x10   :  { %17244 = sst [smem:[#allocation38_spill]] %s17184_s22 }
  0x11   :  { %17245 = sst [smem:[#allocation39_spill]] %s17185_s23 }
  0x12   :  { %17246 = sst [smem:[#allocation40_spill]] %s17187_s25 }
  0x13   :  { %30 = vsyncpa [#allocation4], 0 }
  0x14   :  { %32 = vsyncpa [#allocation4 + $0x1], 0 }
  0x15   :  { %33 = vsyncpa [#allocation7], 0 }
  0x16   :  { %35 = vsyncpa [#allocation7 + $0x1], 0 }
  0x17   :  { %36 = vsyncpa [#allocation10], 0 }
  0x18   :  { %37 = vsyncpa [#allocation5], 0 }
  0x19   :  { %39 = vsyncpa [#allocation5 + $0x1], 0  ;;  %s14601_s29 = smov 0   ;;  %s14603_s2 = smov 0  }
  0x1a   :  { %s14605_s6 = smov 0   ;;  %s14607_s30 = smov 0  }
  0x1b LB: > { %17247 = sst [smem:[#allocation17_spill]] %s14439_s29  ;;  %s14622_s7 = sadd.s32 4294967295, %s14451_s30   ;;  %s14451_s30 = sphi %s14607_s30, %s17298_s30   ;;  %s14447_s6 = sphi %s14605_s6, %s17300_s6   ;;  %s14443_s2 = sphi %s14603_s2, %s17302_s2   ;;  %s14439_s29 = sphi %s14601_s29, %s17301_s29  }
  0x1c   : > { %17248 = sst [smem:[#allocation18_spill]] %s14447_s6  ;;  %s11028_s3 = sadd.s32 4294967294, %s14451_s30  }
  0x1d   : > { %p65_p0 = scmp.ne.s32.totalorder %s14443_s2, %s14439_s29  ;;  %p17202_p1 = scmp.eq.s32.totalorder %s14622_s7, 0 }
  0x1e   : > { %p614_p3 = scmp.eq.s32.totalorder %s11028_s3, 1  ;;  %p11029_p5 = scmp.ge.s32.totalorder %s14451_s30, 1 }
  0x1f   : > { %p14631_p4 = por %p17202_p1, %p65_p0  ;;  %p621_p7 = scmp.lt.s32.totalorder %s14451_s30, 3 }
  0x20   : > { %p14636_p6 = por %p614_p3, %p65_p0  ;;  %s14453_s27 = smov [#allocation9]  }
  0x21   : > { %s17249_s26 = scalar_select %p14631_p4, 1, 0 }
  0x22   : > { %s17250_s1 = scalar_select %p14636_p6, 1, 0 }
  0x23   : > { %p14641_p8 = pnand %p11029_p5, %p621_p7  ;;  %s633_s4 = sshll.u32 %s14453_s27, 4  ;;  %s14645_s4 = int_to_ptr.vmem [resolvable:$true] %s633_s4 }
  0x24   : > { %17251 = sst [smem:[#allocation19_spill]] %s17250_s1  ;;  %s14657_s9 = sadd.s32 1, %s14451_s30  }
  0x25   : > { %s17252_s8 = scalar_select %p14641_p8, 1, 0 }
  0x26   : > { %p12837_p9 = pneg %p14641_p8  ;;  %17254 = sst [smem:[#allocation20_spill]] %s14657_s9 }
  0x27   : > { %s52_s5 = sadd.s32 1, %s14447_s6  ;;  %s49_s0 = ssub.s32 %s14451_s30, %s14657_s9 }
  0x28   : > { %p14652_p11 = pnand %p12837_p9, %p17202_p1  ;;  %s17255_s27 = sld [smem:[#allocation27_spill]] }
  0x2a   : > { %s17253_s28 = scalar_select %p14652_p11, 1, 0 }
  0x2b   : > { %p17210_p13 = pneg %p14652_p11 }
  0x2e   : > { %s14231_s29 = scalar_lea.hbm %s17255_s27, 46400 }
  0x2f   : > { %p14232_p12 = scmp.ne.s32.totalorder %s17255_s27, %s14231_s29  ;;  %p14238_p5 = scmp.lt.u32.totalorder %s14231_s29, %s17255_s27 }
  0x31   : > { %p14234_p0 = pnand %p17210_p13, %p14232_p12 }
  0x33   : > { %p14235_p3 = pneg %p14234_p0 }
  0x35   : > { %p14240_p7 = pnand %p14238_p5, %p14235_p3 }
  0x37   : > { %14243 = shalt.err (!%p14240_p7)
}
  0x38   : > { %s14244_s1 = scalar_lea.vmem %s14645_s4, 46400  ;;  %p14252_p2 = scmp.lt.s32.totalorder %s14645_s4, %s14645_s4 }
  0x39   : > { %p14245_p9 = scmp.ne.s32.totalorder %s14645_s4, %s14244_s1  ;;  %p14253_p12 = scmp.lt.s32.totalorder %s14244_s1, %s14244_s1 }
  0x3b   : > { %p14247_p10 = pnand %p14245_p9, %p17210_p13  ;;  %p14254_p0 = por %p14253_p12, %p14252_p2 }
  0x3d   : > { %p14248_p1 = pneg %p14247_p10 }
  0x3f   : > { %p14255_p6 = pnand %p14254_p0, %p14248_p1 }
  0x41   : > { %14258 = shalt.err (!%p14255_p6)
}
  0x42   : > { %s14454_s20 = smov 1600   ;;  %s14455_s22 = smov 100  }
  0x43   : > { %12840 = dma.hbm_to_vmem [thread:$0]  (!%p14652_p11), %s17255_s27, 46400, %s14645_s4, [#allocation10], %s14454_s20, %s14454_s20, %s14455_s22  }
  0x44   : > { %p50_p1 = scmp.eq.s32.totalorder %s49_s0, 0  ;;  %p59_p2 = scmp.ne.s32.totalorder %s14447_s6, %s14443_s2 }
  0x45   : > { %p60_p6 = scmp.eq.s32.totalorder %s14451_s30, 0  ;;  %p12860_p10 = scmp.lt.s32.totalorder %s14451_s30, 2 }
  0x46   : > { %s14694_s29 = scalar_select %p50_p1, %s14447_s6, %s52_s5  }
  0x47   : > { %p61_p3 = por %p60_p6, %p59_p2  ;;  %p17257_p5 = scmp.eq.s32.totalorder %s14622_s7, 1 }
  0x48   : > { %17256 = sst [smem:[#allocation21_spill]] %s14694_s29  ;;  %s14703_s1 = sand.u32 1, %s14447_s6  }
  0x49   : > { %p14698_p7 = por %p17257_p5, %p59_p2  ;;  %s741_s9 = sand.u32 1, %s14451_s30  }
  0x4a   : > { %p14706_p9 = pnand %p12860_p10, %p61_p3  ;;  %s11036_s4 = sshll.u32 %s14703_s1, 1 }
  0x4b   : > { %s17258_s3 = scalar_select %p14698_p7, 1, 0 }
  0x4c   : > { %s17260_s21 = scalar_select %p14706_p9, 1, 0 }
  0x4d   : > { %17259 = sst [smem:[#allocation22_spill]] %s17258_s3  ;;  %s11037_s0 = sshll.u32 %s14451_s30, 5 }
  0x4e   : > { %s17261_s22 = sld [smem:[#allocation25_spill]]  ;;  %s745_s25 = scalar_lea.vmem [#allocation6], %s11036_s4 }
  0x4f   : > { %s752_s27 = sshll.u32 %s745_s25, 4  ;;  %s14719_s29 = scalar_lea.sflag [#allocation7], %s741_s9  ;;  %s14717_s27 = int_to_ptr.vmem [resolvable:$true] %s752_s27 }
  0x50   : > { %p14725_p0 = pneg %p14706_p9 }
  0x52   : > { %s17262_s3 = scalar_select %p14725_p0, 1, 0 }
  0x54   : > { %s14715_s23 = scalar_lea.hbm %s17261_s22, %s11037_s0  ;;  %s14264_s4 = scalar_lea.hbm %s17261_s22, 64 }
  0x55   : > { %s14259_s6 = scalar_lea.hbm %s14715_s23, 32  ;;  %p14265_p6 = scmp.lt.u32.totalorder %s14715_s23, %s17261_s22 }
  0x56   : > { %p14260_p12 = scmp.ne.s32.totalorder %s14715_s23, %s14259_s6  ;;  %p14266_p10 = scmp.lt.u32.totalorder %s14264_s4, %s14259_s6 }
  0x57   : > { %p14268_p5 = scmp.lt.u32.totalorder %s14259_s6, %s14715_s23 }
  0x58   : > { %p14262_p1 = pnand %p14725_p0, %p14260_p12  ;;  %p14267_p3 = por %p14266_p10, %p14265_p6 }
  0x5a   : > { %p14263_p2 = pneg %p14262_p1  ;;  %p14269_p13 = por %p14268_p5, %p14267_p3 }
  0x5c   : > { %p14270_p7 = pnand %p14269_p13, %p14263_p2 }
  0x5e   : > { %14273 = shalt.err (!%p14270_p7)
}
  0x5f   : > { %s14274_s9 = scalar_lea.vmem %s14717_s27, 32  ;;  %s14456_s0 = smov [#allocation6]  }
  0x60   : > { %p14275_p12 = scmp.ne.s32.totalorder %s14717_s27, %s14274_s9  ;;  %s14279_s20 = sshll.u32 %s14456_s0, 4  ;;  %s14280_s20 = int_to_ptr.vmem [resolvable:$false] %s14279_s20 }
  0x61   : > { %s14281_s5 = scalar_lea.vmem %s14280_s20, 64  ;;  %p14282_p8 = scmp.lt.s32.totalorder %s14717_s27, %s14280_s20 }
  0x62   : > { %p14277_p1 = pnand %p14275_p12, %p14725_p0  ;;  %p14283_p11 = scmp.lt.s32.totalorder %s14281_s5, %s14274_s9 }
  0x64   : > { %p14278_p4 = pneg %p14277_p1  ;;  %p14284_p6 = por %p14283_p11, %p14282_p8 }
  0x66   : > { %p14285_p10 = pnand %p14284_p6, %p14278_p4 }
  0x68   : > { %14288 = shalt.err (!%p14285_p10)
}
  0x69   : > { %12850 = dma.hbm_to_vmem [thread:$0]  (!%p14706_p9), %s14715_s23, 32, %s14717_s27, %s14719_s29  }
  0x6a   : > { %s14457_s6 = smov [#allocation11]   ;;  %s17223_s25 = sshll.u32 %s14703_s1, 2 }
  0x6b   : > { %s653_s4 = sshll.u32 %s14457_s6, 4  ;;  %s17263_s19 = sld [smem:[#allocation30_spill]]  ;;  %s654_s4 = int_to_ptr.vmem [resolvable:$true] %s653_s4 }
  0x6c   : > { %p17264_p8 = scmp.ne.s32.totalorder %s17253_s28, 0 }
  0x6e   : > { %p17265_p11 = pneg %p17264_p8 }
  0x71   : > { %s14289_s20 = scalar_lea.hbm %s17263_s19, 64 }
  0x72   : > { %p14290_p4 = scmp.ne.s32.totalorder %s17263_s19, %s14289_s20  ;;  %p14296_p2 = scmp.lt.u32.totalorder %s14289_s20, %s17263_s19 }
  0x74   : > { %p14292_p13 = pnand %p14290_p4, %p17265_p11 }
  0x76   : > { %p14293_p7 = pneg %p14292_p13 }
  0x78   : > { %p14298_p3 = pnand %p14296_p2, %p14293_p7 }
  0x7a   : > { %14301 = shalt.err (!%p14298_p3)
}
  0x7b   : > { %s14302_s27 = scalar_lea.vmem %s654_s4, 64  ;;  %p17266_p12 = pmov %p17265_p11 }
  0x7c   : > { %p14303_p5 = scmp.ne.s32.totalorder %s654_s4, %s14302_s27  ;;  %p14310_p10 = scmp.lt.s32.totalorder %s654_s4, %s654_s4 }
  0x7d   : > { %p14311_p9 = scmp.lt.s32.totalorder %s14302_s27, %s14302_s27 }
  0x7e   : > { %p14305_p1 = pnand %p14303_p5, %p17266_p12 }
  0x7f   : > { %p14312_p0 = por %p14311_p9, %p14310_p10 }
  0x80   : > { %p14306_p6 = pneg %p14305_p1 }
  0x82   : > { %p14313_p4 = pnand %p14312_p0, %p14306_p6 }
  0x84   : > { %14316 = shalt.err (!%p14313_p4)
}
  0x85   : > { %12843 = dma.hbm_to_vmem [thread:$0]  (!%p17264_p8), %s17263_s19, 64, %s654_s4, [#allocation10]  }
  0x86   : > { %s17224_s16 = sshll.u32 %s14451_s30, 6  ;;  %s17267_s0 = sld [smem:[#allocation23_spill]] }
  0x87   : > { %s719_s28 = scalar_lea.vmem [#allocation3], %s17223_s25  ;;  %s716_s5 = scalar_lea.sflag [#allocation4], %s14703_s1 }
  0x88   : > { %s727_s9 = sshll.u32 %s719_s28, 4  ;;  %p17268_p0 = scmp.ne.s32.totalorder %s17262_s3, 0  ;;  %s728_s9 = int_to_ptr.vmem [resolvable:$true] %s727_s9 }
  0x8c   : > { %s14776_s20 = scalar_lea.hbm %s17267_s0, %s17224_s16  ;;  %s14322_s23 = scalar_lea.hbm %s17267_s0, 128 }
  0x8d   : > { %s14317_s27 = scalar_lea.hbm %s14776_s20, 64  ;;  %p14323_p13 = scmp.lt.u32.totalorder %s14776_s20, %s17267_s0 }
  0x8e   : > { %p14318_p9 = scmp.ne.s32.totalorder %s14776_s20, %s14317_s27  ;;  %p14324_p7 = scmp.lt.u32.totalorder %s14322_s23, %s14317_s27 }
  0x8f   : > { %p14326_p3 = scmp.lt.u32.totalorder %s14317_s27, %s14776_s20 }
  0x90   : > { %p14320_p8 = pnand %p14318_p9, %p17268_p0  ;;  %p14325_p2 = por %p14324_p7, %p14323_p13 }
  0x92   : > { %p14321_p11 = pneg %p14320_p8  ;;  %p14327_p5 = por %p14326_p3, %p14325_p2 }
  0x94   : > { %p14328_p12 = pnand %p14327_p5, %p14321_p11 }
  0x96   : > { %14331 = shalt.err (!%p14328_p12)
}
  0x97   : > { %s14332_s28 = scalar_lea.vmem %s728_s9, 64  ;;  %s14458_s25 = smov [#allocation3]  }
  0x98   : > { %p14333_p1 = scmp.ne.s32.totalorder %s728_s9, %s14332_s28  ;;  %s14337_s16 = sshll.u32 %s14458_s25, 4  ;;  %s14338_s16 = int_to_ptr.vmem [resolvable:$false] %s14337_s16 }
  0x99   : > { %s14339_s4 = scalar_lea.vmem %s14338_s16, 128  ;;  %p14340_p4 = scmp.lt.s32.totalorder %s728_s9, %s14338_s16 }
  0x9a   : > { %p14335_p6 = pnand %p14333_p1, %p17268_p0  ;;  %p14341_p9 = scmp.lt.s32.totalorder %s14339_s4, %s14332_s28 }
  0x9c   : > { %p14336_p10 = pneg %p14335_p6  ;;  %p14342_p8 = por %p14341_p9, %p14340_p4 }
  0x9e   : > { %p14343_p7 = pnand %p14342_p8, %p14336_p10 }
  0xa0   : > { %14346 = shalt.err (!%p14343_p7)
}
  0xa1   : > { %p17269_p13 = scmp.ne.s32.totalorder %s17260_s21, 0  ;;  %s17270_s27 = sshll.u32 %s14451_s30, 6 }
  0xa2   : > { %s17271_s18 = sld [smem:[#allocation26_spill]]  ;;  %s17272_s25 = sshll.u32 %s14703_s1, 2 }
  0xa3   : > { %12847 = dma.hbm_to_vmem [thread:$0]  (!%p17269_p13), %s14776_s20, 64, %s728_s9, %s716_s5  }
  0xa4   : > { %s763_s16 = scalar_lea.vmem [#allocation8], %s17272_s25 }
  0xa5   : > { %s770_s28 = sshll.u32 %s763_s16, 4  ;;  %s771_s28 = int_to_ptr.vmem [resolvable:$true] %s770_s28 }
  0xa8   : > { %s14803_s6 = scalar_lea.hbm %s17271_s18, %s17270_s27  ;;  %s14352_s5 = scalar_lea.hbm %s17271_s18, 128 }
  0xa9   : > { %s14347_s4 = scalar_lea.hbm %s14803_s6, 64  ;;  %p14353_p5 = scmp.lt.u32.totalorder %s14803_s6, %s17271_s18 }
  0xaa   : > { %p14348_p11 = scmp.ne.s32.totalorder %s14803_s6, %s14347_s4  ;;  %p14354_p12 = scmp.lt.u32.totalorder %s14352_s5, %s14347_s4 }
  0xab   : > { %p14356_p6 = scmp.lt.u32.totalorder %s14347_s4, %s14803_s6 }
  0xac   : > { %p14350_p2 = pnand %p14348_p11, %p17268_p0  ;;  %p14355_p1 = por %p14354_p12, %p14353_p5 }
  0xae   : > { %p14351_p3 = pneg %p14350_p2  ;;  %p14357_p10 = por %p14356_p6, %p14355_p1 }
  0xb0   : > { %p14358_p4 = pnand %p14357_p10, %p14351_p3 }
  0xb2   : > { %14361 = shalt.err (!%p14358_p4)
}
  0xb3   : > { %s14362_s1 = scalar_lea.vmem %s771_s28, 64  ;;  %s14459_s23 = smov [#allocation8]  }
  0xb4   : > { %p14363_p9 = scmp.ne.s32.totalorder %s771_s28, %s14362_s1  ;;  %s14367_s25 = sshll.u32 %s14459_s23, 4  ;;  %s14368_s25 = int_to_ptr.vmem [resolvable:$false] %s14367_s25 }
  0xb5   : > { %s14369_s16 = scalar_lea.vmem %s14368_s25, 128  ;;  %p14370_p11 = scmp.lt.s32.totalorder %s771_s28, %s14368_s25 }
  0xb6   : > { %p14365_p8 = pnand %p14363_p9, %p17268_p0  ;;  %p14371_p2 = scmp.lt.s32.totalorder %s14369_s16, %s14362_s1 }
  0xb8   : > { %p14366_p7 = pneg %p14365_p8  ;;  %p14372_p13 = por %p14371_p2, %p14370_p11 }
  0xba   : > { %p14373_p5 = pnand %p14372_p13, %p14366_p7 }
  0xbc   : > { %14376 = shalt.err (!%p14373_p5)
}
  0xbd   : > { %p17273_p12 = scmp.ne.s32.totalorder %s17260_s21, 0  ;;  %p17274_p3 = scmp.ne.s32.totalorder %s17252_s8, 0 }
  0xbe   : > { %s14828_s3 = sand.u32 (!%p17274_p3), 1, %s14443_s2   ;;  %p17275_p0 = scmp.ne.s32.totalorder (!%p17274_p3), %s17249_s26, 0 }
  0xbf   : > { %12853 = dma.hbm_to_vmem [thread:$0]  (!%p17273_p12), %s14803_s6, 64, %s771_s28, %s14719_s29  }
  0xc0   : > { %779 = sbr.rel (%p17274_p3) target bundleno = 6019 (0x1783), region = 120  ;;  %s11041_s4 = sshll.u32 (!%p17274_p3), %s14828_s3, 2 }
  0xc1   : > { %s782_s20 = scalar_lea.sflag (!%p17274_p3), [#allocation4], %s14828_s3  ;;  %s14832_s9 = scalar_lea.vmem (!%p17274_p3), [#allocation3], %s11041_s4 }
  0xc7   : > { %14422 = dma.done.wait (%p17275_p0), %s782_s20, 64  }
  0xc8   : > { %14424 = vsyncadd (%p17275_p0), %s782_s20, 4294967232  ;;  %s790_s21 = sand.u32 1, %s14622_s7   ;;  %s11042_s8 = sshll.u32 %s14828_s3, 1 }
  0xc9   : > { %s791_s29 = scalar_lea.sflag [#allocation7], %s790_s21  ;;  %s14840_s6 = scalar_lea.vmem [#allocation6], %s11042_s8 }
  0xca   : > { %14426 = dma.done.wait (%p17275_p0), %s791_s29, 96  }
  0xcb   : > { %14428 = vsyncadd (%p17275_p0), %s791_s29, 4294967200  ;;  %s14846_s28 = scalar_lea.vmem [#allocation8], %s11041_s4  ;;  %p17276_p13 = scmp.eq.s32.totalorder %s14622_s7, 0 }
  0xcd   : > { %14430 = dma.done.wait (%p17276_p13), [#allocation10], 46464   ;;  %p17277_p1 = pmov %p17276_p13 }
  0xce   : > { %v12919_v0 = vld [vmem:[#allocation9 + $0x4] ss:$100 sps:$4 sm:$0xff]   ;;  %v12921_v1 = vld [vmem:[#allocation9 + $0xc] ss:$100 sps:$4 sm:$0xff]   ;;  %v12927_v5 = vld [vmem:[#allocation9 + $0xd4] ss:$100 sps:$4 sm:$0xff]  }
  0xcf   : > { %14432 = vsyncadd (%p17277_p1), [#allocation10], 4294920832  ;;  %3597 = vmatprep.subr.bf16.mxu0 %v12919_v0  ;;  %v12923_v2 = vld [vmem:[#allocation9] ss:$100 sps:$4 sm:$0xff]   ;;  %v12924_v3 = vld [vmem:[#allocation9 + $0x8] ss:$100 sps:$4 sm:$0xff]   ;;  %3638 = vmatprep.subr.bf16.mxu1 %v12921_v1 }
  0xd0   : > { %v12925_v4 = vld [vmem:[#allocation9 + $0xcc] ss:$100 sps:$4 sm:$0xff]   ;;  %3598 = vmatpush1.bf16.msra.mxu0 %v12923_v2  ;;  %3639 = vmatpush1.bf16.msra.mxu1 %v12924_v3  ;;  %v12931_v8 = vld [vmem:[#allocation9 + $0x194] ss:$100 sps:$4 sm:$0xff]   ;;  %v12933_v9 = vld [vmem:[#allocation9 + $0x19c] ss:$100 sps:$4 sm:$0xff]  }
  0xd1   : > { %v12929_v6 = vld [vmem:[#allocation9 + $0xc8] ss:$100 sps:$4 sm:$0xff]   ;;  %3599 = vmatprep.subr.bf16.mxu0 %v12925_v4  ;;  %v12930_v7 = vld [vmem:[#allocation9 + $0xd0] ss:$100 sps:$4 sm:$0xff]   ;;  %3640 = vmatprep.subr.bf16.mxu1 %v12927_v5  ;;  %v12936_v11 = vld [vmem:[#allocation9 + $0x198] ss:$100 sps:$4 sm:$0xff]  }
  0xd2   : > { %v12935_v10 = vld [vmem:[#allocation9 + $0x190] ss:$100 sps:$4 sm:$0xff]   ;;  %v12937_v12 = vld [vmem:[#allocation9 + $0x25c] ss:$100 sps:$4 sm:$0xff]   ;;  %v12939_v13 = vld [vmem:[#allocation9 + $0x264] ss:$100 sps:$4 sm:$0xff]  }
  0xd3   : > { %v12941_v14 = vld [vmem:[#allocation9 + $0x258] ss:$100 sps:$4 sm:$0xff]   ;;  %v12942_v15 = vld [vmem:[#allocation9 + $0x260] ss:$100 sps:$4 sm:$0xff]   ;;  %v12945_v17 = vld [vmem:[#allocation9 + $0x32c] ss:$100 sps:$4 sm:$0xff]  }
  0xd4   : > { %3600 = vmatpush1.bf16.msra.mxu0 %v12929_v6  ;;  %3641 = vmatpush1.bf16.msra.mxu1 %v12930_v7  ;;  %v12943_v16 = vld [vmem:[#allocation9 + $0x324] ss:$100 sps:$4 sm:$0xff]   ;;  %v12949_v20 = vld [vmem:[#allocation9 + $0x3ec] ss:$100 sps:$4 sm:$0xff]   ;;  %v12951_v21 = vld [vmem:[#allocation9 + $0x3f4] ss:$100 sps:$4 sm:$0xff]  }
  0xd5   : > { %3601 = vmatprep.subr.bf16.mxu0 %v12931_v8  ;;  %3642 = vmatprep.subr.bf16.mxu1 %v12933_v9  ;;  %v12947_v18 = vld [vmem:[#allocation9 + $0x320] ss:$100 sps:$4 sm:$0xff]   ;;  %v12948_v19 = vld [vmem:[#allocation9 + $0x328] ss:$100 sps:$4 sm:$0xff]   ;;  %v12954_v23 = vld [vmem:[#allocation9 + $0x3f0] ss:$100 sps:$4 sm:$0xff]  }
  0xd6   : > { %v12953_v22 = vld [vmem:[#allocation9 + $0x3e8] ss:$100 sps:$4 sm:$0xff]   ;;  %v12955_v24 = vld [vmem:[#allocation9 + $0x4b4] ss:$100 sps:$4 sm:$0xff]   ;;  %v12957_v25 = vld [vmem:[#allocation9 + $0x4bc] ss:$100 sps:$4 sm:$0xff]  }
  0xd7   : > { %v12959_v26 = vld [vmem:[#allocation9 + $0x4b0] ss:$100 sps:$4 sm:$0xff]   ;;  %v12960_v27 = vld [vmem:[#allocation9 + $0x4b8] ss:$100 sps:$4 sm:$0xff]   ;;  %v12963_v29 = vld [vmem:[#allocation9 + $0x584] ss:$100 sps:$4 sm:$0xff]  }
  0xd8   : > { %3602 = vmatpush1.bf16.msra.mxu0 %v12935_v10  ;;  %3643 = vmatpush1.bf16.msra.mxu1 %v12936_v11  ;;  %v12961_v28 = vld [vmem:[#allocation9 + $0x57c] ss:$100 sps:$4 sm:$0xff]   ;;  %v12967_v32 = vld [vmem:[#allocation9 + $0x644] ss:$100 sps:$4 sm:$0xff]   ;;  %v12969_v33 = vld [vmem:[#allocation9 + $0x64c] ss:$100 sps:$4 sm:$0xff]  }
  0xd9   : > { %3603 = vmatprep.subr.bf16.mxu0 %v12937_v12  ;;  %3644 = vmatprep.subr.bf16.mxu1 %v12939_v13  ;;  %v12965_v30 = vld [vmem:[#allocation9 + $0x578] ss:$100 sps:$4 sm:$0xff]   ;;  %v12966_v31 = vld [vmem:[#allocation9 + $0x580] ss:$100 sps:$4 sm:$0xff]   ;;  %v12972_v35 = vld [vmem:[#allocation9 + $0x648] ss:$100 sps:$4 sm:$0xff]  }
  0xda   : > { %v12971_v34 = vld [vmem:[#allocation9 + $0x640] ss:$100 sps:$4 sm:$0xff]   ;;  %v12973_v36 = vld [vmem:[#allocation9 + $0x70c] ss:$100 sps:$4 sm:$0xff]   ;;  %v12975_v37 = vld [vmem:[#allocation9 + $0x714] ss:$100 sps:$4 sm:$0xff]  }
  0xdb   : > { %v12977_v38 = vld [vmem:[#allocation9 + $0x708] ss:$100 sps:$4 sm:$0xff]   ;;  %v12978_v39 = vld [vmem:[#allocation9 + $0x710] ss:$100 sps:$4 sm:$0xff]   ;;  %v12981_v41 = vld [vmem:[#allocation9 + $0x7dc] ss:$100 sps:$4 sm:$0xff]  }
  0xdc   : > { %3604 = vmatpush1.bf16.msra.mxu0 %v12941_v14  ;;  %3645 = vmatpush1.bf16.msra.mxu1 %v12942_v15  ;;  %v12979_v40 = vld [vmem:[#allocation9 + $0x7d4] ss:$100 sps:$4 sm:$0xff]   ;;  %v14853_v42 = vld.sshfl [vmem:[%s14832_s9] sm:$0x33 pattern:$0x76325410] }
  0xdd   : > { %3605 = vmatprep.subr.bf16.mxu0 %v12943_v16  ;;  %3646 = vmatprep.subr.bf16.mxu1 %v12945_v17  ;;  %v12983_v43 = vld [vmem:[#allocation9 + $0x7d0] ss:$100 sps:$4 sm:$0xff]   ;;  %v14857_v44 = vcombine.high %v14853_v42, %v14853_v42  ;;  %vm3517_vm0 = vcmask 850944   ;;  %v12984_v45 = vld [vmem:[#allocation9 + $0x7d8] ss:$100 sps:$4 sm:$0xff]   ;;  %vm3521_vm1 = vcmask 1043456  }
  0xde   : > { %v12985_v46 = vld [vmem:[#allocation9 + $0x89c] ss:$100 sps:$4 sm:$0xff]   ;;  %v12987_v47 = vld [vmem:[#allocation9 + $0x8a4] ss:$100 sps:$4 sm:$0xff]   ;;  %v12993_v51 = vld [vmem:[#allocation9 + $0x96c] ss:$100 sps:$4 sm:$0xff]  }
  0xdf   : > { %11424 = vmatprep.mubr.msk.bf16.mxu0 %vm3517_vm0, %v14857_v44  ;;  %11426 = vmatprep.mubr.msk.bf16.mxu1 %vm3517_vm0, %v14857_v44  ;;  %v12989_v48 = vld [vmem:[#allocation9 + $0x898] ss:$100 sps:$4 sm:$0xff]   ;;  %v12990_v49 = vld [vmem:[#allocation9 + $0x8a0] ss:$100 sps:$4 sm:$0xff]   ;;  %v12996_v53 = vld [vmem:[#allocation9 + $0x968] ss:$100 sps:$4 sm:$0xff]  }
  0xe0   : > { %3606 = vmatpush1.bf16.msra.mxu0 %v12947_v18  ;;  %3647 = vmatpush1.bf16.msra.mxu1 %v12948_v19  ;;  %v12991_v50 = vld [vmem:[#allocation9 + $0x964] ss:$100 sps:$4 sm:$0xff]   ;;  %v12997_v54 = vld [vmem:[#allocation9 + $0xa2c] ss:$100 sps:$4 sm:$0xff]   ;;  %v12999_v55 = vld [vmem:[#allocation9 + $0xa34] ss:$100 sps:$4 sm:$0xff]  }
  0xe1   : > { %3607 = vmatprep.subr.bf16.mxu0 %v12949_v20  ;;  %3648 = vmatprep.subr.bf16.mxu1 %v12951_v21  ;;  %v12995_v52 = vld [vmem:[#allocation9 + $0x960] ss:$100 sps:$4 sm:$0xff]   ;;  %v1262_v56 = vld [vmem:[#allocation9 + $0xaf0] sm:$0xff]  ;;  %v1263_v57 = vld [vmem:[#allocation9 + $0xaf8] sm:$0xff]  ;;  %s17278_s22 = sld [smem:[#allocation28_spill]]  ;;  %vm14462_vm2 = vmmov 0  }
  0xe2   : > { %v13001_v58 = vld [vmem:[#allocation9 + $0xa28] ss:$100 sps:$4 sm:$0xff]   ;;  %v13002_v59 = vld [vmem:[#allocation9 + $0xa30] ss:$100 sps:$4 sm:$0xff]   ;;  %v11399_v60 = vcombine.high %v1262_v56, %v1262_v56  ;;  %v11401_v61 = vcombine.high %v1263_v57, %v1263_v57  ;;  %v11398_v62 = vcombine.low %v1262_v56, %v1262_v56  ;;  %v11400_v63 = vcombine.low %v1263_v57, %v1263_v57  ;;  %v13012_v3 = vld [vmem:[#allocation9 + $0x1c] ss:$100 sps:$4 sm:$0xff]  }
  0xe3   : > { %v13009_v0 = vld [vmem:[#allocation9 + $0x14] ss:$100 sps:$4 sm:$0xff]   ;;  %v13015_v6 = vld [vmem:[#allocation9 + $0xdc] ss:$100 sps:$4 sm:$0xff]   ;;  %v13018_v7 = vld [vmem:[#allocation9 + $0xe4] ss:$100 sps:$4 sm:$0xff]  }
  0xe4   : > { %3608 = vmatpush1.bf16.msra.mxu0 %v12953_v22  ;;  %3649 = vmatpush1.bf16.msra.mxu1 %v12954_v23  ;;  %v3523_v1 = vsel %vm3521_vm1, %v11398_v62, 0  ;;  %v3529_v2 = vsel %vm3521_vm1, %v11400_v63, 0  ;;  %v13007_v4 = vld [vmem:[#allocation9 + $0x10] ss:$100 sps:$4 sm:$0xff]   ;;  %v13010_v5 = vld [vmem:[#allocation9 + $0x18] ss:$100 sps:$4 sm:$0xff]  }
  0xe5   : > { %3609 = vmatprep.subr.bf16.mxu0 %v12955_v24  ;;  %3650 = vmatprep.subr.bf16.mxu1 %v12957_v25  ;;  %v13013_v8 = vld [vmem:[#allocation9 + $0xd8] ss:$100 sps:$4 sm:$0xff]   ;;  %v13016_v9 = vld [vmem:[#allocation9 + $0xe0] ss:$100 sps:$4 sm:$0xff]   ;;  %v13024_v11 = vld [vmem:[#allocation9 + $0x1ac] ss:$100 sps:$4 sm:$0xff]  }
  0xe6   : > { %v13021_v10 = vld [vmem:[#allocation9 + $0x1a4] ss:$100 sps:$4 sm:$0xff]   ;;  %v13027_v14 = vld [vmem:[#allocation9 + $0x26c] ss:$100 sps:$4 sm:$0xff]   ;;  %v13030_v15 = vld [vmem:[#allocation9 + $0x274] ss:$100 sps:$4 sm:$0xff]  }
  0xe7   : > { %v13019_v12 = vld [vmem:[#allocation9 + $0x1a0] ss:$100 sps:$4 sm:$0xff]   ;;  %v13022_v13 = vld [vmem:[#allocation9 + $0x1a8] ss:$100 sps:$4 sm:$0xff]   ;;  %v13028_v17 = vld [vmem:[#allocation9 + $0x270] ss:$100 sps:$4 sm:$0xff]  }
  0xe8   : > { %3610 = vmatpush1.bf16.msra.mxu0 %v12959_v26  ;;  %3651 = vmatpush1.bf16.msra.mxu1 %v12960_v27  ;;  %v13025_v16 = vld [vmem:[#allocation9 + $0x268] ss:$100 sps:$4 sm:$0xff]   ;;  %v13033_v18 = vld [vmem:[#allocation9 + $0x334] ss:$100 sps:$4 sm:$0xff]   ;;  %v13036_v19 = vld [vmem:[#allocation9 + $0x33c] ss:$100 sps:$4 sm:$0xff]  }
  0xe9   : > { %3611 = vmatprep.subr.bf16.mxu0 %v12961_v28  ;;  %3652 = vmatprep.subr.bf16.mxu1 %v12963_v29  ;;  %v13031_v20 = vld [vmem:[#allocation9 + $0x330] ss:$100 sps:$4 sm:$0xff]   ;;  %v13034_v21 = vld [vmem:[#allocation9 + $0x338] ss:$100 sps:$4 sm:$0xff]   ;;  %v13042_v23 = vld [vmem:[#allocation9 + $0x404] ss:$100 sps:$4 sm:$0xff]  }
  0xea   : > { %v13039_v22 = vld [vmem:[#allocation9 + $0x3fc] ss:$100 sps:$4 sm:$0xff]   ;;  %v13045_v26 = vld [vmem:[#allocation9 + $0x4c4] ss:$100 sps:$4 sm:$0xff]   ;;  %v13048_v27 = vld [vmem:[#allocation9 + $0x4cc] ss:$100 sps:$4 sm:$0xff]  }
  0xeb   : > { %v13037_v24 = vld [vmem:[#allocation9 + $0x3f8] ss:$100 sps:$4 sm:$0xff]   ;;  %v13040_v25 = vld [vmem:[#allocation9 + $0x400] ss:$100 sps:$4 sm:$0xff]   ;;  %v13046_v29 = vld [vmem:[#allocation9 + $0x4c8] ss:$100 sps:$4 sm:$0xff]  }
  0xec   : > { %3612 = vmatpush1.bf16.msra.mxu0 %v12965_v30  ;;  %3653 = vmatpush1.bf16.msra.mxu1 %v12966_v31  ;;  %v13043_v28 = vld [vmem:[#allocation9 + $0x4c0] ss:$100 sps:$4 sm:$0xff]   ;;  %v13051_v30 = vld [vmem:[#allocation9 + $0x58c] ss:$100 sps:$4 sm:$0xff]   ;;  %v13054_v31 = vld [vmem:[#allocation9 + $0x594] ss:$100 sps:$4 sm:$0xff]  }
  0xed   : > { %3613 = vmatprep.subr.bf16.mxu0 %v12967_v32  ;;  %3654 = vmatprep.subr.bf16.mxu1 %v12969_v33  ;;  %v13049_v32 = vld [vmem:[#allocation9 + $0x588] ss:$100 sps:$4 sm:$0xff]   ;;  %v13052_v33 = vld [vmem:[#allocation9 + $0x590] ss:$100 sps:$4 sm:$0xff]   ;;  %v13087_v56 = vld [vmem:[#allocation9 + $0xa3c] ss:$100 sps:$4 sm:$0xff]  }
  0xee   : > { %v13090_v57 = vld [vmem:[#allocation9 + $0xa44] ss:$100 sps:$4 sm:$0xff]   ;;  %s17279_s29 = sld [smem:[#allocation29_spill]]  ;;  %vm6112_vm3 = vcmask 261120   ;;  %s17281_s25 = sld [smem:[#allocation31_spill]]  ;;  %vm7121_vm4 = vcmask 654336  }
  0xef   : > { %p891_p6 = scmp.lt.s32.totalorder %s14622_s7, 1  ;;  %s17282_s16 = sld [smem:[#allocation24_spill]]  ;;  %vm6166_vm5 = vcmask 64512   ;;  %vm8180_vm6 = vcmask 1041408   ;;  %vm8176_vm7 = vcmask 31744   ;;  %vm8229_vm8 = vcmask 257024  }
  0xf0   : > { %3614 = vmatpush1.bf16.msra.mxu0 %v12971_v34  ;;  %3655 = vmatpush1.bf16.msra.mxu1 %v12972_v35  ;;  %v13057_v34 = vld [vmem:[#allocation9 + $0x654] ss:$100 sps:$4 sm:$0xff]   ;;  %v13060_v35 = vld [vmem:[#allocation9 + $0x65c] ss:$100 sps:$4 sm:$0xff]   ;;  %s17283_s20 = sld [smem:[#allocation32_spill]]  ;;  %vm8235_vm9 = vcmask 519424  }
  0xf1   : > { %3615 = vmatprep.subr.bf16.mxu0 %v12973_v36  ;;  %3656 = vmatprep.subr.bf16.mxu1 %v12975_v37  ;;  %v13055_v36 = vld [vmem:[#allocation9 + $0x650] ss:$100 sps:$4 sm:$0xff]   ;;  %v13058_v37 = vld [vmem:[#allocation9 + $0x658] ss:$100 sps:$4 sm:$0xff]   ;;  %vm9197_vm12 = vcmask 27648   ;;  %s17286_s1 = sld [smem:[#allocation35_spill]] }
  0xf2   : > { %s17287_s8 = sld [smem:[#allocation37_spill]]  ;;  %s17288_s0 = sld [smem:[#allocation36_spill]] }
  0xf3   : > { %s17289_s5 = sld [smem:[#allocation38_spill]]  ;;  %s12036_s23 = sshll.u32 %s14622_s7, 4 }
  0xf4   : > { %3616 = vmatpush1.bf16.msra.mxu0 %v12977_v38  ;;  %3657 = vmatpush1.bf16.msra.mxu1 %v12978_v39  ;;  %v13063_v38 = vld [vmem:[#allocation9 + $0x71c] ss:$100 sps:$4 sm:$0xff]   ;;  %v13066_v39 = vld [vmem:[#allocation9 + $0x724] ss:$100 sps:$4 sm:$0xff]   ;;  %s17280_s26 = smov %s17279_s29  ;;  %s17291_s27 = sld [smem:[#allocation22_spill]] }
  0xf5   : > { %3617 = vmatprep.subr.bf16.mxu0 %v12979_v40  ;;  %3658 = vmatprep.subr.bf16.mxu1 %v12981_v41  ;;  %v13061_v40 = vld [vmem:[#allocation9 + $0x718] ss:$100 sps:$4 sm:$0xff]   ;;  %v13064_v41 = vld [vmem:[#allocation9 + $0x720] ss:$100 sps:$4 sm:$0xff]  }
  0xf8   : > { %3618 = vmatpush1.bf16.msra.mxu0 %v12983_v43  ;;  %3659 = vmatpush1.bf16.msra.mxu1 %v12984_v45  ;;  %v13069_v43 = vld [vmem:[#allocation9 + $0x7e4] ss:$100 sps:$4 sm:$0xff]   ;;  %v13072_v45 = vld [vmem:[#allocation9 + $0x7ec] ss:$100 sps:$4 sm:$0xff]  }
  0xf9   : > { %3619 = vmatprep.subr.bf16.mxu0 %v12985_v46  ;;  %3660 = vmatprep.subr.bf16.mxu1 %v12987_v47  ;;  %v13067_v46 = vld [vmem:[#allocation9 + $0x7e0] ss:$100 sps:$4 sm:$0xff]   ;;  %v13070_v47 = vld [vmem:[#allocation9 + $0x7e8] ss:$100 sps:$4 sm:$0xff]  }
  0xfa   : > { %p17293_p4 = scmp.ne.s32.totalorder %s17291_s27, 0 }
  0xfc   : > { %3620 = vmatpush1.bf16.msra.mxu0 %v12989_v48  ;;  %3661 = vmatpush1.bf16.msra.mxu1 %v12990_v49  ;;  %v13075_v48 = vld [vmem:[#allocation9 + $0x8ac] ss:$100 sps:$4 sm:$0xff]   ;;  %v13078_v49 = vld [vmem:[#allocation9 + $0x8b4] ss:$100 sps:$4 sm:$0xff]  }
  0xfd   : > { %3621 = vmatprep.subr.bf16.mxu0 %v12991_v50  ;;  %3662 = vmatprep.subr.bf16.mxu1 %v12993_v51  ;;  %v13073_v50 = vld [vmem:[#allocation9 + $0x8a8] ss:$100 sps:$4 sm:$0xff]   ;;  %v13076_v51 = vld [vmem:[#allocation9 + $0x8b0] ss:$100 sps:$4 sm:$0xff]  }
 0x100   : > { %3622 = vmatpush1.bf16.msra.mxu0 %v12995_v52  ;;  %3663 = vmatpush1.bf16.msra.mxu1 %v12996_v53  ;;  %v13081_v52 = vld [vmem:[#allocation9 + $0x974] ss:$100 sps:$4 sm:$0xff]   ;;  %v13084_v53 = vld [vmem:[#allocation9 + $0x97c] ss:$100 sps:$4 sm:$0xff]  }
 0x101   : > { %3623 = vmatprep.subr.bf16.mxu0 %v12997_v54  ;;  %3664 = vmatprep.subr.bf16.mxu1 %v12999_v55  ;;  %v13079_v54 = vld [vmem:[#allocation9 + $0x970] ss:$100 sps:$4 sm:$0xff]   ;;  %v13082_v55 = vld [vmem:[#allocation9 + $0x978] ss:$100 sps:$4 sm:$0xff]  }
 0x104   : > { %3624 = vmatpush1.bf16.msra.mxu0 %v13001_v58  ;;  %3665 = vmatpush1.bf16.msra.mxu1 %v13002_v59  ;;  %v1264_v58 = vld [vmem:[#allocation9 + $0xb00] sm:$0xff]  ;;  %v1265_v59 = vld [vmem:[#allocation9 + $0xb08] sm:$0xff] }
 0x105   : > { %11423 = vmatprep.subr.msk.bf16.mxu0 %vm3521_vm1, %v11399_v60  ;;  %11425 = vmatprep.subr.msk.bf16.mxu1 %vm3521_vm1, %v11401_v61  ;;  %v13085_v60 = vld [vmem:[#allocation9 + $0xa38] ss:$100 sps:$4 sm:$0xff]   ;;  %v13088_v61 = vld [vmem:[#allocation9 + $0xa40] ss:$100 sps:$4 sm:$0xff]   ;;  %v11403_v62 = vcombine.high %v1264_v58, %v1264_v58  ;;  %v11405_v63 = vcombine.high %v1265_v59, %v1265_v59 }
 0x108   : > { %3626 = vmatpush1.bf16.msra.mxu0 %v3523_v1  ;;  %3667 = vmatpush1.bf16.msra.mxu1 %v3529_v2  ;;  %v11404_v1 = vcombine.low %v1265_v59, %v1265_v59  ;;  %v13097_v2 = vld [vmem:[#allocation9 + $0x24] ss:$100 sps:$4 sm:$0xff]   ;;  %v1266_v59 = vld [vmem:[#allocation9 + $0xb10] sm:$0xff] }
 0x109   : > { %3679 = vmatprep.subr.bf16.mxu0 %v13009_v0  ;;  %3720 = vmatprep.subr.bf16.mxu1 %v13012_v3  ;;  %v11402_v0 = vcombine.low %v1264_v58, %v1264_v58  ;;  %v13178_v58 = vld [vmem:[#allocation9 + $0xa54] ss:$100 sps:$4 sm:$0xff]  }
 0x10b   : > { %3630 = vmatmul.mubr.bf16.vlgmr.msra.gmra.mrb[0].mxu0 %v14853_v42  ;;  %3671 = vmatmul.mubr.bf16.vlgmr.msra.gmra.mrb[0].mxu1 %v14853_v42  ;;  %v3535_v3 = vsel %vm3521_vm1, %v11402_v0, 0 }
 0x10c   : > { %3680 = vmatpush1.bf16.msra.mxu0 %v13007_v4  ;;  %3721 = vmatpush1.bf16.msra.mxu1 %v13010_v5  ;;  %v3541_v4 = vsel %vm3521_vm1, %v11404_v1, 0  ;;  %v13100_v5 = vld [vmem:[#allocation9 + $0x2c] ss:$100 sps:$4 sm:$0xff]   ;;  %v11406_v1 = vcombine.low %v1266_v59, %v1266_v59 }
 0x10d   : > { %3681 = vmatprep.subr.bf16.mxu0 %v13015_v6  ;;  %3722 = vmatprep.subr.bf16.mxu1 %v13018_v7  ;;  %v13095_v6 = vld [vmem:[#allocation9 + $0x20] ss:$100 sps:$4 sm:$0xff]   ;;  %v13098_v7 = vld [vmem:[#allocation9 + $0x28] ss:$100 sps:$4 sm:$0xff]  }
 0x10e   : > { %11428 = vmatprep.mubr.msk.bf16.mxu0 %vm3517_vm0, %v14857_v44  ;;  %11430 = vmatprep.mubr.msk.bf16.mxu1 %vm3517_vm0, %v14857_v44 }
 0x110   : > { %3682 = vmatpush1.bf16.msra.mxu0 %v13013_v8  ;;  %3723 = vmatpush1.bf16.msra.mxu1 %v13016_v9  ;;  %v13103_v8 = vld [vmem:[#allocation9 + $0xec] ss:$100 sps:$4 sm:$0xff]   ;;  %v13106_v9 = vld [vmem:[#allocation9 + $0xf4] ss:$100 sps:$4 sm:$0xff]  }
 0x111   : > { %3683 = vmatprep.subr.bf16.mxu0 %v13021_v10  ;;  %3724 = vmatprep.subr.bf16.mxu1 %v13024_v11  ;;  %v13101_v10 = vld [vmem:[#allocation9 + $0xe8] ss:$100 sps:$4 sm:$0xff]   ;;  %v13104_v11 = vld [vmem:[#allocation9 + $0xf0] ss:$100 sps:$4 sm:$0xff]  }
 0x114   : > { %3684 = vmatpush1.bf16.msra.mxu0 %v13019_v12  ;;  %3725 = vmatpush1.bf16.msra.mxu1 %v13022_v13  ;;  %v13109_v12 = vld [vmem:[#allocation9 + $0x1b4] ss:$100 sps:$4 sm:$0xff]   ;;  %v13112_v13 = vld [vmem:[#allocation9 + $0x1bc] ss:$100 sps:$4 sm:$0xff]  }
 0x115   : > { %3685 = vmatprep.subr.bf16.mxu0 %v13027_v14  ;;  %3726 = vmatprep.subr.bf16.mxu1 %v13030_v15  ;;  %v13107_v14 = vld [vmem:[#allocation9 + $0x1b0] ss:$100 sps:$4 sm:$0xff]   ;;  %v13110_v15 = vld [vmem:[#allocation9 + $0x1b8] ss:$100 sps:$4 sm:$0xff]  }
 0x118   : > { %3686 = vmatpush1.bf16.msra.mxu0 %v13025_v16  ;;  %3727 = vmatpush1.bf16.msra.mxu1 %v13028_v17  ;;  %v13115_v16 = vld [vmem:[#allocation9 + $0x27c] ss:$100 sps:$4 sm:$0xff]  }
 0x119   : > { %3687 = vmatprep.subr.bf16.mxu0 %v13033_v18  ;;  %3728 = vmatprep.subr.bf16.mxu1 %v13036_v19  ;;  %v13113_v17 = vld [vmem:[#allocation9 + $0x278] ss:$100 sps:$4 sm:$0xff]   ;;  %v13116_v18 = vld [vmem:[#allocation9 + $0x280] ss:$100 sps:$4 sm:$0xff]  }
 0x11a   : > { %v13121_v19 = vld [vmem:[#allocation9 + $0x344] ss:$100 sps:$4 sm:$0xff]  }
 0x11c   : > { %3688 = vmatpush1.bf16.msra.mxu0 %v13031_v20  ;;  %3729 = vmatpush1.bf16.msra.mxu1 %v13034_v21  ;;  %v13124_v20 = vld [vmem:[#allocation9 + $0x34c] ss:$100 sps:$4 sm:$0xff]   ;;  %v13119_v21 = vld [vmem:[#allocation9 + $0x340] ss:$100 sps:$4 sm:$0xff]  }
 0x11d   : > { %3689 = vmatprep.subr.bf16.mxu0 %v13039_v22  ;;  %3730 = vmatprep.subr.bf16.mxu1 %v13042_v23  ;;  %v13122_v22 = vld [vmem:[#allocation9 + $0x348] ss:$100 sps:$4 sm:$0xff]  }
 0x11e   : > { %v13127_v23 = vld [vmem:[#allocation9 + $0x40c] ss:$100 sps:$4 sm:$0xff]  }
 0x120   : > { %3690 = vmatpush1.bf16.msra.mxu0 %v13037_v24  ;;  %3731 = vmatpush1.bf16.msra.mxu1 %v13040_v25  ;;  %v13130_v24 = vld [vmem:[#allocation9 + $0x414] ss:$100 sps:$4 sm:$0xff]   ;;  %v13125_v25 = vld [vmem:[#allocation9 + $0x408] ss:$100 sps:$4 sm:$0xff]  }
 0x121   : > { %3691 = vmatprep.subr.bf16.mxu0 %v13045_v26  ;;  %3732 = vmatprep.subr.bf16.mxu1 %v13048_v27  ;;  %v13128_v26 = vld [vmem:[#allocation9 + $0x410] ss:$100 sps:$4 sm:$0xff]  }
 0x122   : > { %v13133_v27 = vld [vmem:[#allocation9 + $0x4d4] ss:$100 sps:$4 sm:$0xff]  }
 0x124   : > { %3692 = vmatpush1.bf16.msra.mxu0 %v13043_v28  ;;  %3733 = vmatpush1.bf16.msra.mxu1 %v13046_v29  ;;  %v13136_v28 = vld [vmem:[#allocation9 + $0x4dc] ss:$100 sps:$4 sm:$0xff]   ;;  %v13131_v29 = vld [vmem:[#allocation9 + $0x4d0] ss:$100 sps:$4 sm:$0xff]  }
 0x125   : > { %3693 = vmatprep.subr.bf16.mxu0 %v13051_v30  ;;  %3734 = vmatprep.subr.bf16.mxu1 %v13054_v31  ;;  %v13134_v30 = vld [vmem:[#allocation9 + $0x4d8] ss:$100 sps:$4 sm:$0xff]  }
 0x126   : > { %v13139_v31 = vld [vmem:[#allocation9 + $0x59c] ss:$100 sps:$4 sm:$0xff]  }
 0x128   : > { %3694 = vmatpush1.bf16.msra.mxu0 %v13049_v32  ;;  %3735 = vmatpush1.bf16.msra.mxu1 %v13052_v33  ;;  %v13142_v32 = vld [vmem:[#allocation9 + $0x5a4] ss:$100 sps:$4 sm:$0xff]   ;;  %v13137_v33 = vld [vmem:[#allocation9 + $0x598] ss:$100 sps:$4 sm:$0xff]  }
 0x129   : > { %3695 = vmatprep.subr.bf16.mxu0 %v13057_v34  ;;  %3736 = vmatprep.subr.bf16.mxu1 %v13060_v35  ;;  %v13140_v34 = vld [vmem:[#allocation9 + $0x5a0] ss:$100 sps:$4 sm:$0xff]  }
 0x12a   : > { %v13145_v35 = vld [vmem:[#allocation9 + $0x664] ss:$100 sps:$4 sm:$0xff]  }
 0x12c   : > { %3696 = vmatpush1.bf16.msra.mxu0 %v13055_v36  ;;  %3737 = vmatpush1.bf16.msra.mxu1 %v13058_v37  ;;  %v13148_v36 = vld [vmem:[#allocation9 + $0x66c] ss:$100 sps:$4 sm:$0xff]   ;;  %v13143_v37 = vld [vmem:[#allocation9 + $0x660] ss:$100 sps:$4 sm:$0xff]  }
 0x12d   : > { %3697 = vmatprep.subr.bf16.mxu0 %v13063_v38  ;;  %3738 = vmatprep.subr.bf16.mxu1 %v13066_v39  ;;  %v13146_v38 = vld [vmem:[#allocation9 + $0x668] ss:$100 sps:$4 sm:$0xff]  }
 0x12e   : > { %v13151_v39 = vld [vmem:[#allocation9 + $0x72c] ss:$100 sps:$4 sm:$0xff]  }
 0x130   : > { %3698 = vmatpush1.bf16.msra.mxu0 %v13061_v40  ;;  %3739 = vmatpush1.bf16.msra.mxu1 %v13064_v41  ;;  %v13154_v40 = vld [vmem:[#allocation9 + $0x734] ss:$100 sps:$4 sm:$0xff]   ;;  %v13149_v41 = vld [vmem:[#allocation9 + $0x728] ss:$100 sps:$4 sm:$0xff]  }
 0x131   : > { %3699 = vmatprep.subr.bf16.mxu0 %v13069_v43  ;;  %3740 = vmatprep.subr.bf16.mxu1 %v13072_v45  ;;  %v13152_v43 = vld [vmem:[#allocation9 + $0x730] ss:$100 sps:$4 sm:$0xff]  }
 0x132   : > { %v13157_v45 = vld [vmem:[#allocation9 + $0x7f4] ss:$100 sps:$4 sm:$0xff]  }
 0x134   : > { %3700 = vmatpush1.bf16.msra.mxu0 %v13067_v46  ;;  %3741 = vmatpush1.bf16.msra.mxu1 %v13070_v47  ;;  %v13160_v46 = vld [vmem:[#allocation9 + $0x7fc] ss:$100 sps:$4 sm:$0xff]   ;;  %v13155_v47 = vld [vmem:[#allocation9 + $0x7f0] ss:$100 sps:$4 sm:$0xff]  }
 0x135   : > { %3701 = vmatprep.subr.bf16.mxu0 %v13075_v48  ;;  %3742 = vmatprep.subr.bf16.mxu1 %v13078_v49  ;;  %v13158_v48 = vld [vmem:[#allocation9 + $0x7f8] ss:$100 sps:$4 sm:$0xff]  }
 0x136   : > { %v13163_v49 = vld [vmem:[#allocation9 + $0x8bc] ss:$100 sps:$4 sm:$0xff]  }
 0x138   : > { %3702 = vmatpush1.bf16.msra.mxu0 %v13073_v50  ;;  %3743 = vmatpush1.bf16.msra.mxu1 %v13076_v51  ;;  %v13166_v50 = vld [vmem:[#allocation9 + $0x8c4] ss:$100 sps:$4 sm:$0xff]   ;;  %v13161_v51 = vld [vmem:[#allocation9 + $0x8b8] ss:$100 sps:$4 sm:$0xff]  }
 0x139   : > { %3703 = vmatprep.subr.bf16.mxu0 %v13081_v52  ;;  %3744 = vmatprep.subr.bf16.mxu1 %v13084_v53  ;;  %v13164_v52 = vld [vmem:[#allocation9 + $0x8c0] ss:$100 sps:$4 sm:$0xff]  }
 0x13a   : > { %v13169_v53 = vld [vmem:[#allocation9 + $0x984] ss:$100 sps:$4 sm:$0xff]  }
 0x13c   : > { %3704 = vmatpush1.bf16.msra.mxu0 %v13079_v54  ;;  %3745 = vmatpush1.bf16.msra.mxu1 %v13082_v55  ;;  %v13172_v54 = vld [vmem:[#allocation9 + $0x98c] ss:$100 sps:$4 sm:$0xff]   ;;  %v13167_v55 = vld [vmem:[#allocation9 + $0x980] ss:$100 sps:$4 sm:$0xff]  }
 0x13d   : > { %3705 = vmatprep.subr.bf16.mxu0 %v13087_v56  ;;  %3746 = vmatprep.subr.bf16.mxu1 %v13090_v57  ;;  %v13170_v56 = vld [vmem:[#allocation9 + $0x988] ss:$100 sps:$4 sm:$0xff]  }
 0x13e   : > { %v13175_v57 = vld [vmem:[#allocation9 + $0xa4c] ss:$100 sps:$4 sm:$0xff]  }
 0x140   : > { %3706 = vmatpush1.bf16.msra.mxu0 %v13085_v60  ;;  %3747 = vmatpush1.bf16.msra.mxu1 %v13088_v61  ;;  %v1267_v60 = vld [vmem:[#allocation9 + $0xb18] sm:$0xff]  ;;  %v13173_v61 = vld [vmem:[#allocation9 + $0xa48] ss:$100 sps:$4 sm:$0xff]  }
 0x141   : > { %11427 = vmatprep.subr.msk.bf16.mxu0 %vm3521_vm1, %v11403_v62  ;;  %11429 = vmatprep.subr.msk.bf16.mxu1 %vm3521_vm1, %v11405_v63  ;;  %v13176_v62 = vld [vmem:[#allocation9 + $0xa50] ss:$100 sps:$4 sm:$0xff]   ;;  %v11407_v63 = vcombine.high %v1266_v59, %v1266_v59  ;;  %v11409_v0 = vcombine.high %v1267_v60, %v1267_v60  ;;  %v13263_v59 = vld [vmem:[#allocation9 + $0xa5c] ss:$100 sps:$4 sm:$0xff]  }
 0x144   : > { %3708 = vmatpush1.bf16.msra.mxu0 %v3535_v3  ;;  %3749 = vmatpush1.bf16.msra.mxu1 %v3541_v4  ;;  %v13185_v3 = vld [vmem:[#allocation9 + $0x34] ss:$100 sps:$4 sm:$0xff]   ;;  %v3547_v4 = vsel %vm3521_vm1, %v11406_v1, 0 }
 0x145   : > { %3761 = vmatprep.subr.bf16.mxu0 %v13097_v2  ;;  %3802 = vmatprep.subr.bf16.mxu1 %v13100_v5  ;;  %v11408_v2 = vcombine.low %v1267_v60, %v1267_v60  ;;  %v13266_v60 = vld [vmem:[#allocation9 + $0xa64] ss:$100 sps:$4 sm:$0xff]  }
 0x147   : > { %3712 = vmatmul.mubr.bf16.vlgmr.msra.gmra.mrb[4].mxu0 %v14853_v42  ;;  %3753 = vmatmul.mubr.bf16.vlgmr.msra.gmra.mrb[4].mxu1 %v14853_v42  ;;  %v13118_v42 = vld [vmem:[#allocation9 + $0x284] ss:$100 sps:$4 sm:$0xff]   ;;  %v3553_v5 = vsel %vm3521_vm1, %v11408_v2, 0 }
 0x148   : > { %3762 = vmatpush1.bf16.msra.mxu0 %v13095_v6  ;;  %3803 = vmatpush1.bf16.msra.mxu1 %v13098_v7  ;;  %v13188_v6 = vld [vmem:[#allocation9 + $0x3c] ss:$100 sps:$4 sm:$0xff]   ;;  %v13183_v7 = vld [vmem:[#allocation9 + $0x30] ss:$100 sps:$4 sm:$0xff]  }
 0x149   : > { %3763 = vmatprep.subr.bf16.mxu0 %v13103_v8  ;;  %3804 = vmatprep.subr.bf16.mxu1 %v13106_v9  ;;  %v13186_v8 = vld [vmem:[#allocation9 + $0x38] ss:$100 sps:$4 sm:$0xff]  }
 0x14a   : > { %11432 = vmatprep.mubr.msk.bf16.mxu0 %vm3517_vm0, %v14857_v44  ;;  %11434 = vmatprep.mubr.msk.bf16.mxu1 %vm3517_vm0, %v14857_v44  ;;  %v13191_v9 = vld [vmem:[#allocation9 + $0xfc] ss:$100 sps:$4 sm:$0xff]  }
 0x14c   : > { %3764 = vmatpush1.bf16.msra.mxu0 %v13101_v10  ;;  %3805 = vmatpush1.bf16.msra.mxu1 %v13104_v11  ;;  %v13194_v10 = vld [vmem:[#allocation9 + $0x104] ss:$100 sps:$4 sm:$0xff]   ;;  %v14888_v11 = vld.sshfl [vmem:[%s14832_s9] sm:$0x33 pattern:$0x76325410] }
 0x14d   : > { %3765 = vmatprep.subr.bf16.mxu0 %v13109_v12  ;;  %3806 = vmatprep.subr.bf16.mxu1 %v13112_v13  ;;  %v13189_v12 = vld [vmem:[#allocation9 + $0xf8] ss:$100 sps:$4 sm:$0xff]   ;;  %v13192_v13 = vld [vmem:[#allocation9 + $0x100] ss:$100 sps:$4 sm:$0xff]  }
 0x150   : > { %3766 = vmatpush1.bf16.msra.mxu0 %v13107_v14  ;;  %3807 = vmatpush1.bf16.msra.mxu1 %v13110_v15  ;;  %v13197_v14 = vld [vmem:[#allocation9 + $0x1c4] ss:$100 sps:$4 sm:$0xff]   ;;  %v13200_v15 = vld [vmem:[#allocation9 + $0x1cc] ss:$100 sps:$4 sm:$0xff]  }
 0x151   : > { %3767 = vmatprep.subr.bf16.mxu0 %v13115_v16  ;;  %3808 = vmatprep.subr.bf16.mxu1 %v13118_v42  ;;  %v13195_v16 = vld [vmem:[#allocation9 + $0x1c0] ss:$100 sps:$4 sm:$0xff]   ;;  %v13198_v42 = vld [vmem:[#allocation9 + $0x1c8] ss:$100 sps:$4 sm:$0xff]  }
 0x154   : > { %3768 = vmatpush1.bf16.msra.mxu0 %v13113_v17  ;;  %3809 = vmatpush1.bf16.msra.mxu1 %v13116_v18  ;;  %v13203_v17 = vld [vmem:[#allocation9 + $0x28c] ss:$100 sps:$4 sm:$0xff]   ;;  %v13206_v18 = vld [vmem:[#allocation9 + $0x294] ss:$100 sps:$4 sm:$0xff]  }
 0x155   : > { %3769 = vmatprep.subr.bf16.mxu0 %v13121_v19  ;;  %3810 = vmatprep.subr.bf16.mxu1 %v13124_v20  ;;  %v13201_v19 = vld [vmem:[#allocation9 + $0x288] ss:$100 sps:$4 sm:$0xff]   ;;  %v13204_v20 = vld [vmem:[#allocation9 + $0x290] ss:$100 sps:$4 sm:$0xff]  }
 0x158   : > { %3770 = vmatpush1.bf16.msra.mxu0 %v13119_v21  ;;  %3811 = vmatpush1.bf16.msra.mxu1 %v13122_v22  ;;  %v13209_v21 = vld [vmem:[#allocation9 + $0x354] ss:$100 sps:$4 sm:$0xff]   ;;  %v13212_v22 = vld [vmem:[#allocation9 + $0x35c] ss:$100 sps:$4 sm:$0xff]  }
 0x159   : > { %3771 = vmatprep.subr.bf16.mxu0 %v13127_v23  ;;  %3812 = vmatprep.subr.bf16.mxu1 %v13130_v24  ;;  %v13207_v23 = vld [vmem:[#allocation9 + $0x350] ss:$100 sps:$4 sm:$0xff]   ;;  %v13210_v24 = vld [vmem:[#allocation9 + $0x358] ss:$100 sps:$4 sm:$0xff]  }
 0x15c   : > { %3772 = vmatpush1.bf16.msra.mxu0 %v13125_v25  ;;  %3813 = vmatpush1.bf16.msra.mxu1 %v13128_v26  ;;  %v13215_v25 = vld [vmem:[#allocation9 + $0x41c] ss:$100 sps:$4 sm:$0xff]   ;;  %v13218_v26 = vld [vmem:[#allocation9 + $0x424] ss:$100 sps:$4 sm:$0xff]  }
 0x15d   : > { %3773 = vmatprep.subr.bf16.mxu0 %v13133_v27  ;;  %3814 = vmatprep.subr.bf16.mxu1 %v13136_v28  ;;  %v13213_v27 = vld [vmem:[#allocation9 + $0x418] ss:$100 sps:$4 sm:$0xff]   ;;  %v13216_v28 = vld [vmem:[#allocation9 + $0x420] ss:$100 sps:$4 sm:$0xff]  }
 0x160   : > { %3774 = vmatpush1.bf16.msra.mxu0 %v13131_v29  ;;  %3815 = vmatpush1.bf16.msra.mxu1 %v13134_v30  ;;  %v13221_v29 = vld [vmem:[#allocation9 + $0x4e4] ss:$100 sps:$4 sm:$0xff]   ;;  %v13224_v30 = vld [vmem:[#allocation9 + $0x4ec] ss:$100 sps:$4 sm:$0xff]  }
 0x161   : > { %3775 = vmatprep.subr.bf16.mxu0 %v13139_v31  ;;  %3816 = vmatprep.subr.bf16.mxu1 %v13142_v32  ;;  %v13219_v31 = vld [vmem:[#allocation9 + $0x4e0] ss:$100 sps:$4 sm:$0xff]   ;;  %v13222_v32 = vld [vmem:[#allocation9 + $0x4e8] ss:$100 sps:$4 sm:$0xff]  }
 0x164   : > { %3776 = vmatpush1.bf16.msra.mxu0 %v13137_v33  ;;  %3817 = vmatpush1.bf16.msra.mxu1 %v13140_v34  ;;  %v13227_v33 = vld [vmem:[#allocation9 + $0x5ac] ss:$100 sps:$4 sm:$0xff]   ;;  %v13230_v34 = vld [vmem:[#allocation9 + $0x5b4] ss:$100 sps:$4 sm:$0xff]  }
 0x165   : > { %3777 = vmatprep.subr.bf16.mxu0 %v13145_v35  ;;  %3818 = vmatprep.subr.bf16.mxu1 %v13148_v36  ;;  %v13225_v35 = vld [vmem:[#allocation9 + $0x5a8] ss:$100 sps:$4 sm:$0xff]   ;;  %v13228_v36 = vld [vmem:[#allocation9 + $0x5b0] ss:$100 sps:$4 sm:$0xff]  }
 0x168   : > { %3778 = vmatpush1.bf16.msra.mxu0 %v13143_v37  ;;  %3819 = vmatpush1.bf16.msra.mxu1 %v13146_v38  ;;  %v13233_v37 = vld [vmem:[#allocation9 + $0x674] ss:$100 sps:$4 sm:$0xff]   ;;  %v13236_v38 = vld [vmem:[#allocation9 + $0x67c] ss:$100 sps:$4 sm:$0xff]  }
 0x169   : > { %3779 = vmatprep.subr.bf16.mxu0 %v13151_v39  ;;  %3820 = vmatprep.subr.bf16.mxu1 %v13154_v40  ;;  %v13231_v39 = vld [vmem:[#allocation9 + $0x670] ss:$100 sps:$4 sm:$0xff]   ;;  %v13234_v40 = vld [vmem:[#allocation9 + $0x678] ss:$100 sps:$4 sm:$0xff]  }
 0x16c   : > { %3780 = vmatpush1.bf16.msra.mxu0 %v13149_v41  ;;  %3821 = vmatpush1.bf16.msra.mxu1 %v13152_v43  ;;  %v13239_v41 = vld [vmem:[#allocation9 + $0x73c] ss:$100 sps:$4 sm:$0xff]   ;;  %v13242_v43 = vld [vmem:[#allocation9 + $0x744] ss:$100 sps:$4 sm:$0xff]  }
 0x16d   : > { %3781 = vmatprep.subr.bf16.mxu0 %v13157_v45  ;;  %3822 = vmatprep.subr.bf16.mxu1 %v13160_v46  ;;  %v13237_v45 = vld [vmem:[#allocation9 + $0x738] ss:$100 sps:$4 sm:$0xff]   ;;  %v13240_v46 = vld [vmem:[#allocation9 + $0x740] ss:$100 sps:$4 sm:$0xff]  }
 0x170   : > { %3782 = vmatpush1.bf16.msra.mxu0 %v13155_v47  ;;  %3823 = vmatpush1.bf16.msra.mxu1 %v13158_v48  ;;  %v13245_v47 = vld [vmem:[#allocation9 + $0x804] ss:$100 sps:$4 sm:$0xff]   ;;  %v13248_v48 = vld [vmem:[#allocation9 + $0x80c] ss:$100 sps:$4 sm:$0xff]  }
 0x171   : > { %3783 = vmatprep.subr.bf16.mxu0 %v13163_v49  ;;  %3824 = vmatprep.subr.bf16.mxu1 %v13166_v50  ;;  %v13243_v49 = vld [vmem:[#allocation9 + $0x800] ss:$100 sps:$4 sm:$0xff]   ;;  %v13246_v50 = vld [vmem:[#allocation9 + $0x808] ss:$100 sps:$4 sm:$0xff]  }
 0x174   : > { %3784 = vmatpush1.bf16.msra.mxu0 %v13161_v51  ;;  %3825 = vmatpush1.bf16.msra.mxu1 %v13164_v52  ;;  %v13251_v51 = vld [vmem:[#allocation9 + $0x8cc] ss:$100 sps:$4 sm:$0xff]   ;;  %v13254_v52 = vld [vmem:[#allocation9 + $0x8d4] ss:$100 sps:$4 sm:$0xff]  }
 0x175   : > { %3785 = vmatprep.subr.bf16.mxu0 %v13169_v53  ;;  %3826 = vmatprep.subr.bf16.mxu1 %v13172_v54  ;;  %v13249_v53 = vld [vmem:[#allocation9 + $0x8c8] ss:$100 sps:$4 sm:$0xff]   ;;  %v13252_v54 = vld [vmem:[#allocation9 + $0x8d0] ss:$100 sps:$4 sm:$0xff]  }
 0x178   : > { %3786 = vmatpush1.bf16.msra.mxu0 %v13167_v55  ;;  %3827 = vmatpush1.bf16.msra.mxu1 %v13170_v56  ;;  %v13257_v55 = vld [vmem:[#allocation9 + $0x994] ss:$100 sps:$4 sm:$0xff]   ;;  %v13260_v56 = vld [vmem:[#allocation9 + $0x99c] ss:$100 sps:$4 sm:$0xff]  }
 0x179   : > { %3787 = vmatprep.subr.bf16.mxu0 %v13175_v57  ;;  %3828 = vmatprep.subr.bf16.mxu1 %v13178_v58  ;;  %v13255_v57 = vld [vmem:[#allocation9 + $0x990] ss:$100 sps:$4 sm:$0xff]   ;;  %v13258_v58 = vld [vmem:[#allocation9 + $0x998] ss:$100 sps:$4 sm:$0xff]  }
 0x17c   : > { %3788 = vmatpush1.bf16.msra.mxu0 %v13173_v61  ;;  %3829 = vmatpush1.bf16.msra.mxu1 %v13176_v62  ;;  %v1268_v61 = vld [vmem:[#allocation9 + $0xb20] sm:$0xff]  ;;  %v1269_v62 = vld [vmem:[#allocation9 + $0xb28] sm:$0xff] }
 0x17d   : > { %11431 = vmatprep.subr.msk.bf16.mxu0 %vm3521_vm1, %v11407_v63  ;;  %11433 = vmatprep.subr.msk.bf16.mxu1 %vm3521_vm1, %v11409_v0  ;;  %v13261_v63 = vld [vmem:[#allocation9 + $0xa58] ss:$100 sps:$4 sm:$0xff]   ;;  %v13264_v0 = vld [vmem:[#allocation9 + $0xa60] ss:$100 sps:$4 sm:$0xff]   ;;  %v11411_v1 = vcombine.high %v1268_v61, %v1268_v61  ;;  %v11413_v2 = vcombine.high %v1269_v62, %v1269_v62 }
 0x180   : > { %3790 = vmatpush1.bf16.msra.mxu0 %v3547_v4  ;;  %3831 = vmatpush1.bf16.msra.mxu1 %v3553_v5  ;;  %v11412_v4 = vcombine.low %v1269_v62, %v1269_v62  ;;  %v13273_v5 = vld [vmem:[#allocation9 + $0x44] ss:$100 sps:$4 sm:$0xff]   ;;  %v13339_v62 = vld [vmem:[#allocation9 + $0x8dc] ss:$100 sps:$4 sm:$0xff]  }
 0x181   : > { %3843 = vmatprep.subr.bf16.mxu0 %v13185_v3  ;;  %3884 = vmatprep.subr.bf16.mxu1 %v13188_v6  ;;  %v11410_v3 = vcombine.low %v1268_v61, %v1268_v61  ;;  %v13276_v6 = vld [vmem:[#allocation9 + $0x4c] ss:$100 sps:$4 sm:$0xff]   ;;  %v13334_v61 = vld [vmem:[#allocation9 + $0x818] ss:$100 sps:$4 sm:$0xff]  }
 0x183   : > { %3794 = vmatmul.mubr.bf16.vlgmr.msra.gmra.mrb[8].mxu0 %v14888_v11  ;;  %3835 = vmatmul.mubr.bf16.vlgmr.msra.gmra.mrb[8].mxu1 %v14888_v11 }
 0x184   : > { %3844 = vmatpush1.bf16.msra.mxu0 %v13183_v7  ;;  %3885 = vmatpush1.bf16.msra.mxu1 %v13186_v8  ;;  %v14460_v7 = vmov 0   ;;  %v3559_v8 = vsel %vm3521_vm1, %v11410_v3, 0  ;;  %v13348_v3 = vld [vmem:[#allocation9 + $0x9ac] ss:$100 sps:$4 sm:$0xff]  }
 0x185   : > { %3845 = vmatprep.subr.bf16.mxu0 %v13191_v9  ;;  %3886 = vmatprep.subr.bf16.mxu1 %v13194_v10  ;;  %v3565_v9 = vsel %vm3521_vm1, %v11412_v4, 0  ;;  %v13271_v10 = vld [vmem:[#allocation9 + $0x40] ss:$100 sps:$4 sm:$0xff]  }
 0x186   : > { %11436 = vmatprep.mubr.msk.bf16.mxu0 %vm3517_vm0, %v14857_v44  ;;  %11438 = vmatprep.mubr.msk.bf16.mxu1 %vm3517_vm0, %v14857_v44  ;;  %v13343_v4 = vld [vmem:[#allocation9 + $0x9a0] ss:$100 sps:$4 sm:$0xff]  }
 0x187   : > { %12911 = vset.pattern.permute.xlu1 %v14460_v7 }
 0x188   : > { %3846 = vmatpush1.bf16.msra.mxu0 %v13189_v12  ;;  %3887 = vmatpush1.bf16.msra.mxu1 %v13192_v13  ;;  %v13274_v12 = vld [vmem:[#allocation9 + $0x48] ss:$100 sps:$4 sm:$0xff]  }
 0x189   : > { %3847 = vmatprep.subr.bf16.mxu0 %v13197_v14  ;;  %3888 = vmatprep.subr.bf16.mxu1 %v13200_v15  ;;  %v13279_v13 = vld [vmem:[#allocation9 + $0x10c] ss:$100 sps:$4 sm:$0xff]   ;;  %v13282_v14 = vld [vmem:[#allocation9 + $0x114] ss:$100 sps:$4 sm:$0xff]  }
 0x18a   : > { %v13277_v15 = vld [vmem:[#allocation9 + $0x108] ss:$100 sps:$4 sm:$0xff]  }
 0x18c   : > { %3848 = vmatpush1.bf16.msra.mxu0 %v13195_v16  ;;  %3889 = vmatpush1.bf16.msra.mxu1 %v13198_v42  ;;  %v13280_v16 = vld [vmem:[#allocation9 + $0x110] ss:$100 sps:$4 sm:$0xff]  }
 0x18d   : > { %3849 = vmatprep.subr.bf16.mxu0 %v13203_v17  ;;  %3890 = vmatprep.subr.bf16.mxu1 %v13206_v18  ;;  %v13285_v42 = vld [vmem:[#allocation9 + $0x1d4] ss:$100 sps:$4 sm:$0xff]   ;;  %v13288_v17 = vld [vmem:[#allocation9 + $0x1dc] ss:$100 sps:$4 sm:$0xff]  }
 0x18e   : > { %v13283_v18 = vld [vmem:[#allocation9 + $0x1d0] ss:$100 sps:$4 sm:$0xff]  }
 0x190   : > { %3850 = vmatpush1.bf16.msra.mxu0 %v13201_v19  ;;  %3891 = vmatpush1.bf16.msra.mxu1 %v13204_v20  ;;  %v13286_v19 = vld [vmem:[#allocation9 + $0x1d8] ss:$100 sps:$4 sm:$0xff]  }
 0x191   : > { %3851 = vmatprep.subr.bf16.mxu0 %v13209_v21  ;;  %3892 = vmatprep.subr.bf16.mxu1 %v13212_v22  ;;  %v13291_v20 = vld [vmem:[#allocation9 + $0x29c] ss:$100 sps:$4 sm:$0xff]   ;;  %v13294_v21 = vld [vmem:[#allocation9 + $0x2a4] ss:$100 sps:$4 sm:$0xff]  }
 0x192   : > { %v13289_v22 = vld [vmem:[#allocation9 + $0x298] ss:$100 sps:$4 sm:$0xff]  }
 0x194   : > { %3852 = vmatpush1.bf16.msra.mxu0 %v13207_v23  ;;  %3893 = vmatpush1.bf16.msra.mxu1 %v13210_v24  ;;  %v13292_v23 = vld [vmem:[#allocation9 + $0x2a0] ss:$100 sps:$4 sm:$0xff]  }
 0x195   : > { %3853 = vmatprep.subr.bf16.mxu0 %v13215_v25  ;;  %3894 = vmatprep.subr.bf16.mxu1 %v13218_v26  ;;  %v13297_v24 = vld [vmem:[#allocation9 + $0x364] ss:$100 sps:$4 sm:$0xff]   ;;  %v13300_v25 = vld [vmem:[#allocation9 + $0x36c] ss:$100 sps:$4 sm:$0xff]  }
 0x196   : > { %v13295_v26 = vld [vmem:[#allocation9 + $0x360] ss:$100 sps:$4 sm:$0xff]  }
 0x198   : > { %3854 = vmatpush1.bf16.msra.mxu0 %v13213_v27  ;;  %3895 = vmatpush1.bf16.msra.mxu1 %v13216_v28  ;;  %v13298_v27 = vld [vmem:[#allocation9 + $0x368] ss:$100 sps:$4 sm:$0xff]  }
 0x199   : > { %3855 = vmatprep.subr.bf16.mxu0 %v13221_v29  ;;  %3896 = vmatprep.subr.bf16.mxu1 %v13224_v30  ;;  %v13303_v28 = vld [vmem:[#allocation9 + $0x42c] ss:$100 sps:$4 sm:$0xff]   ;;  %v13306_v29 = vld [vmem:[#allocation9 + $0x434] ss:$100 sps:$4 sm:$0xff]  }
 0x19a   : > { %v13301_v30 = vld [vmem:[#allocation9 + $0x428] ss:$100 sps:$4 sm:$0xff]  }
 0x19c   : > { %3856 = vmatpush1.bf16.msra.mxu0 %v13219_v31  ;;  %3897 = vmatpush1.bf16.msra.mxu1 %v13222_v32  ;;  %v13304_v31 = vld [vmem:[#allocation9 + $0x430] ss:$100 sps:$4 sm:$0xff]  }
 0x19d   : > { %3857 = vmatprep.subr.bf16.mxu0 %v13227_v33  ;;  %3898 = vmatprep.subr.bf16.mxu1 %v13230_v34  ;;  %v13309_v32 = vld [vmem:[#allocation9 + $0x4f4] ss:$100 sps:$4 sm:$0xff]   ;;  %v13312_v33 = vld [vmem:[#allocation9 + $0x4fc] ss:$100 sps:$4 sm:$0xff]  }
 0x19e   : > { %v13307_v34 = vld [vmem:[#allocation9 + $0x4f0] ss:$100 sps:$4 sm:$0xff]  }
 0x1a0   : > { %3858 = vmatpush1.bf16.msra.mxu0 %v13225_v35  ;;  %3899 = vmatpush1.bf16.msra.mxu1 %v13228_v36  ;;  %v13310_v35 = vld [vmem:[#allocation9 + $0x4f8] ss:$100 sps:$4 sm:$0xff]  }
 0x1a1   : > { %3859 = vmatprep.subr.bf16.mxu0 %v13233_v37  ;;  %3900 = vmatprep.subr.bf16.mxu1 %v13236_v38  ;;  %v13315_v36 = vld [vmem:[#allocation9 + $0x5bc] ss:$100 sps:$4 sm:$0xff]   ;;  %v13318_v37 = vld [vmem:[#allocation9 + $0x5c4] ss:$100 sps:$4 sm:$0xff]  }
 0x1a2   : > { %v13313_v38 = vld [vmem:[#allocation9 + $0x5b8] ss:$100 sps:$4 sm:$0xff]  }
 0x1a4   : > { %3860 = vmatpush1.bf16.msra.mxu0 %v13231_v39  ;;  %3901 = vmatpush1.bf16.msra.mxu1 %v13234_v40  ;;  %v13316_v39 = vld [vmem:[#allocation9 + $0x5c0] ss:$100 sps:$4 sm:$0xff]  }
 0x1a5   : > { %3861 = vmatprep.subr.bf16.mxu0 %v13239_v41  ;;  %3902 = vmatprep.subr.bf16.mxu1 %v13242_v43  ;;  %v13321_v40 = vld [vmem:[#allocation9 + $0x684] ss:$100 sps:$4 sm:$0xff]   ;;  %v13324_v41 = vld [vmem:[#allocation9 + $0x68c] ss:$100 sps:$4 sm:$0xff]  }
 0x1a6   : > { %v13319_v43 = vld [vmem:[#allocation9 + $0x680] ss:$100 sps:$4 sm:$0xff]  }
 0x1a8   : > { %3862 = vmatpush1.bf16.msra.mxu0 %v13237_v45  ;;  %3903 = vmatpush1.bf16.msra.mxu1 %v13240_v46  ;;  %v13322_v45 = vld [vmem:[#allocation9 + $0x688] ss:$100 sps:$4 sm:$0xff]  }
 0x1a9   : > { %3863 = vmatprep.subr.bf16.mxu0 %v13245_v47  ;;  %3904 = vmatprep.subr.bf16.mxu1 %v13248_v48  ;;  %v13327_v46 = vld [vmem:[#allocation9 + $0x74c] ss:$100 sps:$4 sm:$0xff]   ;;  %v13330_v47 = vld [vmem:[#allocation9 + $0x754] ss:$100 sps:$4 sm:$0xff]  }
 0x1ac   : > { %3864 = vmatpush1.bf16.msra.mxu0 %v13243_v49  ;;  %3905 = vmatpush1.bf16.msra.mxu1 %v13246_v50 }
 0x1ad   : > { %3865 = vmatprep.subr.bf16.mxu0 %v13251_v51  ;;  %3906 = vmatprep.subr.bf16.mxu1 %v13254_v52 }
 0x1b0   : > { %3866 = vmatpush1.bf16.msra.mxu0 %v13249_v53  ;;  %3907 = vmatpush1.bf16.msra.mxu1 %v13252_v54  ;;  %v13325_v53 = vld [vmem:[#allocation9 + $0x748] ss:$100 sps:$4 sm:$0xff]   ;;  %v13328_v54 = vld [vmem:[#allocation9 + $0x750] ss:$100 sps:$4 sm:$0xff]  }
 0x1b1   : > { %3867 = vmatprep.subr.bf16.mxu0 %v13257_v55  ;;  %3908 = vmatprep.subr.bf16.mxu1 %v13260_v56 }
 0x1b4   : > { %3868 = vmatpush1.bf16.msra.mxu0 %v13255_v57  ;;  %3909 = vmatpush1.bf16.msra.mxu1 %v13258_v58  ;;  %v13333_v57 = vld [vmem:[#allocation9 + $0x814] ss:$100 sps:$4 sm:$0xff]   ;;  %v13336_v58 = vld [vmem:[#allocation9 + $0x81c] ss:$100 sps:$4 sm:$0xff]  }
 0x1b5   : > { %3869 = vmatprep.subr.bf16.mxu0 %v13263_v59  ;;  %3910 = vmatprep.subr.bf16.mxu1 %v13266_v60  ;;  %v13331_v60 = vld [vmem:[#allocation9 + $0x810] ss:$100 sps:$4 sm:$0xff]  }
 0x1b8   : > { %3870 = vmatpush1.bf16.msra.mxu0 %v13261_v63  ;;  %3911 = vmatpush1.bf16.msra.mxu1 %v13264_v0  ;;  %v13342_v63 = vld [vmem:[#allocation9 + $0x8e4] ss:$100 sps:$4 sm:$0xff]   ;;  %v13337_v0 = vld [vmem:[#allocation9 + $0x8d8] ss:$100 sps:$4 sm:$0xff]  }
 0x1b9   : > { %11435 = vmatprep.subr.msk.bf16.mxu0 %vm3521_vm1, %v11411_v1  ;;  %11437 = vmatprep.subr.msk.bf16.mxu1 %vm3521_vm1, %v11413_v2  ;;  %v13340_v1 = vld [vmem:[#allocation9 + $0x8e0] ss:$100 sps:$4 sm:$0xff]  }
 0x1ba   : > { %v13345_v2 = vld [vmem:[#allocation9 + $0x9a4] ss:$100 sps:$4 sm:$0xff]  }
 0x1bc   : > { %3872 = vmatpush1.bf16.msra.mxu0 %v3559_v8  ;;  %3913 = vmatpush1.bf16.msra.mxu1 %v3565_v9  ;;  %v13354_v8 = vld [vmem:[#allocation9 + $0xa74] ss:$100 sps:$4 sm:$0xff]  }
 0x1bd   : > { %3925 = vmatprep.subr.bf16.mxu0 %v13273_v5  ;;  %3966 = vmatprep.subr.bf16.mxu1 %v13276_v6  ;;  %v13346_v5 = vld [vmem:[#allocation9 + $0x9a8] ss:$100 sps:$4 sm:$0xff]   ;;  %v1270_v9 = vld [vmem:[#allocation9 + $0xb30] sm:$0xff] }
 0x1be   : > { %v13351_v6 = vld [vmem:[#allocation9 + $0xa6c] ss:$100 sps:$4 sm:$0xff]  }
 0x1bf   : > { %3876 = vmatmul.mubr.bf16.vlgmr.msra.gmra.mrb[12].mxu0 %v14888_v11  ;;  %3917 = vmatmul.mubr.bf16.vlgmr.msra.gmra.mrb[12].mxu1 %v14888_v11 }
 0x1c0   : > { %3926 = vmatpush1.bf16.msra.mxu0 %v13271_v10  ;;  %3967 = vmatpush1.bf16.msra.mxu1 %v13274_v12  ;;  %v1271_v10 = vld [vmem:[#allocation9 + $0xb38] sm:$0xff]  ;;  %v13349_v12 = vld [vmem:[#allocation9 + $0xa68] ss:$100 sps:$4 sm:$0xff]  }
 0x1c1   : > { %3927 = vmatprep.subr.bf16.mxu0 %v13279_v13  ;;  %3968 = vmatprep.subr.bf16.mxu1 %v13282_v14  ;;  %v13352_v13 = vld [vmem:[#allocation9 + $0xa70] ss:$100 sps:$4 sm:$0xff]   ;;  %v11414_v14 = vcombine.low %v1270_v9, %v1270_v9 }
 0x1c2   : > { %11440 = vmatprep.mubr.msk.bf16.mxu0 %vm3517_vm0, %v14857_v44  ;;  %11442 = vmatprep.mubr.msk.bf16.mxu1 %vm3517_vm0, %v14857_v44 }
 0x1c4   : > { %3928 = vmatpush1.bf16.msra.mxu0 %v13277_v15  ;;  %3969 = vmatpush1.bf16.msra.mxu1 %v13280_v16  ;;  %v11415_v15 = vcombine.high %v1270_v9, %v1270_v9  ;;  %v11417_v16 = vcombine.high %v1271_v10, %v1271_v10  ;;  %v13416_v9 = vld [vmem:[#allocation9 + $0x760] ss:$100 sps:$4 sm:$0xff]  }
 0x1c5   : > { %3929 = vmatprep.subr.bf16.mxu0 %v13285_v42  ;;  %3970 = vmatprep.subr.bf16.mxu1 %v13288_v17  ;;  %v11416_v42 = vcombine.low %v1271_v10, %v1271_v10  ;;  %v13361_v17 = vld [vmem:[#allocation9 + $0x54] ss:$100 sps:$4 sm:$0xff]  }
 0x1c8   : > { %3930 = vmatpush1.bf16.msra.mxu0 %v13283_v18  ;;  %3971 = vmatpush1.bf16.msra.mxu1 %v13286_v19  ;;  %v13364_v18 = vld [vmem:[#allocation9 + $0x5c] ss:$100 sps:$4 sm:$0xff]   ;;  %v3571_v19 = vsel %vm3521_vm1, %v11414_v14, 0  ;;  %v13424_v14 = vld [vmem:[#allocation9 + $0x82c] ss:$100 sps:$4 sm:$0xff]  }
 0x1c9   : > { %3931 = vmatprep.subr.bf16.mxu0 %v13291_v20  ;;  %3972 = vmatprep.subr.bf16.mxu1 %v13294_v21  ;;  %v3577_v20 = vsel %vm3521_vm1, %v11416_v42, 0  ;;  %v13359_v21 = vld [vmem:[#allocation9 + $0x50] ss:$100 sps:$4 sm:$0xff]   ;;  %v13419_v42 = vld [vmem:[#allocation9 + $0x820] ss:$100 sps:$4 sm:$0xff]  }
 0x1cc   : > { %3932 = vmatpush1.bf16.msra.mxu0 %v13289_v22  ;;  %3973 = vmatpush1.bf16.msra.mxu1 %v13292_v23  ;;  %v13362_v22 = vld [vmem:[#allocation9 + $0x58] ss:$100 sps:$4 sm:$0xff]  }
 0x1cd   : > { %3933 = vmatprep.subr.bf16.mxu0 %v13297_v24  ;;  %3974 = vmatprep.subr.bf16.mxu1 %v13300_v25  ;;  %v13367_v23 = vld [vmem:[#allocation9 + $0x11c] ss:$100 sps:$4 sm:$0xff]   ;;  %v13370_v24 = vld [vmem:[#allocation9 + $0x124] ss:$100 sps:$4 sm:$0xff]  }
 0x1ce   : > { %v13365_v25 = vld [vmem:[#allocation9 + $0x118] ss:$100 sps:$4 sm:$0xff]  }
 0x1d0   : > { %3934 = vmatpush1.bf16.msra.mxu0 %v13295_v26  ;;  %3975 = vmatpush1.bf16.msra.mxu1 %v13298_v27  ;;  %v13368_v26 = vld [vmem:[#allocation9 + $0x120] ss:$100 sps:$4 sm:$0xff]  }
 0x1d1   : > { %3935 = vmatprep.subr.bf16.mxu0 %v13303_v28  ;;  %3976 = vmatprep.subr.bf16.mxu1 %v13306_v29  ;;  %v13373_v27 = vld [vmem:[#allocation9 + $0x1e4] ss:$100 sps:$4 sm:$0xff]   ;;  %v13376_v28 = vld [vmem:[#allocation9 + $0x1ec] ss:$100 sps:$4 sm:$0xff]  }
 0x1d2   : > { %v13371_v29 = vld [vmem:[#allocation9 + $0x1e0] ss:$100 sps:$4 sm:$0xff]  }
 0x1d4   : > { %3936 = vmatpush1.bf16.msra.mxu0 %v13301_v30  ;;  %3977 = vmatpush1.bf16.msra.mxu1 %v13304_v31  ;;  %v13374_v30 = vld [vmem:[#allocation9 + $0x1e8] ss:$100 sps:$4 sm:$0xff]   ;;  %v13382_v31 = vld [vmem:[#allocation9 + $0x2b4] ss:$100 sps:$4 sm:$0xff]  }
 0x1d5   : > { %3937 = vmatprep.subr.bf16.mxu0 %v13309_v32  ;;  %3978 = vmatprep.subr.bf16.mxu1 %v13312_v33  ;;  %v13377_v32 = vld [vmem:[#allocation9 + $0x2a8] ss:$100 sps:$4 sm:$0xff]   ;;  %v13380_v33 = vld [vmem:[#allocation9 + $0x2b0] ss:$100 sps:$4 sm:$0xff]  }
 0x1d8   : > { %3938 = vmatpush1.bf16.msra.mxu0 %v13307_v34  ;;  %3979 = vmatpush1.bf16.msra.mxu1 %v13310_v35  ;;  %v13385_v34 = vld [vmem:[#allocation9 + $0x374] ss:$100 sps:$4 sm:$0xff]   ;;  %v13388_v35 = vld [vmem:[#allocation9 + $0x37c] ss:$100 sps:$4 sm:$0xff]  }
 0x1d9   : > { %3939 = vmatprep.subr.bf16.mxu0 %v13315_v36  ;;  %3980 = vmatprep.subr.bf16.mxu1 %v13318_v37  ;;  %v13383_v36 = vld [vmem:[#allocation9 + $0x370] ss:$100 sps:$4 sm:$0xff]   ;;  %v13386_v37 = vld [vmem:[#allocation9 + $0x378] ss:$100 sps:$4 sm:$0xff]  }
 0x1dc   : > { %3940 = vmatpush1.bf16.msra.mxu0 %v13313_v38  ;;  %3981 = vmatpush1.bf16.msra.mxu1 %v13316_v39  ;;  %v13391_v38 = vld [vmem:[#allocation9 + $0x43c] ss:$100 sps:$4 sm:$0xff]   ;;  %v13394_v39 = vld [vmem:[#allocation9 + $0x444] ss:$100 sps:$4 sm:$0xff]  }
 0x1dd   : > { %3941 = vmatprep.subr.bf16.mxu0 %v13321_v40  ;;  %3982 = vmatprep.subr.bf16.mxu1 %v13324_v41  ;;  %v13389_v40 = vld [vmem:[#allocation9 + $0x438] ss:$100 sps:$4 sm:$0xff]   ;;  %v13392_v41 = vld [vmem:[#allocation9 + $0x440] ss:$100 sps:$4 sm:$0xff]  }
 0x1de   : > { %v14907_v48 = vpop.f32.mrb[0].mxu0  ;;  %v14909_v49 = vpop.f32.mrb[0].mxu1 }
 0x1df   : > { %v14911_v50 = vpop.f32.mrb[1].mxu0  ;;  %v14913_v51 = vpop.f32.mrb[1].mxu1 }
 0x1e0   : > { %v3635_v52 = vpop.f32.mrb[2].mxu0  ;;  %3942 = vmatpush1.bf16.msra.mxu0 %v13319_v43  ;;  %3983 = vmatpush1.bf16.msra.mxu1 %v13322_v45  ;;  %v3676_v55 = vpop.f32.mrb[2].mxu1  ;;  %v13397_v43 = vld [vmem:[#allocation9 + $0x504] ss:$100 sps:$4 sm:$0xff]   ;;  %v4155_v45 = vmul.f32 0.044715, %v14911_v50 }
 0x1e1   : > { %v3636_v56 = vpop.f32.mrb[3].mxu0  ;;  %3943 = vmatprep.subr.bf16.mxu0 %v13327_v46  ;;  %3984 = vmatprep.subr.bf16.mxu1 %v13330_v47  ;;  %v3677_v59 = vpop.f32.mrb[3].mxu1  ;;  %v13400_v46 = vld [vmem:[#allocation9 + $0x50c] ss:$100 sps:$4 sm:$0xff]   ;;  %v13395_v47 = vld [vmem:[#allocation9 + $0x500] ss:$100 sps:$4 sm:$0xff]  }
 0x1e2   : > { %v13398_v52 = vld [vmem:[#allocation9 + $0x508] ss:$100 sps:$4 sm:$0xff]   ;;  %v4180_v55 = vmul.f32 %v4155_v45, %v14911_v50  ;;  %v13412_v59 = vld [vmem:[#allocation9 + $0x69c] ss:$100 sps:$4 sm:$0xff]  }
 0x1e3   : > { %v13401_v56 = vld [vmem:[#allocation9 + $0x5c8] ss:$100 sps:$4 sm:$0xff]  }
 0x1e4   : > { %3944 = vmatpush1.bf16.msra.mxu0 %v13325_v53  ;;  %3985 = vmatpush1.bf16.msra.mxu1 %v13328_v54  ;;  %v13403_v53 = vld [vmem:[#allocation9 + $0x5cc] ss:$100 sps:$4 sm:$0xff]   ;;  %v13406_v54 = vld [vmem:[#allocation9 + $0x5d4] ss:$100 sps:$4 sm:$0xff]  }
 0x1e5   : > { %3945 = vmatprep.subr.bf16.mxu0 %v13333_v57  ;;  %3986 = vmatprep.subr.bf16.mxu1 %v13336_v58  ;;  %v13404_v57 = vld [vmem:[#allocation9 + $0x5d0] ss:$100 sps:$4 sm:$0xff]  }
 0x1e6   : > { %v13409_v58 = vld [vmem:[#allocation9 + $0x694] ss:$100 sps:$4 sm:$0xff]  }
 0x1e8   : > { %3946 = vmatpush1.bf16.msra.mxu0 %v13331_v60  ;;  %3987 = vmatpush1.bf16.msra.mxu1 %v13334_v61  ;;  %v4205_v60 = vmul.f32 %v4180_v55, %v14911_v50  ;;  %v13407_v61 = vld [vmem:[#allocation9 + $0x690] ss:$100 sps:$4 sm:$0xff]  }
 0x1e9   : > { %3947 = vmatprep.subr.bf16.mxu0 %v13339_v62  ;;  %3988 = vmatprep.subr.bf16.mxu1 %v13342_v63  ;;  %v13410_v62 = vld [vmem:[#allocation9 + $0x698] ss:$100 sps:$4 sm:$0xff]  }
 0x1ea   : > { %v13415_v63 = vld [vmem:[#allocation9 + $0x75c] ss:$100 sps:$4 sm:$0xff]  }
 0x1ec   : > { %3948 = vmatpush1.bf16.msra.mxu0 %v13337_v0  ;;  %3989 = vmatpush1.bf16.msra.mxu1 %v13340_v1  ;;  %v13418_v0 = vld [vmem:[#allocation9 + $0x764] ss:$100 sps:$4 sm:$0xff]   ;;  %v4230_v1 = vadd.f32 %v4205_v60, %v14911_v50  ;;  %v13452_v60 = vld [vmem:[%s17278_s22 + $0x8] sm:$0xff]  }
 0x1ed   : > { %3949 = vmatprep.subr.bf16.mxu0 %v13345_v2  ;;  %3990 = vmatprep.subr.bf16.mxu1 %v13348_v3 }
 0x1f0   : > { %3950 = vmatpush1.bf16.msra.mxu0 %v13343_v4  ;;  %3991 = vmatpush1.bf16.msra.mxu1 %v13346_v5 }
 0x1f1   : > { %3951 = vmatprep.subr.bf16.mxu0 %v13351_v6  ;;  %3992 = vmatprep.subr.bf16.mxu1 %v13354_v8  ;;  %v13413_v8 = vld [vmem:[#allocation9 + $0x758] ss:$100 sps:$4 sm:$0xff]  }
 0x1f4   : > { %3952 = vmatpush1.bf16.msra.mxu0 %v13349_v12  ;;  %3993 = vmatpush1.bf16.msra.mxu1 %v13352_v13  ;;  %v13421_v13 = vld [vmem:[#allocation9 + $0x824] ss:$100 sps:$4 sm:$0xff]  }
 0x1f5   : > { %11439 = vmatprep.subr.msk.bf16.mxu0 %vm3521_vm1, %v11415_v15  ;;  %11441 = vmatprep.subr.msk.bf16.mxu1 %vm3521_vm1, %v11417_v16  ;;  %v4255_v16 = vmul.f32 0.7978846, %v4230_v1  ;;  %v13455_v1 = vld [vmem:[%s17278_s22 + $0x10] sm:$0xff]  }
 0x1f7   : > { %14105 = vtanh.f32 %v4255_v16  ;;  %v13463_v16 = vld [vmem:[#allocation9 + $0x448] ss:$100 sps:$4 sm:$0xff]  }
 0x1f8   : > { %3954 = vmatpush1.bf16.msra.mxu0 %v3571_v19  ;;  %3995 = vmatpush1.bf16.msra.mxu1 %v3577_v20  ;;  %v13430_v19 = vld [vmem:[#allocation9 + $0x8f4] ss:$100 sps:$4 sm:$0xff]   ;;  %v13425_v20 = vld [vmem:[#allocation9 + $0x8e8] ss:$100 sps:$4 sm:$0xff]  }
 0x1f9   : > { %4007 = vmatprep.subr.bf16.mxu0 %v13361_v17  ;;  %4048 = vmatprep.subr.bf16.mxu1 %v13364_v18  ;;  %v13422_v17 = vld [vmem:[#allocation9 + $0x828] ss:$100 sps:$4 sm:$0xff]  }
 0x1fa   : > { %v13427_v18 = vld [vmem:[#allocation9 + $0x8ec] ss:$100 sps:$4 sm:$0xff]  }
 0x1fb   : > { %3958 = vmatmul.mubr.bf16.vlgmr.msra.gmra.mrb[16].mxu0 %v14888_v11  ;;  %3999 = vmatmul.mubr.bf16.vlgmr.msra.gmra.mrb[16].mxu1 %v14888_v11  ;;  %v13379_v11 = vld [vmem:[#allocation9 + $0x2ac] ss:$100 sps:$4 sm:$0xff]  }
 0x1fc   : > { %4008 = vmatpush1.bf16.msra.mxu0 %v13359_v21  ;;  %4049 = vmatpush1.bf16.msra.mxu1 %v13362_v22  ;;  %v13428_v21 = vld [vmem:[#allocation9 + $0x8f0] ss:$100 sps:$4 sm:$0xff]  }
 0x1fd   : > { %4009 = vmatprep.subr.bf16.mxu0 %v13367_v23  ;;  %4050 = vmatprep.subr.bf16.mxu1 %v13370_v24  ;;  %v13433_v22 = vld [vmem:[#allocation9 + $0x9b4] ss:$100 sps:$4 sm:$0xff]   ;;  %v13436_v23 = vld [vmem:[#allocation9 + $0x9bc] ss:$100 sps:$4 sm:$0xff]  }
 0x1fe   : > { %11444 = vmatprep.mubr.msk.bf16.mxu0 %vm3517_vm0, %v14857_v44  ;;  %11446 = vmatprep.mubr.msk.bf16.mxu1 %vm3517_vm0, %v14857_v44  ;;  %v1272_v24 = vld [vmem:[#allocation9 + $0xb40] sm:$0xff] }
 0x200   : > { %4010 = vmatpush1.bf16.msra.mxu0 %v13365_v25  ;;  %4051 = vmatpush1.bf16.msra.mxu1 %v13368_v26  ;;  %v13431_v25 = vld [vmem:[#allocation9 + $0x9b0] ss:$100 sps:$4 sm:$0xff]   ;;  %v13434_v26 = vld [vmem:[#allocation9 + $0x9b8] ss:$100 sps:$4 sm:$0xff]  }
 0x201   : > { %4011 = vmatprep.subr.bf16.mxu0 %v13373_v27  ;;  %4052 = vmatprep.subr.bf16.mxu1 %v13376_v28  ;;  %v13439_v27 = vld [vmem:[#allocation9 + $0xa7c] ss:$100 sps:$4 sm:$0xff]   ;;  %v4154_v28 = vmul.f32 0.044715, %v14907_v48 }
 0x204   : > { %4012 = vmatpush1.bf16.msra.mxu0 %v13371_v29  ;;  %4053 = vmatpush1.bf16.msra.mxu1 %v13374_v30  ;;  %v13442_v29 = vld [vmem:[#allocation9 + $0xa84] ss:$100 sps:$4 sm:$0xff]  }
 0x205   : > { %4013 = vmatprep.subr.bf16.mxu0 %v13379_v11  ;;  %4054 = vmatprep.subr.bf16.mxu1 %v13382_v31  ;;  %v1273_v30 = vld [vmem:[#allocation9 + $0xb48] sm:$0xff]  ;;  %v11418_v11 = vcombine.low %v1272_v24, %v1272_v24  ;;  %v13437_v31 = vld [vmem:[#allocation9 + $0xa78] ss:$100 sps:$4 sm:$0xff]  }
 0x208   : > { %4014 = vmatpush1.bf16.msra.mxu0 %v13377_v32  ;;  %4055 = vmatpush1.bf16.msra.mxu1 %v13380_v33  ;;  %v14106_v32 = vpop.eup %14105  ;;  %v4179_v33 = vmul.f32 %v4154_v28, %v14907_v48  ;;  %v13470_v28 = vld [vmem:[%s17278_s22 + $0x38] sm:$0xff]  }
 0x209   : > { %4015 = vmatprep.subr.bf16.mxu0 %v13385_v34  ;;  %4056 = vmatprep.subr.bf16.mxu1 %v13388_v35  ;;  %v13440_v34 = vld [vmem:[#allocation9 + $0xa80] ss:$100 sps:$4 sm:$0xff]   ;;  %v11420_v35 = vcombine.low %v1273_v30, %v1273_v30 }
 0x20b   : > { %v3589_v45 = vsel %vm3521_vm1, %v11420_v35, 0 }
 0x20c   : > { %4016 = vmatpush1.bf16.msra.mxu0 %v13383_v36  ;;  %4057 = vmatpush1.bf16.msra.mxu1 %v13386_v37  ;;  %v4157_v36 = vmul.f32 0.044715, %v14913_v51  ;;  %v11419_v37 = vcombine.high %v1272_v24, %v1272_v24  ;;  %v13468_v24 = vld [vmem:[%s17278_s22 + $0x78] sm:$0xff]  }
 0x20d   : > { %4017 = vmatprep.subr.bf16.mxu0 %v13391_v38  ;;  %4058 = vmatprep.subr.bf16.mxu1 %v13394_v39  ;;  %v11421_v38 = vcombine.high %v1273_v30, %v1273_v30  ;;  %v3583_v39 = vsel %vm3521_vm1, %v11418_v11, 0  ;;  %v13471_v30 = vld [vmem:[%s17278_s22 + $0xc0] sm:$0xff]   ;;  %v4132_v11 = vmul.f32 0.5, %v14913_v51 }
 0x210   : > { %4018 = vmatpush1.bf16.msra.mxu0 %v13389_v40  ;;  %4059 = vmatpush1.bf16.msra.mxu1 %v13392_v41  ;;  %v13447_v40 = vld [vmem:[%s17278_s22 + $0x40] sm:$0xff]   ;;  %v4305_v41 = vadd.f32 1.0, %v14106_v32 }
 0x211   : > { %4019 = vmatprep.subr.bf16.mxu0 %v13397_v43  ;;  %4060 = vmatprep.subr.bf16.mxu1 %v13400_v46  ;;  %v4204_v43 = vmul.f32 %v4179_v33, %v14907_v48  ;;  %v4182_v46 = vmul.f32 %v4157_v36, %v14913_v51  ;;  %v13473_v36 = vld [vmem:[%s17278_s22 + $0x80] sm:$0xff]  }
 0x213   : > { %v4229_v55 = vadd.f32 %v4204_v43, %v14907_v48  ;;  %v13474_v43 = vld [vmem:[%s17278_s22 + $0xc8] sm:$0xff]  }
 0x214   : > { %4020 = vmatpush1.bf16.msra.mxu0 %v13395_v47  ;;  %4061 = vmatpush1.bf16.msra.mxu1 %v13398_v52  ;;  %v4130_v47 = vmul.f32 0.5, %v14911_v50  ;;  %v13448_v52 = vld [vmem:[#allocation9 + $0x60] ss:$100 sps:$4 sm:$0xff]  }
 0x215   : > { %4021 = vmatprep.subr.bf16.mxu0 %v13403_v53  ;;  %4062 = vmatprep.subr.bf16.mxu1 %v13406_v54  ;;  %v13449_v53 = vld [vmem:[%s17278_s22] sm:$0xff]  }
 0x216   : > { %v4330_v54 = vmul.f32 %v4305_v41, %v4130_v47  ;;  %v14960_v50 = vld.sshfl [vmem:[%s14832_s9] sm:$0x33 pattern:$0x76325410]  ;;  %s892_s9 = scalar_select %p891_p6, %s14622_s7, 1 }
 0x218   : > { %4022 = vmatpush1.bf16.msra.mxu0 %v13401_v56  ;;  %4063 = vmatpush1.bf16.msra.mxu1 %v13404_v57  ;;  %v4207_v56 = vmul.f32 %v4182_v46, %v14913_v51  ;;  %v13450_v57 = vld [vmem:[%s17278_s22 + $0x48] sm:$0xff]   ;;  %s11046_s21 = sshll.u32 %s892_s9, 1  ;;  %s17285_s9 = sld [smem:[#allocation34_spill]] }
 0x219   : > { %4023 = vmatprep.subr.bf16.mxu0 %v13409_v58  ;;  %4064 = vmatprep.subr.bf16.mxu1 %v13412_v59  ;;  %v4355_v58 = vpack.c.bf16 %v4330_v54, %v4330_v54  ;;  %v13451_v59 = vld [vmem:[#allocation9 + $0x128] ss:$100 sps:$4 sm:$0xff]   ;;  %s894_s4 = scalar_lea.vmem %s17282_s16, %s11046_s21  ;;  %s17290_s21 = sld [smem:[#allocation39_spill]] }
 0x21a   : > { %v14929_v2 = vpop.f32.mrb[4].mxu0  ;;  %v14931_v3 = vpop.f32.mrb[4].mxu1  ;;  %s890_s16 = scalar_lea.vmem [#allocation12], %s14828_s3 }
 0x21b   : > { %v14933_v4 = vpop.f32.mrb[5].mxu0  ;;  %v14935_v5 = vpop.f32.mrb[5].mxu1 }
 0x21c   : > { %v3717_v6 = vpop.f32.mrb[6].mxu0  ;;  %4024 = vmatpush1.bf16.msra.mxu0 %v13407_v61  ;;  %4065 = vmatpush1.bf16.msra.mxu1 %v13410_v62  ;;  %v3758_v10 = vpop.f32.mrb[6].mxu1  ;;  %v4254_v61 = vmul.f32 0.7978846, %v4229_v55  ;;  %v4232_v62 = vadd.f32 %v4207_v56, %v14913_v51  ;;  %v13475_v55 = vld [vmem:[#allocation9 + $0x768] ss:$100 sps:$4 sm:$0xff]  }
 0x21d   : > { %v3718_v12 = vpop.f32.mrb[7].mxu0  ;;  %4025 = vmatprep.subr.bf16.mxu0 %v13415_v63  ;;  %4066 = vmatprep.subr.bf16.mxu1 %v13418_v0  ;;  %v3759_v15 = vpop.f32.mrb[7].mxu1  ;;  %v13453_v63 = vld [vmem:[%s17278_s22 + $0x50] sm:$0xff]   ;;  %v13454_v0 = vld [vmem:[#allocation9 + $0x1f0] ss:$100 sps:$4 sm:$0xff]   ;;  %v13459_v10 = vld [vmem:[%s17278_s22 + $0x60] sm:$0xff]  }
 0x21e   : > { %14107 = vtanh.f32 %v4254_v61  ;;  %v4257_v6 = vmul.f32 0.7978846, %v4232_v62  ;;  %v13460_v12 = vld [vmem:[#allocation9 + $0x380] ss:$100 sps:$4 sm:$0xff]   ;;  %v13476_v56 = vld [vmem:[%s17278_s22 + $0x88] sm:$0xff]  }
 0x220   : > { %4026 = vmatpush1.bf16.msra.mxu0 %v13413_v8  ;;  %4067 = vmatpush1.bf16.msra.mxu1 %v13416_v9  ;;  %v13456_v8 = vld [vmem:[%s17278_s22 + $0x58] sm:$0xff]   ;;  %v13457_v9 = vld [vmem:[#allocation9 + $0x2b8] ss:$100 sps:$4 sm:$0xff]   ;;  %14109 = vtanh.f32 %v4257_v6 }
 0x221   : > { %4027 = vmatprep.subr.bf16.mxu0 %v13421_v13  ;;  %4068 = vmatprep.subr.bf16.mxu1 %v13424_v14  ;;  %v13461_v13 = vld [vmem:[%s17278_s22 + $0x20] sm:$0xff]   ;;  %v13462_v14 = vld [vmem:[%s17278_s22 + $0x68] sm:$0xff]  }
 0x224   : > { %4028 = vmatpush1.bf16.msra.mxu0 %v13419_v42  ;;  %4069 = vmatpush1.bf16.msra.mxu1 %v13422_v17  ;;  %v13464_v42 = vld [vmem:[%s17278_s22 + $0x28] sm:$0xff]   ;;  %v4156_v17 = vmul.f32 0.044715, %v14909_v49 }
 0x225   : > { %4029 = vmatprep.subr.bf16.mxu0 %v13427_v18  ;;  %4070 = vmatprep.subr.bf16.mxu1 %v13430_v19  ;;  %v4159_v18 = vmul.f32 0.044715, %v14933_v4  ;;  %v13465_v19 = vld [vmem:[%s17278_s22 + $0x70] sm:$0xff]  }
 0x226   : > { %v4181_v32 = vmul.f32 %v4156_v17, %v14909_v49 }
 0x228   : > { %4030 = vmatpush1.bf16.msra.mxu0 %v13425_v20  ;;  %4071 = vmatpush1.bf16.msra.mxu1 %v13428_v21  ;;  %v14108_v15 = vpop.eup %14107  ;;  %v13466_v21 = vld [vmem:[#allocation9 + $0x510] ss:$100 sps:$4 sm:$0xff]   ;;  %v4206_v51 = vmul.f32 %v4181_v32, %v14909_v49 }
 0x229   : > { %4031 = vmatprep.subr.bf16.mxu0 %v13433_v22  ;;  %4072 = vmatprep.subr.bf16.mxu1 %v13436_v23  ;;  %v4304_v20 = vadd.f32 1.0, %v14108_v15  ;;  %v13467_v22 = vld [vmem:[%s17278_s22 + $0x30] sm:$0xff]   ;;  %v4161_v23 = vmul.f32 0.044715, %v14935_v5  ;;  %v13484_v15 = vld [vmem:[#allocation9 + $0x9c0] ss:$100 sps:$4 sm:$0xff]  }
 0x22b   : > { %v4186_v33 = vmul.f32 %v4161_v23, %v14935_v5  ;;  %v13489_v23 = vld [vmem:[%s17278_s22 + $0xf0] sm:$0xff]  }
 0x22c   : > { %4032 = vmatpush1.bf16.msra.mxu0 %v13431_v25  ;;  %4073 = vmatpush1.bf16.msra.mxu1 %v13434_v26  ;;  %v14110_v25 = vpop.eup %14109  ;;  %v4184_v26 = vmul.f32 %v4159_v18, %v14933_v4 }
 0x22d   : > { %4033 = vmatprep.subr.bf16.mxu0 %v13439_v27  ;;  %4074 = vmatprep.subr.bf16.mxu1 %v13442_v29  ;;  %v13469_v27 = vld [vmem:[#allocation9 + $0x5d8] ss:$100 sps:$4 sm:$0xff]   ;;  %v4129_v29 = vmul.f32 0.5, %v14907_v48  ;;  %v13472_v48 = vld [vmem:[#allocation9 + $0x6a0] ss:$100 sps:$4 sm:$0xff]  }
 0x22e   : > { %v4209_v35 = vmul.f32 %v4184_v26, %v14933_v4 }
 0x230   : > { %4034 = vmatpush1.bf16.msra.mxu0 %v13437_v31  ;;  %4075 = vmatpush1.bf16.msra.mxu1 %v13440_v34  ;;  %v4307_v31 = vadd.f32 1.0, %v14110_v25  ;;  %v4329_v34 = vmul.f32 %v4304_v20, %v4129_v29  ;;  %v13488_v20 = vld [vmem:[%s17278_s22 + $0xa8] sm:$0xff]   ;;  %v4131_v29 = vmul.f32 0.5, %v14909_v49 }
 0x231   : > { %11443 = vmatprep.subr.msk.bf16.mxu0 %vm3521_vm1, %v11419_v37  ;;  %11445 = vmatprep.subr.msk.bf16.mxu1 %vm3521_vm1, %v11421_v38  ;;  %v4211_v38 = vmul.f32 %v4186_v33, %v14935_v5 }
 0x232   : > { %v4332_v37 = vmul.f32 %v4307_v31, %v4132_v11 }
 0x234   : > { %4036 = vmatpush1.bf16.msra.mxu0 %v3583_v39  ;;  %4077 = vmatpush1.bf16.msra.mxu1 %v3589_v45  ;;  %v4354_v39 = vpack.c.bf16 %v4329_v34, %v4329_v34  ;;  %v4357_v47 = vpack.c.bf16 %v4332_v37, %v4332_v37 }
 0x235   : > { %4089 = vmatprep.subr.bf16.mxu0 %v14460_v7  ;;  %12040 = vmatprep.subr.bf16.mxu1 %v13447_v40  ;;  %v4234_v40 = vadd.f32 %v4209_v35, %v14933_v4  ;;  %v13493_v35 = vld [vmem:[%s17278_s22 + $0x140] sm:$0xff]  }
 0x237   : > { %4040 = vmatmul.mubr.bf16.vlgmr.msra.gmra.mrb[20].mxu0 %v14960_v50  ;;  %4081 = vmatmul.mubr.bf16.vlgmr.msra.gmra.mrb[20].mxu1 %v14960_v50  ;;  %v4259_v62 = vmul.f32 0.7978846, %v4234_v40 }
 0x238   : > { %4090 = vmatpush1.bf16.msra.mxu0 %v13448_v52  ;;  %12041 = vmatpush3.bf16.msra.mxu1 %v13449_v53  ;;  %v4231_v53 = vadd.f32 %v4206_v51, %v14909_v49  ;;  %v13492_v49 = vld [vmem:[%s17278_s22 + $0xf8] sm:$0xff]  }
 0x239   : > { %5611 = vmatprep.mubr.bf16.mxu1 %v4355_v58  ;;  %4091 = vmatprep.subr.bf16.mxu0 %v14460_v7  ;;  %v4236_v58 = vadd.f32 %v4211_v38, %v14935_v5  ;;  %14111 = vtanh.f32 %v4259_v62  ;;  %v13494_v38 = vld [vmem:[%s17278_s22 + $0xb8] sm:$0xff]   ;;  %v13500_v62 = vld [vmem:[%s17278_s22 + $0x150] sm:$0xff]  }
 0x23a   : > { %12042 = vmatprep.subr.bf16.mxu1 %v13450_v57  ;;  %11447 = vmatprep.mubr.msk.bf16.mxu0 %vm3517_vm0, %v14857_v44  ;;  %v13458_v44 = vld [vmem:[%s17278_s22 + $0x18] sm:$0xff]   ;;  %v4256_v6 = vmul.f32 0.7978846, %v4231_v53 }
 0x23c   : > { %4092 = vmatpush1.bf16.msra.mxu0 %v13451_v59  ;;  %12043 = vmatpush3.bf16.msra.mxu1 %v13452_v60  ;;  %v13477_v60 = vld [vmem:[%s17278_s22 + $0xd0] sm:$0xff]   ;;  %14113 = vtanh.f32 %v4256_v6 }
 0x23d   : > { %4093 = vmatprep.subr.bf16.mxu0 %v14460_v7  ;;  %12044 = vmatprep.subr.bf16.mxu1 %v13453_v63  ;;  %v13478_v63 = vld [vmem:[#allocation9 + $0x830] ss:$100 sps:$4 sm:$0xff]  }
 0x240   : > { %4094 = vmatpush1.bf16.msra.mxu0 %v13454_v0  ;;  %12045 = vmatpush3.bf16.msra.mxu1 %v13455_v1  ;;  %v13479_v0 = vld [vmem:[%s17278_s22 + $0x90] sm:$0xff]   ;;  %v13480_v1 = vld [vmem:[%s17278_s22 + $0xd8] sm:$0xff]  }
 0x241   : > { %4095 = vmatprep.subr.bf16.mxu0 %v14460_v7  ;;  %12046 = vmatprep.subr.bf16.mxu1 %v13456_v8  ;;  %v4158_v8 = vmul.f32 0.044715, %v14929_v2 }
 0x244   : > { %4096 = vmatpush1.bf16.msra.mxu0 %v13457_v9  ;;  %12047 = vmatpush3.bf16.msra.mxu1 %v13458_v44  ;;  %v4261_v9 = vmul.f32 0.7978846, %v4236_v58  ;;  %v13481_v44 = vld [vmem:[#allocation9 + $0x8f8] ss:$100 sps:$4 sm:$0xff]   ;;  %v13498_v58 = vld [vmem:[%s17278_s22 + $0x108] sm:$0xff]  }
 0x245   : > { %4097 = vmatprep.subr.bf16.mxu0 %v14460_v7  ;;  %12048 = vmatprep.subr.bf16.mxu1 %v13459_v10  ;;  %v13482_v10 = vld [vmem:[%s17278_s22 + $0x98] sm:$0xff]  }
 0x246   : > { %14115 = vtanh.f32 %v4261_v9 }
 0x248   : > { %4098 = vmatpush1.bf16.msra.mxu0 %v13460_v12  ;;  %12049 = vmatpush3.bf16.msra.mxu1 %v13461_v13  ;;  %v4160_v12 = vmul.f32 0.044715, %v14931_v3  ;;  %v13483_v13 = vld [vmem:[%s17278_s22 + $0xe0] sm:$0xff]  }
 0x249   : > { %4099 = vmatprep.subr.bf16.mxu0 %v14460_v7  ;;  %12050 = vmatprep.subr.bf16.mxu1 %v13462_v14  ;;  %v4183_v14 = vmul.f32 %v4158_v8, %v14929_v2  ;;  %v13503_v8 = vld [vmem:[%s17278_s22 + $0x188] sm:$0xff]  }
 0x24a   : > { %v4185_v18 = vmul.f32 %v4160_v12, %v14931_v3 }
 0x24b   : > { %v4208_v17 = vmul.f32 %v4183_v14, %v14929_v2  ;;  %v13506_v14 = vld [vmem:[%s17278_s22 + $0x118] sm:$0xff]  }
 0x24c   : > { %4100 = vmatpush1.bf16.msra.mxu0 %v13463_v16  ;;  %12051 = vmatpush3.bf16.msra.mxu1 %v13464_v42  ;;  %v13485_v16 = vld [vmem:[%s17278_s22 + $0xa0] sm:$0xff]   ;;  %v13486_v42 = vld [vmem:[%s17278_s22 + $0xe8] sm:$0xff]  }
 0x24d   : > { %4101 = vmatprep.subr.bf16.mxu0 %v14460_v7  ;;  %12052 = vmatprep.subr.bf16.mxu1 %v13465_v19  ;;  %v13487_v19 = vld [vmem:[#allocation9 + $0xa88] ss:$100 sps:$4 sm:$0xff]  }
 0x250   : > { %4102 = vmatpush1.bf16.msra.mxu0 %v13466_v21  ;;  %12053 = vmatpush3.bf16.msra.mxu1 %v13467_v22  ;;  %v13490_v21 = vld [vmem:[#allocation9 + $0xb50] ss:$0 sps:$4 sm:$0xff]  }
 0x251   : > { %4103 = vmatprep.subr.bf16.mxu0 %v14460_v7  ;;  %12054 = vmatprep.subr.bf16.mxu1 %v13468_v24  ;;  %v14112_v24 = vpop.eup %14111  ;;  %v3595_v33 = vsel %vm3521_vm1, %v13490_v21, 0  ;;  %v13514_v21 = vld [vmem:[%s17278_s22 + $0x128] sm:$0xff]  }
 0x252   : > { %v14114_v26 = vpop.eup %14113  ;;  %v4309_v11 = vadd.f32 1.0, %v14112_v24  ;;  %v13517_v24 = vld [vmem:[%s17278_s22 + $0x1e8] sm:$0xff]  }
 0x253   : > { %v14116_v31 = vpop.eup %14115 }
 0x254   : > { %4104 = vmatpush1.bf16.msra.mxu0 %v13469_v27  ;;  %12055 = vmatpush3.bf16.msra.mxu1 %v13470_v28  ;;  %v4233_v27 = vadd.f32 %v4208_v17, %v14929_v2  ;;  %v4210_v28 = vmul.f32 %v4185_v18, %v14931_v3  ;;  %v13510_v17 = vld [vmem:[%s17278_s22 + $0x120] sm:$0xff]   ;;  %v13511_v18 = vld [vmem:[%s17278_s22 + $0x198] sm:$0xff]  }
 0x255   : > { %4105 = vmatprep.subr.bf16.mxu0 %v14460_v7  ;;  %12062 = vmatprep.subr.bf16.mxu1 %v13471_v30  ;;  %v13491_v30 = vld [vmem:[%s17278_s22 + $0xb0] sm:$0xff]  }
 0x256   : > { %v15032_v41 = vpop.f32.mrb[8].mxu0  ;;  %v15037_v45 = vpop.f32.mrb[8].mxu1  ;;  %v4258_v37 = vmul.f32 0.7978846, %v4233_v27  ;;  %v4235_v51 = vadd.f32 %v4210_v28, %v14931_v3  ;;  %v13519_v27 = vld [vmem:[%s17278_s22 + $0x1a8] sm:$0xff]   ;;  %v13520_v28 = vld [vmem:[%s17278_s22 + $0x178] sm:$0xff]  }
 0x257   : > { %v15039_v46 = vpop.f32.mrb[9].mxu0  ;;  %5612 = vmatmul.mubr.bf16.vlgmr.msra.gmra.mrb[24].mxu1 %v4354_v39  ;;  %v15041_v52 = vpop.f32.mrb[9].mxu1  ;;  %v13495_v39 = vld [vmem:[%s17278_s22 + $0x100] sm:$0xff]  }
 0x258   : > { %v3799_v54 = vpop.f32.mrb[10].mxu0  ;;  %4106 = vmatpush1.bf16.msra.mxu0 %v13472_v48  ;;  %12063 = vmatpush3.bf16.msra.mxu1 %v13473_v36  ;;  %v3840_v57 = vpop.f32.mrb[10].mxu1  ;;  %v4163_v22 = vmul.f32 0.044715, %v15039_v46  ;;  %v4165_v25 = vmul.f32 0.044715, %v15041_v52  ;;  %14117 = vtanh.f32 %v4258_v37 }
 0x259   : > { %5651 = vmatprep.mubr.bf16.mxu1 %v4357_v47  ;;  %v3800_v59 = vpop.f32.mrb[11].mxu0  ;;  %4107 = vmatprep.subr.bf16.mxu0 %v14460_v7  ;;  %v3841_v61 = vpop.f32.mrb[11].mxu1  ;;  %v4134_v48 = vmul.f32 0.5, %v14933_v4  ;;  %v4306_v36 = vadd.f32 1.0, %v14114_v26  ;;  %v4136_v47 = vmul.f32 0.5, %v14935_v5  ;;  %v4311_v4 = vadd.f32 1.0, %v14116_v31 }
 0x25a   : > { %12064 = vmatprep.subr.bf16.mxu1 %v13474_v43  ;;  %v4188_v32 = vmul.f32 %v4163_v22, %v15039_v46  ;;  %v4190_v34 = vmul.f32 %v4165_v25, %v15041_v52  ;;  %v13496_v43 = vld [vmem:[%s17278_s22 + $0x148] sm:$0xff]   ;;  %v4260_v57 = vmul.f32 0.7978846, %v4235_v51  ;;  %v13499_v5 = vld [vmem:[%s17278_s22 + $0x180] sm:$0xff]   ;;  %v15127_v59 = vmul.f32 0.044715, %v15032_v41 }
 0x25b   : > { %v4334_v40 = vmul.f32 %v4309_v11, %v4134_v48  ;;  %v4336_v61 = vmul.f32 %v4311_v4, %v4136_v47  ;;  %v13515_v22 = vld [vmem:[%s17278_s22 + $0x1a0] sm:$0xff]   ;;  %v13518_v26 = vld [vmem:[%s17278_s22 + $0x130] sm:$0xff]   ;;  %v13524_v37 = vld [vmem:[%s17278_s22 + $0x1f8] sm:$0xff]   ;;  %v4135_v51 = vmul.f32 0.5, %v14931_v3  ;;  %v4140_v4 = vmul.f32 0.5, %v15041_v52 }
 0x25c   : > { %4108 = vmatpush1.bf16.msra.mxu0 %v13475_v55  ;;  %12065 = vmatpush3.bf16.msra.mxu1 %v13476_v56  ;;  %v4213_v53 = vmul.f32 %v4188_v32, %v15039_v46  ;;  %v4215_v54 = vmul.f32 %v4190_v34, %v15041_v52  ;;  %v13497_v55 = vld [vmem:[%s17278_s22 + $0x1c0] sm:$0xff]   ;;  %v4331_v56 = vmul.f32 %v4306_v36, %v4131_v29  ;;  %v13522_v32 = vld [vmem:[%s17278_s22 + $0x138] sm:$0xff]   ;;  %v13523_v34 = vld [vmem:[%s17278_s22 + $0x1b0] sm:$0xff]   ;;  %v4164_v36 = vmul.f32 0.044715, %v15037_v45 }
 0x25d   : > { %4109 = vmatprep.subr.bf16.mxu0 %v14460_v7  ;;  %12066 = vmatprep.subr.bf16.mxu1 %v13477_v60  ;;  %v4359_v60 = vpack.c.bf16 %v4334_v40, %v4334_v40  ;;  %v4361_v9 = vpack.c.bf16 %v4336_v61, %v4336_v61  ;;  %v4187_v48 = vmul.f32 %v15127_v59, %v15032_v41 }
 0x25e   : > { %v4356_v6 = vpack.c.bf16 %v4331_v56, %v4331_v56 }
 0x25f   : > { %v4212_v3 = vmul.f32 %v4187_v48, %v15032_v41  ;;  %v13545_v48 = vld [vmem:[%s17278_s22 + $0x2e0] sm:$0xff]  }
 0x260   : > { %4110 = vmatpush1.bf16.msra.mxu0 %v13478_v63  ;;  %12067 = vmatpush3.bf16.msra.mxu1 %v13479_v0  ;;  %v4238_v63 = vadd.f32 %v4213_v53, %v15039_v46  ;;  %v4240_v0 = vadd.f32 %v4215_v54, %v15041_v52  ;;  %v4189_v54 = vmul.f32 %v4164_v36, %v15037_v45  ;;  %v13546_v36 = vld [vmem:[%s17278_s22 + $0x228] sm:$0xff]  }
 0x261   : > { %4111 = vmatprep.subr.bf16.mxu0 %v14460_v7  ;;  %12068 = vmatprep.subr.bf16.mxu1 %v13480_v1  ;;  %v13501_v1 = vld [vmem:[%s17278_s22 + $0x1c8] sm:$0xff]  }
 0x262   : > { %v4263_v12 = vmul.f32 0.7978846, %v4238_v63  ;;  %v14118_v25 = vpop.eup %14117  ;;  %v4237_v63 = vadd.f32 %v4212_v3, %v15032_v41 }
 0x263   : > { %v4308_v11 = vadd.f32 1.0, %v14118_v25 }
 0x264   : > { %4112 = vmatpush1.bf16.msra.mxu0 %v13481_v44  ;;  %12069 = vmatpush3.bf16.msra.mxu1 %v13482_v10  ;;  %v13504_v44 = vld [vmem:[%s17278_s22 + $0x158] sm:$0xff]   ;;  %v13505_v10 = vld [vmem:[%s17278_s22 + $0x1d0] sm:$0xff]   ;;  %14119 = vtanh.f32 %v4263_v12 }
 0x265   : > { %4113 = vmatprep.subr.bf16.mxu0 %v14460_v7  ;;  %12070 = vmatprep.subr.bf16.mxu1 %v13483_v13  ;;  %v4265_v13 = vmul.f32 0.7978846, %v4240_v0  ;;  %14121 = vtanh.f32 %v4260_v57  ;;  %v13528_v57 = vld [vmem:[%s17278_s22 + $0x248] sm:$0xff]   ;;  %v4214_v0 = vmul.f32 %v4189_v54, %v15037_v45 }
 0x267   : > { %14123 = vtanh.f32 %v4265_v13 }
 0x268   : > { %4114 = vmatpush1.bf16.msra.mxu0 %v13484_v15  ;;  %12071 = vmatpush3.bf16.msra.mxu1 %v13485_v16  ;;  %v13507_v15 = vld [vmem:[%s17278_s22 + $0x190] sm:$0xff]   ;;  %v13508_v16 = vld [vmem:[%s17278_s22 + $0x160] sm:$0xff]  }
 0x269   : > { %4115 = vmatprep.subr.bf16.mxu0 %v14460_v7  ;;  %12072 = vmatprep.subr.bf16.mxu1 %v13486_v42  ;;  %v13509_v42 = vld [vmem:[%s17278_s22 + $0x1d8] sm:$0xff]  }
 0x26c   : > { %4116 = vmatpush1.bf16.msra.mxu0 %v13487_v19  ;;  %12073 = vmatpush3.bf16.msra.mxu1 %v13488_v20  ;;  %v13512_v19 = vld [vmem:[%s17278_s22 + $0x168] sm:$0xff]   ;;  %v13513_v20 = vld [vmem:[%s17278_s22 + $0x1e0] sm:$0xff]  }
 0x26d   : > { %4117 = vmatprep.subr.bf16.mxu0 %v14460_v7  ;;  %12074 = vmatprep.subr.bf16.mxu1 %v13489_v23  ;;  %v13516_v23 = vld [vmem:[%s17278_s22 + $0x170] sm:$0xff]  }
 0x26e   : > { %v14120_v29 = vpop.eup %14119 }
 0x26f   : > { %v14122_v31 = vpop.eup %14121 }
 0x270   : > { %4118 = vmatpush1.bf16.msra.mxu0 %v3595_v33  ;;  %12075 = vmatpush3.bf16.msra.mxu1 %v13491_v30  ;;  %v13521_v30 = vld [vmem:[%s17278_s22 + $0x1f0] sm:$0xff]   ;;  %v4133_v33 = vmul.f32 0.5, %v14929_v2  ;;  %v4310_v40 = vadd.f32 1.0, %v14122_v31 }
 0x271   : > { %12076 = vmatprep.subr.bf16.mxu1 %v13492_v49  ;;  %12084 = vmatprep.subr.bf16.mxu0 %v13493_v35  ;;  %v4313_v49 = vadd.f32 1.0, %v14120_v29  ;;  %v14124_v35 = vpop.eup %14123  ;;  %v13540_v29 = vld [vmem:[%s17278_s22 + $0x260] sm:$0xff]  }
 0x272   : > { %v4333_v2 = vmul.f32 %v4308_v11, %v4133_v33  ;;  %v4315_v53 = vadd.f32 1.0, %v14124_v35  ;;  %v4335_v56 = vmul.f32 %v4310_v40, %v4135_v51  ;;  %v13544_v35 = vld [vmem:[%s17278_s22 + $0x268] sm:$0xff]   ;;  %v13548_v51 = vld [vmem:[%s17278_s22 + $0x270] sm:$0xff]  }
 0x273   : > { %4122 = vmatmul.mubr.bf16.vlgmr.msra.gmra.mrb[24].mxu0 %v14960_v50  ;;  %v13502_v50 = vld [vmem:[%s17278_s22 + $0x110] sm:$0xff]  }
 0x274   : > { %12077 = vmatpush3.bf16.msra.mxu1 %v13494_v38  ;;  %12085 = vmatpush3.bf16.msra.mxu0 %v13495_v39  ;;  %v13525_v38 = vld [vmem:[%s17278_s22 + $0x240] sm:$0xff]   ;;  %v4138_v39 = vmul.f32 0.5, %v15039_v46  ;;  %v4358_v46 = vpack.c.bf16 %v4333_v2, %v4333_v2  ;;  %v4340_v61 = vmul.f32 %v4315_v53, %v4140_v4  ;;  %v13549_v2 = vld [vmem:[%s17278_s22 + $0x2e8] sm:$0xff]   ;;  %v13552_v4 = vld [vmem:[%s17278_s22 + $0x278] sm:$0xff]  }
 0x275   : > { %5691 = vmatprep.mubr.bf16.mxu0 %v4359_v60  ;;  %12086 = vmatprep.subr.bf16.mxu0 %v13496_v43  ;;  %v13526_v43 = vld [vmem:[%s17278_s22 + $0x1b8] sm:$0xff]   ;;  %v13553_v53 = vld [vmem:[%s17278_s22 + $0x2f0] sm:$0xff]  }
 0x276   : > { %12106 = vmatprep.subr.bf16.mxu1 %v13497_v55  ;;  %v4338_v47 = vmul.f32 %v4313_v49, %v4138_v39  ;;  %v13527_v55 = vld [vmem:[%s17278_s22 + $0x200] sm:$0xff]   ;;  %v13543_v49 = vld [vmem:[%s17278_s22 + $0x298] sm:$0xff]  }
 0x277   : > { %5652 = vmatmul.mubr.bf16.vlgmr.msra.gmra.mrb[28].mxu1 %v4356_v6 }
 0x278   : > { %12087 = vmatpush3.bf16.msra.mxu0 %v13498_v58  ;;  %12107 = vmatpush3.bf16.msra.mxu1 %v13499_v5  ;;  %v13529_v58 = vld [vmem:[%s17278_s22 + $0x2c0] sm:$0xff]   ;;  %v4363_v60 = vpack.c.bf16 %v4338_v47, %v4338_v47  ;;  %v13551_v47 = vld [vmem:[%s17278_s22 + $0x2a8] sm:$0xff]  }
 0x279   : > { %5731 = vmatprep.mubr.bf16.mxu1 %v4361_v9  ;;  %12088 = vmatprep.subr.bf16.mxu0 %v13500_v62 }
 0x27a   : > { %12108 = vmatprep.subr.bf16.mxu1 %v13501_v1 }
 0x27c   : > { %12089 = vmatpush3.bf16.msra.mxu0 %v13502_v50  ;;  %12109 = vmatpush3.bf16.msra.mxu1 %v13503_v8  ;;  %v13530_v50 = vld [vmem:[%s17278_s22 + $0x208] sm:$0xff]   ;;  %v13531_v8 = vld [vmem:[%s17278_s22 + $0x280] sm:$0xff]  }
 0x27d   : > { %12090 = vmatprep.subr.bf16.mxu0 %v13504_v44  ;;  %12110 = vmatprep.subr.bf16.mxu1 %v13505_v10  ;;  %v4360_v44 = vpack.c.bf16 %v4335_v56, %v4335_v56  ;;  %v13532_v10 = vld [vmem:[%s17278_s22 + $0x250] sm:$0xff]  }
 0x280   : > { %12091 = vmatpush3.bf16.msra.mxu0 %v13506_v14  ;;  %12111 = vmatpush3.bf16.msra.mxu1 %v13507_v15  ;;  %v13533_v15 = vld [vmem:[%s17278_s22 + $0x2c8] sm:$0xff]  }
 0x281   : > { %12092 = vmatprep.subr.bf16.mxu0 %v13508_v16  ;;  %12112 = vmatprep.subr.bf16.mxu1 %v13509_v42  ;;  %v4365_v42 = vpack.c.bf16 %v4340_v61, %v4340_v61  ;;  %v4137_v61 = vmul.f32 0.5, %v15032_v41  ;;  %v13557_v41 = vld [vmem:[%s17278_s22 + $0x340] sm:$0xff]  }
 0x284   : > { %12093 = vmatpush3.bf16.msra.mxu0 %v13510_v17  ;;  %12113 = vmatpush3.bf16.msra.mxu1 %v13511_v18  ;;  %v4262_v18 = vmul.f32 0.7978846, %v4237_v63  ;;  %v13556_v63 = vld [vmem:[%s17278_s22 + $0x2f8] sm:$0xff]  }
 0x285   : > { %12094 = vmatprep.subr.bf16.mxu0 %v13512_v19  ;;  %12114 = vmatprep.subr.bf16.mxu1 %v13513_v20  ;;  %v4239_v19 = vadd.f32 %v4214_v0, %v15037_v45 }
 0x286   : > { %14125 = vtanh.f32 %v4262_v18  ;;  %v13562_v18 = vld [vmem:[%s17278_s22 + $0x308] sm:$0xff]  }
 0x287   : > { %v4264_v31 = vmul.f32 0.7978846, %v4239_v19  ;;  %v13563_v19 = vld [vmem:[%s17278_s22 + $0x380] sm:$0xff]  }
 0x288   : > { %12095 = vmatpush3.bf16.msra.mxu0 %v13514_v21  ;;  %12115 = vmatpush3.bf16.msra.mxu1 %v13515_v22  ;;  %v13534_v21 = vld [vmem:[%s17278_s22 + $0x210] sm:$0xff]   ;;  %v13535_v22 = vld [vmem:[%s17278_s22 + $0x288] sm:$0xff]  }
 0x289   : > { %12096 = vmatprep.subr.bf16.mxu0 %v13516_v23  ;;  %12116 = vmatprep.subr.bf16.mxu1 %v13517_v24  ;;  %v13536_v23 = vld [vmem:[%s17278_s22 + $0x258] sm:$0xff]   ;;  %v13537_v24 = vld [vmem:[%s17278_s22 + $0x2d0] sm:$0xff]  }
 0x28c   : > { %12097 = vmatpush3.bf16.msra.mxu0 %v13518_v26  ;;  %12117 = vmatpush3.bf16.msra.mxu1 %v13519_v27  ;;  %v13538_v27 = vld [vmem:[%s17278_s22 + $0x218] sm:$0xff]  }
 0x28d   : > { %12098 = vmatprep.subr.bf16.mxu0 %v13520_v28  ;;  %12118 = vmatprep.subr.bf16.mxu1 %v13521_v30  ;;  %v13539_v28 = vld [vmem:[%s17278_s22 + $0x290] sm:$0xff]   ;;  %v13541_v30 = vld [vmem:[%s17278_s22 + $0x2d8] sm:$0xff]  }
 0x290   : > { %12099 = vmatpush3.bf16.msra.mxu0 %v13522_v32  ;;  %12119 = vmatpush3.bf16.msra.mxu1 %v13523_v34  ;;  %v13542_v34 = vld [vmem:[%s17278_s22 + $0x220] sm:$0xff]   ;;  %v14126_v40 = vpop.eup %14125 }
 0x291   : > { %12120 = vmatprep.subr.bf16.mxu1 %v13524_v37  ;;  %12128 = vmatprep.subr.bf16.mxu0 %v13525_v38  ;;  %v13547_v37 = vld [vmem:[%s17278_s22 + $0x2a0] sm:$0xff]  }
 0x292   : > { %v15228_v52 = vpop.f32.mrb[12].mxu0  ;;  %v15233_v5 = vpop.f32.mrb[12].mxu1 }
 0x293   : > { %v15235_v59 = vpop.f32.mrb[13].mxu0  ;;  %5692 = vmatmul.mubr.bf16.vlgmr.msra.gmra.mrb[28].mxu0 %v4358_v46  ;;  %v15237_v62 = vpop.f32.mrb[13].mxu1  ;;  %v4166_v38 = vmul.f32 0.044715, %v15228_v52  ;;  %v4168_v39 = vmul.f32 0.044715, %v15233_v5 }
 0x294   : > { %v4167_v1 = vmul.f32 0.044715, %v15235_v59  ;;  %v3881_v6 = vpop.f32.mrb[14].mxu0  ;;  %12121 = vmatpush3.bf16.msra.mxu1 %v13526_v43  ;;  %12129 = vmatpush3.bf16.msra.mxu0 %v13527_v55  ;;  %v4169_v12 = vmul.f32 0.044715, %v15237_v62  ;;  %v3922_v13 = vpop.f32.mrb[14].mxu1 }
 0x295   : > { %5771 = vmatprep.mubr.bf16.mxu0 %v4363_v60  ;;  %v3882_v9 = vpop.f32.mrb[15].mxu0  ;;  %12130 = vmatprep.subr.bf16.mxu0 %v13528_v57  ;;  %v3923_v16 = vpop.f32.mrb[15].mxu1  ;;  %v13550_v43 = vld [vmem:[%s17278_s22 + $0x230] sm:$0xff]   ;;  %v4191_v3 = vmul.f32 %v4166_v38, %v15228_v52  ;;  %v4193_v55 = vmul.f32 %v4168_v39, %v15233_v5  ;;  %v4312_v46 = vadd.f32 1.0, %v14126_v40  ;;  %v13554_v57 = vld [vmem:[%s17278_s22 + $0x238] sm:$0xff]   ;;  %v13581_v39 = vld [vmem:[%s17278_s22 + $0x3e8] sm:$0xff]  }
 0x296   : > { %v4192_v14 = vmul.f32 %v4167_v1, %v15235_v59  ;;  %12150 = vmatprep.subr.bf16.mxu1 %v13529_v58  ;;  %v4194_v17 = vmul.f32 %v4169_v12, %v15237_v62  ;;  %v13555_v58 = vld [vmem:[%s17278_s22 + $0x2b0] sm:$0xff]   ;;  %v4139_v1 = vmul.f32 0.5, %v15037_v45  ;;  %v4142_v9 = vmul.f32 0.5, %v15235_v59  ;;  %v13558_v45 = vld [vmem:[%s17278_s22 + $0x2b8] sm:$0xff]  }
 0x297   : > { %5732 = vmatmul.mubr.bf16.vlgmr.msra.gmra.mrb[32].mxu1 %v4360_v44  ;;  %v4216_v6 = vmul.f32 %v4191_v3, %v15228_v52  ;;  %v4144_v12 = vmul.f32 0.5, %v15237_v62  ;;  %v13580_v38 = vld [vmem:[%s17278_s22 + $0x370] sm:$0xff]   ;;  %v4141_v40 = vmul.f32 0.5, %v15228_v52  ;;  %v13584_v3 = vld [vmem:[%s17278_s22 + $0x378] sm:$0xff]  }
 0x298   : > { %v4217_v20 = vmul.f32 %v4192_v14, %v15235_v59  ;;  %12131 = vmatpush3.bf16.msra.mxu0 %v13530_v50  ;;  %12151 = vmatpush3.bf16.msra.mxu1 %v13531_v8  ;;  %v4219_v25 = vmul.f32 %v4194_v17, %v15237_v62  ;;  %v4218_v50 = vmul.f32 %v4193_v55, %v15233_v5  ;;  %v13586_v55 = vld [vmem:[%s17278_s22 + $0x338] sm:$0xff]  }
 0x299   : > { %5811 = vmatprep.mubr.bf16.mxu1 %v4365_v42  ;;  %12132 = vmatprep.subr.bf16.mxu0 %v13532_v10  ;;  %v4337_v8 = vmul.f32 %v4312_v46, %v4137_v61  ;;  %v13559_v10 = vld [vmem:[%s17278_s22 + $0x300] sm:$0xff]   ;;  %v4241_v16 = vadd.f32 %v4216_v6, %v15228_v52  ;;  %v4143_v52 = vmul.f32 0.5, %v15233_v5  ;;  %v13587_v46 = vld [vmem:[%s17278_s22 + $0x3b0] sm:$0xff]   ;;  %v13590_v61 = vld [vmem:[%s17278_s22 + $0x3b8] sm:$0xff]  }
 0x29a   : > { %v4242_v26 = vadd.f32 %v4217_v20, %v15235_v59  ;;  %12152 = vmatprep.subr.bf16.mxu1 %v13533_v15  ;;  %v4244_v11 = vadd.f32 %v4219_v25, %v15237_v62  ;;  %v13560_v15 = vld [vmem:[%s17278_s22 + $0x348] sm:$0xff]   ;;  %v13561_v59 = vld [vmem:[%s17278_s22 + $0x3c0] sm:$0xff]   ;;  %v4243_v42 = vadd.f32 %v4218_v50, %v15233_v5 }
 0x29b   : > { %v4362_v17 = vpack.c.bf16 %v4337_v8, %v4337_v8  ;;  %v13591_v6 = vld [vmem:[%s17278_s22 + $0x400] sm:$0xff]   ;;  %v13592_v50 = vld [vmem:[%s17278_s22 + $0x448] sm:$0xff]  }
 0x29c   : > { %v4267_v32 = vmul.f32 0.7978846, %v4242_v26  ;;  %12133 = vmatpush3.bf16.msra.mxu0 %v13534_v21  ;;  %12153 = vmatpush3.bf16.msra.mxu1 %v13535_v22  ;;  %v4269_v33 = vmul.f32 0.7978846, %v4244_v11  ;;  %v13564_v22 = vld [vmem:[%s17278_s22 + $0x350] sm:$0xff]  }
 0x29d   : > { %12134 = vmatprep.subr.bf16.mxu0 %v13536_v23  ;;  %12154 = vmatprep.subr.bf16.mxu1 %v13537_v24  ;;  %v13565_v23 = vld [vmem:[%s17278_s22 + $0x3c8] sm:$0xff]   ;;  %v4266_v24 = vmul.f32 0.7978846, %v4241_v16  ;;  %v4268_v25 = vmul.f32 0.7978846, %v4243_v42  ;;  %v13569_v11 = vld [vmem:[%s17278_s22 + $0x3d0] sm:$0xff]  }
 0x29e   : > { %14127 = vtanh.f32 %v4267_v32  ;;  %v13571_v32 = vld [vmem:[%s17278_s22 + $0x390] sm:$0xff]  }
 0x29f   : > { %14129 = vtanh.f32 %v4264_v31  ;;  %v13570_v31 = vld [vmem:[%s17278_s22 + $0x318] sm:$0xff]  }
 0x2a0   : > { %12135 = vmatpush3.bf16.msra.mxu0 %v13538_v27  ;;  %12155 = vmatpush3.bf16.msra.mxu1 %v13539_v28  ;;  %14131 = vtanh.f32 %v4269_v33  ;;  %v13566_v27 = vld [vmem:[%s17278_s22 + $0x310] sm:$0xff]   ;;  %v13567_v28 = vld [vmem:[%s17278_s22 + $0x388] sm:$0xff]   ;;  %v13572_v33 = vld [vmem:[%s17278_s22 + $0x360] sm:$0xff]  }
 0x2a1   : > { %12136 = vmatprep.subr.bf16.mxu0 %v13540_v29  ;;  %12156 = vmatprep.subr.bf16.mxu1 %v13541_v30  ;;  %v13568_v30 = vld [vmem:[%s17278_s22 + $0x358] sm:$0xff]   ;;  %14133 = vtanh.f32 %v4266_v24 }
 0x2a2   : > { %14135 = vtanh.f32 %v4268_v25  ;;  %v13596_v25 = vld [vmem:[%s17278_s22 + $0x450] sm:$0xff]  }
 0x2a4   : > { %12137 = vmatpush3.bf16.msra.mxu0 %v13542_v34  ;;  %12157 = vmatpush3.bf16.msra.mxu1 %v13543_v49  ;;  %v13573_v34 = vld [vmem:[%s17278_s22 + $0x3d8] sm:$0xff]   ;;  %v13574_v49 = vld [vmem:[%s17278_s22 + $0x320] sm:$0xff]  }
 0x2a5   : > { %12138 = vmatprep.subr.bf16.mxu0 %v13544_v35  ;;  %12158 = vmatprep.subr.bf16.mxu1 %v13545_v48  ;;  %v13575_v35 = vld [vmem:[%s17278_s22 + $0x398] sm:$0xff]   ;;  %v13576_v48 = vld [vmem:[%s17278_s22 + $0x368] sm:$0xff]  }
 0x2a8   : > { %12139 = vmatpush3.bf16.msra.mxu0 %v13546_v36  ;;  %12159 = vmatpush3.bf16.msra.mxu1 %v13547_v37  ;;  %v14128_v54 = vpop.eup %14127  ;;  %v13577_v36 = vld [vmem:[%s17278_s22 + $0x3e0] sm:$0xff]   ;;  %v13578_v37 = vld [vmem:[%s17278_s22 + $0x328] sm:$0xff]  }
 0x2a9   : > { %12140 = vmatprep.subr.bf16.mxu0 %v13548_v51  ;;  %12160 = vmatprep.subr.bf16.mxu1 %v13549_v2  ;;  %v14130_v56 = vpop.eup %14129  ;;  %v4317_v0 = vadd.f32 1.0, %v14128_v54  ;;  %v13579_v51 = vld [vmem:[%s17278_s22 + $0x3a0] sm:$0xff]   ;;  %v13585_v54 = vld [vmem:[%s17278_s22 + $0x3f0] sm:$0xff]  }
 0x2aa   : > { %v14132_v60 = vpop.eup %14131  ;;  %v4314_v44 = vadd.f32 1.0, %v14130_v56 }
 0x2ab   : > { %v4319_v13 = vadd.f32 1.0, %v14132_v60  ;;  %v4342_v14 = vmul.f32 %v4317_v0, %v4142_v9  ;;  %v14134_v2 = vpop.eup %14133 }
 0x2ac   : > { %12141 = vmatpush3.bf16.msra.mxu0 %v13550_v43  ;;  %12161 = vmatpush3.bf16.msra.mxu1 %v13551_v47  ;;  %v4339_v62 = vmul.f32 %v4314_v44, %v4139_v1  ;;  %v13582_v43 = vld [vmem:[%s17278_s22 + $0x330] sm:$0xff]   ;;  %v13583_v47 = vld [vmem:[%s17278_s22 + $0x3a8] sm:$0xff]  }
 0x2ad   : > { %12142 = vmatprep.subr.bf16.mxu0 %v13552_v4  ;;  %12162 = vmatprep.subr.bf16.mxu1 %v13553_v53  ;;  %v4344_v20 = vmul.f32 %v4319_v13, %v4144_v12  ;;  %v4367_v21 = vpack.c.bf16 %v4342_v14, %v4342_v14  ;;  %v4316_v4 = vadd.f32 1.0, %v14134_v2  ;;  %v14136_v53 = vpop.eup %14135 }
 0x2ae   : > { %v4364_v26 = vpack.c.bf16 %v4339_v62, %v4339_v62  ;;  %v4318_v56 = vadd.f32 1.0, %v14136_v53  ;;  %v13594_v62 = vld [vmem:[%s17278_s22 + $0x408] sm:$0xff]  }
 0x2af   : > { %v4369_v29 = vpack.c.bf16 %v4344_v20, %v4344_v20  ;;  %v4341_v5 = vmul.f32 %v4316_v4, %v4141_v40  ;;  %v13604_v40 = vld [vmem:[%s17278_s22 + $0x460] sm:$0xff]   ;;  %v13607_v4 = vld [vmem:[%s17278_s22 + $0x498] sm:$0xff]   ;;  %v13608_v53 = vld [vmem:[%s17278_s22 + $0x468] sm:$0xff]  }
 0x2b0   : > { %12143 = vmatpush3.bf16.msra.mxu0 %v13554_v57  ;;  %12163 = vmatpush3.bf16.msra.mxu1 %v13555_v58  ;;  %v13588_v57 = vld [vmem:[%s17278_s22 + $0x3f8] sm:$0xff]   ;;  %v13589_v58 = vld [vmem:[%s17278_s22 + $0x440] sm:$0xff]  }
 0x2b1   : > { %12164 = vmatprep.subr.bf16.mxu1 %v13556_v63  ;;  %12172 = vmatprep.subr.bf16.mxu0 %v13557_v41  ;;  %v4366_v44 = vpack.c.bf16 %v4341_v5, %v4341_v5 }
 0x2b3   : > { %5772 = vmatmul.mubr.bf16.vlgmr.msra.gmra.mrb[32].mxu0 %v4362_v17 }
 0x2b4   : > { %12165 = vmatpush3.bf16.msra.mxu1 %v13558_v45  ;;  %12173 = vmatpush3.bf16.msra.mxu0 %v13559_v10  ;;  %v4343_v45 = vmul.f32 %v4318_v56, %v4143_v52  ;;  %v13593_v10 = vld [vmem:[%s17278_s22 + $0x4c0] sm:$0xff]   ;;  %v13613_v56 = vld [vmem:[%s17278_s22 + $0x4e8] sm:$0xff]  }
 0x2b5   : > { %5851 = vmatprep.mubr.bf16.mxu0 %v4367_v21  ;;  %12174 = vmatprep.subr.bf16.mxu0 %v13560_v15  ;;  %v13611_v52 = vld [vmem:[%s17278_s22 + $0x4a0] sm:$0xff]  }
 0x2b6   : > { %12194 = vmatprep.subr.bf16.mxu1 %v13561_v59 }
 0x2b7   : > { %5812 = vmatmul.mubr.bf16.vlgmr.msra.gmra.mrb[36].mxu1 %v4364_v26  ;;  %v13597_v26 = vld [vmem:[%s17278_s22 + $0x4c8] sm:$0xff]  }
 0x2b8   : > { %12175 = vmatpush3.bf16.msra.mxu0 %v13562_v18  ;;  %12195 = vmatpush3.bf16.msra.mxu1 %v13563_v19  ;;  %v13595_v18 = vld [vmem:[%s17278_s22 + $0x480] sm:$0xff]  }
 0x2b9   : > { %12176 = vmatprep.subr.bf16.mxu0 %v13564_v22  ;;  %12196 = vmatprep.subr.bf16.mxu1 %v13565_v23 }
 0x2ba   : > { %5891 = vmatprep.mubr.bf16.mxu1 %v4369_v29 }
 0x2bc   : > { %12177 = vmatpush3.bf16.msra.mxu0 %v13566_v27  ;;  %12197 = vmatpush3.bf16.msra.mxu1 %v13567_v28 }
 0x2bd   : > { %12178 = vmatprep.subr.bf16.mxu0 %v13568_v30  ;;  %12198 = vmatprep.subr.bf16.mxu1 %v13569_v11  ;;  %v4368_v30 = vpack.c.bf16 %v4343_v45, %v4343_v45  ;;  %v13618_v45 = vld [vmem:[%s17278_s22 + $0x438] sm:$0xff]  }
 0x2c0   : > { %12179 = vmatpush3.bf16.msra.mxu0 %v13570_v31  ;;  %12199 = vmatpush3.bf16.msra.mxu1 %v13571_v32 }
 0x2c1   : > { %12180 = vmatprep.subr.bf16.mxu0 %v13572_v33  ;;  %12200 = vmatprep.subr.bf16.mxu1 %v13573_v34  ;;  %v13598_v33 = vld [vmem:[%s17278_s22 + $0x410] sm:$0xff]   ;;  %v13599_v34 = vld [vmem:[%s17278_s22 + $0x488] sm:$0xff]  }
 0x2c4   : > { %12181 = vmatpush3.bf16.msra.mxu0 %v13574_v49  ;;  %12201 = vmatpush3.bf16.msra.mxu1 %v13575_v35 }
 0x2c5   : > { %12182 = vmatprep.subr.bf16.mxu0 %v13576_v48  ;;  %12202 = vmatprep.subr.bf16.mxu1 %v13577_v36  ;;  %v13600_v48 = vld [vmem:[%s17278_s22 + $0x458] sm:$0xff]   ;;  %v13601_v36 = vld [vmem:[%s17278_s22 + $0x4d0] sm:$0xff]  }
 0x2c8   : > { %12183 = vmatpush3.bf16.msra.mxu0 %v13578_v37  ;;  %12203 = vmatpush3.bf16.msra.mxu1 %v13579_v51 }
 0x2c9   : > { %12184 = vmatprep.subr.bf16.mxu0 %v13580_v38  ;;  %12204 = vmatprep.subr.bf16.mxu1 %v13581_v39  ;;  %v13602_v38 = vld [vmem:[%s17278_s22 + $0x418] sm:$0xff]   ;;  %v13603_v39 = vld [vmem:[%s17278_s22 + $0x490] sm:$0xff]  }
 0x2cc   : > { %12185 = vmatpush3.bf16.msra.mxu0 %v13582_v43  ;;  %12205 = vmatpush3.bf16.msra.mxu1 %v13583_v47  ;;  %v13605_v43 = vld [vmem:[%s17278_s22 + $0x4d8] sm:$0xff]   ;;  %v13606_v47 = vld [vmem:[%s17278_s22 + $0x420] sm:$0xff]  }
 0x2cd   : > { %12186 = vmatprep.subr.bf16.mxu0 %v13584_v3  ;;  %12206 = vmatprep.subr.bf16.mxu1 %v13585_v54  ;;  %v13609_v3 = vld [vmem:[%s17278_s22 + $0x4e0] sm:$0xff]   ;;  %v13610_v54 = vld [vmem:[%s17278_s22 + $0x428] sm:$0xff]  }
 0x2ce   : > { %v3959_v60 = vpop.f32.mrb[16].mxu0  ;;  %v4000_v63 = vpop.f32.mrb[16].mxu1 }
 0x2cf   : > { %v4170_v0 = vmul.f32 0.044715, %v3959_v60  ;;  %v3961_v1 = vpop.f32.mrb[17].mxu0  ;;  %v4002_v8 = vpop.f32.mrb[17].mxu1  ;;  %v4172_v12 = vmul.f32 0.044715, %v4000_v63 }
 0x2d0   : > { %v4171_v41 = vmul.f32 0.044715, %v3961_v1  ;;  %v3963_v9 = vpop.f32.mrb[18].mxu0  ;;  %12187 = vmatpush3.bf16.msra.mxu0 %v13586_v55  ;;  %12207 = vmatpush3.bf16.msra.mxu1 %v13587_v46  ;;  %v15456_v13 = vmul.f32 0.5, %v3959_v60  ;;  %v15458_v16 = vmul.f32 0.5, %v4000_v63  ;;  %v4004_v42 = vpop.f32.mrb[18].mxu1 }
 0x2d1   : > { %v4195_v14 = vmul.f32 %v4170_v0, %v3959_v60  ;;  %v3964_v15 = vpop.f32.mrb[19].mxu0  ;;  %12208 = vmatprep.subr.bf16.mxu1 %v13588_v57  ;;  %12216 = vmatprep.subr.bf16.mxu0 %v13589_v58  ;;  %v4173_v59 = vmul.f32 0.044715, %v4002_v8  ;;  %v4197_v19 = vmul.f32 %v4172_v12, %v4000_v63  ;;  %v15466_v20 = vmul.f32 0.5, %v3961_v1  ;;  %v4005_v22 = vpop.f32.mrb[19].mxu1  ;;  %v13612_v46 = vld [vmem:[%s17278_s22 + $0x470] sm:$0xff]  }
 0x2d2   : > { %v4196_v17 = vmul.f32 %v4171_v41, %v3961_v1  ;;  %v15468_v21 = vmul.f32 0.5, %v4002_v8  ;;  %v13614_v0 = vld [vmem:[%s17278_s22 + $0x430] sm:$0xff]   ;;  %v13620_v15 = vld [vmem:[%s17278_s22 + $0x4f8] sm:$0xff]   ;;  %v13623_v42 = vld [vmem:[%s17278_s22 + $0x500] sm:$0xff]  }
 0x2d3   : > { %v4220_v23 = vmul.f32 %v4195_v14, %v3959_v60  ;;  %5852 = vmatmul.mubr.bf16.vlgmr.msra.gmra.mrb[36].mxu0 %v4366_v44  ;;  %v4198_v24 = vmul.f32 %v4173_v59, %v4002_v8  ;;  %v4222_v28 = vmul.f32 %v4197_v19, %v4000_v63  ;;  %v13617_v41 = vld [vmem:[%s17278_s22 + $0x4f0] sm:$0xff]   ;;  %v13622_v14 = vld [vmem:[%s17278_s22 + $0x540] sm:$0xff]  }
 0x2d4   : > { %v4221_v27 = vmul.f32 %v4196_v17, %v3961_v1  ;;  %12209 = vmatpush3.bf16.msra.mxu1 %v13590_v61  ;;  %12217 = vmatpush3.bf16.msra.mxu0 %v13591_v6  ;;  %v13616_v6 = vld [vmem:[%s17278_s22 + $0x478] sm:$0xff]  }
 0x2d5   : > { %v4245_v29 = vadd.f32 %v4220_v23, %v3959_v60  ;;  %12218 = vmatprep.subr.bf16.mxu0 %v13592_v50  ;;  %12238 = vmatprep.subr.bf16.mxu1 %v13593_v10  ;;  %v4223_v11 = vmul.f32 %v4198_v24, %v4002_v8  ;;  %v4247_v32 = vadd.f32 %v4222_v28, %v4000_v63  ;;  %v13619_v10 = vld [vmem:[%s17278_s22 + $0x4b0] sm:$0xff]   ;;  %v13621_v17 = vld [vmem:[%s17278_s22 + $0x4b8] sm:$0xff]   ;;  %v13628_v23 = vld [vmem:[%s17278_s22 + $0x5c8] sm:$0xff]  }
 0x2d6   : > { %v4246_v31 = vadd.f32 %v4221_v27, %v3961_v1  ;;  %v13615_v1 = vld [vmem:[%s17278_s22 + $0x4a8] sm:$0xff]   ;;  %v13631_v24 = vld [vmem:[%s17278_s22 + $0x510] sm:$0xff]   ;;  %v13635_v28 = vld [vmem:[%s17278_s22 + $0x518] sm:$0xff]  }
 0x2d7   : > { %v4270_v49 = vmul.f32 0.7978846, %v4245_v29  ;;  %5892 = vmatmul.mubr.bf16.vlgmr.msra.gmra.mrb[40].mxu1 %v4368_v30  ;;  %v4248_v35 = vadd.f32 %v4223_v11, %v4002_v8  ;;  %v4272_v51 = vmul.f32 0.7978846, %v4247_v32  ;;  %v13632_v27 = vld [vmem:[%s17278_s22 + $0x5d0] sm:$0xff]   ;;  %v13638_v30 = vld [vmem:[%s17278_s22 + $0x560] sm:$0xff]  }
 0x2d8   : > { %v4271_v37 = vmul.f32 0.7978846, %v4246_v31  ;;  %12219 = vmatpush3.bf16.msra.mxu0 %v13594_v62  ;;  %12239 = vmatpush3.bf16.msra.mxu1 %v13595_v18  ;;  %v13626_v62 = vld [vmem:[%s17278_s22 + $0x548] sm:$0xff]   ;;  %v13633_v29 = vld [vmem:[%s17278_s22 + $0x590] sm:$0xff]   ;;  %v13636_v11 = vld [vmem:[%s17278_s22 + $0x5d8] sm:$0xff]  }
 0x2d9   : > { %14137 = vtanh.f32 %v4270_v49  ;;  %v4273_v2 = vmul.f32 0.7978846, %v4248_v35  ;;  %12220 = vmatprep.subr.bf16.mxu0 %v13596_v25  ;;  %12240 = vmatprep.subr.bf16.mxu1 %v13597_v26  ;;  %v13629_v25 = vld [vmem:[%s17278_s22 + $0x588] sm:$0xff]   ;;  %v13634_v26 = vld [vmem:[%s17278_s22 + $0x558] sm:$0xff]   ;;  %v13639_v31 = vld [vmem:[%s17278_s22 + $0x520] sm:$0xff]  }
 0x2da   : > { %14139 = vtanh.f32 %v4272_v51  ;;  %v13637_v32 = vld [vmem:[%s17278_s22 + $0x598] sm:$0xff]   ;;  %v13643_v49 = vld [vmem:[%s17278_s22 + $0x528] sm:$0xff]   ;;  %v13641_v35 = vld [vmem:[%s17278_s22 + $0x5a0] sm:$0xff]  }
 0x2db   : > { %14141 = vtanh.f32 %v4271_v37  ;;  %v13647_v37 = vld [vmem:[%s17278_s22 + $0x530] sm:$0xff]   ;;  %v13645_v51 = vld [vmem:[%s17278_s22 + $0x5a8] sm:$0xff]  }
 0x2dc   : > { %12221 = vmatpush3.bf16.msra.mxu0 %v13598_v33  ;;  %12241 = vmatpush3.bf16.msra.mxu1 %v13599_v34  ;;  %14143 = vtanh.f32 %v4273_v2  ;;  %v13642_v33 = vld [vmem:[%s17278_s22 + $0x568] sm:$0xff]   ;;  %v13640_v34 = vld [vmem:[%s17278_s22 + $0x5e0] sm:$0xff]   ;;  %v13650_v2 = vld [vmem:[%s17278_s22 + $0x578] sm:$0xff]  }
 0x2dd   : > { %12222 = vmatprep.subr.bf16.mxu0 %v13600_v48  ;;  %12242 = vmatprep.subr.bf16.mxu1 %v13601_v36  ;;  %v13646_v48 = vld [vmem:[%s17278_s22 + $0x570] sm:$0xff]   ;;  %v13644_v36 = vld [vmem:[%s17278_s22 + $0x5e8] sm:$0xff]  }
 0x2e0   : > { %12223 = vmatpush3.bf16.msra.mxu0 %v13602_v38  ;;  %12243 = vmatpush3.bf16.msra.mxu1 %v13603_v39  ;;  %v13648_v38 = vld [vmem:[%s17278_s22 + $0x5f0] sm:$0xff]  }
 0x2e1   : > { %12224 = vmatprep.subr.bf16.mxu0 %v13604_v40  ;;  %12244 = vmatprep.subr.bf16.mxu1 %v13605_v43  ;;  %v13651_v43 = vld [vmem:[%s17278_s22 + $0x538] sm:$0xff]  }
 0x2e3   : > { %v14138_v55 = vpop.eup %14137 }
 0x2e4   : > { %v14140_v57 = vpop.eup %14139  ;;  %12225 = vmatpush3.bf16.msra.mxu0 %v13606_v47  ;;  %12245 = vmatpush3.bf16.msra.mxu1 %v13607_v4  ;;  %v4320_v58 = vadd.f32 1.0, %v14138_v55 }
 0x2e5   : > { %v14142_v5 = vpop.eup %14141  ;;  %12226 = vmatprep.subr.bf16.mxu0 %v13608_v53  ;;  %12246 = vmatprep.subr.bf16.mxu1 %v13609_v3  ;;  %v4322_v60 = vadd.f32 1.0, %v14140_v57  ;;  %v13652_v57 = vld [vmem:[%s17278_s22 + $0x5f8] sm:$0xff]  }
 0x2e6   : > { %v14144_v61 = vpop.eup %14143  ;;  %v4321_v63 = vadd.f32 1.0, %v14142_v5  ;;  %v4345_v59 = vmul.f32 %v4320_v58, %v15456_v13  ;;  %v13624_v13 = vld [vmem:[%s17278_s22 + $0x5c0] sm:$0xff]  }
 0x2e7   : > { %v4323_v50 = vadd.f32 1.0, %v14144_v61  ;;  %v4347_v18 = vmul.f32 %v4322_v60, %v15458_v16  ;;  %v13630_v16 = vld [vmem:[%s17278_s22 + $0x550] sm:$0xff]  }
 0x2e8   : > { %12227 = vmatpush3.bf16.msra.mxu0 %v13610_v54  ;;  %12247 = vmatpush3.bf16.msra.mxu1 %v13611_v52  ;;  %v4346_v8 = vmul.f32 %v4321_v63, %v15466_v20  ;;  %v4370_v19 = vpack.c.bf16 %v4345_v59, %v4345_v59  ;;  %v13627_v20 = vld [vmem:[%s17278_s22 + $0x508] sm:$0xff]   ;;  %v13649_v52 = vld [vmem:[%s17278_s22 + $0x5b0] sm:$0xff]  }
 0x2e9   : > { %12228 = vmatprep.subr.bf16.mxu0 %v13612_v46  ;;  %12248 = vmatprep.subr.bf16.mxu1 %v13613_v56  ;;  %v4348_v9 = vmul.f32 %v4323_v50, %v15468_v21  ;;  %v13625_v21 = vld [vmem:[%s17278_s22 + $0x580] sm:$0xff]   ;;  %v4372_v22 = vpack.c.bf16 %v4347_v18, %v4347_v18 }
 0x2ea   : > { %v4371_v44 = vpack.c.bf16 %v4346_v8, %v4346_v8 }
 0x2eb   : > { %v4373_v12 = vpack.c.bf16 %v4348_v9, %v4348_v9  ;;  %v13653_v9 = vld [vmem:[%s17278_s22 + $0x5b8] sm:$0xff]  }
 0x2ec   : > { %5931 = vmatprep.mubr.bf16.mxu0 %v4371_v44  ;;  %12229 = vmatpush3.bf16.msra.mxu0 %v13614_v0 }
 0x2ed   : > { %12249 = vmatpush3.bf16.msra.mxu1 %v13615_v1  ;;  %12230 = vmatprep.subr.bf16.mxu0 %v13616_v6 }
 0x2ee   : > { %12250 = vmatprep.subr.bf16.mxu1 %v13617_v41  ;;  %5971 = vmatprep.mubr.bf16.mxu1 %v4373_v12 }
 0x2f0   : > { %12231 = vmatpush3.bf16.msra.mxu0 %v13618_v45 }
 0x2f1   : > { %12251 = vmatpush3.bf16.msra.mxu1 %v13619_v10  ;;  %12260 = vmatprep.subr.bf16.mxu0 %v13622_v14  ;;  %v14461_v14 = vmov 0.0  }
 0x2f2   : > { %12252 = vmatprep.subr.bf16.mxu1 %v13620_v15 }
 0x2f3   : > { %5932 = vmatmul.mubr.bf16.vlgmr.msra.gmra.mrb[40].mxu0 %v4370_v19 }
 0x2f4   : > { %12261 = vmatpush3.bf16.msra.mxu0 %v13623_v42 }
 0x2f5   : > { %12253 = vmatpush3.bf16.msra.mxu1 %v13621_v17  ;;  %12262 = vmatprep.subr.bf16.mxu0 %v13626_v62 }
 0x2f6   : > { %12282 = vmatprep.subr.bf16.mxu1 %v13624_v13 }
 0x2f8   : > { %5972 = vmatmul.mubr.bf16.vlgmr.msra.gmra.mrb[44].mxu1 %v4372_v22  ;;  %12263 = vmatpush3.bf16.msra.mxu0 %v13627_v20 }
 0x2f9   : > { %12283 = vmatpush3.bf16.msra.mxu1 %v13625_v21  ;;  %12264 = vmatprep.subr.bf16.mxu0 %v13630_v16 }
 0x2fa   : > { %12284 = vmatprep.subr.bf16.mxu1 %v13628_v23 }
 0x2fc   : > { %12265 = vmatpush3.bf16.msra.mxu0 %v13631_v24 }
 0x2fd   : > { %12285 = vmatpush3.bf16.msra.mxu1 %v13629_v25  ;;  %12266 = vmatprep.subr.bf16.mxu0 %v13634_v26 }
 0x2fe   : > { %12286 = vmatprep.subr.bf16.mxu1 %v13632_v27 }
 0x300   : > { %12267 = vmatpush3.bf16.msra.mxu0 %v13635_v28 }
 0x301   : > { %12287 = vmatpush3.bf16.msra.mxu1 %v13633_v29  ;;  %12268 = vmatprep.subr.bf16.mxu0 %v13638_v30  ;;  %v13654_v29 = vld [vmem:[%s17278_s22 + $0x600] sm:$0xff]  }
 0x302   : > { %12288 = vmatprep.subr.bf16.mxu1 %v13636_v11 }
 0x304   : > { %12269 = vmatpush3.bf16.msra.mxu0 %v13639_v31 }
 0x305   : > { %12289 = vmatpush3.bf16.msra.mxu1 %v13637_v32  ;;  %12270 = vmatprep.subr.bf16.mxu0 %v13642_v33 }
 0x306   : > { %12290 = vmatprep.subr.bf16.mxu1 %v13640_v34  ;;  %v13655_v34 = vld [vmem:[%s17278_s22 + $0x608] sm:$0xff]  }
 0x308   : > { %12271 = vmatpush3.bf16.msra.mxu0 %v13643_v49 }
 0x309   : > { %12291 = vmatpush3.bf16.msra.mxu1 %v13641_v35  ;;  %12272 = vmatprep.subr.bf16.mxu0 %v13646_v48 }
 0x30a   : > { %v4041_v39 = vpop.f32.mrb[20].mxu0  ;;  %v4082_v40 = vpop.f32.mrb[20].mxu1  ;;  %12292 = vmatprep.subr.bf16.mxu1 %v13644_v36 }
 0x30b   : > { %v4149_v47 = vmul.f32 0.5, %v4041_v39  ;;  %v4174_v4 = vmul.f32 0.044715, %v4041_v39  ;;  %v4043_v53 = vpop.f32.mrb[21].mxu0  ;;  %v4151_v3 = vmul.f32 0.5, %v4082_v40  ;;  %v4084_v54 = vpop.f32.mrb[21].mxu1 }
 0x30c   : > { %v4175_v55 = vmul.f32 0.044715, %v4043_v53  ;;  %v4045_v46 = vpop.f32.mrb[22].mxu0  ;;  %v4176_v56 = vmul.f32 0.044715, %v4082_v40  ;;  %12273 = vmatpush3.bf16.msra.mxu0 %v13647_v37  ;;  %v4150_v58 = vmul.f32 0.5, %v4043_v53 }
 0x30d   : > { %v4199_v5 = vmul.f32 %v4174_v4, %v4041_v39  ;;  %v4046_v60 = vpop.f32.mrb[23].mxu0  ;;  %v4177_v61 = vmul.f32 0.044715, %v4084_v54  ;;  %12293 = vmatpush3.bf16.msra.mxu1 %v13645_v51  ;;  %12274 = vmatprep.subr.bf16.mxu0 %v13650_v2  ;;  %v4086_v63 = vpop.f32.mrb[22].mxu1  ;;  %v4152_v0 = vmul.f32 0.5, %v4084_v54  ;;  %v13656_v37 = vld [vmem:[%s17278_s22 + $0x610] sm:$0xff]  }
 0x30e   : > { %v4200_v1 = vmul.f32 %v4175_v55, %v4043_v53  ;;  %v4201_v6 = vmul.f32 %v4176_v56, %v4082_v40  ;;  %12294 = vmatprep.subr.bf16.mxu1 %v13648_v38  ;;  %v4087_v50 = vpop.f32.mrb[23].mxu1  ;;  %v13657_v2 = vld [vmem:[%s17278_s22 + $0x618] sm:$0xff]   ;;  %v13658_v38 = vld [vmem:[%s17278_s22 + $0x620] sm:$0xff]  }
 0x30f   : > { %v4224_v8 = vmul.f32 %v4199_v5, %v4041_v39  ;;  %v4202_v41 = vmul.f32 %v4177_v61, %v4084_v54 }
 0x310   : > { %v4225_v44 = vmul.f32 %v4200_v1, %v4043_v53  ;;  %v4226_v45 = vmul.f32 %v4201_v6, %v4082_v40  ;;  %12275 = vmatpush3.bf16.msra.mxu0 %v13651_v43  ;;  %v13661_v43 = vld [vmem:[%s17278_s22 + $0x638] sm:$0xff]  }
 0x311   : > { %v4249_v10 = vadd.f32 %v4224_v8, %v4041_v39  ;;  %v4227_v12 = vmul.f32 %v4202_v41, %v4084_v54  ;;  %12295 = vmatpush3.bf16.msra.mxu1 %v13649_v52  ;;  %12569 = vmatprep.subr.bf16.mxu0 %v14461_v14  ;;  %v13659_v39 = vld [vmem:[%s17278_s22 + $0x628] sm:$0xff]  }
 0x312   : > { %v4250_v15 = vadd.f32 %v4225_v44, %v4043_v53  ;;  %v4251_v59 = vadd.f32 %v4226_v45, %v4082_v40  ;;  %12296 = vmatprep.subr.bf16.mxu1 %v13652_v57  ;;  %v13660_v40 = vld [vmem:[%s17278_s22 + $0x630] sm:$0xff]  }
 0x313   : > { %v4274_v42 = vmul.f32 0.7978846, %v4249_v10  ;;  %v4252_v17 = vadd.f32 %v4227_v12, %v4084_v54 }
 0x314   : > { %v4275_v62 = vmul.f32 0.7978846, %v4250_v15  ;;  %v4276_v18 = vmul.f32 0.7978846, %v4251_v59 }
 0x315   : > { %14145 = vtanh.f32 %v4274_v42  ;;  %v4277_v13 = vmul.f32 0.7978846, %v4252_v17  ;;  %12297 = vmatpush3.bf16.msra.mxu1 %v13653_v9 }
 0x316   : > { %14147 = vtanh.f32 %v4276_v18  ;;  %12589 = vmatprep.subr.bf16.mxu1 %v14461_v14 }
 0x317   : > { %14149 = vtanh.f32 %v4275_v62 }
 0x318   : > { %14151 = vtanh.f32 %v4277_v13  ;;  %v13662_v13 = vld [vmem:[%s17279_s29] sm:$0xff]   ;;  %s14464_s29 = smov 32  }
 0x31f   : > { %v14146_v19 = vpop.eup %14145 }
 0x320   : > { %v14148_v20 = vpop.eup %14147  ;;  %v4324_v21 = vadd.f32 1.0, %v14146_v19 }
 0x321   : > { %v14150_v16 = vpop.eup %14149  ;;  %v4326_v22 = vadd.f32 1.0, %v14148_v20 }
 0x322   : > { %v14152_v23 = vpop.eup %14151  ;;  %v4325_v24 = vadd.f32 1.0, %v14150_v16  ;;  %v4349_v25 = vmul.f32 %v4324_v21, %v4149_v47 }
 0x323   : > { %v4327_v26 = vadd.f32 1.0, %v14152_v23  ;;  %v4351_v27 = vmul.f32 %v4326_v22, %v4151_v3 }
 0x324   : > { %v4350_v28 = vmul.f32 %v4325_v24, %v4150_v58  ;;  %v4374_v32 = vpack.c.bf16 %v4349_v25, %v4349_v25 }
 0x325   : > { %v4352_v30 = vmul.f32 %v4327_v26, %v4152_v0  ;;  %v4376_v31 = vpack.c.bf16 %v4351_v27, %v4351_v27 }
 0x326   : > { %v4375_v11 = vpack.c.bf16 %v4350_v28, %v4350_v28 }
 0x327   : > { %v4377_v33 = vpack.c.bf16 %v4352_v30, %v4352_v30 }
 0x328   : > { %6011 = vmatprep.mubr.bf16.mxu0 %v4375_v11 }
 0x329   : > { %6012 = vmatmul.mubr.bf16.vlgmr.msra.gmra.mrb[44].mxu0 %v4374_v32  ;;  %6051 = vmatprep.mubr.bf16.mxu1 %v4377_v33 }
 0x32a   : > { %v12056_v49 = vpop.f32.mrb[24].mxu1  ;;  %6052 = vmatmul.mubr.bf16.vlgmr.msra.gmra.mrb[48].mxu1 %v4376_v31  ;;  %12570 = vmatpush3.bf16.msra.mxu0 %v13654_v29 }
 0x32b   : > { %v12057_v35 = vpop.f32.mrb[25].mxu1  ;;  %12571 = vmatprep.subr.bf16.mxu0 %v14461_v14  ;;  %12585 = vmatprep.mubr.msk.bf16.mxu0 %vm14462_vm2, %v14461_v14 }
 0x32c   : > { %v12058_v48 = vadd.f32 %v12057_v35, %v12056_v49  ;;  %v12059_v36 = vpop.f32.mrb[26].mxu1  ;;  %12593 = vmatprep.mubr.msk.bf16.mxu1 %vm14462_vm2, %v14461_v14  ;;  %12590 = vmatpush3.bf16.msra.mxu1 %v13662_v13  ;;  %v13681_v13 = vld [vmem:[%s17281_s25 + $0x54] ss:$36 sps:$4 sm:$0xff]  }
 0x32d   : > { %v12060_v51 = vpop.f32.mrb[27].mxu1  ;;  %12591 = vmatprep.subr.bf16.mxu1 %v14461_v14 }
 0x32e   : > { %12572 = vmatpush3.bf16.msra.mxu0 %v13655_v34 }
 0x32f   : > { %12573 = vmatprep.subr.bf16.mxu0 %v14461_v14 }
 0x332   : > { %12574 = vmatpush3.bf16.msra.mxu0 %v13656_v37 }
 0x333   : > { %12575 = vmatprep.subr.bf16.mxu0 %v14461_v14 }
 0x336   : > { %12576 = vmatpush3.bf16.msra.mxu0 %v13657_v2  ;;  %v13663_v2 = vld [vmem:[%s17280_s26 + $0x8] sm:$0xff]  }
 0x337   : > { %12577 = vmatprep.subr.bf16.mxu0 %v14461_v14  ;;  %12592 = vmatpush3.bf16.msra.mxu1 %v13663_v2  ;;  %v13733_v2 = vld [vmem:[%s17281_s25 + $0x2d8] ss:$36 sps:$4 sm:$0xff]  }
 0x338   : > { %12597 = vmatprep.subr.bf16.mxu1 %v14461_v14 }
 0x33a   : > { %12578 = vmatpush3.bf16.msra.mxu0 %v13658_v38 }
 0x33b   : > { %12579 = vmatprep.subr.bf16.mxu0 %v14461_v14 }
 0x33e   : > { %12580 = vmatpush3.bf16.msra.mxu0 %v13659_v39 }
 0x33f   : > { %12581 = vmatprep.subr.bf16.mxu0 %v14461_v14 }
 0x342   : > { %12582 = vmatpush3.bf16.msra.mxu0 %v13660_v40 }
 0x343   : > { %12583 = vmatprep.subr.bf16.mxu0 %v14461_v14 }
 0x346   : > { %v4123_v47 = vpop.f32.mrb[24].mxu0  ;;  %12584 = vmatpush3.bf16.msra.mxu0 %v13661_v43 }
 0x347   : > { %v4178_v4 = vmul.f32 0.044715, %v4123_v47  ;;  %v4125_v53 = vpop.f32.mrb[25].mxu0  ;;  %v4153_v1 = vmul.f32 0.5, %v4123_v47 }
 0x348   : > { %v4126_v3 = vpop.f32.mrb[26].mxu0 }
 0x349   : > { %v4203_v54 = vmul.f32 %v4178_v4, %v4123_v47  ;;  %v4127_v52 = vpop.f32.mrb[27].mxu0 }
 0x34a   : > { %v12078_v55 = vpop.f32.mrb[28].mxu1 }
 0x34b   : > { %v4228_v46 = vmul.f32 %v4203_v54, %v4123_v47  ;;  %v12079_v56 = vpop.f32.mrb[29].mxu1 }
 0x34c   : > { %v12080_v57 = vadd.f32 %v12079_v56, %v12078_v55  ;;  %v12081_v58 = vpop.f32.mrb[30].mxu1 }
 0x34d   : > { %v4253_v5 = vadd.f32 %v4228_v46, %v4123_v47  ;;  %v12082_v60 = vpop.f32.mrb[31].mxu1 }
 0x34e   : > { %v5654_v61 = vadd.f32 %v12080_v57, %v12058_v48 }
 0x34f   : > { %v4278_v63 = vmul.f32 0.7978846, %v4253_v5 }
 0x351   : > { %14153 = vtanh.f32 %v4278_v63 }
 0x35b   : > { %v14154_v0 = vpop.eup %14153 }
 0x35c   : > { %v4328_v6 = vadd.f32 1.0, %v14154_v0 }
 0x35e   : > { %v4353_v50 = vmul.f32 %v4328_v6, %v4153_v1 }
 0x360   : > { %v4378_v8 = vpack.c.bf16 %v4353_v50, %v4353_v50 }
 0x362   : > { %12586 = vmatmul.mubr.bf16.vlgmr.msra.gmra.mrb[48].mxu0 %v4378_v8 }
 0x366   : > { %v12100_v41 = vpop.f32.mrb[28].mxu0 }
 0x367   : > { %v12101_v9 = vpop.f32.mrb[29].mxu0 }
 0x368   : > { %v12102_v44 = vadd.f32 %v12101_v9, %v12100_v41  ;;  %v12103_v45 = vpop.f32.mrb[30].mxu0 }
 0x369   : > { %v12104_v10 = vpop.f32.mrb[31].mxu0 }
 0x36a   : > { %v5694_v12 = vadd.f32 %v12102_v44, %v5654_v61  ;;  %v12122_v15 = vpop.f32.mrb[32].mxu1 }
 0x36b   : > { %v12123_v59 = vpop.f32.mrb[33].mxu1 }
 0x36c   : > { %v12124_v42 = vadd.f32 %v12123_v59, %v12122_v15  ;;  %v12125_v17 = vpop.f32.mrb[34].mxu1  ;;  %v1679_v15 = vld [vmem:[#allocation11] sm:$0xf] }
 0x36d   : > { %v12126_v62 = vpop.f32.mrb[35].mxu1  ;;  %v6171_v59 = vsel %vm3521_vm1, %v1679_v15, 0  ;;  %v13673_v17 = vld [vmem:[%s17281_s25 + $0x8] ss:$36 sps:$4 sm:$0xff]  }
 0x36e   : > { %v5734_v18 = vadd.f32 %v12124_v42, %v5694_v12  ;;  %v13666_v42 = vld [vmem:[%s17281_s25 + $0x4] ss:$36 sps:$4 sm:$0xff]   ;;  %v13675_v62 = vld [vmem:[%s17281_s25 + $0xc] ss:$36 sps:$4 sm:$0xff]  }
 0x36f   : > { %7166 = vmatprep.subr.bf16.mxu0 %v13675_v62 }
 0x370   : > { %7167 = vmatpush1.bf16.msra.mxu0 %v13673_v17  ;;  %v13813_v17 = vld [vmem:[%s17281_s25 + $0x2ec] ss:$36 sps:$4 sm:$0xff]  }
 0x371   : > { %7168 = vmatprep.subr.bf16.mxu0 %v13681_v13 }
 0x386   : > { %v12144_v19 = vpop.f32.mrb[32].mxu0 }
 0x387   : > { %v12145_v20 = vpop.f32.mrb[33].mxu0 }
 0x388   : > { %v12146_v21 = vadd.f32 %v12145_v20, %v12144_v19  ;;  %v12147_v16 = vpop.f32.mrb[34].mxu0  ;;  %v13685_v19 = vld [vmem:[%s17281_s25 + $0x98] ss:$36 sps:$4 sm:$0xff]  }
 0x389   : > { %v12148_v22 = vpop.f32.mrb[35].mxu0  ;;  %v13687_v20 = vld [vmem:[%s17281_s25 + $0x9c] ss:$36 sps:$4 sm:$0xff]   ;;  %v13693_v16 = vld [vmem:[%s17281_s25 + $0xe4] ss:$36 sps:$4 sm:$0xff]  }
 0x38a   : > { %v5774_v23 = vadd.f32 %v12146_v21, %v5734_v18  ;;  %v12166_v24 = vpop.f32.mrb[36].mxu1  ;;  %v13679_v18 = vld [vmem:[%s17281_s25 + $0x50] ss:$36 sps:$4 sm:$0xff]   ;;  %v13691_v21 = vld [vmem:[%s17281_s25 + $0xe0] ss:$36 sps:$4 sm:$0xff]  }
 0x38b   : > { %v12167_v25 = vpop.f32.mrb[37].mxu1  ;;  %7169 = vmatpush1.bf16.msra.mxu0 %v13679_v18  ;;  %v13697_v22 = vld [vmem:[%s17281_s25 + $0x128] ss:$36 sps:$4 sm:$0xff]  }
 0x38c   : > { %v12168_v26 = vadd.f32 %v12167_v25, %v12166_v24  ;;  %v12169_v27 = vpop.f32.mrb[38].mxu1  ;;  %7170 = vmatprep.subr.bf16.mxu0 %v13687_v20  ;;  %v13703_v24 = vld [vmem:[%s17281_s25 + $0x170] ss:$36 sps:$4 sm:$0xff]  }
 0x38d   : > { %v12170_v28 = vpop.f32.mrb[39].mxu1  ;;  %v13705_v25 = vld [vmem:[%s17281_s25 + $0x174] ss:$36 sps:$4 sm:$0xff]   ;;  %v13711_v27 = vld [vmem:[%s17281_s25 + $0x1bc] ss:$36 sps:$4 sm:$0xff]  }
 0x38e   : > { %v5814_v29 = vadd.f32 %v12168_v26, %v5774_v23  ;;  %v13699_v23 = vld [vmem:[%s17281_s25 + $0x12c] ss:$36 sps:$4 sm:$0xff]   ;;  %v13709_v26 = vld [vmem:[%s17281_s25 + $0x1b8] ss:$36 sps:$4 sm:$0xff]   ;;  %v13715_v28 = vld [vmem:[%s17281_s25 + $0x200] ss:$36 sps:$4 sm:$0xff]  }
 0x38f   : > { %7171 = vmatpush1.bf16.msra.mxu0 %v13685_v19  ;;  %v13815_v19 = vld [vmem:[%s17281_s25 + $0x330] ss:$36 sps:$4 sm:$0xff]  }
 0x390   : > { %7172 = vmatprep.subr.bf16.mxu0 %v13693_v16  ;;  %v13817_v20 = vld [vmem:[%s17281_s25 + $0x334] ss:$36 sps:$4 sm:$0xff]  }
 0x393   : > { %7173 = vmatpush1.bf16.msra.mxu0 %v13691_v21 }
 0x394   : > { %7174 = vmatprep.subr.bf16.mxu0 %v13699_v23  ;;  %v13821_v23 = vld [vmem:[%s17281_s25 + $0x37c] ss:$36 sps:$4 sm:$0xff]  }
 0x397   : > { %7175 = vmatpush1.bf16.msra.mxu0 %v13697_v22  ;;  %v13819_v22 = vld [vmem:[%s17281_s25 + $0x378] ss:$36 sps:$4 sm:$0xff]  }
 0x398   : > { %7176 = vmatprep.subr.bf16.mxu0 %v13705_v25 }
 0x39b   : > { %7177 = vmatpush1.bf16.msra.mxu0 %v13703_v24 }
 0x39c   : > { %7178 = vmatprep.subr.bf16.mxu0 %v13711_v27 }
 0x39f   : > { %7179 = vmatpush1.bf16.msra.mxu0 %v13709_v26 }
 0x3a6   : > { %v12188_v30 = vpop.f32.mrb[36].mxu0 }
 0x3a7   : > { %v12189_v11 = vpop.f32.mrb[37].mxu0 }
 0x3a8   : > { %v12190_v31 = vadd.f32 %v12189_v11, %v12188_v30  ;;  %v12191_v32 = vpop.f32.mrb[38].mxu0  ;;  %v13721_v30 = vld [vmem:[%s17281_s25 + $0x248] ss:$36 sps:$4 sm:$0xff]  }
 0x3a9   : > { %v12192_v33 = vpop.f32.mrb[39].mxu0  ;;  %v13723_v11 = vld [vmem:[%s17281_s25 + $0x24c] ss:$36 sps:$4 sm:$0xff]  }
 0x3aa   : > { %v5854_v34 = vadd.f32 %v12190_v31, %v5814_v29  ;;  %v12210_v49 = vpop.f32.mrb[40].mxu1  ;;  %v13717_v29 = vld [vmem:[%s17281_s25 + $0x204] ss:$36 sps:$4 sm:$0xff]   ;;  %v14463_v31 = vmov 1966171168   ;;  %v6511_v33 = vlaneseq }
 0x3ab   : > { %v12211_v35 = vpop.f32.mrb[41].mxu1  ;;  %7180 = vmatprep.subr.bf16.mxu0 %v13717_v29  ;;  %v6509_v32 = vunpack.c.l.s4 %v14463_v31  ;;  %v13672_v31 = vld [vmem:[%s17281_s25 + $0x94] ss:$36 sps:$4 sm:$0xff]  }
 0x3ac   : > { %v12212_v48 = vadd.f32 %v12211_v35, %v12210_v49  ;;  %v12213_v36 = vpop.f32.mrb[42].mxu1  ;;  %7181 = vmatpush1.bf16.msra.mxu0 %v13715_v28  ;;  %v13729_v49 = vld [vmem:[%s17281_s25 + $0x294] ss:$36 sps:$4 sm:$0xff]   ;;  %v13664_v28 = vld [vmem:[%s17281_s25] ss:$36 sps:$4 sm:$0xff]  }
 0x3ad   : > { %v12214_v37 = vpop.f32.mrb[43].mxu1  ;;  %7182 = vmatprep.subr.bf16.mxu0 %v13723_v11  ;;  %v6510_v35 = vunpack.c.0.s8 %v6509_v32  ;;  %v13667_v11 = vld [vmem:[%s17281_s25 + $0x48] ss:$36 sps:$4 sm:$0xff]   ;;  %v13670_v32 = vld [vmem:[%s17281_s25 + $0x90] ss:$36 sps:$4 sm:$0xff]  }
 0x3ae   : > { %v5894_v51 = vadd.f32 %v12212_v48, %v5854_v34  ;;  %v13727_v34 = vld [vmem:[%s17281_s25 + $0x290] ss:$36 sps:$4 sm:$0xff]   ;;  %v11652_v48 = vld.sshfl [vmem:[%s894_s4] sm:$0x11 pattern:$0x75316420] }
 0x3af   : > { %v6507_v36 = vcombine.high %v11652_v48, %v11652_v48  ;;  %v15769_v37 = vshrl.u32 %v6511_v33, 7  ;;  %v13678_v33 = vld [vmem:[%s17281_s25 + $0xdc] ss:$36 sps:$4 sm:$0xff]  }
 0x3b0   : > { %7183 = vmatpush1.bf16.msra.mxu0 %v13721_v30  ;;  %v13669_v30 = vld [vmem:[%s17281_s25 + $0x4c] ss:$36 sps:$4 sm:$0xff]  }
 0x3b1   : > { %7184 = vmatprep.subr.bf16.mxu0 %v13729_v49  ;;  %v13684_v49 = vld [vmem:[%s17281_s25 + $0x124] ss:$36 sps:$4 sm:$0xff]  }
 0x3b4   : > { %7185 = vmatpush1.bf16.msra.mxu0 %v13727_v34  ;;  %v13676_v34 = vld [vmem:[%s17281_s25 + $0xd8] ss:$36 sps:$4 sm:$0xff]  }
 0x3c6   : > { %v12232_v38 = vpop.f32.mrb[40].mxu0 }
 0x3c7   : > { %v12233_v39 = vpop.f32.mrb[41].mxu0 }
 0x3c8   : > { %v12234_v40 = vadd.f32 %v12233_v39, %v12232_v38  ;;  %v12235_v43 = vpop.f32.mrb[42].mxu0  ;;  %v13735_v38 = vld [vmem:[%s17281_s25 + $0x2dc] ss:$36 sps:$4 sm:$0xff]  }
 0x3c9   : > { %v12236_v47 = vpop.f32.mrb[43].mxu0  ;;  %7186 = vmatprep.subr.bf16.mxu0 %v13735_v38  ;;  %v13741_v43 = vld [vmem:[%s17281_s25 + $0x324] ss:$36 sps:$4 sm:$0xff]   ;;  %v13702_v38 = vld [vmem:[%s17281_s25 + $0x1fc] ss:$36 sps:$4 sm:$0xff]  }
 0x3ca   : > { %v5934_v4 = vadd.f32 %v12234_v40, %v5894_v51  ;;  %v6513_v51 = vsub.s32 %v6510_v35, %v15769_v37  ;;  %7187 = vmatpush1.bf16.msra.mxu0 %v13733_v2  ;;  %v13739_v40 = vld [vmem:[%s17281_s25 + $0x320] ss:$36 sps:$4 sm:$0xff]   ;;  %v13745_v47 = vld [vmem:[%s17281_s25 + $0x368] ss:$36 sps:$4 sm:$0xff]   ;;  %v13694_v2 = vld [vmem:[%s17281_s25 + $0x1b0] ss:$36 sps:$4 sm:$0xff]  }
 0x3cb   : > { %v12254_v53 = vpop.f32.mrb[44].mxu1  ;;  %7188 = vmatprep.subr.bf16.mxu0 %v13741_v43  ;;  %v13682_v35 = vld [vmem:[%s17281_s25 + $0x120] ss:$36 sps:$4 sm:$0xff]  }
 0x3cc   : > { %v12255_v3 = vpop.f32.mrb[45].mxu1  ;;  %v15778_v39 = vrot.slane %v6507_v36, %v6513_v51  ;;  %v13688_v36 = vld [vmem:[%s17281_s25 + $0x168] ss:$36 sps:$4 sm:$0xff]  }
 0x3cd   : > { %v12256_v54 = vadd.f32 %v12255_v3, %v12254_v53  ;;  %v12257_v52 = vpop.f32.mrb[46].mxu1  ;;  %v15794_v53 = vrot.slane %v11652_v48, %v6513_v51  ;;  %v13751_v3 = vld [vmem:[%s17281_s25 + $0x18] ss:$36 sps:$4 sm:$0xff]   ;;  %v13690_v48 = vld [vmem:[%s17281_s25 + $0x16c] ss:$36 sps:$4 sm:$0xff]  }
 0x3ce   : > { %v12258_v55 = vpop.f32.mrb[47].mxu1  ;;  %11771 = vmatprep.mubr.msk.bf16.mxu0 %vm7121_vm4, %v15778_v39  ;;  %7189 = vmatpush1.bf16.msra.mxu0 %v13739_v40  ;;  %v13757_v52 = vld [vmem:[%s17281_s25 + $0x60] ss:$36 sps:$4 sm:$0xff]   ;;  %v13696_v51 = vld [vmem:[%s17281_s25 + $0x1b4] ss:$36 sps:$4 sm:$0xff]  }
 0x3cf   : > { %v5974_v46 = vadd.f32 %v12256_v54, %v5934_v4  ;;  %v13747_v4 = vld [vmem:[%s17281_s25 + $0x36c] ss:$36 sps:$4 sm:$0xff]   ;;  %v13753_v54 = vld [vmem:[%s17281_s25 + $0x1c] ss:$36 sps:$4 sm:$0xff]   ;;  %v13759_v55 = vld [vmem:[%s17281_s25 + $0x64] ss:$36 sps:$4 sm:$0xff]  }
 0x3d0   : > { %7190 = vmatprep.subr.bf16.mxu0 %v13747_v4  ;;  %v13700_v40 = vld [vmem:[%s17281_s25 + $0x1f8] ss:$36 sps:$4 sm:$0xff]   ;;  %v13708_v43 = vld [vmem:[%s17281_s25 + $0x244] ss:$36 sps:$4 sm:$0xff]   ;;  %v13714_v4 = vld [vmem:[%s17281_s25 + $0x28c] ss:$36 sps:$4 sm:$0xff]  }
 0x3d2   : > { %7191 = vmatpush1.bf16.msra.mxu0 %v13745_v47  ;;  %v13706_v47 = vld [vmem:[%s17281_s25 + $0x240] ss:$36 sps:$4 sm:$0xff]  }
 0x3d3   : > { %7248 = vmatprep.subr.bf16.mxu0 %v13753_v54  ;;  %v13720_v54 = vld [vmem:[%s17281_s25 + $0x2d4] ss:$36 sps:$4 sm:$0xff]  }
 0x3d5   : > { %7199 = vmatmul.mubr.bf16.vlgmr.msra.gmra.mrb[52].mxu0 %v15794_v53 }
 0x3d6   : > { %7249 = vmatpush1.bf16.msra.mxu0 %v13751_v3  ;;  %11773 = vmatprep.mubr.msk.bf16.mxu0 %vm7121_vm4, %v15778_v39  ;;  %v13712_v3 = vld [vmem:[%s17281_s25 + $0x288] ss:$36 sps:$4 sm:$0xff]  }
 0x3d7   : > { %7250 = vmatprep.subr.bf16.mxu0 %v13759_v55  ;;  %v13726_v55 = vld [vmem:[%s17281_s25 + $0x31c] ss:$36 sps:$4 sm:$0xff]  }
 0x3da   : > { %7251 = vmatpush1.bf16.msra.mxu0 %v13757_v52  ;;  %v13718_v52 = vld [vmem:[%s17281_s25 + $0x2d0] ss:$36 sps:$4 sm:$0xff]  }
 0x3fc   : > { %v12276_v56 = vpop.f32.mrb[44].mxu0 }
 0x3fd   : > { %v12277_v57 = vpop.f32.mrb[45].mxu0  ;;  %v12298_v58 = vpop.f32.mrb[48].mxu1 }
 0x3fe   : > { %v12278_v5 = vadd.f32 %v12277_v57, %v12276_v56  ;;  %v12279_v60 = vpop.f32.mrb[46].mxu0  ;;  %v12299_v61 = vpop.f32.mrb[49].mxu1  ;;  %v13765_v56 = vld [vmem:[%s17281_s25 + $0xac] ss:$36 sps:$4 sm:$0xff]  }
 0x3ff   : > { %v12280_v63 = vpop.f32.mrb[47].mxu0  ;;  %v12300_v0 = vadd.f32 %v12299_v61, %v12298_v58  ;;  %v12301_v1 = vpop.f32.mrb[50].mxu1  ;;  %7252 = vmatprep.subr.bf16.mxu0 %v13765_v56  ;;  %v13769_v57 = vld [vmem:[%s17281_s25 + $0xf0] ss:$36 sps:$4 sm:$0xff]   ;;  %v13777_v60 = vld [vmem:[%s17281_s25 + $0x13c] ss:$36 sps:$4 sm:$0xff]  }
 0x400   : > { %v6014_v6 = vadd.f32 %v12278_v5, %v5974_v46  ;;  %v12302_v50 = vpop.f32.mrb[51].mxu1  ;;  %v13763_v46 = vld [vmem:[%s17281_s25 + $0xa8] ss:$36 sps:$4 sm:$0xff]   ;;  %v13771_v58 = vld [vmem:[%s17281_s25 + $0xf4] ss:$36 sps:$4 sm:$0xff]  }
 0x401   : > { %7253 = vmatpush1.bf16.msra.mxu0 %v13763_v46  ;;  %v13775_v5 = vld [vmem:[%s17281_s25 + $0x138] ss:$36 sps:$4 sm:$0xff]   ;;  %v13781_v61 = vld [vmem:[%s17281_s25 + $0x180] ss:$36 sps:$4 sm:$0xff]   ;;  %v13789_v1 = vld [vmem:[%s17281_s25 + $0x1cc] ss:$36 sps:$4 sm:$0xff]  }
 0x402   : > { %v6054_v8 = vadd.f32 %v12300_v0, %v6014_v6  ;;  %7254 = vmatprep.subr.bf16.mxu0 %v13771_v58  ;;  %v13783_v63 = vld [vmem:[%s17281_s25 + $0x184] ss:$36 sps:$4 sm:$0xff]   ;;  %v13793_v6 = vld [vmem:[%s17281_s25 + $0x210] ss:$36 sps:$4 sm:$0xff]   ;;  %v13724_v46 = vld [vmem:[%s17281_s25 + $0x318] ss:$36 sps:$4 sm:$0xff]  }
 0x403   : > { %v13787_v0 = vld [vmem:[%s17281_s25 + $0x1c8] ss:$36 sps:$4 sm:$0xff]   ;;  %v13795_v50 = vld [vmem:[%s17281_s25 + $0x214] ss:$36 sps:$4 sm:$0xff]  }
 0x404   : > { %v13732_v56 = vld [vmem:[%s17281_s25 + $0x364] ss:$36 sps:$4 sm:$0xff]   ;;  %v13738_v58 = vld [vmem:[%s17281_s25 + $0x14] ss:$36 sps:$4 sm:$0xff]  }
 0x405   : > { %7255 = vmatpush1.bf16.msra.mxu0 %v13769_v57  ;;  %v13730_v57 = vld [vmem:[%s17281_s25 + $0x360] ss:$36 sps:$4 sm:$0xff]  }
 0x406   : > { %7256 = vmatprep.subr.bf16.mxu0 %v13777_v60  ;;  %v13744_v60 = vld [vmem:[%s17281_s25 + $0x5c] ss:$36 sps:$4 sm:$0xff]  }
 0x409   : > { %7257 = vmatpush1.bf16.msra.mxu0 %v13775_v5  ;;  %v13736_v5 = vld [vmem:[%s17281_s25 + $0x10] ss:$36 sps:$4 sm:$0xff]  }
 0x40a   : > { %7258 = vmatprep.subr.bf16.mxu0 %v13783_v63  ;;  %v13750_v63 = vld [vmem:[%s17281_s25 + $0xa4] ss:$36 sps:$4 sm:$0xff]  }
 0x40d   : > { %7259 = vmatpush1.bf16.msra.mxu0 %v13781_v61  ;;  %v13742_v61 = vld [vmem:[%s17281_s25 + $0x58] ss:$36 sps:$4 sm:$0xff]  }
 0x40e   : > { %7260 = vmatprep.subr.bf16.mxu0 %v13789_v1  ;;  %v13756_v1 = vld [vmem:[%s17281_s25 + $0xec] ss:$36 sps:$4 sm:$0xff]  }
 0x411   : > { %7261 = vmatpush1.bf16.msra.mxu0 %v13787_v0  ;;  %v13748_v0 = vld [vmem:[%s17281_s25 + $0xa0] ss:$36 sps:$4 sm:$0xff]  }
 0x412   : > { %7262 = vmatprep.subr.bf16.mxu0 %v13795_v50  ;;  %v13762_v50 = vld [vmem:[%s17281_s25 + $0x134] ss:$36 sps:$4 sm:$0xff]  }
 0x415   : > { %7263 = vmatpush1.bf16.msra.mxu0 %v13793_v6  ;;  %v13754_v6 = vld [vmem:[%s17281_s25 + $0xe8] ss:$36 sps:$4 sm:$0xff]  }
 0x435   : > { %v6093_v41 = vpop.f32.mrb[48].mxu0 }
 0x436   : > { %v15693_v9 = vadd.f32 %v6093_v41, %v6054_v8  ;;  %v12587_v44 = vpop.f32.mrb[49].mxu0  ;;  %v13799_v8 = vld [vmem:[%s17281_s25 + $0x258] ss:$36 sps:$4 sm:$0xff]  }
 0x437   : > { %v6096_v45 = vpop.f32.mrb[50].mxu0  ;;  %v13801_v41 = vld [vmem:[%s17281_s25 + $0x25c] ss:$36 sps:$4 sm:$0xff]  }
 0x438   : > { %v6099_v10 = vpack.c.bf16 %v15693_v9, %v15693_v9  ;;  %v12588_v12 = vpop.f32.mrb[51].mxu0  ;;  %7264 = vmatprep.subr.bf16.mxu0 %v13801_v41  ;;  %v13805_v44 = vld [vmem:[%s17281_s25 + $0x2a0] ss:$36 sps:$4 sm:$0xff]  }
 0x439   : > { %7265 = vmatpush1.bf16.msra.mxu0 %v13799_v8  ;;  %v13807_v45 = vld [vmem:[%s17281_s25 + $0x2a4] ss:$36 sps:$4 sm:$0xff]   ;;  %v13760_v8 = vld [vmem:[%s17281_s25 + $0x130] ss:$36 sps:$4 sm:$0xff]   ;;  %v13768_v41 = vld [vmem:[%s17281_s25 + $0x17c] ss:$36 sps:$4 sm:$0xff]  }
 0x43a   : > { %12594 = vmatmul.mubr.msk.bf16.vlgmr.msra.gmra.mrb[52].mxu1 %vm6112_vm3, %v6099_v10  ;;  %7266 = vmatprep.subr.bf16.mxu0 %v13807_v45  ;;  %v13774_v45 = vld [vmem:[%s17281_s25 + $0x1c4] ss:$36 sps:$4 sm:$0xff]  }
 0x43b   : > { %12599 = vmatprep.mubr.msk.bf16.mxu1 %vm14462_vm2, %v14461_v14  ;;  %12598 = vmatpush3.bf16.msra.mxu1 %v6171_v59  ;;  %v13811_v59 = vld [vmem:[%s17281_s25 + $0x2e8] ss:$36 sps:$4 sm:$0xff]  }
 0x43c   : > { %7125 = vmatprep.subr.bf16.mxu1 %v13666_v42 }
 0x43d   : > { %7267 = vmatpush1.bf16.msra.mxu0 %v13805_v44  ;;  %v13766_v44 = vld [vmem:[%s17281_s25 + $0x178] ss:$36 sps:$4 sm:$0xff]  }
 0x43e   : > { %7268 = vmatprep.subr.bf16.mxu0 %v13813_v17  ;;  %v13792_v17 = vld [vmem:[%s17281_s25 + $0x29c] ss:$36 sps:$4 sm:$0xff]  }
 0x441   : > { %7269 = vmatpush1.bf16.msra.mxu0 %v13811_v59  ;;  %v13786_v59 = vld [vmem:[%s17281_s25 + $0x254] ss:$36 sps:$4 sm:$0xff]  }
 0x442   : > { %7270 = vmatprep.subr.bf16.mxu0 %v13817_v20  ;;  %v13802_v20 = vld [vmem:[%s17281_s25 + $0x328] ss:$36 sps:$4 sm:$0xff]  }
 0x445   : > { %7271 = vmatpush1.bf16.msra.mxu0 %v13815_v19  ;;  %v13804_v19 = vld [vmem:[%s17281_s25 + $0x32c] ss:$36 sps:$4 sm:$0xff]  }
 0x446   : > { %7272 = vmatprep.subr.bf16.mxu0 %v13821_v23  ;;  %v13818_v23 = vld [vmem:[%s17281_s25 + $0x68] ss:$36 sps:$4 sm:$0xff]  }
 0x449   : > { %7273 = vmatpush1.bf16.msra.mxu0 %v13819_v22  ;;  %v13814_v22 = vld [vmem:[%s17281_s25 + $0x20] ss:$36 sps:$4 sm:$0xff]  }
 0x44c   : > { %7281 = vmatmul.mubr.bf16.vlgmr.msra.gmra.mrb[56].mxu0 %v15794_v53 }
 0x50d   : > { %v6150_v10 = vpop.f32.mrb[52].mxu1 }
 0x50e   : > { %v6157_v12 = vmul.f32 0.044715, %v6150_v10  ;;  %v12595_v15 = vpop.f32.mrb[53].mxu1  ;;  %v6156_v25 = vmul.f32 0.5, %v6150_v10 }
 0x50f   : > { %v6153_v42 = vpop.f32.mrb[54].mxu1  ;;  %v13778_v15 = vld [vmem:[%s17281_s25 + $0x208] ss:$36 sps:$4 sm:$0xff]  }
 0x510   : > { %v6158_v62 = vmul.f32 %v6157_v12, %v6150_v10  ;;  %v12596_v18 = vpop.f32.mrb[55].mxu1  ;;  %v13780_v12 = vld [vmem:[%s17281_s25 + $0x20c] ss:$36 sps:$4 sm:$0xff]  }
 0x511   : > { %v13784_v42 = vld [vmem:[%s17281_s25 + $0x250] ss:$36 sps:$4 sm:$0xff]   ;;  %v13798_v18 = vld [vmem:[%s17281_s25 + $0x2e4] ss:$36 sps:$4 sm:$0xff]  }
 0x512   : > { %v6159_v13 = vmul.f32 %v6158_v62, %v6150_v10  ;;  %v13790_v62 = vld [vmem:[%s17281_s25 + $0x298] ss:$36 sps:$4 sm:$0xff]  }
 0x514   : > { %v6160_v21 = vadd.f32 %v6159_v13, %v6150_v10  ;;  %v13772_v10 = vld [vmem:[%s17281_s25 + $0x1c0] ss:$36 sps:$4 sm:$0xff]  }
 0x515   : > { %v13796_v13 = vld [vmem:[%s17281_s25 + $0x2e0] ss:$36 sps:$4 sm:$0xff]  }
 0x516   : > { %v6161_v16 = vmul.f32 0.7978846, %v6160_v21  ;;  %v13810_v21 = vld [vmem:[%s17281_s25 + $0x374] ss:$36 sps:$4 sm:$0xff]  }
 0x518   : > { %14155 = vtanh.f32 %v6161_v16  ;;  %v13808_v16 = vld [vmem:[%s17281_s25 + $0x370] ss:$36 sps:$4 sm:$0xff]  }
 0x522   : > { %v14156_v24 = vpop.eup %14155 }
 0x523   : > { %v6163_v26 = vadd.f32 1.0, %v14156_v24  ;;  %v13822_v24 = vld [vmem:[%s17281_s25 + $0xb0] ss:$36 sps:$4 sm:$0xff]  }
 0x525   : > { %v6164_v27 = vmul.f32 %v6163_v26, %v6156_v25  ;;  %v13823_v25 = vld [vmem:[%s17281_s25 + $0xf8] ss:$36 sps:$4 sm:$0xff]   ;;  %v13834_v26 = vld [vmem:[%s17283_s20] sm:$0xff]  }
 0x527   : > { %v6165_v29 = vpack.c.bf16 %v6164_v27, %v6164_v27  ;;  %v13824_v27 = vld [vmem:[%s17281_s25 + $0x140] ss:$36 sps:$4 sm:$0xff]  }
 0x529   : > { %12600 = vmatmul.mubr.msk.bf16.vlgmr.msra.gmra.mrb[56].mxu1 %vm6166_vm5, %v6165_v29  ;;  %v13826_v29 = vld [vmem:[%s17281_s25 + $0x1d0] ss:$36 sps:$4 sm:$0xff]  }
 0x52a   : > { %7126 = vmatpush1.bf16.msra.mxu1 %v13664_v28  ;;  %11770 = vmatprep.mubr.msk.bf16.mxu1 %vm7121_vm4, %v15778_v39  ;;  %v13825_v28 = vld [vmem:[%s17281_s25 + $0x188] ss:$36 sps:$4 sm:$0xff]  }
 0x52b   : > { %7127 = vmatprep.subr.bf16.mxu1 %v13669_v30  ;;  %v13827_v30 = vld [vmem:[%s17281_s25 + $0x218] ss:$36 sps:$4 sm:$0xff]  }
 0x52e   : > { %7128 = vmatpush1.bf16.msra.mxu1 %v13667_v11  ;;  %v13828_v11 = vld [vmem:[%s17281_s25 + $0x260] ss:$36 sps:$4 sm:$0xff]  }
 0x52f   : > { %7129 = vmatprep.subr.bf16.mxu1 %v13672_v31  ;;  %v13835_v31 = vld [vmem:[%s17283_s20 + $0x48] sm:$0xff]  }
 0x532   : > { %7130 = vmatpush1.bf16.msra.mxu1 %v13670_v32  ;;  %v13836_v32 = vld [vmem:[%s17283_s20 + $0x8] sm:$0xff]  }
 0x533   : > { %7131 = vmatprep.subr.bf16.mxu1 %v13678_v33  ;;  %v13829_v33 = vld [vmem:[%s17281_s25 + $0x2a8] ss:$36 sps:$4 sm:$0xff]  }
 0x536   : > { %7132 = vmatpush1.bf16.msra.mxu1 %v13676_v34  ;;  %v13837_v34 = vld [vmem:[%s17283_s20 + $0x50] sm:$0xff]  }
 0x537   : > { %7133 = vmatprep.subr.bf16.mxu1 %v13684_v49  ;;  %v13838_v49 = vld [vmem:[%s17283_s20 + $0x10] sm:$0xff]  }
 0x53a   : > { %7134 = vmatpush1.bf16.msra.mxu1 %v13682_v35  ;;  %v13830_v35 = vld [vmem:[%s17281_s25 + $0x2f0] ss:$36 sps:$4 sm:$0xff]  }
 0x53b   : > { %7135 = vmatprep.subr.bf16.mxu1 %v13690_v48  ;;  %v13839_v48 = vld [vmem:[%s17283_s20 + $0x58] sm:$0xff]  }
 0x53e   : > { %7136 = vmatpush1.bf16.msra.mxu1 %v13688_v36  ;;  %v13840_v36 = vld [vmem:[%s17283_s20 + $0x18] sm:$0xff]  }
 0x53f   : > { %7137 = vmatprep.subr.bf16.mxu1 %v13696_v51  ;;  %v13831_v51 = vld [vmem:[%s17281_s25 + $0x338] ss:$36 sps:$4 sm:$0xff]  }
 0x542   : > { %7138 = vmatpush1.bf16.msra.mxu1 %v13694_v2  ;;  %v13841_v2 = vld [vmem:[%s17283_s20 + $0x60] sm:$0xff]  }
 0x543   : > { %7139 = vmatprep.subr.bf16.mxu1 %v13702_v38  ;;  %v13842_v38 = vld [vmem:[%s17283_s20 + $0x20] sm:$0xff]  }
 0x546   : > { %7140 = vmatpush1.bf16.msra.mxu1 %v13700_v40  ;;  %v13843_v40 = vld [vmem:[%s17283_s20 + $0x68] sm:$0xff]  }
 0x547   : > { %7141 = vmatprep.subr.bf16.mxu1 %v13708_v43  ;;  %v16121_v43 = vpop.f32.mrb[52].mxu0 }
 0x54a   : > { %7142 = vmatpush1.bf16.msra.mxu1 %v13706_v47  ;;  %v16123_v47 = vpop.f32.mrb[53].mxu0 }
 0x54b   : > { %7143 = vmatprep.subr.bf16.mxu1 %v13714_v4  ;;  %v13832_v4 = vld [vmem:[%s17281_s25 + $0x380] ss:$36 sps:$4 sm:$0xff]  }
 0x54e   : > { %7144 = vmatpush1.bf16.msra.mxu1 %v13712_v3  ;;  %v13844_v3 = vld [vmem:[%s17283_s20 + $0x28] sm:$0xff]  }
 0x54f   : > { %7145 = vmatprep.subr.bf16.mxu1 %v13720_v54  ;;  %v7204_v54 = vpop.f32.mrb[54].mxu0 }
 0x550   : > { %v7332_v54 = vmul.f32 0.5, %v16123_v47 }
 0x552   : > { %7146 = vmatpush1.bf16.msra.mxu1 %v13718_v52  ;;  %v13845_v52 = vld [vmem:[%s17283_s20 + $0x70] sm:$0xff]  }
 0x553   : > { %7147 = vmatprep.subr.bf16.mxu1 %v13726_v55  ;;  %v7205_v55 = vpop.f32.mrb[55].mxu0 }
 0x556   : > { %7148 = vmatpush1.bf16.msra.mxu1 %v13724_v46  ;;  %v13846_v46 = vld [vmem:[%s17283_s20 + $0x30] sm:$0xff]  }
 0x557   : > { %7149 = vmatprep.subr.bf16.mxu1 %v13732_v56  ;;  %v13847_v56 = vld [vmem:[%s17283_s20 + $0x78] sm:$0xff]  }
 0x55a   : > { %7150 = vmatpush1.bf16.msra.mxu1 %v13730_v57  ;;  %v13848_v57 = vld [vmem:[%s17283_s20 + $0x38] sm:$0xff]  }
 0x55b   : > { %7207 = vmatprep.subr.bf16.mxu1 %v13738_v58  ;;  %v13849_v58 = vld [vmem:[%s17283_s20 + $0xc0] sm:$0xff]  }
 0x55d   : > { %7158 = vmatmul.mubr.bf16.vlgmr.msra.gmra.mrb[60].mxu1 %v15794_v53 }
 0x55e   : > { %7208 = vmatpush1.bf16.msra.mxu1 %v13736_v5  ;;  %11772 = vmatprep.mubr.msk.bf16.mxu1 %vm7121_vm4, %v15778_v39  ;;  %v13861_v5 = vld [vmem:[%s17283_s20 + $0x140] sm:$0xff]  }
 0x55f   : > { %7209 = vmatprep.subr.bf16.mxu1 %v13744_v60  ;;  %v13865_v60 = vld [vmem:[%s17283_s20 + $0x148] sm:$0xff]  }
 0x562   : > { %7210 = vmatpush1.bf16.msra.mxu1 %v13742_v61  ;;  %v13866_v61 = vld [vmem:[%s17283_s20 + $0x108] sm:$0xff]  }
 0x563   : > { %7211 = vmatprep.subr.bf16.mxu1 %v13750_v63  ;;  %v13869_v63 = vld [vmem:[%s17283_s20 + $0x150] sm:$0xff]  }
 0x566   : > { %7212 = vmatpush1.bf16.msra.mxu1 %v13748_v0  ;;  %v13870_v0 = vld [vmem:[%s17283_s20 + $0x110] sm:$0xff]  }
 0x567   : > { %7213 = vmatprep.subr.bf16.mxu1 %v13756_v1  ;;  %v13872_v1 = vld [vmem:[%s17283_s20 + $0x158] sm:$0xff]  }
 0x56a   : > { %7214 = vmatpush1.bf16.msra.mxu1 %v13754_v6  ;;  %v13874_v6 = vld [vmem:[%s17283_s20 + $0x118] sm:$0xff]  }
 0x56b   : > { %7215 = vmatprep.subr.bf16.mxu1 %v13762_v50  ;;  %v16172_v50 = vpop.f32.mrb[56].mxu0 }
 0x56e   : > { %7216 = vmatpush1.bf16.msra.mxu1 %v13760_v8  ;;  %v13876_v8 = vld [vmem:[%s17283_s20 + $0x160] sm:$0xff]  }
 0x56f   : > { %7217 = vmatprep.subr.bf16.mxu1 %v13768_v41  ;;  %v16177_v41 = vpop.f32.mrb[57].mxu0 }
 0x572   : > { %7218 = vmatpush1.bf16.msra.mxu1 %v13766_v44  ;;  %v13878_v44 = vld [vmem:[%s17283_s20 + $0x120] sm:$0xff]  }
 0x573   : > { %7219 = vmatprep.subr.bf16.mxu1 %v13774_v45  ;;  %v7286_v45 = vpop.f32.mrb[58].mxu0 }
 0x576   : > { %7220 = vmatpush1.bf16.msra.mxu1 %v13772_v10  ;;  %v7287_v10 = vpop.f32.mrb[59].mxu0 }
 0x577   : > { %7221 = vmatprep.subr.bf16.mxu1 %v13780_v12  ;;  %v13880_v12 = vld [vmem:[%s17283_s20 + $0x168] sm:$0xff]  }
 0x578   : > { %v13851_v10 = vld [vmem:[%s17283_s20 + $0xc8] sm:$0xff]  }
 0x57a   : > { %7222 = vmatpush1.bf16.msra.mxu1 %v13778_v15  ;;  %v13882_v15 = vld [vmem:[%s17283_s20 + $0x128] sm:$0xff]  }
 0x57b   : > { %7223 = vmatprep.subr.bf16.mxu1 %v13786_v59  ;;  %v13884_v59 = vld [vmem:[%s17283_s20 + $0x170] sm:$0xff]  }
 0x57e   : > { %7224 = vmatpush1.bf16.msra.mxu1 %v13784_v42  ;;  %v13886_v42 = vld [vmem:[%s17283_s20 + $0x130] sm:$0xff]  }
 0x57f   : > { %7225 = vmatprep.subr.bf16.mxu1 %v13792_v17 }
 0x582   : > { %7226 = vmatpush1.bf16.msra.mxu1 %v13790_v62  ;;  %v13888_v62 = vld [vmem:[%s17283_s20 + $0x178] sm:$0xff]  }
 0x583   : > { %7227 = vmatprep.subr.bf16.mxu1 %v13798_v18 }
 0x586   : > { %7228 = vmatpush1.bf16.msra.mxu1 %v13796_v13 }
 0x587   : > { %7229 = vmatprep.subr.bf16.mxu1 %v13804_v19 }
 0x58a   : > { %7230 = vmatpush1.bf16.msra.mxu1 %v13802_v20  ;;  %v13890_v20 = vld [vmem:[%s17283_s20 + $0x138] sm:$0xff]  }
 0x58b   : > { %7231 = vmatprep.subr.bf16.mxu1 %v13810_v21 }
 0x58e   : > { %7232 = vmatpush1.bf16.msra.mxu1 %v13808_v16 }
 0x58f   : > { %7289 = vmatprep.subr.bf16.mxu1 %v14460_v7 }
 0x591   : > { %7240 = vmatmul.mubr.bf16.vlgmr.msra.gmra.mrb[64].mxu1 %v15794_v53 }
 0x592   : > { %7290 = vmatpush1.bf16.msra.mxu1 %v13814_v22  ;;  %11774 = vmatprep.mubr.msk.bf16.mxu1 %vm7121_vm4, %v15778_v39  ;;  %v13833_v39 = vld [vmem:[%s17283_s20 + $0x40] sm:$0xff]  }
 0x593   : > { %7291 = vmatprep.subr.bf16.mxu1 %v14460_v7  ;;  %12318 = vmatprep.subr.bf16.mxu0 %v13833_v39  ;;  %v7341_v39 = vmul.f32 0.044715, %v16123_v47 }
 0x594   : > { %12319 = vmatpush3.bf16.msra.mxu0 %v13834_v26 }
 0x595   : > { %12320 = vmatprep.subr.bf16.mxu0 %v13835_v31  ;;  %v7350_v26 = vmul.f32 %v7341_v39, %v16123_v47  ;;  %v7344_v39 = vmul.f32 0.044715, %v16172_v50 }
 0x596   : > { %7292 = vmatpush1.bf16.msra.mxu1 %v13818_v23 }
 0x597   : > { %7293 = vmatprep.subr.bf16.mxu1 %v14460_v7 }
 0x598   : > { %12321 = vmatpush3.bf16.msra.mxu0 %v13836_v32 }
 0x599   : > { %12322 = vmatprep.subr.bf16.mxu0 %v13837_v34 }
 0x59a   : > { %7294 = vmatpush1.bf16.msra.mxu1 %v13822_v24 }
 0x59b   : > { %7295 = vmatprep.subr.bf16.mxu1 %v14460_v7 }
 0x59c   : > { %12323 = vmatpush3.bf16.msra.mxu0 %v13838_v49 }
 0x59d   : > { %12324 = vmatprep.subr.bf16.mxu0 %v13839_v48 }
 0x59e   : > { %7296 = vmatpush1.bf16.msra.mxu1 %v13823_v25 }
 0x59f   : > { %7297 = vmatprep.subr.bf16.mxu1 %v14460_v7 }
 0x5a0   : > { %12325 = vmatpush3.bf16.msra.mxu0 %v13840_v36 }
 0x5a1   : > { %12326 = vmatprep.subr.bf16.mxu0 %v13841_v2 }
 0x5a2   : > { %7298 = vmatpush1.bf16.msra.mxu1 %v13824_v27  ;;  %v7359_v27 = vmul.f32 %v7350_v26, %v16123_v47  ;;  %v13864_v26 = vld [vmem:[%s17283_s20 + $0xb0] sm:$0xff]  }
 0x5a3   : > { %7299 = vmatprep.subr.bf16.mxu1 %v14460_v7 }
 0x5a4   : > { %12327 = vmatpush3.bf16.msra.mxu0 %v13842_v38 }
 0x5a5   : > { %12328 = vmatprep.subr.bf16.mxu0 %v13843_v40 }
 0x5a6   : > { %7300 = vmatpush1.bf16.msra.mxu1 %v13825_v28  ;;  %v7368_v28 = vadd.f32 %v7359_v27, %v16123_v47  ;;  %v13850_v47 = vld [vmem:[%s17283_s20 + $0x80] sm:$0xff]   ;;  %v7336_v27 = vmul.f32 0.5, %v16177_v41 }
 0x5a7   : > { %7301 = vmatprep.subr.bf16.mxu1 %v14460_v7 }
 0x5a8   : > { %12329 = vmatpush3.bf16.msra.mxu0 %v13844_v3  ;;  %v7340_v3 = vmul.f32 0.044715, %v16121_v43 }
 0x5a9   : > { %12330 = vmatprep.subr.bf16.mxu0 %v13845_v52 }
 0x5aa   : > { %7302 = vmatpush1.bf16.msra.mxu1 %v13826_v29 }
 0x5ab   : > { %7303 = vmatprep.subr.bf16.mxu1 %v14460_v7 }
 0x5ac   : > { %12331 = vmatpush3.bf16.msra.mxu0 %v13846_v46 }
 0x5ad   : > { %12332 = vmatprep.subr.bf16.mxu0 %v13847_v56 }
 0x5ae   : > { %7304 = vmatpush1.bf16.msra.mxu1 %v13827_v30 }
 0x5af   : > { %7305 = vmatprep.subr.bf16.mxu1 %v14460_v7 }
 0x5b0   : > { %12333 = vmatpush3.bf16.msra.mxu0 %v13848_v57 }
 0x5b1   : > { %12340 = vmatprep.subr.bf16.mxu0 %v13849_v58 }
 0x5b2   : > { %7306 = vmatpush1.bf16.msra.mxu1 %v13828_v11 }
 0x5b3   : > { %7307 = vmatprep.subr.bf16.mxu1 %v14460_v7 }
 0x5b6   : > { %7308 = vmatpush1.bf16.msra.mxu1 %v13829_v33  ;;  %v7377_v33 = vmul.f32 0.7978846, %v7368_v28 }
 0x5b7   : > { %7309 = vmatprep.subr.bf16.mxu1 %v14460_v7 }
 0x5ba   : > { %7310 = vmatpush1.bf16.msra.mxu1 %v13830_v35 }
 0x5bb   : > { %7311 = vmatprep.subr.bf16.mxu1 %v14460_v7 }
 0x5be   : > { %7312 = vmatpush1.bf16.msra.mxu1 %v13831_v51 }
 0x5bf   : > { %7313 = vmatprep.subr.bf16.mxu1 %v14460_v7 }
 0x5c2   : > { %7314 = vmatpush1.bf16.msra.mxu1 %v13832_v4  ;;  %v7345_v4 = vmul.f32 0.044715, %v16177_v41 }
 0x5c3   : > { %12362 = vmatprep.subr.bf16.mxu1 %v13861_v5  ;;  %v7349_v5 = vmul.f32 %v7340_v3, %v16121_v43 }
 0x5c4   : > { %v7354_v58 = vmul.f32 %v7345_v4, %v16177_v41 }
 0x5c5   : > { %7322 = vmatmul.mubr.bf16.vlgmr.msra.gmra.mrb[68].mxu1 %v15794_v53  ;;  %v13862_v53 = vld [vmem:[%s17283_s20 + $0x100] sm:$0xff]  }
 0x5c6   : > { %12363 = vmatpush3.bf16.msra.mxu1 %v13862_v53 }
 0x5c7   : > { %12364 = vmatprep.subr.bf16.mxu1 %v13865_v60 }
 0x5ca   : > { %12365 = vmatpush3.bf16.msra.mxu1 %v13866_v61 }
 0x5cb   : > { %12366 = vmatprep.subr.bf16.mxu1 %v13869_v63 }
 0x5ce   : > { %12367 = vmatpush3.bf16.msra.mxu1 %v13870_v0 }
 0x5cf   : > { %12368 = vmatprep.subr.bf16.mxu1 %v13872_v1  ;;  %v7363_v1 = vmul.f32 %v7354_v58, %v16177_v41 }
 0x5d2   : > { %12369 = vmatpush3.bf16.msra.mxu1 %v13874_v6  ;;  %v7358_v6 = vmul.f32 %v7349_v5, %v16121_v43 }
 0x5d3   : > { %12370 = vmatprep.subr.bf16.mxu1 %v13876_v8 }
 0x5d6   : > { %12371 = vmatpush3.bf16.msra.mxu1 %v13878_v44 }
 0x5d7   : > { %12372 = vmatprep.subr.bf16.mxu1 %v13880_v12  ;;  %v7372_v12 = vadd.f32 %v7363_v1, %v16177_v41  ;;  %v13885_v1 = vld [vmem:[%s17283_s20 + $0x198] sm:$0xff]  }
 0x5da   : > { %12373 = vmatpush3.bf16.msra.mxu1 %v13882_v15  ;;  %v7367_v15 = vadd.f32 %v7358_v6, %v16121_v43  ;;  %v13887_v6 = vld [vmem:[%s17283_s20 + $0x1e0] sm:$0xff]  }
 0x5db   : > { %12374 = vmatprep.subr.bf16.mxu1 %v13884_v59  ;;  %v13852_v59 = vld [vmem:[%s17283_s20 + $0x88] sm:$0xff]  }
 0x5de   : > { %12375 = vmatpush3.bf16.msra.mxu1 %v13886_v42  ;;  %v13853_v42 = vld [vmem:[%s17283_s20 + $0xd0] sm:$0xff]  }
 0x5df   : > { %12376 = vmatprep.subr.bf16.mxu1 %v13888_v62  ;;  %v7376_v62 = vmul.f32 0.7978846, %v7367_v15 }
 0x5e2   : > { %12377 = vmatpush3.bf16.msra.mxu1 %v13890_v20  ;;  %v13857_v20 = vld [vmem:[%s17283_s20 + $0xe0] sm:$0xff]  }
 0x5e3   : > { %12603 = vmatprep.subr.bf16.mxu1 %v14461_v14 }
 0x5fc   : > { %v6207_v17 = vpop.f32.mrb[56].mxu1 }
 0x5fd   : > { %v6213_v18 = vsub.f32 0.0, %v6207_v17  ;;  %v12601_v13 = vpop.f32.mrb[57].mxu1  ;;  %v7381_v17 = vmul.f32 0.7978846, %v7372_v12 }
 0x5fe   : > { %v6210_v19 = vpop.f32.mrb[58].mxu1  ;;  %v13855_v13 = vld [vmem:[%s17283_s20 + $0xd8] sm:$0xff]  }
 0x5ff   : > { %v6214_v21 = vmul.f32 1.442695, %v6213_v18  ;;  %v12602_v16 = vpop.f32.mrb[59].mxu1  ;;  %v13854_v18 = vld [vmem:[%s17283_s20 + $0x90] sm:$0xff]   ;;  %v13856_v19 = vld [vmem:[%s17283_s20 + $0x98] sm:$0xff]  }
 0x600   : > { %v13859_v16 = vld [vmem:[%s17283_s20 + $0xe8] sm:$0xff]  }
 0x601   : > { %14157 = vpow2.f32 %v6214_v21  ;;  %v13858_v21 = vld [vmem:[%s17283_s20 + $0xa0] sm:$0xff]  }
 0x60b   : > { %v14158_v22 = vpop.eup %14157 }
 0x60c   : > { %v6216_v23 = vadd.f32 1.0, %v14158_v22  ;;  %v13860_v22 = vld [vmem:[%s17283_s20 + $0xa8] sm:$0xff]  }
 0x60e   : > { %14159 = vrcp.f32 %v6216_v23 }
 0x60f   : > { %14161 = vtanh.f32 %v7377_v33 }
 0x618   : > { %v14160_v24 = vpop.eup %14159 }
 0x619   : > { %v6218_v25 = vmul.f32 %v14160_v24, %v15693_v9  ;;  %v14162_v40 = vpop.eup %14161  ;;  %v13863_v24 = vld [vmem:[%s17283_s20 + $0xf0] sm:$0xff]  }
 0x61a   : > { %v7395_v52 = vadd.f32 1.0, %v14162_v40 }
 0x61b   : > { %8232 = vrot.lane.b32.xlu0 %v6218_v25, %s14464_s29 }
 0x61c   : > { %v7404_v61 = vmul.f32 %v7395_v52, %v7332_v54  ;;  %v13873_v54 = vld [vmem:[%s17283_s20 + $0x180] sm:$0xff]  }
 0x61e   : > { %v7413_v44 = vpack.c.bf16 %v7404_v61, %v7404_v61 }
 0x630   : > { %v7159_v29 = vpop.f32.mrb[60].mxu1 }
 0x631   : > { %v7338_v30 = vmul.f32 0.044715, %v7159_v29  ;;  %v7161_v11 = vpop.f32.mrb[61].mxu1  ;;  %v7329_v56 = vmul.f32 0.5, %v7159_v29 }
 0x632   : > { %v7339_v31 = vmul.f32 0.044715, %v7161_v11  ;;  %v7163_v32 = vpop.f32.mrb[62].mxu1  ;;  %v7330_v53 = vmul.f32 0.5, %v7161_v11 }
 0x633   : > { %v7347_v34 = vmul.f32 %v7338_v30, %v7159_v29  ;;  %v7164_v49 = vpop.f32.mrb[63].mxu1 }
 0x634   : > { %v7348_v35 = vmul.f32 %v7339_v31, %v7161_v11 }
 0x635   : > { %v7356_v9 = vmul.f32 %v7347_v34, %v7159_v29  ;;  %v7353_v34 = vmul.f32 %v7344_v39, %v16172_v50  ;;  %v13896_v39 = vld [vmem:[%s17283_s20 + $0x1b8] sm:$0xff]  }
 0x636   : > { %v7357_v48 = vmul.f32 %v7348_v35, %v7161_v11 }
 0x637   : > { %v7365_v36 = vadd.f32 %v7356_v9, %v7159_v29  ;;  %v7331_v29 = vmul.f32 0.5, %v16121_v43  ;;  %v13868_v43 = vld [vmem:[%s17283_s20 + $0xb8] sm:$0xff]   ;;  %v7362_v40 = vmul.f32 %v7353_v34, %v16172_v50 }
 0x638   : > { %v7366_v51 = vadd.f32 %v7357_v48, %v7161_v11  ;;  %v13867_v11 = vld [vmem:[%s17283_s20 + $0xf8] sm:$0xff]  }
 0x639   : > { %v7374_v2 = vmul.f32 0.7978846, %v7365_v36  ;;  %v7371_v58 = vadd.f32 %v7362_v40, %v16172_v50 }
 0x63a   : > { %v7375_v38 = vmul.f32 0.7978846, %v7366_v51 }
 0x63b   : > { %14163 = vtanh.f32 %v7374_v2  ;;  %v13871_v2 = vld [vmem:[%s17283_s20 + $0x1c0] sm:$0xff]   ;;  %v7380_v61 = vmul.f32 0.7978846, %v7371_v58 }
 0x63c   : > { %14165 = vtanh.f32 %v7375_v38 }
 0x63d   : > { %14167 = vtanh.f32 %v7381_v17 }
 0x63e   : > { %14169 = vtanh.f32 %v7376_v62 }
 0x645   : > { %v14164_v55 = vpop.eup %14163 }
 0x646   : > { %v14166_v46 = vpop.eup %14165  ;;  %v7392_v57 = vadd.f32 1.0, %v14164_v55 }
 0x647   : > { %v7393_v60 = vadd.f32 1.0, %v14166_v46  ;;  %v14168_v23 = vpop.eup %14167 }
 0x648   : > { %v7401_v63 = vmul.f32 %v7392_v57, %v7329_v56  ;;  %v14170_v25 = vpop.eup %14169  ;;  %v7399_v28 = vadd.f32 1.0, %v14168_v23  ;;  %v13875_v56 = vld [vmem:[%s17283_s20 + $0x1c8] sm:$0xff]   ;;  %v13894_v23 = vld [vmem:[%s17283_s20 + $0x1b0] sm:$0xff]  }
 0x649   : > { %v7402_v0 = vmul.f32 %v7393_v60, %v7330_v53  ;;  %v7394_v31 = vadd.f32 1.0, %v14170_v25  ;;  %v13877_v53 = vld [vmem:[%s17283_s20 + $0x188] sm:$0xff]   ;;  %v13879_v60 = vld [vmem:[%s17283_s20 + $0x1d0] sm:$0xff]   ;;  %v13895_v25 = vld [vmem:[%s17283_s20 + $0x1f8] sm:$0xff]  }
 0x64a   : > { %v7410_v45 = vpack.c.bf16 %v7401_v63, %v7401_v63  ;;  %v7408_v41 = vmul.f32 %v7399_v28, %v7336_v27  ;;  %v13881_v63 = vld [vmem:[%s17283_s20 + $0x190] sm:$0xff]   ;;  %v13900_v28 = vld [vmem:[%s17283_s20 + $0x218] sm:$0xff]  }
 0x64b   : > { %v7411_v8 = vpack.c.bf16 %v7402_v0, %v7402_v0  ;;  %v7403_v51 = vmul.f32 %v7394_v31, %v7331_v29  ;;  %v13883_v0 = vld [vmem:[%s17283_s20 + $0x1d8] sm:$0xff]   ;;  %v13901_v29 = vld [vmem:[%s17283_s20 + $0x220] sm:$0xff]  }
 0x64c   : > { %v7417_v52 = vpack.c.bf16 %v7408_v41, %v7408_v41 }
 0x64d   : > { %7883 = vmatprep.mubr.bf16.mxu0 %v7411_v8  ;;  %v7412_v46 = vpack.c.bf16 %v7403_v51, %v7403_v51 }
 0x64e   : > { %7884 = vmatmul.mubr.bf16.vlgmr.msra.gmra.mrb[60].mxu0 %v7410_v45 }
 0x64f   : > { %12341 = vmatpush3.bf16.msra.mxu0 %v13850_v47  ;;  %7923 = vmatprep.mubr.bf16.mxu0 %v7413_v44 }
 0x650   : > { %12342 = vmatprep.subr.bf16.mxu0 %v13851_v10  ;;  %v13889_v10 = vld [vmem:[%s17283_s20 + $0x1a0] sm:$0xff]  }
 0x653   : > { %12343 = vmatpush3.bf16.msra.mxu0 %v13852_v59  ;;  %v13891_v59 = vld [vmem:[%s17283_s20 + $0x1e8] sm:$0xff]  }
 0x654   : > { %12344 = vmatprep.subr.bf16.mxu0 %v13853_v42 }
 0x657   : > { %12345 = vmatpush3.bf16.msra.mxu0 %v13854_v18 }
 0x658   : > { %12346 = vmatprep.subr.bf16.mxu0 %v13855_v13  ;;  %v13892_v13 = vld [vmem:[%s17283_s20 + $0x1a8] sm:$0xff]  }
 0x65b   : > { %12347 = vmatpush3.bf16.msra.mxu0 %v13856_v19  ;;  %v13897_v19 = vld [vmem:[%s17283_s20 + $0x200] sm:$0xff]  }
 0x65c   : > { %12348 = vmatprep.subr.bf16.mxu0 %v13857_v20 }
 0x65f   : > { %12349 = vmatpush3.bf16.msra.mxu0 %v13858_v21  ;;  %v13893_v21 = vld [vmem:[%s17283_s20 + $0x1f0] sm:$0xff]  }
 0x660   : > { %12350 = vmatprep.subr.bf16.mxu0 %v13859_v16  ;;  %v7335_v16 = vmul.f32 0.5, %v16172_v50 }
 0x663   : > { %12351 = vmatpush3.bf16.msra.mxu0 %v13860_v22 }
 0x664   : > { %v7241_v30 = vpop.f32.mrb[64].mxu1  ;;  %12352 = vmatprep.subr.bf16.mxu0 %v13863_v24  ;;  %v13898_v24 = vld [vmem:[%s17283_s20 + $0x208] sm:$0xff]  }
 0x665   : > { %v7342_v32 = vmul.f32 0.044715, %v7241_v30  ;;  %v7243_v33 = vpop.f32.mrb[65].mxu1  ;;  %v7333_v44 = vmul.f32 0.5, %v7241_v30 }
 0x666   : > { %v7343_v49 = vmul.f32 0.044715, %v7243_v33  ;;  %v7245_v35 = vpop.f32.mrb[66].mxu1  ;;  %v7334_v12 = vmul.f32 0.5, %v7243_v33 }
 0x667   : > { %v7351_v9 = vmul.f32 %v7342_v32, %v7241_v30  ;;  %12353 = vmatpush3.bf16.msra.mxu0 %v13864_v26  ;;  %v7246_v48 = vpop.f32.mrb[67].mxu1  ;;  %v13899_v26 = vld [vmem:[%s17283_s20 + $0x210] sm:$0xff]  }
 0x668   : > { %v7352_v36 = vmul.f32 %v7343_v49, %v7243_v33  ;;  %12354 = vmatprep.subr.bf16.mxu0 %v13867_v11  ;;  %v13903_v11 = vld [vmem:[%s17283_s20 + $0x230] sm:$0xff]  }
 0x669   : > { %v7360_v38 = vmul.f32 %v7351_v9, %v7241_v30  ;;  %v13904_v9 = vld [vmem:[%s17283_s20 + $0x238] sm:$0xff]  }
 0x66a   : > { %v7361_v4 = vmul.f32 %v7352_v36, %v7243_v33 }
 0x66b   : > { %v7369_v3 = vadd.f32 %v7360_v38, %v7241_v30  ;;  %12355 = vmatpush3.bf16.msra.mxu0 %v13868_v43  ;;  %v13902_v30 = vld [vmem:[%s17283_s20 + $0x228] sm:$0xff]  }
 0x66c   : > { %v7370_v55 = vadd.f32 %v7361_v4, %v7243_v33  ;;  %12384 = vmatprep.subr.bf16.mxu0 %v13871_v2  ;;  %v13905_v4 = vld [vmem:[%s17172_s10] sm:$0xff]  }
 0x66d   : > { %v7378_v57 = vmul.f32 0.7978846, %v7369_v3  ;;  %v13906_v3 = vld [vmem:[%s17172_s10 + $0x8] sm:$0xff]  }
 0x66e   : > { %v7379_v5 = vmul.f32 0.7978846, %v7370_v55  ;;  %7924 = vmatmul.mubr.bf16.vlgmr.msra.gmra.mrb[64].mxu0 %v7412_v46 }
 0x66f   : > { %14171 = vtanh.f32 %v7378_v57  ;;  %12385 = vmatpush3.bf16.msra.mxu0 %v13873_v54  ;;  %8003 = vmatprep.mubr.bf16.mxu0 %v7417_v52 }
 0x670   : > { %12386 = vmatprep.subr.bf16.mxu0 %v13875_v56  ;;  %14173 = vtanh.f32 %v7379_v5 }
 0x671   : > { %14175 = vtanh.f32 %v7380_v61 }
 0x673   : > { %12387 = vmatpush3.bf16.msra.mxu0 %v13877_v53 }
 0x674   : > { %12388 = vmatprep.subr.bf16.mxu0 %v13879_v60 }
 0x677   : > { %12389 = vmatpush3.bf16.msra.mxu0 %v13881_v63 }
 0x678   : > { %12390 = vmatprep.subr.bf16.mxu0 %v13883_v0 }
 0x679   : > { %v14172_v8 = vpop.eup %14171 }
 0x67a   : > { %v14174_v47 = vpop.eup %14173  ;;  %v7396_v45 = vadd.f32 1.0, %v14172_v8 }
 0x67b   : > { %12391 = vmatpush3.bf16.msra.mxu0 %v13885_v1  ;;  %v7397_v15 = vadd.f32 1.0, %v14174_v47  ;;  %v14176_v62 = vpop.eup %14175 }
 0x67c   : > { %12392 = vmatprep.subr.bf16.mxu0 %v13887_v6  ;;  %v7405_v42 = vmul.f32 %v7396_v45, %v7333_v44  ;;  %v7398_v22 = vadd.f32 1.0, %v14176_v62 }
 0x67d   : > { %v7406_v17 = vmul.f32 %v7397_v15, %v7334_v12 }
 0x67e   : > { %v7414_v20 = vpack.c.bf16 %v7405_v42, %v7405_v42  ;;  %v7407_v50 = vmul.f32 %v7398_v22, %v7335_v16  ;;  %v8170_v16 = vld [vmem:[%s17174_s12] sm:$0x3] }
 0x67f   : > { %12393 = vmatpush3.bf16.msra.mxu0 %v13889_v10  ;;  %v7415_v18 = vpack.c.bf16 %v7406_v17, %v7406_v17  ;;  %v8182_v22 = vsel %vm8180_vm6, %v8170_v16, 0 }
 0x680   : > { %12394 = vmatprep.subr.bf16.mxu0 %v13891_v59  ;;  %v7416_v27 = vpack.c.bf16 %v7407_v50, %v7407_v50 }
 0x681   : > { %7963 = vmatprep.mubr.bf16.mxu1 %v7415_v18 }
 0x682   : > { %7964 = vmatmul.mubr.bf16.vlgmr.msra.gmra.mrb[72].mxu1 %v7414_v20  ;;  %v6498_v20 = vld [vmem:[%s17173_s11] sm:$0xf] }
 0x683   : > { %12395 = vmatpush3.bf16.msra.mxu0 %v13892_v13  ;;  %12604 = vmatpush3.bf16.msra.mxu1 %v13897_v19 }
 0x684   : > { %12396 = vmatprep.subr.bf16.mxu0 %v13893_v21  ;;  %12605 = vmatprep.subr.bf16.mxu1 %v14461_v14  ;;  %v8121_v21 = vsel %vm3521_vm1, %v6498_v20, 0 }
 0x685   : > { %12619 = vmatprep.mubr.msk.bf16.mxu1 %vm14462_vm2, %v14461_v14 }
 0x687   : > { %12397 = vmatpush3.bf16.msra.mxu0 %v13894_v23  ;;  %12606 = vmatpush3.bf16.msra.mxu1 %v13898_v24  ;;  %v8169_v23 = vld [vmem:[%s14840_s6] sm:$0x3]  ;;  %s17284_s6 = sld [smem:[#allocation33_spill]] }
 0x688   : > { %12398 = vmatprep.subr.bf16.mxu0 %v13895_v25  ;;  %12607 = vmatprep.subr.bf16.mxu1 %v14461_v14 }
 0x68b   : > { %12399 = vmatpush3.bf16.msra.mxu0 %v13896_v39  ;;  %12608 = vmatpush3.bf16.msra.mxu1 %v13899_v26 }
 0x68c   : > { %12609 = vmatprep.subr.bf16.mxu1 %v14461_v14  ;;  %12623 = vmatprep.subr.bf16.mxu0 %v14461_v14 }
 0x68e   : > { %8004 = vmatmul.mubr.bf16.vlgmr.msra.gmra.mrb[68].mxu0 %v7416_v27 }
 0x68f   : > { %12610 = vmatpush3.bf16.msra.mxu1 %v13900_v28  ;;  %12627 = vmatprep.mubr.msk.bf16.mxu0 %vm14462_vm2, %v14461_v14 }
 0x690   : > { %12611 = vmatprep.subr.bf16.mxu1 %v14461_v14  ;;  %12624 = vmatpush3.bf16.msra.mxu0 %v13905_v4  ;;  %v13912_v4 = vld [vmem:[%s17175_s13 + $0x28] sm:$0xff]  }
 0x691   : > { %12625 = vmatprep.subr.bf16.mxu0 %v14461_v14 }
 0x693   : > { %12612 = vmatpush3.bf16.msra.mxu1 %v13901_v29 }
 0x694   : > { %12613 = vmatprep.subr.bf16.mxu1 %v14461_v14  ;;  %12626 = vmatpush3.bf16.msra.mxu0 %v13906_v3  ;;  %v13913_v3 = vld [vmem:[%s17175_s13 + $0x30] sm:$0xff]  }
 0x695   : > { %12631 = vmatprep.subr.bf16.mxu0 %v14461_v14 }
 0x697   : > { %12614 = vmatpush3.bf16.msra.mxu1 %v13902_v30 }
 0x698   : > { %v7323_v31 = vpop.f32.mrb[68].mxu1  ;;  %12615 = vmatprep.subr.bf16.mxu1 %v14461_v14 }
 0x699   : > { %v7346_v32 = vmul.f32 0.044715, %v7323_v31  ;;  %v7325_v33 = vpop.f32.mrb[69].mxu1  ;;  %v7337_v51 = vmul.f32 0.5, %v7323_v31 }
 0x69a   : > { %v7326_v34 = vpop.f32.mrb[70].mxu1 }
 0x69b   : > { %v7355_v49 = vmul.f32 %v7346_v32, %v7323_v31  ;;  %v7327_v35 = vpop.f32.mrb[71].mxu1  ;;  %12616 = vmatpush3.bf16.msra.mxu1 %v13903_v11 }
 0x69c   : > { %12617 = vmatprep.subr.bf16.mxu1 %v14461_v14  ;;  %v13908_v35 = vld [vmem:[%s17175_s13 + $0x8] sm:$0xff]  }
 0x69d   : > { %v7364_v48 = vmul.f32 %v7355_v49, %v7323_v31  ;;  %v13907_v49 = vld [vmem:[%s17175_s13] sm:$0xff]  }
 0x69f   : > { %v7373_v43 = vadd.f32 %v7364_v48, %v7323_v31  ;;  %12618 = vmatpush3.bf16.msra.mxu1 %v13904_v9  ;;  %v13909_v9 = vld [vmem:[%s17175_s13 + $0x10] sm:$0xff]   ;;  %v13910_v48 = vld [vmem:[%s17175_s13 + $0x18] sm:$0xff]  }
 0x6a0   : > { %12637 = vmatprep.subr.bf16.mxu1 %v14461_v14 }
 0x6a1   : > { %v7382_v41 = vmul.f32 0.7978846, %v7373_v43 }
 0x6a3   : > { %14177 = vtanh.f32 %v7382_v41 }
 0x6ad   : > { %v14178_v36 = vpop.eup %14177 }
 0x6ae   : > { %v7400_v2 = vadd.f32 1.0, %v14178_v36  ;;  %v13911_v36 = vld [vmem:[%s17175_s13 + $0x20] sm:$0xff]  }
 0x6b0   : > { %v7409_v38 = vmul.f32 %v7400_v2, %v7337_v51  ;;  %v11851_v51 = vld [vmem:[%s17186_s24] ss:$0 sm:$0xff] }
 0x6b2   : > { %v7418_v40 = vpack.c.bf16 %v7409_v38, %v7409_v38 }
 0x6b4   : > { %12620 = vmatmul.mubr.bf16.vlgmr.msra.gmra.mrb[76].mxu1 %v7418_v40 }
 0x6b5   : > { %12639 = vmatprep.mubr.msk.bf16.mxu1 %vm14462_vm2, %v14461_v14  ;;  %12638 = vmatpush3.bf16.msra.mxu1 %v8182_v22 }
 0x6b6   : > { %12663 = vmatprep.subr.bf16.mxu1 %v14461_v14 }
 0x6bc   : > { %12640 = vmatmul.mubr.msk.bf16.vlgmr.msra.gmra.mrb[80].mxu1 %vm8176_vm7, %v8169_v23 }
 0x6bd   : > { %12679 = vmatprep.mubr.msk.bf16.mxu1 %vm14462_vm2, %v14461_v14 }
 0x721   : > { %v12334_v54 = vpop.f32.mrb[60].mxu0 }
 0x722   : > { %v12335_v52 = vpop.f32.mrb[61].mxu0 }
 0x723   : > { %v12336_v55 = vadd.f32 %v12335_v52, %v12334_v54  ;;  %v12337_v46 = vpop.f32.mrb[62].mxu0  ;;  %v13914_v54 = vld [vmem:[%s17175_s13 + $0x38] sm:$0xff]   ;;  %v13915_v52 = vld [vmem:[%s17176_s14] sm:$0xff]  }
 0x724   : > { %v12338_v56 = vpop.f32.mrb[63].mxu0  ;;  %12664 = vmatpush3.bf16.msra.mxu1 %v13915_v52  ;;  %v13961_v52 = vld [vmem:[%s17177_s15 + $0xc4] ss:$16 sps:$4 sm:$0xff]  }
 0x725   : > { %12665 = vmatprep.subr.bf16.mxu1 %v14461_v14 }
 0x741   : > { %v12356_v57 = vpop.f32.mrb[64].mxu0 }
 0x742   : > { %v12357_v58 = vpop.f32.mrb[65].mxu0 }
 0x743   : > { %v12358_v5 = vadd.f32 %v12357_v58, %v12356_v57  ;;  %v12359_v53 = vpop.f32.mrb[66].mxu0 }
 0x744   : > { %v12360_v60 = vpop.f32.mrb[67].mxu0 }
 0x745   : > { %v7926_v61 = vadd.f32 %v12358_v5, %v12336_v55 }
 0x755   : > { %v12378_v63 = vpop.f32.mrb[72].mxu1 }
 0x756   : > { %v12379_v0 = vpop.f32.mrb[73].mxu1 }
 0x757   : > { %v12380_v1 = vadd.f32 %v12379_v0, %v12378_v63  ;;  %v12381_v6 = vpop.f32.mrb[74].mxu1 }
 0x758   : > { %v12382_v8 = vpop.f32.mrb[75].mxu1  ;;  %v8233_v6 = vpop.permute.xlu0 %8232 }
 0x759   : > { %v7966_v47 = vadd.f32 %v12380_v1, %v7926_v61  ;;  %v16425_v61 = vsub.s32 0, %v15769_v37 }
 0x761   : > { %v12400_v44 = vpop.f32.mrb[68].mxu0 }
 0x762   : > { %v12401_v45 = vpop.f32.mrb[69].mxu0 }
 0x763   : > { %v12402_v10 = vadd.f32 %v12401_v45, %v12400_v44  ;;  %v12403_v12 = vpop.f32.mrb[70].mxu0  ;;  %v13916_v44 = vld [vmem:[%s17176_s14 + $0x8] sm:$0xff]   ;;  %v13917_v45 = vld [vmem:[%s17176_s14 + $0x10] sm:$0xff]  }
 0x764   : > { %v12404_v15 = vpop.f32.mrb[71].mxu0  ;;  %12666 = vmatpush3.bf16.msra.mxu1 %v13916_v44  ;;  %v13919_v12 = vld [vmem:[%s17176_s14 + $0x20] sm:$0xff]  }
 0x765   : > { %v8006_v59 = vadd.f32 %v12402_v10, %v7966_v47  ;;  %12667 = vmatprep.subr.bf16.mxu1 %v14461_v14  ;;  %v13918_v10 = vld [vmem:[%s17176_s14 + $0x18] sm:$0xff]   ;;  %v13920_v15 = vld [vmem:[%s17176_s14 + $0x28] sm:$0xff]  }
 0x768   : > { %12668 = vmatpush3.bf16.msra.mxu1 %v13917_v45 }
 0x769   : > { %12669 = vmatprep.subr.bf16.mxu1 %v14461_v14 }
 0x76c   : > { %12670 = vmatpush3.bf16.msra.mxu1 %v13918_v10 }
 0x76d   : > { %12671 = vmatprep.subr.bf16.mxu1 %v14461_v14 }
 0x770   : > { %12672 = vmatpush3.bf16.msra.mxu1 %v13919_v12 }
 0x771   : > { %12673 = vmatprep.subr.bf16.mxu1 %v14461_v14 }
 0x774   : > { %12674 = vmatpush3.bf16.msra.mxu1 %v13920_v15 }
 0x775   : > { %12675 = vmatprep.subr.bf16.mxu1 %v14461_v14 }
 0x787   : > { %v8045_v42 = vpop.f32.mrb[76].mxu1 }
 0x788   : > { %v16362_v17 = vadd.f32 %v8045_v42, %v8006_v59  ;;  %v12621_v62 = vpop.f32.mrb[77].mxu1  ;;  %v13921_v59 = vld [vmem:[%s17176_s14 + $0x30] sm:$0xff]   ;;  %v13922_v42 = vld [vmem:[%s17176_s14 + $0x38] sm:$0xff]  }
 0x789   : > { %v8048_v18 = vpop.f32.mrb[78].mxu1  ;;  %12676 = vmatpush3.bf16.msra.mxu1 %v13921_v59  ;;  %v13972_v59 = vld [vmem:[%s17179_s17] sm:$0xff]  }
 0x78a   : > { %v8051_v13 = vpack.c.bf16 %v16362_v17, %v16362_v17  ;;  %v12622_v19 = vpop.f32.mrb[79].mxu1  ;;  %12677 = vmatprep.subr.bf16.mxu1 %v14461_v14 }
 0x78c   : > { %12628 = vmatmul.mubr.msk.bf16.vlgmr.msra.gmra.mrb[72].mxu0 %vm6112_vm3, %v8051_v13 }
 0x78d   : > { %12633 = vmatprep.mubr.msk.bf16.mxu0 %vm14462_vm2, %v14461_v14  ;;  %12632 = vmatpush3.bf16.msra.mxu0 %v8121_v21 }
 0x78e   : > { %12643 = vmatprep.subr.bf16.mxu0 %v14461_v14  ;;  %12678 = vmatpush3.bf16.msra.mxu1 %v13922_v42 }
 0x78f   : > { %v8218_v43 = vpop.f32.mrb[80].mxu1 }
 0x790   : > { %v12641_v41 = vpop.f32.mrb[81].mxu1  ;;  %v8219_v38 = vadd.f32 %v11851_v51, %v8218_v43  ;;  %v13941_v43 = vld [vmem:[%s17177_s15 + $0x60] ss:$16 sps:$4 sm:$0xff]   ;;  %v13952_v51 = vld [vmem:[%s17177_s15 + $0x8c] ss:$16 sps:$4 sm:$0xff]  }
 0x791   : > { %v8221_v2 = vpop.f32.mrb[82].mxu1  ;;  %v13944_v41 = vld [vmem:[%s17177_s15 + $0x68] ss:$16 sps:$4 sm:$0xff]  }
 0x792   : > { %v12642_v40 = vpop.f32.mrb[83].mxu1  ;;  %8224 = vst [vmem:[#allocation2] sm:$0xf] %v8219_v38  ;;  %v13947_v2 = vld [vmem:[%s17177_s15 + $0x80] ss:$16 sps:$4 sm:$0xff]  }
 0x793   : > { %v13950_v38 = vld [vmem:[%s17177_s15 + $0x88] ss:$16 sps:$4 sm:$0xff]   ;;  %v13955_v40 = vld [vmem:[%s17177_s15 + $0xa4] ss:$16 sps:$4 sm:$0xff]  }
 0x85f   : > { %v8101_v24 = vpop.f32.mrb[72].mxu0 }
 0x860   : > { %v8108_v25 = vmul.f32 0.044715, %v8101_v24  ;;  %v12629_v50 = vpop.f32.mrb[73].mxu0  ;;  %v8107_v31 = vmul.f32 0.5, %v8101_v24 }
 0x861   : > { %v8104_v39 = vpop.f32.mrb[74].mxu0 }
 0x862   : > { %v8109_v26 = vmul.f32 %v8108_v25, %v8101_v24  ;;  %v12630_v27 = vpop.f32.mrb[75].mxu0 }
 0x863   : > { %v13928_v27 = vld [vmem:[%s17177_s15 + $0xc] ss:$16 sps:$4 sm:$0xff]  }
 0x864   : > { %v8110_v28 = vmul.f32 %v8109_v26, %v8101_v24  ;;  %v13925_v26 = vld [vmem:[%s17177_s15 + $0x4] ss:$16 sps:$4 sm:$0xff]   ;;  %8764 = vmatprep.subr.bf16.mxu1 %v13928_v27 }
 0x866   : > { %v8111_v29 = vadd.f32 %v8110_v28, %v8101_v24  ;;  %v13923_v28 = vld [vmem:[%s17177_s15] ss:$16 sps:$4 sm:$0xff]  }
 0x868   : > { %v8112_v30 = vmul.f32 0.7978846, %v8111_v29  ;;  %v13926_v29 = vld [vmem:[%s17177_s15 + $0x8] ss:$16 sps:$4 sm:$0xff]  }
 0x86a   : > { %14179 = vtanh.f32 %v8112_v30  ;;  %v13931_v30 = vld [vmem:[%s17177_s15 + $0x24] ss:$16 sps:$4 sm:$0xff]  }
 0x874   : > { %v14180_v11 = vpop.eup %14179 }
 0x875   : > { %v8114_v32 = vadd.f32 1.0, %v14180_v11  ;;  %v13934_v11 = vld [vmem:[%s17177_s15 + $0x2c] ss:$16 sps:$4 sm:$0xff]  }
 0x877   : > { %v8115_v33 = vmul.f32 %v8114_v32, %v8107_v31  ;;  %v13929_v31 = vld [vmem:[%s17177_s15 + $0x20] ss:$16 sps:$4 sm:$0xff]   ;;  %v13932_v32 = vld [vmem:[%s17177_s15 + $0x28] ss:$16 sps:$4 sm:$0xff]  }
 0x879   : > { %v8116_v34 = vpack.c.bf16 %v8115_v33, %v8115_v33  ;;  %v13937_v33 = vld [vmem:[%s17177_s15 + $0x44] ss:$16 sps:$4 sm:$0xff]  }
 0x87b   : > { %12634 = vmatmul.mubr.msk.bf16.vlgmr.msra.gmra.mrb[76].mxu0 %vm6166_vm5, %v8116_v34  ;;  %v13940_v34 = vld [vmem:[%s17177_s15 + $0x4c] ss:$16 sps:$4 sm:$0xff]  }
 0x87c   : > { %12659 = vmatprep.mubr.msk.bf16.mxu0 %vm14462_vm2, %v14461_v14  ;;  %12644 = vmatpush3.bf16.msra.mxu0 %v13907_v49  ;;  %v13935_v49 = vld [vmem:[%s17177_s15 + $0x40] ss:$16 sps:$4 sm:$0xff]  }
 0x87d   : > { %12645 = vmatprep.subr.bf16.mxu0 %v14461_v14 }
 0x880   : > { %12646 = vmatpush3.bf16.msra.mxu0 %v13908_v35  ;;  %v13938_v35 = vld [vmem:[%s17177_s15 + $0x48] ss:$16 sps:$4 sm:$0xff]  }
 0x881   : > { %12647 = vmatprep.subr.bf16.mxu0 %v14461_v14 }
 0x884   : > { %12648 = vmatpush3.bf16.msra.mxu0 %v13909_v9  ;;  %v13943_v9 = vld [vmem:[%s17177_s15 + $0x64] ss:$16 sps:$4 sm:$0xff]  }
 0x885   : > { %12649 = vmatprep.subr.bf16.mxu0 %v14461_v14 }
 0x888   : > { %12650 = vmatpush3.bf16.msra.mxu0 %v13910_v48  ;;  %v13946_v48 = vld [vmem:[%s17177_s15 + $0x6c] ss:$16 sps:$4 sm:$0xff]  }
 0x889   : > { %12651 = vmatprep.subr.bf16.mxu0 %v14461_v14 }
 0x88c   : > { %12652 = vmatpush3.bf16.msra.mxu0 %v13911_v36  ;;  %v13949_v36 = vld [vmem:[%s17177_s15 + $0x84] ss:$16 sps:$4 sm:$0xff]  }
 0x88d   : > { %12653 = vmatprep.subr.bf16.mxu0 %v14461_v14 }
 0x890   : > { %12654 = vmatpush3.bf16.msra.mxu0 %v13912_v4  ;;  %v13953_v4 = vld [vmem:[%s17177_s15 + $0xa0] ss:$16 sps:$4 sm:$0xff]  }
 0x891   : > { %12655 = vmatprep.subr.bf16.mxu0 %v14461_v14 }
 0x894   : > { %12656 = vmatpush3.bf16.msra.mxu0 %v13913_v3  ;;  %v13956_v3 = vld [vmem:[%s17177_s15 + $0xa8] ss:$16 sps:$4 sm:$0xff]  }
 0x895   : > { %12657 = vmatprep.subr.bf16.mxu0 %v14461_v14 }
 0x898   : > { %12658 = vmatpush3.bf16.msra.mxu0 %v13914_v54  ;;  %v13958_v54 = vld [vmem:[%s17177_s15 + $0xac] ss:$16 sps:$4 sm:$0xff]  }
 0x899   : > { %8723 = vmatprep.subr.bf16.mxu0 %v13925_v26 }
 0x94e   : > { %v8157_v55 = vpop.f32.mrb[76].mxu0 }
 0x94f   : > { %v8163_v46 = vsub.f32 0.0, %v8157_v55  ;;  %v12635_v56 = vpop.f32.mrb[77].mxu0  ;;  %v13964_v55 = vld [vmem:[%s17177_s15 + $0xcc] ss:$16 sps:$4 sm:$0xff]  }
 0x950   : > { %v8160_v57 = vpop.f32.mrb[78].mxu0  ;;  %v13962_v56 = vld [vmem:[%s17177_s15 + $0xc8] ss:$16 sps:$4 sm:$0xff]  }
 0x951   : > { %v8164_v58 = vmul.f32 1.442695, %v8163_v46  ;;  %v12636_v5 = vpop.f32.mrb[79].mxu0  ;;  %v13959_v46 = vld [vmem:[%s17177_s15 + $0xc0] ss:$16 sps:$4 sm:$0xff]  }
 0x952   : > { %v13967_v57 = vld [vmem:[%s17177_s15 + $0xe4] ss:$16 sps:$4 sm:$0xff]   ;;  %v13965_v5 = vld [vmem:[%s17177_s15 + $0xe0] ss:$16 sps:$4 sm:$0xff]  }
 0x953   : > { %14181 = vpow2.f32 %v8164_v58  ;;  %v13970_v58 = vld [vmem:[%s17177_s15 + $0xec] ss:$16 sps:$4 sm:$0xff]  }
 0x95d   : > { %v14182_v53 = vpop.eup %14181 }
 0x95e   : > { %v8166_v60 = vadd.f32 1.0, %v14182_v53  ;;  %v13968_v53 = vld [vmem:[%s17177_s15 + $0xe8] ss:$16 sps:$4 sm:$0xff]  }
 0x960   : > { %14183 = vrcp.f32 %v8166_v60  ;;  %v13971_v60 = vld [vmem:[%s17179_s17 + $0x40] sm:$0xff]  }
 0x96a   : > { %v14184_v63 = vpop.eup %14183 }
 0x96b   : > { %v8168_v0 = vmul.f32 %v14184_v63, %v16362_v17 }
 0x96d   : > { %v8228_v1 = vrot.slane %v8168_v0, %v16425_v61 }
 0x96f   : > { %8230 = vst.msk [vmem:[#allocation2] sm:$0xf] %vm8229_vm8, %v8228_v1 }
 0x970   : > { %8236 = vst.msk [vmem:[#allocation2] sm:$0xf] %vm8235_vm9, %v8233_v6 }
 0x977   : > { %v16429_v8 = vld [vmem:[#allocation2] sm:$0xf] }
 0x978   : > { %v8254_v47 = vpack.c.bf16 %v16429_v8, %v16429_v8 }
 0x97a   : > { %12660 = vmatmul.mubr.bf16.vlgmr.msra.gmra.mrb[80].mxu0 %v8254_v47 }
 0x97b   : > { %8755 = vmatprep.mubr.bf16.mxu0 %v14460_v7  ;;  %8724 = vmatpush1.bf16.msra.mxu0 %v13923_v28  ;;  %v8496_v28 = vld [vmem:[%s17284_s6] sm:$0xff]  ;;  %s10888_s6 = sshll.u32 %s890_s16, 4  ;;  %s17120_s6 = int_to_ptr.vmem [resolvable:$true] %s10888_s6 }
 0x97c   : > { %8725 = vmatprep.subr.bf16.mxu0 %v13931_v30  ;;  %s14377_s7 = scalar_lea.vmem %s17120_s6, 16 }
 0x97d   : > { %p14378_p10 = scmp.ne.s32.totalorder %s17120_s6, %s14377_s7 }
 0x97f   : > { %8726 = vmatpush1.bf16.msra.mxu0 %v13929_v31  ;;  %p14379_p9 = pnand %p14378_p10, %p17293_p4 }
 0x980   : > { %8727 = vmatprep.subr.bf16.mxu0 %v13937_v33 }
 0x981   : > { %p14380_p8 = pneg %p14379_p9 }
 0x983   : > { %8728 = vmatpush1.bf16.msra.mxu0 %v13935_v49  ;;  %v8810_v49 = vcombine.high %v8496_v28, %v8496_v28 }
 0x984   : > { %8729 = vmatprep.subr.bf16.mxu0 %v13943_v9 }
 0x987   : > { %8730 = vmatpush1.bf16.msra.mxu0 %v13941_v43 }
 0x988   : > { %8731 = vmatprep.subr.bf16.mxu0 %v13949_v36 }
 0x98b   : > { %8732 = vmatpush1.bf16.msra.mxu0 %v13947_v2 }
 0x98c   : > { %8733 = vmatprep.subr.bf16.mxu0 %v13955_v40 }
 0x98f   : > { %8734 = vmatpush1.bf16.msra.mxu0 %v13953_v4  ;;  %v13988_v4 = vld [vmem:[%s17179_s17 + $0xc0] sm:$0xff]  }
 0x990   : > { %8735 = vmatprep.subr.bf16.mxu0 %v13961_v52  ;;  %v13990_v52 = vld [vmem:[%s17179_s17 + $0xc8] sm:$0xff]  }
 0x993   : > { %8736 = vmatpush1.bf16.msra.mxu0 %v13959_v46  ;;  %v13992_v46 = vld [vmem:[%s17179_s17 + $0xd0] sm:$0xff]  }
 0x994   : > { %8737 = vmatprep.subr.bf16.mxu0 %v13967_v57  ;;  %v13994_v57 = vld [vmem:[%s17179_s17 + $0xd8] sm:$0xff]  }
 0x997   : > { %8738 = vmatpush1.bf16.msra.mxu0 %v13965_v5  ;;  %v13996_v5 = vld [vmem:[%s17179_s17 + $0xe0] sm:$0xff]  }
 0xa4d   : > { %v8337_v17 = vpop.f32.mrb[80].mxu0 }
 0xa4e   : > { %v8344_v62 = vmul.f32 0.044715, %v8337_v17  ;;  %v12661_v18 = vpop.f32.mrb[81].mxu0  ;;  %v8343_v24 = vmul.f32 0.5, %v8337_v17 }
 0xa4f   : > { %v8340_v13 = vpop.f32.mrb[82].mxu0  ;;  %v13976_v18 = vld [vmem:[%s17179_s17 + $0x10] sm:$0xff]  }
 0xa50   : > { %v8345_v19 = vmul.f32 %v8344_v62, %v8337_v17  ;;  %v12662_v20 = vpop.f32.mrb[83].mxu0  ;;  %v13974_v62 = vld [vmem:[%s17179_s17 + $0x8] sm:$0xff]   ;;  %v13977_v13 = vld [vmem:[%s17179_s17 + $0x58] sm:$0xff]  }
 0xa51   : > { %v13979_v20 = vld [vmem:[%s17179_s17 + $0x60] sm:$0xff]  }
 0xa52   : > { %v8346_v21 = vmul.f32 %v8345_v19, %v8337_v17  ;;  %v13978_v19 = vld [vmem:[%s17179_s17 + $0x18] sm:$0xff]  }
 0xa54   : > { %v8347_v16 = vadd.f32 %v8346_v21, %v8337_v17  ;;  %v13973_v17 = vld [vmem:[%s17179_s17 + $0x48] sm:$0xff]   ;;  %v13980_v21 = vld [vmem:[%s17179_s17 + $0x20] sm:$0xff]  }
 0xa56   : > { %v8348_v22 = vmul.f32 0.7978846, %v8347_v16  ;;  %v13981_v16 = vld [vmem:[%s17179_s17 + $0x68] sm:$0xff]  }
 0xa58   : > { %14185 = vtanh.f32 %v8348_v22  ;;  %v13982_v22 = vld [vmem:[%s17179_s17 + $0x28] sm:$0xff]  }
 0xa62   : > { %v14186_v23 = vpop.eup %14185 }
 0xa63   : > { %v8350_v25 = vadd.f32 1.0, %v14186_v23  ;;  %v13983_v23 = vld [vmem:[%s17179_s17 + $0x70] sm:$0xff]  }
 0xa65   : > { %v8351_v50 = vmul.f32 %v8350_v25, %v8343_v24  ;;  %v13984_v24 = vld [vmem:[%s17179_s17 + $0x30] sm:$0xff]   ;;  %v13985_v25 = vld [vmem:[%s17179_s17 + $0x78] sm:$0xff]  }
 0xa67   : > { %v8368_v39 = vpack.c.bf16 %v8351_v50, %v8351_v50  ;;  %v13986_v50 = vld [vmem:[%s17179_s17 + $0x38] sm:$0xff]  }
 0xa69   : > { %12680 = vmatmul.mubr.bf16.vlgmr.msra.gmra.mrb[84].mxu1 %v8368_v39  ;;  %v14465_v39 = vmov 1983009808  }
 0xa6a   : > { %8796 = vmatprep.mubr.bf16.mxu1 %v14460_v7  ;;  %8765 = vmatpush1.bf16.msra.mxu1 %v13926_v29  ;;  %v8812_v26 = vunpack.c.l.s4 %v14465_v39 }
 0xa6b   : > { %8766 = vmatprep.subr.bf16.mxu1 %v13934_v11 }
 0xa6c   : > { %v8813_v27 = vunpack.c.0.s8 %v8812_v26 }
 0xa6e   : > { %8767 = vmatpush1.bf16.msra.mxu1 %v13932_v32  ;;  %v16616_v29 = vsub.s32 %v8813_v27, %v15769_v37 }
 0xa6f   : > { %8768 = vmatprep.subr.bf16.mxu1 %v13940_v34 }
 0xa70   : > { %v8817_v30 = vrot.slane %v8496_v28, %v16616_v29 }
 0xa72   : > { %8769 = vmatpush1.bf16.msra.mxu1 %v13938_v35  ;;  %v8825_v11 = vcombine.high %v8817_v30, %v8817_v30 }
 0xa73   : > { %8770 = vmatprep.subr.bf16.mxu1 %v13946_v48 }
 0xa76   : > { %8771 = vmatpush1.bf16.msra.mxu1 %v13944_v41 }
 0xa77   : > { %8772 = vmatprep.subr.bf16.mxu1 %v13952_v51 }
 0xa7a   : > { %8773 = vmatpush1.bf16.msra.mxu1 %v13950_v38  ;;  %v8824_v38 = vrot.slane %v8810_v49, %v16616_v29 }
 0xa7b   : > { %8774 = vmatprep.subr.bf16.mxu1 %v13958_v54  ;;  %v13989_v54 = vld [vmem:[%s17179_s17 + $0x80] sm:$0xff]  }
 0xa7c   : > { %v8826_v40 = vcombine.high %v8824_v38, %v8824_v38 }
 0xa7e   : > { %8775 = vmatpush1.bf16.msra.mxu1 %v13956_v3 }
 0xa7f   : > { %8776 = vmatprep.subr.bf16.mxu1 %v13964_v55  ;;  %v13991_v55 = vld [vmem:[%s17179_s17 + $0x88] sm:$0xff]  }
 0xa82   : > { %8777 = vmatpush1.bf16.msra.mxu1 %v13962_v56  ;;  %v13993_v56 = vld [vmem:[%s17179_s17 + $0x90] sm:$0xff]  }
 0xa83   : > { %8778 = vmatprep.subr.bf16.mxu1 %v13970_v58  ;;  %v13995_v58 = vld [vmem:[%s17179_s17 + $0x98] sm:$0xff]  }
 0xa86   : > { %8779 = vmatpush1.bf16.msra.mxu1 %v13968_v53  ;;  %v13997_v53 = vld [vmem:[%s17179_s17 + $0xa0] sm:$0xff]  }
 0xa87   : > { %12440 = vmatprep.subr.bf16.mxu1 %v13971_v60  ;;  %v13998_v60 = vld [vmem:[%s17179_s17 + $0xe8] sm:$0xff]  }
 0xb3c   : > { %v8451_v63 = vpop.f32.mrb[84].mxu1 }
 0xb3d   : > { %v8457_v0 = vsub.f32 0.0, %v8451_v63  ;;  %v12681_v1 = vpop.f32.mrb[85].mxu1  ;;  %v13999_v63 = vld [vmem:[%s17179_s17 + $0xa8] sm:$0xff]  }
 0xb3e   : > { %v8454_v6 = vpop.f32.mrb[86].mxu1  ;;  %v14001_v1 = vld [vmem:[%s17179_s17 + $0xb0] sm:$0xff]  }
 0xb3f   : > { %v8458_v47 = vmul.f32 1.442695, %v8457_v0  ;;  %v12682_v44 = vpop.f32.mrb[87].mxu1  ;;  %v14000_v0 = vld [vmem:[%s17179_s17 + $0xf0] sm:$0xff]   ;;  %v14002_v6 = vld [vmem:[%s17179_s17 + $0xf8] sm:$0xff]  }
 0xb40   : > { %v14004_v44 = vld [vmem:[%s17285_s9] sm:$0xff]  }
 0xb41   : > { %14187 = vpow2.f32 %v8458_v47  ;;  %v14003_v47 = vld [vmem:[%s17179_s17 + $0xb8] sm:$0xff]  }
 0xb4b   : > { %v14188_v45 = vpop.eup %14187 }
 0xb4c   : > { %v8460_v10 = vadd.f32 1.0, %v14188_v45  ;;  %v14005_v45 = vld [vmem:[%s17285_s9 + $0x8] sm:$0xff]  }
 0xb4e   : > { %14189 = vrcp.f32 %v8460_v10  ;;  %v14006_v10 = vld [vmem:[%s17285_s9 + $0x10] sm:$0xff]  }
 0xb58   : > { %v14190_v12 = vpop.eup %14189 }
 0xb59   : > { %v8462_v15 = vmul.f32 %v14190_v12, %v16429_v8  ;;  %v13975_v8 = vld [vmem:[%s17179_s17 + $0x50] sm:$0xff]   ;;  %v14007_v12 = vld [vmem:[%s17285_s9 + $0x18] sm:$0xff]  }
 0xb5b   : > { %v16565_v42 = vpack.c.bf16 %v8462_v15, %v8462_v15  ;;  %v14008_v15 = vld [vmem:[%s17285_s9 + $0x20] sm:$0xff]  }
 0xb5d   : > { %8756 = vmatmul.mubr.bf16.vlgmr.msra.gmra.mrb[84].mxu0 %v16565_v42  ;;  %8797 = vmatmul.mubr.bf16.vlgmr.msra.gmra.mrb[88].mxu1 %v16565_v42 }
 0xb5e   : > { %12441 = vmatpush3.bf16.msra.mxu1 %v13972_v59  ;;  %8863 = vmatprep.mubr.bf16.mxu0 %v8825_v11  ;;  %v14009_v59 = vld [vmem:[%s17285_s9 + $0x28] sm:$0xff]  }
 0xb5f   : > { %12442 = vmatprep.subr.bf16.mxu1 %v13973_v17  ;;  %v14010_v17 = vld [vmem:[%s17285_s9 + $0x30] sm:$0xff]  }
 0xb62   : > { %12443 = vmatpush3.bf16.msra.mxu1 %v13974_v62  ;;  %v14011_v62 = vld [vmem:[%s17285_s9 + $0x38] sm:$0xff]  }
 0xb63   : > { %12444 = vmatprep.subr.bf16.mxu1 %v13975_v8  ;;  %v14466_v8 = vmov 1  }
 0xb64   : > { %12910 = vset.pattern.permute.xlu0 %v14466_v8 }
 0xb66   : > { %12445 = vmatpush3.bf16.msra.mxu1 %v13976_v18 }
 0xb67   : > { %12446 = vmatprep.subr.bf16.mxu1 %v13977_v13 }
 0xb6a   : > { %12447 = vmatpush3.bf16.msra.mxu1 %v13978_v19 }
 0xb6b   : > { %12448 = vmatprep.subr.bf16.mxu1 %v13979_v20 }
 0xb6e   : > { %12449 = vmatpush3.bf16.msra.mxu1 %v13980_v21 }
 0xb6f   : > { %12450 = vmatprep.subr.bf16.mxu1 %v13981_v16 }
 0xb72   : > { %12451 = vmatpush3.bf16.msra.mxu1 %v13982_v22 }
 0xb73   : > { %12452 = vmatprep.subr.bf16.mxu1 %v13983_v23 }
 0xb76   : > { %12453 = vmatpush3.bf16.msra.mxu1 %v13984_v24 }
 0xb77   : > { %12454 = vmatprep.subr.bf16.mxu1 %v13985_v25 }
 0xb7a   : > { %12455 = vmatpush3.bf16.msra.mxu1 %v13986_v50 }
 0xb7b   : > { %12683 = vmatprep.subr.bf16.mxu1 %v14461_v14 }
 0xc30   : > { %v8757_v31 = vpop.f32.mrb[84].mxu0  ;;  %v8798_v32 = vpop.f32.mrb[88].mxu1 }
 0xc31   : > { %v8759_v33 = vpop.f32.mrb[85].mxu0  ;;  %v8800_v34 = vpop.f32.mrb[89].mxu1  ;;  %v16619_v43 = vpack.c.bf16 %v8757_v31, %v8757_v31  ;;  %v16634_v3 = vpack.c.bf16 %v8798_v32, %v8798_v32 }
 0xc32   : > { %v8806_v35 = vpack.c.bf16 %v8759_v33, %v8759_v33  ;;  %v8761_v9 = vpop.f32.mrb[86].mxu0  ;;  %v8802_v48 = vpop.f32.mrb[90].mxu1  ;;  %v16621_v51 = vpack.c.bf16 %v8800_v34, %v8800_v34  ;;  %v9216_v34 = vsub.s32 1, %v15769_v37 }
 0xc33   : > { %v8762_v41 = vpop.f32.mrb[87].mxu0  ;;  %v8803_v36 = vpop.f32.mrb[91].mxu1 }
 0xc34   : > { %8831 = vmatprep.subr.bf16.mxu0 %v8806_v35  ;;  %9135 = vmatprep.mubr.bf16.mxu1 %v8806_v35  ;;  %v9239_v2 = vsel %vm8180_vm6, %v8806_v35, 0  ;;  %v9333_v41 = vsub.s32 2, %v15769_v37 }
 0xc35   : > { %8832 = vmatpush1.bf16.xpose.msra.mxu0 %v16619_v43  ;;  %9136 = vmatmul.mubr.bf16.vlgmr.msra.gmra.mrb[92].mxu1 %v16619_v43 }
 0xc36   : > { %12684 = vmatpush3.bf16.msra.mxu1 %v9239_v2  ;;  %8871 = vmatprep.subr.bf16.mxu0 %v16621_v51 }
 0xc37   : > { %12685 = vmatprep.mubr.msk.bf16.mxu1 %vm14462_vm2, %v14461_v14  ;;  %12689 = vmatprep.subr.bf16.mxu1 %v14461_v14 }
 0xc3c   : > { %8864 = vmatmul.mubr.bf16.vlgmr.msra.gmra.mrb[88].mxu0 %v8817_v30  ;;  %v14468_v30 = vmov 3  }
 0xc3d   : > { %8872 = vmatpush1.bf16.xpose.msra.mxu0 %v16634_v3  ;;  %8903 = vmatprep.mubr.bf16.mxu0 %v8826_v40 }
 0xc3e   : > { %12462 = vmatprep.subr.bf16.mxu0 %v13988_v4 }
 0xc48   : > { %8904 = vmatmul.mubr.bf16.vlgmr.msra.gmra.mrb[88].mxu0 %v8824_v38  ;;  %v16731_v38 = vld [vmem:[%s14846_s28] sm:$0xf]  ;;  %s14470_s28 = smov [#allocation12]  }
 0xc49   : > { %12463 = vmatpush3.bf16.msra.mxu0 %v13989_v54  ;;  %9175 = vmatprep.mubr.bf16.mxu0 %v16621_v51 }
 0xc4a   : > { %12464 = vmatprep.subr.bf16.mxu0 %v13990_v52 }
 0xc4d   : > { %12465 = vmatpush3.bf16.msra.mxu0 %v13991_v55 }
 0xc4e   : > { %12466 = vmatprep.subr.bf16.mxu0 %v13992_v46 }
 0xc51   : > { %12467 = vmatpush3.bf16.msra.mxu0 %v13993_v56  ;;  %v9405_v56 = vsub.s32 3, %v15769_v37 }
 0xc52   : > { %12468 = vmatprep.subr.bf16.mxu0 %v13994_v57 }
 0xc55   : > { %12469 = vmatpush3.bf16.msra.mxu0 %v13995_v58 }
 0xc56   : > { %12470 = vmatprep.subr.bf16.mxu0 %v13996_v5 }
 0xc59   : > { %12471 = vmatpush3.bf16.msra.mxu0 %v13997_v53 }
 0xc5a   : > { %12472 = vmatprep.subr.bf16.mxu0 %v13998_v60 }
 0xc5d   : > { %12473 = vmatpush3.bf16.msra.mxu0 %v13999_v63 }
 0xc5e   : > { %12474 = vmatprep.subr.bf16.mxu0 %v14000_v0 }
 0xc61   : > { %12475 = vmatpush3.bf16.msra.mxu0 %v14001_v1 }
 0xc62   : > { %12476 = vmatprep.subr.bf16.mxu0 %v14002_v6 }
 0xc65   : > { %12477 = vmatpush3.bf16.msra.mxu0 %v14003_v47 }
 0xc66   : > { %12707 = vmatprep.subr.bf16.mxu0 %v14461_v14 }
 0xc68   : > { %9176 = vmatmul.mubr.bf16.vlgmr.msra.gmra.mrb[92].mxu0 %v16634_v3 }
 0xc69   : > { %12708 = vmatpush3.bf16.msra.mxu0 %v14004_v44  ;;  %12723 = vmatprep.mubr.msk.bf16.mxu0 %vm14462_vm2, %v14461_v14 }
 0xc6a   : > { %12709 = vmatprep.subr.bf16.mxu0 %v14461_v14 }
 0xc6d   : > { %12710 = vmatpush3.bf16.msra.mxu0 %v14005_v45 }
 0xc6e   : > { %12711 = vmatprep.subr.bf16.mxu0 %v14461_v14 }
 0xc71   : > { %12712 = vmatpush3.bf16.msra.mxu0 %v14006_v10 }
 0xc72   : > { %12713 = vmatprep.subr.bf16.mxu0 %v14461_v14 }
 0xc75   : > { %12714 = vmatpush3.bf16.msra.mxu0 %v14007_v12 }
 0xc76   : > { %12715 = vmatprep.subr.bf16.mxu0 %v14461_v14 }
 0xc79   : > { %12716 = vmatpush3.bf16.msra.mxu0 %v14008_v15 }
 0xc7a   : > { %12717 = vmatprep.subr.bf16.mxu0 %v14461_v14 }
 0xc7d   : > { %12718 = vmatpush3.bf16.msra.mxu0 %v14009_v59 }
 0xc7e   : > { %12719 = vmatprep.subr.bf16.mxu0 %v14461_v14 }
 0xc81   : > { %12720 = vmatpush3.bf16.msra.mxu0 %v14010_v17 }
 0xc82   : > { %12721 = vmatprep.subr.bf16.mxu0 %v14461_v14 }
 0xc85   : > { %12722 = vmatpush3.bf16.msra.mxu0 %v14011_v62 }
 0xc88   : > { %12724 = vmatmul.mubr.bf16.vlgmr.msra.gmra.mrb[96].mxu0 %v16565_v42  ;;  %v14467_v42 = vmov 2  }
 0xc89   : > { %9936 = vmatprep.mubr.bf16.mxu0 %v14460_v7 }
 0xd08   : > { %v12456_v18 = vpop.f32.mrb[92].mxu1 }
 0xd09   : > { %v12457_v13 = vpop.f32.mrb[93].mxu1 }
 0xd0a   : > { %v12458_v19 = vadd.f32 %v12457_v13, %v12456_v18  ;;  %v12459_v20 = vpop.f32.mrb[94].mxu1 }
 0xd0b   : > { %v12460_v21 = vpop.f32.mrb[95].mxu1 }
 0xd1b   : > { %v8905_v16 = vpop.f32.mrb[88].mxu0 }
 0xd1c   : > { %v8907_v22 = vpop.f32.mrb[89].mxu0  ;;  %v9191_v49 = vrot.slane %v8905_v16, %v16425_v61  ;;  %v9217_v35 = vrot.slane %v8905_v16, %v9216_v34  ;;  %v9334_v54 = vrot.slane %v8905_v16, %v9333_v41  ;;  %v9406_v0 = vrot.slane %v8905_v16, %v9405_v56 }
 0xd1d   : > { %v8908_v23 = vpop.f32.mrb[90].mxu0 }
 0xd1e   : > { %v8909_v24 = vpop.f32.mrb[91].mxu0 }
 0xd3b   : > { %v12478_v25 = vpop.f32.mrb[92].mxu0 }
 0xd3c   : > { %v12479_v50 = vpop.f32.mrb[93].mxu0 }
 0xd3d   : > { %v12480_v39 = vadd.f32 %v12479_v50, %v12478_v25  ;;  %v12481_v26 = vpop.f32.mrb[94].mxu0 }
 0xd3e   : > { %v12482_v27 = vpop.f32.mrb[95].mxu0 }
 0xd3f   : > { %v9178_v28 = vadd.f32 %v12480_v39, %v12458_v19 }
 0xd41   : > { %9185 = vperm.xlu1 %12911, %v9178_v28   ;;  %9211 = vperm.xlu0 %12910, %v9178_v28  }
 0xd45   : > { %12912 = vset.pattern.permute.xlu1 %v14467_v42  ;;  %12915 = vset.pattern.permute.xlu0 %v14460_v7 }
 0xd46   : > { %9328 = vperm.xlu1 %12912, %v9178_v28  }
 0xd4a   : > { %12913 = vset.pattern.permute.xlu1 %v14468_v30 }
 0xd4b   : > { %9400 = vperm.xlu1 %12913, %v9178_v28  }
 0xd4f   : > { %12914 = vset.pattern.permute.xlu1 %v14466_v8 }
 0xd5b   : > { %v16723_v11 = vpop.f32.mrb[96].mxu0 }
 0xd5c   : > { %v12725_v31 = vpop.f32.mrb[97].mxu0 }
 0xd5d   : > { %v9583_v32 = vpop.f32.mrb[98].mxu0 }
 0xd5e   : > { %v12726_v33 = vpop.f32.mrb[99].mxu0 }
 0xd5f   : > { %v14015_v33 = vld [vmem:[%s17286_s1 + $0x8] ss:$16 sps:$4 sm:$0xff]  }
 0xdc0   : > { %v9186_v9 = vpop.permute.xlu1 %9185  ;;  %v9212_v48 = vpop.permute.xlu0 %9211 }
 0xdc1   : > { %v9192_v36 = vadd.f32 %v9191_v49, %v9186_v9  ;;  %v9218_v2 = vadd.f32 %v9217_v35, %v9212_v48  ;;  %v14017_v49 = vld [vmem:[%s17286_s1 + $0xc] ss:$16 sps:$4 sm:$0xff]  }
 0xdc2   : > { %9904 = vmatprep.subr.bf16.mxu0 %v14017_v49 }
 0xdc3   : > { %vm9193_vm10 = vcmp.gt.f32.partialorder %v9192_v36, 0.0  ;;  %v9194_v40 = vmul.f32 0.2, %v9192_v36  ;;  %vm9219_vm11 = vcmp.gt.f32.partialorder %v9218_v2, 0.0  ;;  %v9220_v4 = vmul.f32 0.2, %v9218_v2  ;;  %9905 = vmatpush1.bf16.msra.mxu0 %v14015_v33 }
 0xdc5   : > { %v9329_v52 = vpop.permute.xlu1 %9328  ;;  %v9195_v55 = vsel %vm9193_vm10, %v9192_v36, %v9194_v40  ;;  %v9221_v46 = vsel %vm9219_vm11, %v9218_v2, %v9220_v4  ;;  %v9285_v40 = vsel %vm8180_vm6, %v16619_v43, 0 }
 0xdc6   : > { %v9335_v57 = vadd.f32 %v9334_v54, %v9329_v52  ;;  %v9196_v58 = vadd.f32 %v9195_v55, %v16731_v38  ;;  %v9222_v5 = vadd.f32 %v9221_v46, %v16731_v38  ;;  %v9356_v46 = vsel %vm8180_vm6, %v16634_v3, 0 }
 0xdc7   : > { %v9428_v3 = vsel %vm8180_vm6, %v16621_v51, 0  ;;  %v14020_v51 = vld [vmem:[%s17286_s1 + $0x24] ss:$16 sps:$4 sm:$0xff]  }
 0xdc8   : > { %vm9336_vm13 = vcmp.gt.f32.partialorder %v9335_v57, 0.0  ;;  %v9337_v53 = vmul.f32 0.2, %v9335_v57  ;;  %v9198_v60 = vsel %vm9197_vm12, %v9196_v58, -inf  ;;  %v9223_v63 = vsel %vm9197_vm12, %v9222_v5, -inf }
 0xdc9   : > { %9199 = vmax.xlane.f32.xlu1 %v9198_v60  ;;  %9224 = vmax.xlane.f32.xlu0 %v9223_v63 }
 0xdca   : > { %v9401_v1 = vpop.permute.xlu1 %9400  ;;  %v9338_v6 = vsel %vm9336_vm13, %v9335_v57, %v9337_v53  ;;  %v14014_v53 = vld [vmem:[%s17286_s1 + $0x4] ss:$16 sps:$4 sm:$0xff]  }
 0xdcb   : > { %v9407_v47 = vadd.f32 %v9406_v0, %v9401_v1  ;;  %v9339_v44 = vadd.f32 %v9338_v6, %v16731_v38  ;;  %v14012_v0 = vld [vmem:[%s17286_s1] ss:$16 sps:$4 sm:$0xff]   ;;  %v14023_v6 = vld [vmem:[%s17286_s1 + $0x2c] ss:$16 sps:$4 sm:$0xff]  }
 0xdcc   : > { %9906 = vmatprep.subr.bf16.mxu0 %v14023_v6  ;;  %v14068_v6 = vld [vmem:[%s17287_s8 + $0x60] sm:$0xff]  }
 0xdcd   : > { %vm9408_vm14 = vcmp.gt.f32.partialorder %v9407_v47, 0.0  ;;  %v9409_v45 = vmul.f32 0.2, %v9407_v47  ;;  %v9340_v10 = vsel %vm9197_vm12, %v9339_v44, -inf }
 0xdce   : > { %9341 = vmax.xlane.f32.xlu0 %v9340_v10  ;;  %v14024_v10 = vld [vmem:[%s17286_s1 + $0x40] ss:$16 sps:$4 sm:$0xff]  }
 0xdcf   : > { %v9410_v12 = vsel %vm9408_vm14, %v9407_v47, %v9409_v45  ;;  %v14018_v47 = vld [vmem:[%s17286_s1 + $0x20] ss:$16 sps:$4 sm:$0xff]   ;;  %v14029_v45 = vld [vmem:[%s17286_s1 + $0x4c] ss:$16 sps:$4 sm:$0xff]  }
 0xdd0   : > { %v9411_v15 = vadd.f32 %v9410_v12, %v16731_v38  ;;  %v14027_v12 = vld [vmem:[%s17286_s1 + $0x48] ss:$16 sps:$4 sm:$0xff]  }
 0xdd2   : > { %v9412_v59 = vsel %vm9197_vm12, %v9411_v15, -inf }
 0xdd3   : > { %9413 = vmax.xlane.f32.xlu0 %v9412_v59  ;;  %v14035_v59 = vld [vmem:[%s17286_s1 + $0x6c] ss:$16 sps:$4 sm:$0xff]  }
 0xe56   : > { %v9200_v17 = vpop.xlane.xlu1 %9199  ;;  %v9225_v62 = vpop.xlane.xlu0 %9224 }
 0xe57   : > { %v9201_v8 = vsub.f32 %v9196_v58, %v9200_v17  ;;  %v9226_v18 = vsub.f32 %v9222_v5, %v9225_v62  ;;  %v14030_v17 = vld [vmem:[%s17286_s1 + $0x60] ss:$16 sps:$4 sm:$0xff]   ;;  %v14033_v62 = vld [vmem:[%s17286_s1 + $0x68] ss:$16 sps:$4 sm:$0xff]  }
 0xe59   : > { %v9202_v13 = vmul.f32 1.442695, %v9201_v8  ;;  %v9227_v19 = vmul.f32 1.442695, %v9226_v18  ;;  %v14038_v8 = vld [vmem:[%s17286_s1 + $0x84] ss:$16 sps:$4 sm:$0xff]  }
 0xe5a   : > { %v14041_v18 = vld [vmem:[%s17286_s1 + $0x8c] ss:$16 sps:$4 sm:$0xff]  }
 0xe5b   : > { %14191 = vpow2.f32 %v9202_v13  ;;  %v9342_v20 = vpop.xlane.xlu0 %9341  ;;  %v14036_v13 = vld [vmem:[%s17286_s1 + $0x80] ss:$16 sps:$4 sm:$0xff]  }
 0xe5c   : > { %14193 = vpow2.f32 %v9227_v19  ;;  %v9343_v21 = vsub.f32 %v9339_v44, %v9342_v20  ;;  %v14021_v44 = vld [vmem:[%s17286_s1 + $0x28] ss:$16 sps:$4 sm:$0xff]   ;;  %v14044_v20 = vld [vmem:[%s17286_s1 + $0xa4] ss:$16 sps:$4 sm:$0xff]  }
 0xe5d   : > { %9907 = vmatpush1.bf16.msra.mxu0 %v14021_v44  ;;  %v14039_v19 = vld [vmem:[%s17286_s1 + $0x88] ss:$16 sps:$4 sm:$0xff]  }
 0xe5e   : > { %v9344_v16 = vmul.f32 1.442695, %v9343_v21  ;;  %9908 = vmatprep.subr.bf16.mxu0 %v14029_v45  ;;  %v14047_v21 = vld [vmem:[%s17286_s1 + $0xac] ss:$16 sps:$4 sm:$0xff]   ;;  %v14072_v45 = vld [vmem:[%s17287_s8 + $0x70] sm:$0xff]  }
 0xe5f   : > { %v14070_v44 = vld [vmem:[%s17287_s8 + $0x68] sm:$0xff]  }
 0xe60   : > { %14195 = vpow2.f32 %v9344_v16  ;;  %v9414_v22 = vpop.xlane.xlu0 %9413  ;;  %v14042_v16 = vld [vmem:[%s17286_s1 + $0xa0] ss:$16 sps:$4 sm:$0xff]  }
 0xe61   : > { %v9415_v23 = vsub.f32 %v9411_v15, %v9414_v22  ;;  %9909 = vmatpush1.bf16.msra.mxu0 %v14027_v12  ;;  %v14032_v15 = vld [vmem:[%s17286_s1 + $0x64] ss:$16 sps:$4 sm:$0xff]   ;;  %v14045_v22 = vld [vmem:[%s17286_s1 + $0xa8] ss:$16 sps:$4 sm:$0xff]  }
 0xe62   : > { %9910 = vmatprep.subr.bf16.mxu0 %v14035_v59  ;;  %v14074_v12 = vld [vmem:[%s17287_s8 + $0x78] sm:$0xff]   ;;  %v9636_v59 = vld [vmem:[%s17288_s0] sm:$0xff]  ;;  %s10876_s0 = scalar_lea.sflag [#allocation5], %s14828_s3 }
 0xe63   : > { %v9416_v24 = vmul.f32 1.442695, %v9415_v23  ;;  %v14050_v23 = vld [vmem:[%s17286_s1 + $0xc4] ss:$16 sps:$4 sm:$0xff]  }
 0xe65   : > { %v14192_v25 = vpop.eup %14191  ;;  %14197 = vpow2.f32 %v9416_v24  ;;  %9911 = vmatpush1.bf16.msra.mxu0 %v14033_v62  ;;  %v14053_v24 = vld [vmem:[%s17286_s1 + $0xcc] ss:$16 sps:$4 sm:$0xff]  }
 0xe66   : > { %v14194_v50 = vpop.eup %14193  ;;  %v9204_v39 = vsel %vm9197_vm12, %v14192_v25, 0.0  ;;  %9912 = vmatprep.subr.bf16.mxu0 %v14041_v18 }
 0xe67   : > { %9205 = vadd.xlane.f32.xlu0 %v9204_v39  ;;  %v9229_v26 = vsel %vm9197_vm12, %v14194_v50, 0.0  ;;  %v14056_v39 = vld [vmem:[%s17286_s1 + $0xe4] ss:$16 sps:$4 sm:$0xff]  }
 0xe68   : > { %9230 = vadd.xlane.f32.xlu1 %v9229_v26  ;;  %v14059_v26 = vld [vmem:[%s17286_s1 + $0xec] ss:$16 sps:$4 sm:$0xff]  }
 0xe69   : > { %9913 = vmatpush1.bf16.msra.mxu0 %v14039_v19 }
 0xe6a   : > { %v14196_v27 = vpop.eup %14195  ;;  %9914 = vmatprep.subr.bf16.mxu0 %v14047_v21 }
 0xe6b   : > { %v9346_v28 = vsel %vm9197_vm12, %v14196_v27, 0.0 }
 0xe6c   : > { %9347 = vadd.xlane.f32.xlu1 %v9346_v28  ;;  %v14057_v28 = vld [vmem:[%s17286_s1 + $0xe8] ss:$16 sps:$4 sm:$0xff]  }
 0xe6d   : > { %9915 = vmatpush1.bf16.msra.mxu0 %v14045_v22 }
 0xe6e   : > { %9916 = vmatprep.subr.bf16.mxu0 %v14053_v24 }
 0xe6f   : > { %v14198_v31 = vpop.eup %14197 }
 0xe70   : > { %v9418_v32 = vsel %vm9197_vm12, %v14198_v31, 0.0 }
 0xe71   : > { %9419 = vadd.xlane.f32.xlu0 %v9418_v32  ;;  %v11937_v32 = vld [vmem:[%s17186_s24 + $0x1] ss:$0 sm:$0xff] }
 0xef4   : > { %v9206_v9 = vpop.xlane.xlu0 %9205 }
 0xef5   : > { %v9231_v35 = vpop.xlane.xlu1 %9230 }
 0xef6   : > { %14199 = vrcp.f32 %v9231_v35 }
 0xef7   : > { %14201 = vrcp.f32 %v9206_v9  ;;  %v11947_v9 = vld [vmem:[%s17186_s24 + $0x3] ss:$0 sm:$0xff] }
 0xef9   : > { %v9348_v4 = vpop.xlane.xlu1 %9347 }
 0xefa   : > { %14203 = vrcp.f32 %v9348_v4  ;;  %v11948_v4 = vld [vmem:[%s17186_s24 + $0x4] ss:$0 sm:$0xff] }
 0xefe   : > { %v9420_v43 = vpop.xlane.xlu0 %9419 }
 0xeff   : > { %14205 = vrcp.f32 %v9420_v43 }
 0xf00   : > { %v14200_v48 = vpop.eup %14199 }
 0xf01   : > { %v9233_v36 = vmul.f32 %v14200_v48, %v14194_v50  ;;  %v14202_v54 = vpop.eup %14201  ;;  %v14051_v50 = vld [vmem:[%s17286_s1 + $0xc8] ss:$16 sps:$4 sm:$0xff]  }
 0xf02   : > { %v9208_v52 = vmul.f32 %v14202_v54, %v14192_v25  ;;  %v14048_v25 = vld [vmem:[%s17286_s1 + $0xc0] ss:$16 sps:$4 sm:$0xff]   ;;  %9917 = vmatpush1.bf16.msra.mxu0 %v14051_v50 }
 0xf03   : > { %v9234_v2 = vpack.c.bf16 %v9233_v36, %v9233_v36  ;;  %9918 = vmatprep.subr.bf16.mxu0 %v14059_v26 }
 0xf04   : > { %v9209_v55 = vpack.c.bf16 %v9208_v52, %v9208_v52  ;;  %v14204_v57 = vpop.eup %14203 }
 0xf05   : > { %12686 = vmatmul.mubr.msk.bf16.vlgmr.msra.gmra.mrb[96].mxu1 %vm8176_vm7, %v9234_v2  ;;  %v9350_v58 = vmul.f32 %v14204_v57, %v14196_v27  ;;  %v14054_v27 = vld [vmem:[%s17286_s1 + $0xe0] ss:$16 sps:$4 sm:$0xff]  }
 0xf06   : > { %12690 = vmatpush3.bf16.msra.mxu1 %v9285_v40  ;;  %12691 = vmatprep.mubr.msk.bf16.mxu1 %vm14462_vm2, %v14461_v14  ;;  %v11938_v40 = vld [vmem:[%s17186_s24 + $0x2] ss:$0 sm:$0xff] }
 0xf07   : > { %12695 = vmatprep.subr.bf16.mxu1 %v14461_v14  ;;  %v9351_v5 = vpack.c.bf16 %v9350_v58, %v9350_v58  ;;  %9919 = vmatpush1.bf16.msra.mxu0 %v14057_v28  ;;  %v9581_v52 = vadd.f32 %v11938_v40, %v16723_v11  ;;  %v14062_v11 = vld [vmem:[%s17287_s8 + $0x48] sm:$0xff]   ;;  %v14077_v28 = vld [vmem:[%s17287_s8 + $0xc0] sm:$0xff]  }
 0xf08   : > { %v14087_v40 = vld [vmem:[%s17287_s8 + $0xe8] sm:$0xff]  }
 0xf09   : > { %v14206_v60 = vpop.eup %14205 }
 0xf0a   : > { %v9422_v63 = vmul.f32 %v14206_v60, %v14198_v31  ;;  %v14060_v31 = vld [vmem:[%s17287_s8 + $0x40] sm:$0xff]   ;;  %v14063_v60 = vld [vmem:[%s17287_s8 + $0x8] sm:$0xff]  }
 0xf0b   : > { %12501 = vmatprep.subr.bf16.mxu0 %v14060_v31 }
 0xf0c   : > { %v9423_v1 = vpack.c.bf16 %v9422_v63, %v9422_v63  ;;  %v14064_v63 = vld [vmem:[%s17287_s8 + $0x50] sm:$0xff]  }
 0xf11   : > { %12692 = vmatmul.mubr.msk.bf16.vlgmr.msra.gmra.mrb[96].mxu1 %vm8176_vm7, %v9209_v55 }
 0xf12   : > { %12696 = vmatpush3.bf16.msra.mxu1 %v9356_v46  ;;  %12697 = vmatprep.mubr.msk.bf16.mxu1 %vm14462_vm2, %v14461_v14 }
 0xf13   : > { %12701 = vmatprep.subr.bf16.mxu1 %v14461_v14 }
 0xf1d   : > { %12698 = vmatmul.mubr.msk.bf16.vlgmr.msra.gmra.mrb[96].mxu1 %vm8176_vm7, %v9351_v5 }
 0xf1e   : > { %12702 = vmatpush3.bf16.msra.mxu1 %v9428_v3  ;;  %12703 = vmatprep.mubr.msk.bf16.mxu1 %vm14462_vm2, %v14461_v14 }
 0xf1f   : > { %9863 = vmatprep.subr.bf16.mxu1 %v14014_v53  ;;  %v14061_v53 = vld [vmem:[%s17287_s8] sm:$0xff]  }
 0xf29   : > { %12704 = vmatmul.mubr.msk.bf16.vlgmr.msra.gmra.mrb[96].mxu1 %vm8176_vm7, %v9423_v1  ;;  %v14066_v1 = vld [vmem:[%s17287_s8 + $0x58] sm:$0xff]  }
 0xf2a   : > { %9864 = vmatpush1.bf16.msra.mxu1 %v14012_v0  ;;  %9895 = vmatprep.mubr.bf16.mxu1 %v14460_v7  ;;  %v14026_v7 = vld [vmem:[%s17286_s1 + $0x44] ss:$16 sps:$4 sm:$0xff]   ;;  %s17292_s1 = sld [smem:[#allocation40_spill]] }
 0xf2b   : > { %9865 = vmatprep.subr.bf16.mxu1 %v14020_v51  ;;  %v14065_v0 = vld [vmem:[%s17287_s8 + $0x10] sm:$0xff]   ;;  %v14067_v51 = vld [vmem:[%s17287_s8 + $0x18] sm:$0xff]  }
 0xf2e   : > { %9866 = vmatpush1.bf16.msra.mxu1 %v14018_v47  ;;  %v14069_v47 = vld [vmem:[%s17287_s8 + $0x20] sm:$0xff]  }
 0xf2f   : > { %9867 = vmatprep.subr.bf16.mxu1 %v14026_v7  ;;  %v14071_v7 = vld [vmem:[%s17287_s8 + $0x28] sm:$0xff]  }
 0xf32   : > { %9868 = vmatpush1.bf16.msra.mxu1 %v14024_v10  ;;  %v14073_v10 = vld [vmem:[%s17287_s8 + $0x30] sm:$0xff]  }
 0xf33   : > { %9869 = vmatprep.subr.bf16.mxu1 %v14032_v15  ;;  %v14075_v15 = vld [vmem:[%s17287_s8 + $0x38] sm:$0xff]  }
 0xf36   : > { %9870 = vmatpush1.bf16.msra.mxu1 %v14030_v17  ;;  %v9957_v17 = vrot.slane %v9636_v59, %v16616_v29 }
 0xf37   : > { %9871 = vmatprep.subr.bf16.mxu1 %v14038_v8 }
 0xf38   : > { %v9965_v62 = vcombine.high %v9957_v17, %v9957_v17 }
 0xf3a   : > { %9872 = vmatpush1.bf16.msra.mxu1 %v14036_v13 }
 0xf3b   : > { %9873 = vmatprep.subr.bf16.mxu1 %v14044_v20  ;;  %v9950_v20 = vcombine.high %v9636_v59, %v9636_v59 }
 0xf3d   : > { %v9964_v26 = vrot.slane %v9950_v20, %v16616_v29  ;;  %v14078_v29 = vld [vmem:[%s17287_s8 + $0x80] sm:$0xff]  }
 0xf3e   : > { %9874 = vmatpush1.bf16.msra.mxu1 %v14042_v16 }
 0xf3f   : > { %9875 = vmatprep.subr.bf16.mxu1 %v14050_v23 }
 0xf42   : > { %9876 = vmatpush1.bf16.msra.mxu1 %v14048_v25 }
 0xf43   : > { %9877 = vmatprep.subr.bf16.mxu1 %v14056_v39 }
 0xf46   : > { %9878 = vmatpush1.bf16.msra.mxu1 %v14054_v27  ;;  %v9966_v27 = vcombine.high %v9964_v26, %v9964_v26 }
 0xffc   : > { %v9464_v33 = vpop.f32.mrb[96].mxu1 }
 0xffd   : > { %v9471_v49 = vmul.f32 0.25, %v9464_v33  ;;  %v12705_v35 = vpop.f32.mrb[97].mxu1  ;;  %v14080_v33 = vld [vmem:[%s17287_s8 + $0x88] sm:$0xff]  }
 0xffe   : > { %v9467_v48 = vpop.f32.mrb[98].mxu1  ;;  %v14082_v35 = vld [vmem:[%s17287_s8 + $0x90] sm:$0xff]  }
 0xfff   : > { %v9476_v36 = vadd.f32 %v11937_v32, %v9471_v49  ;;  %v12706_v2 = vpop.f32.mrb[99].mxu1  ;;  %v14079_v32 = vld [vmem:[%s17287_s8 + $0xc8] sm:$0xff]   ;;  %v14081_v49 = vld [vmem:[%s17287_s8 + $0xd0] sm:$0xff]   ;;  %v14084_v48 = vld [vmem:[%s17287_s8 + $0x98] sm:$0xff]  }
0x1000   : > { %v14086_v2 = vld [vmem:[%s17287_s8 + $0xa0] sm:$0xff]  }
0x1001   : > { %v9591_v54 = vmul.f32 %v11947_v9, %v9476_v36  ;;  %v14083_v9 = vld [vmem:[%s17287_s8 + $0xd8] sm:$0xff]   ;;  %v14085_v36 = vld [vmem:[%s17287_s8 + $0xe0] sm:$0xff]  }
0x1003   : > { %v9597_v55 = vadd.f32 %v11948_v4, %v9591_v54  ;;  %v14088_v4 = vld [vmem:[%s17287_s8 + $0xa8] sm:$0xff]   ;;  %v14089_v54 = vld [vmem:[%s17287_s8 + $0xf0] sm:$0xff]  }
0x1005   : > { %v9598_v46 = vadd.f32 %v9597_v55, %v9581_v52  ;;  %v14090_v52 = vld [vmem:[%s17287_s8 + $0xb0] sm:$0xff]   ;;  %v14091_v55 = vld [vmem:[%s17287_s8 + $0xf8] sm:$0xff]  }
0x1007   : > { %v9600_v43 = vmul.f32 1.442695, %v9598_v46  ;;  %vm9599_vm15 = vcmp.gt.f32.partialorder %v9598_v46, 0.0 }
0x1009   : > { %14207 = vpow2.f32 %v9600_v43 }
0x1013   : > { %v14208_v57 = vpop.eup %14207 }
0x1014   : > { %v11949_v58 = vadd.f32 -1.0, %v14208_v57 }
0x1016   : > { %v16881_v5 = vsel %vm9599_vm15, %v9598_v46, %v11949_v58  ;;  %v14092_v46 = vld [vmem:[%s17287_s8 + $0xb8] sm:$0xff]   ;;  %s14381_s8 = sshll.u32 %s14470_s28, 4  ;;  %s14382_s8 = int_to_ptr.vmem [resolvable:$false] %s14381_s8 }
0x1017   : > { %v9702_v3 = vpack.c.bf16 %v16881_v5, %v16881_v5  ;;  %s14383_s4 = scalar_lea.vmem %s14382_s8, 32  ;;  %p14384_p7 = scmp.lt.s32.totalorder %s17120_s6, %s14382_s8 }
0x1018   : > { %p14385_p11 = scmp.lt.s32.totalorder %s14383_s4, %s14377_s7 }
0x1019   : > { %9896 = vmatmul.mubr.bf16.vlgmr.msra.gmra.mrb[100].mxu1 %v9702_v3  ;;  %9937 = vmatmul.mubr.bf16.vlgmr.msra.gmra.mrb[100].mxu0 %v9702_v3 }
0x101a   : > { %12502 = vmatpush3.bf16.msra.mxu0 %v14061_v53  ;;  %10003 = vmatprep.mubr.bf16.mxu1 %v9965_v62  ;;  %p14386_p2 = por %p14385_p11, %p14384_p7 }
0x101b   : > { %12503 = vmatprep.subr.bf16.mxu0 %v14062_v11 }
0x101c   : > { %p14387_p5 = pnand %p14386_p2, %p14380_p8 }
0x101e   : > { %12504 = vmatpush3.bf16.msra.mxu0 %v14063_v60 }
0x101f   : > { %12505 = vmatprep.subr.bf16.mxu0 %v14064_v63 }
0x1022   : > { %12506 = vmatpush3.bf16.msra.mxu0 %v14065_v0 }
0x1023   : > { %12507 = vmatprep.subr.bf16.mxu0 %v14066_v1 }
0x1026   : > { %12508 = vmatpush3.bf16.msra.mxu0 %v14067_v51 }
0x1027   : > { %12509 = vmatprep.subr.bf16.mxu0 %v14068_v6 }
0x102a   : > { %12510 = vmatpush3.bf16.msra.mxu0 %v14069_v47 }
0x102b   : > { %12511 = vmatprep.subr.bf16.mxu0 %v14070_v44 }
0x102e   : > { %12512 = vmatpush3.bf16.msra.mxu0 %v14071_v7 }
0x102f   : > { %12513 = vmatprep.subr.bf16.mxu0 %v14072_v45 }
0x1032   : > { %12514 = vmatpush3.bf16.msra.mxu0 %v14073_v10 }
0x1033   : > { %12515 = vmatprep.subr.bf16.mxu0 %v14074_v12 }
0x1036   : > { %12516 = vmatpush3.bf16.msra.mxu0 %v14075_v15 }
0x1037   : > { %12727 = vmatprep.subr.bf16.mxu0 %v14461_v14 }
0x10ec   : > { %v9897_v8 = vpop.f32.mrb[100].mxu1  ;;  %v9938_v18 = vpop.f32.mrb[100].mxu0 }
0x10ed   : > { %v9899_v13 = vpop.f32.mrb[101].mxu1  ;;  %v9940_v19 = vpop.f32.mrb[101].mxu0  ;;  %v16935_v23 = vpack.c.bf16 %v9897_v8, %v9897_v8  ;;  %v16950_v31 = vpack.c.bf16 %v9938_v18, %v9938_v18 }
0x10ee   : > { %v9946_v21 = vpack.c.bf16 %v9899_v13, %v9899_v13  ;;  %v9901_v16 = vpop.f32.mrb[102].mxu1  ;;  %v9942_v22 = vpop.f32.mrb[102].mxu0  ;;  %v16937_v50 = vpack.c.bf16 %v9940_v19, %v9940_v19 }
0x10ef   : > { %v9902_v24 = vpop.f32.mrb[103].mxu1  ;;  %v9943_v25 = vpop.f32.mrb[103].mxu0 }
0x10f0   : > { %9971 = vmatprep.subr.bf16.mxu1 %v9946_v21  ;;  %10275 = vmatprep.mubr.bf16.mxu0 %v9946_v21  ;;  %v10378_v39 = vsel %vm8180_vm6, %v9946_v21, 0 }
0x10f1   : > { %9972 = vmatpush1.bf16.xpose.msra.mxu1 %v16935_v23  ;;  %10276 = vmatmul.mubr.bf16.vlgmr.msra.gmra.mrb[104].mxu0 %v16935_v23 }
0x10f2   : > { %12728 = vmatpush3.bf16.msra.mxu0 %v10378_v39  ;;  %10011 = vmatprep.subr.bf16.mxu1 %v16937_v50 }
0x10f3   : > { %12729 = vmatprep.mubr.msk.bf16.mxu0 %vm14462_vm2, %v14461_v14  ;;  %12733 = vmatprep.subr.bf16.mxu0 %v14461_v14 }
0x10f8   : > { %10004 = vmatmul.mubr.bf16.vlgmr.msra.gmra.mrb[104].mxu1 %v9957_v17 }
0x10f9   : > { %10012 = vmatpush1.bf16.xpose.msra.mxu1 %v16950_v31  ;;  %10043 = vmatprep.mubr.bf16.mxu1 %v9966_v27 }
0x10fa   : > { %12523 = vmatprep.subr.bf16.mxu1 %v14077_v28 }
0x1104   : > { %10044 = vmatmul.mubr.bf16.vlgmr.msra.gmra.mrb[104].mxu1 %v9964_v26 }
0x1105   : > { %12524 = vmatpush3.bf16.msra.mxu1 %v14078_v29  ;;  %10315 = vmatprep.mubr.bf16.mxu1 %v16937_v50 }
0x1106   : > { %12525 = vmatprep.subr.bf16.mxu1 %v14079_v32 }
0x1109   : > { %12526 = vmatpush3.bf16.msra.mxu1 %v14080_v33 }
0x110a   : > { %12527 = vmatprep.subr.bf16.mxu1 %v14081_v49 }
0x110d   : > { %12528 = vmatpush3.bf16.msra.mxu1 %v14082_v35 }
0x110e   : > { %12529 = vmatprep.subr.bf16.mxu1 %v14083_v9 }
0x1111   : > { %12530 = vmatpush3.bf16.msra.mxu1 %v14084_v48 }
0x1112   : > { %12531 = vmatprep.subr.bf16.mxu1 %v14085_v36 }
0x1115   : > { %12532 = vmatpush3.bf16.msra.mxu1 %v14086_v2 }
0x1116   : > { %12533 = vmatprep.subr.bf16.mxu1 %v14087_v40 }
0x1119   : > { %12534 = vmatpush3.bf16.msra.mxu1 %v14088_v4 }
0x111a   : > { %12535 = vmatprep.subr.bf16.mxu1 %v14089_v54 }
0x111d   : > { %12536 = vmatpush3.bf16.msra.mxu1 %v14090_v52 }
0x111e   : > { %12537 = vmatprep.subr.bf16.mxu1 %v14091_v55 }
0x1121   : > { %12538 = vmatpush3.bf16.msra.mxu1 %v14092_v46 }
0x1122   : > { %12751 = vmatprep.subr.bf16.mxu1 %v14461_v14 }
0x1124   : > { %10316 = vmatmul.mubr.bf16.vlgmr.msra.gmra.mrb[108].mxu1 %v16950_v31 }
0x1125   : > { %12753 = vmatprep.mubr.msk.bf16.mxu1 %vm14462_vm2, %v14461_v14 }
0x11c4   : > { %v12517_v43 = vpop.f32.mrb[104].mxu0 }
0x11c5   : > { %v12518_v57 = vpop.f32.mrb[105].mxu0 }
0x11c6   : > { %v12519_v58 = vadd.f32 %v12518_v57, %v12517_v43  ;;  %v12520_v53 = vpop.f32.mrb[106].mxu0 }
0x11c7   : > { %v12521_v3 = vpop.f32.mrb[107].mxu0 }
0x11d7   : > { %v10045_v11 = vpop.f32.mrb[104].mxu1 }
0x11d8   : > { %v10047_v60 = vpop.f32.mrb[105].mxu1  ;;  %v10331_v45 = vrot.slane %v10045_v11, %v16425_v61  ;;  %v10356_v10 = vrot.slane %v10045_v11, %v9216_v34  ;;  %v10545_v22 = vrot.slane %v10045_v11, %v9405_v56 }
0x11d9   : > { %v10048_v63 = vpop.f32.mrb[106].mxu1 }
0x11da   : > { %v10049_v0 = vpop.f32.mrb[107].mxu1 }
0x11f7   : > { %v12539_v1 = vpop.f32.mrb[108].mxu1 }
0x11f8   : > { %v12540_v51 = vpop.f32.mrb[109].mxu1 }
0x11f9   : > { %v12541_v6 = vadd.f32 %v12540_v51, %v12539_v1  ;;  %v12542_v47 = vpop.f32.mrb[110].mxu1  ;;  %v10424_v1 = vsel %vm8180_vm6, %v16935_v23, 0 }
0x11fa   : > { %v12543_v44 = vpop.f32.mrb[111].mxu1 }
0x11fb   : > { %v10318_v7 = vadd.f32 %v12541_v6, %v12519_v58 }
0x11fd   : > { %10325 = vperm.xlu0 %12915, %v10318_v7   ;;  %10350 = vperm.xlu1 %12914, %v10318_v7  }
0x1201   : > { %12916 = vset.pattern.permute.xlu1 %v14467_v42  ;;  %12918 = vset.pattern.permute.xlu0 %v14468_v30  ;;  %v10473_v42 = vrot.slane %v10045_v11, %v9333_v41 }
0x1202   : > { %10467 = vperm.xlu1 %12916, %v10318_v7  }
0x1206   : > { %12917 = vset.pattern.permute.xlu1 %v14468_v30 }
0x1207   : > { %10539 = vperm.xlu1 %12917, %v10318_v7   ;;  %v10495_v7 = vsel %vm8180_vm6, %v16950_v31, 0 }
0x127c   : > { %v10326_v12 = vpop.permute.xlu0 %10325  ;;  %v10351_v15 = vpop.permute.xlu1 %10350 }
0x127d   : > { %v10332_v59 = vadd.f32 %v10331_v45, %v10326_v12  ;;  %v10357_v17 = vadd.f32 %v10356_v10, %v10351_v15  ;;  %v10567_v15 = vsel %vm8180_vm6, %v16937_v50, 0 }
0x127f   : > { %vm10333_vm0 = vcmp.gt.f32.partialorder %v10332_v59, 0.0  ;;  %v10334_v62 = vmul.f32 0.2, %v10332_v59  ;;  %vm10358_vm1 = vcmp.gt.f32.partialorder %v10357_v17, 0.0  ;;  %v10359_v8 = vmul.f32 0.2, %v10357_v17 }
0x1281   : > { %v10468_v18 = vpop.permute.xlu1 %10467  ;;  %v10335_v13 = vsel %vm10333_vm0, %v10332_v59, %v10334_v62  ;;  %v10360_v30 = vsel %vm10358_vm1, %v10357_v17, %v10359_v8  ;;  %v12018_v62 = vld [vmem:[%s17186_s24 + $0x7] ss:$0 sm:$0xff] }
0x1282   : > { %v10474_v19 = vadd.f32 %v10473_v42, %v10468_v18  ;;  %v10336_v61 = vadd.f32 %v10335_v13, %v16731_v38  ;;  %v10361_v20 = vadd.f32 %v10360_v30, %v16731_v38  ;;  %v12019_v18 = vld [vmem:[%s17186_s24 + $0x5] ss:$0 sm:$0xff] }
0x1284   : > { %vm10475_vm3 = vcmp.gt.f32.partialorder %v10474_v19, 0.0  ;;  %v10476_v34 = vmul.f32 0.2, %v10474_v19  ;;  %v10337_v21 = vsel %vm9197_vm12, %v10336_v61, -inf  ;;  %v10362_v16 = vsel %vm9197_vm12, %v10361_v20, -inf }
0x1285   : > { %10338 = vmax.xlane.f32.xlu0 %v10337_v21  ;;  %10363 = vmax.xlane.f32.xlu1 %v10362_v16 }
0x1286   : > { %v10540_v41 = vpop.permute.xlu1 %10539  ;;  %v10477_v24 = vsel %vm10475_vm3, %v10474_v19, %v10476_v34 }
0x1287   : > { %v10546_v25 = vadd.f32 %v10545_v22, %v10540_v41  ;;  %v10478_v39 = vadd.f32 %v10477_v24, %v16731_v38 }
0x1289   : > { %vm10547_vm4 = vcmp.gt.f32.partialorder %v10546_v25, 0.0  ;;  %v10548_v26 = vmul.f32 0.2, %v10546_v25  ;;  %v10479_v27 = vsel %vm9197_vm12, %v10478_v39, -inf }
0x128a   : > { %10480 = vmax.xlane.f32.xlu1 %v10479_v27  ;;  %v14469_v27 = vmov 1048592000  }
0x128b   : > { %v10549_v28 = vsel %vm10547_vm4, %v10546_v25, %v10548_v26  ;;  %v14093_v26 = vld [vmem:[%s17289_s5] sm:$0xff]  }
0x128c   : > { %v10550_v29 = vadd.f32 %v10549_v28, %v16731_v38  ;;  %v14095_v28 = vld [vmem:[%s17289_s5 + $0x10] sm:$0xff]  }
0x128e   : > { %v10551_v32 = vsel %vm9197_vm12, %v10550_v29, -inf }
0x128f   : > { %10552 = vmax.xlane.f32.xlu1 %v10551_v32  ;;  %v14097_v32 = vld [vmem:[%s17289_s5 + $0x20] sm:$0xff]  }
0x1312   : > { %v10339_v33 = vpop.xlane.xlu0 %10338  ;;  %v10364_v49 = vpop.xlane.xlu1 %10363 }
0x1313   : > { %v10340_v37 = vsub.f32 %v10336_v61, %v10339_v33  ;;  %v10365_v56 = vsub.f32 %v10361_v20, %v10364_v49  ;;  %v12020_v61 = vld [vmem:[%s17186_s24 + $0x6] ss:$0 sm:$0xff]  ;;  %v14098_v33 = vld [vmem:[%s17289_s5 + $0x28] sm:$0xff]   ;;  %v14099_v49 = vld [vmem:[%s17289_s5 + $0x30] sm:$0xff]  }
0x1315   : > { %v10366_v35 = vmul.f32 1.442695, %v10365_v56  ;;  %v10341_v9 = vmul.f32 1.442695, %v10340_v37  ;;  %v14100_v37 = vld [vmem:[%s17289_s5 + $0x38] sm:$0xff]  }
0x1317   : > { %v10481_v48 = vpop.xlane.xlu1 %10480  ;;  %14209 = vpow2.f32 %v10366_v35 }
0x1318   : > { %v10482_v36 = vsub.f32 %v10478_v39, %v10481_v48  ;;  %14211 = vpow2.f32 %v10341_v9 }
0x131a   : > { %v10483_v2 = vmul.f32 1.442695, %v10482_v36 }
0x131c   : > { %v10553_v40 = vpop.xlane.xlu1 %10552  ;;  %14213 = vpow2.f32 %v10483_v2  ;;  %v14101_v2 = vld [vmem:[%s17290_s21] sm:$0xff]  }
0x131d   : > { %v10554_v4 = vsub.f32 %v10550_v29, %v10553_v40  ;;  %v14096_v29 = vld [vmem:[%s17289_s5 + $0x18] sm:$0xff]   ;;  %v14102_v40 = vld [vmem:[%s17290_s21 + $0x8] sm:$0xff]  }
0x131f   : > { %v10555_v54 = vmul.f32 1.442695, %v10554_v4  ;;  %v14103_v4 = vld [vmem:[%s17290_s21 + $0x10] sm:$0xff]  }
0x1321   : > { %14215 = vpow2.f32 %v10555_v54  ;;  %v14210_v38 = vpop.eup %14209  ;;  %v14104_v54 = vld [vmem:[%s17290_s21 + $0x18] sm:$0xff]  }
0x1322   : > { %v10368_v52 = vsel %vm9197_vm12, %v14210_v38, 0.0  ;;  %v14212_v55 = vpop.eup %14211 }
0x1323   : > { %10369 = vadd.xlane.f32.xlu1 %v10368_v52  ;;  %v10343_v46 = vsel %vm9197_vm12, %v14212_v55, 0.0 }
0x1326   : > { %v14214_v43 = vpop.eup %14213 }
0x1327   : > { %10344 = vadd.xlane.f32.xlu1 %v10343_v46  ;;  %v10485_v58 = vsel %vm9197_vm12, %v14214_v43, 0.0 }
0x132b   : > { %v14216_v57 = vpop.eup %14215  ;;  %10486 = vadd.xlane.f32.xlu1 %v10485_v58 }
0x132c   : > { %v10557_v53 = vsel %vm9197_vm12, %v14216_v57, 0.0 }
0x132d   : > { %10558 = vadd.xlane.f32.xlu0 %v10557_v53 }
0x13b0   : > { %v10370_v3 = vpop.xlane.xlu1 %10369 }
0x13b1   : > { %14217 = vrcp.f32 %v10370_v3 }
0x13b4   : > { %v10345_v11 = vpop.xlane.xlu1 %10344 }
0x13b5   : > { %14219 = vrcp.f32 %v10345_v11 }
0x13b8   : > { %v10487_v51 = vpop.xlane.xlu1 %10486 }
0x13b9   : > { %14221 = vrcp.f32 %v10487_v51 }
0x13ba   : > { %v10559_v23 = vpop.xlane.xlu0 %10558 }
0x13bb   : > { %v14218_v60 = vpop.eup %14217  ;;  %14223 = vrcp.f32 %v10559_v23 }
0x13bc   : > { %v10372_v63 = vmul.f32 %v14218_v60, %v14210_v38  ;;  %v10698_v38 = vld [vmem:[%s17186_s24 + $0x8] sm:$0x1] }
0x13be   : > { %v10373_v0 = vpack.c.bf16 %v10372_v63, %v10372_v63 }
0x13bf   : > { %v14220_v6 = vpop.eup %14219 }
0x13c0   : > { %12730 = vmatmul.mubr.msk.bf16.vlgmr.msra.gmra.mrb[108].mxu0 %vm8176_vm7, %v10373_v0  ;;  %v10347_v47 = vmul.f32 %v14220_v6, %v14212_v55  ;;  %v10805_v6 = vld [vmem:[%s17186_s24 + $0x9] sm:$0x1] }
0x13c1   : > { %12734 = vmatpush3.bf16.msra.mxu0 %v10424_v1  ;;  %12735 = vmatprep.mubr.msk.bf16.mxu0 %vm14462_vm2, %v14461_v14 }
0x13c2   : > { %12739 = vmatprep.subr.bf16.mxu0 %v14461_v14  ;;  %v10348_v44 = vpack.c.bf16 %v10347_v47, %v10347_v47 }
0x13c3   : > { %v14222_v45 = vpop.eup %14221 }
0x13c4   : > { %v10489_v10 = vmul.f32 %v14222_v45, %v14214_v43 }
0x13c5   : > { %v14224_v31 = vpop.eup %14223 }
0x13c6   : > { %v10490_v12 = vpack.c.bf16 %v10489_v10, %v10489_v10  ;;  %v10561_v59 = vmul.f32 %v14224_v31, %v14216_v57 }
0x13c8   : > { %v10562_v17 = vpack.c.bf16 %v10561_v59, %v10561_v59 }
0x13cc   : > { %12736 = vmatmul.mubr.msk.bf16.vlgmr.msra.gmra.mrb[108].mxu0 %vm8176_vm7, %v10348_v44 }
0x13cd   : > { %12740 = vmatpush3.bf16.msra.mxu0 %v10495_v7  ;;  %12741 = vmatprep.mubr.msk.bf16.mxu0 %vm14462_vm2, %v14461_v14 }
0x13ce   : > { %12745 = vmatprep.subr.bf16.mxu0 %v14461_v14 }
0x13d8   : > { %12742 = vmatmul.mubr.msk.bf16.vlgmr.msra.gmra.mrb[108].mxu0 %vm8176_vm7, %v10490_v12 }
0x13d9   : > { %12746 = vmatpush3.bf16.msra.mxu0 %v10567_v15  ;;  %12747 = vmatprep.mubr.msk.bf16.mxu0 %vm14462_vm2, %v14461_v14 }
0x13da   : > { %12777 = vmatprep.subr.bf16.mxu0 %v14461_v14 }
0x13e4   : > { %12748 = vmatmul.mubr.msk.bf16.vlgmr.msra.gmra.mrb[108].mxu0 %vm8176_vm7, %v10562_v17 }
0x13e5   : > { %12785 = vmatprep.mubr.msk.bf16.mxu0 %vm14462_vm2, %v14461_v14  ;;  %12778 = vmatpush3.bf16.msra.mxu0 %v14101_v2 }
0x13e6   : > { %12779 = vmatprep.subr.bf16.mxu0 %v14461_v14 }
0x13e9   : > { %12780 = vmatpush3.bf16.msra.mxu0 %v14102_v40 }
0x13ea   : > { %12781 = vmatprep.subr.bf16.mxu0 %v14461_v14 }
0x13ed   : > { %12782 = vmatpush3.bf16.msra.mxu0 %v14103_v4 }
0x13ee   : > { %12783 = vmatprep.subr.bf16.mxu0 %v14461_v14 }
0x13f1   : > { %12784 = vmatpush3.bf16.msra.mxu0 %v14104_v54 }
0x14b7   : > { %v10603_v8 = vpop.f32.mrb[108].mxu0 }
0x14b8   : > { %v10610_v50 = vmul.f32 0.25, %v10603_v8  ;;  %v12749_v42 = vpop.f32.mrb[109].mxu0 }
0x14b9   : > { %v10606_v13 = vpop.f32.mrb[110].mxu0 }
0x14ba   : > { %v10615_v30 = vadd.f32 %v12018_v62, %v10610_v50  ;;  %v12750_v19 = vpop.f32.mrb[111].mxu0 }
0x14bc   : > { %v10621_v20 = vmul.f32 %v12019_v18, %v10615_v30 }
0x14be   : > { %v10627_v34 = vadd.f32 %v12020_v61, %v10621_v20 }
0x14c0   : > { %v10628_v21 = vadd.f32 %v10627_v34, %v16881_v5  ;;  %v14094_v5 = vld [vmem:[%s17289_s5 + $0x8] sm:$0xff]   ;;  %s17118_s5 = scalar_lea.hbm %s17292_s1, %s12036_s23 }
0x14c2   : > { %v10630_v16 = vmul.f32 1.442695, %v10628_v21  ;;  %vm10629_vm5 = vcmp.gt.f32.partialorder %v10628_v21, 0.0 }
0x14c4   : > { %14225 = vpow2.f32 %v10630_v16 }
0x14ce   : > { %v14226_v22 = vpop.eup %14225 }
0x14cf   : > { %v12021_v41 = vadd.f32 -1.0, %v14226_v22 }
0x14d1   : > { %v10633_v24 = vsel %vm10629_vm5, %v10628_v21, %v12021_v41 }
0x14d2   : > { %v10634_v25 = vpack.c.bf16 %v10633_v24, %v10633_v24 }
0x14d4   : > { %v10639_v39 = vsel %vm8180_vm6, %v10634_v25, 0 }
0x14d5   : > { %12752 = vmatpush3.bf16.msra.mxu1 %v10639_v39 }
0x14d6   : > { %12757 = vmatprep.subr.bf16.mxu1 %v14461_v14 }
0x14d8   : > { %12754 = vmatmul.mubr.msk.bf16.vlgmr.msra.gmra.mrb[112].mxu1 %vm8176_vm7, %v14469_v27 }
0x14d9   : > { %12758 = vmatpush3.bf16.msra.mxu1 %v14093_v26  ;;  %12773 = vmatprep.mubr.msk.bf16.mxu1 %vm14462_vm2, %v14461_v14  ;;  %vm10830_vm2 = vcmask 523264  }
0x14da   : > { %12759 = vmatprep.subr.bf16.mxu1 %v14461_v14 }
0x14dd   : > { %12760 = vmatpush3.bf16.msra.mxu1 %v14094_v5 }
0x14de   : > { %12761 = vmatprep.subr.bf16.mxu1 %v14461_v14 }
0x14e1   : > { %12762 = vmatpush3.bf16.msra.mxu1 %v14095_v28 }
0x14e2   : > { %12763 = vmatprep.subr.bf16.mxu1 %v14461_v14 }
0x14e5   : > { %12764 = vmatpush3.bf16.msra.mxu1 %v14096_v29 }
0x14e6   : > { %12765 = vmatprep.subr.bf16.mxu1 %v14461_v14 }
0x14e9   : > { %12766 = vmatpush3.bf16.msra.mxu1 %v14097_v32 }
0x14ea   : > { %12767 = vmatprep.subr.bf16.mxu1 %v14461_v14 }
0x14ed   : > { %12768 = vmatpush3.bf16.msra.mxu1 %v14098_v33 }
0x14ee   : > { %12769 = vmatprep.subr.bf16.mxu1 %v14461_v14 }
0x14f1   : > { %12770 = vmatpush3.bf16.msra.mxu1 %v14099_v49 }
0x14f2   : > { %12771 = vmatprep.subr.bf16.mxu1 %v14461_v14 }
0x14f5   : > { %12772 = vmatpush3.bf16.msra.mxu1 %v14100_v37 }
0x15ab   : > { %v10675_v56 = vpop.f32.mrb[112].mxu1 }
0x15ac   : > { %v10697_v35 = vpack.c.bf16 %v10675_v56, %v10675_v56  ;;  %v12755_v9 = vpop.f32.mrb[113].mxu1 }
0x15ad   : > { %v10678_v48 = vpop.f32.mrb[114].mxu1 }
0x15ae   : > { %12774 = vmatmul.mubr.bf16.vlgmr.msra.gmra.mrb[116].mxu1 %v10697_v35  ;;  %v12756_v36 = vpop.f32.mrb[115].mxu1 }
0x1681   : > { %v10781_v52 = vpop.f32.mrb[116].mxu1 }
0x1682   : > { %v10782_v55 = vadd.f32 %v10781_v52, %v10698_v38  ;;  %v12775_v46 = vpop.f32.mrb[117].mxu1 }
0x1683   : > { %v10784_v43 = vpop.f32.mrb[118].mxu1 }
0x1684   : > { %v10788_v57 = vmul.f32 0.044715, %v10782_v55  ;;  %v12776_v58 = vpop.f32.mrb[119].mxu1  ;;  %v10787_v14 = vmul.f32 0.5, %v10782_v55 }
0x1686   : > { %v10789_v53 = vmul.f32 %v10788_v57, %v10782_v55 }
0x1688   : > { %v10790_v3 = vmul.f32 %v10789_v53, %v10782_v55 }
0x168a   : > { %v10791_v11 = vadd.f32 %v10790_v3, %v10782_v55 }
0x168c   : > { %v10792_v60 = vmul.f32 0.7978846, %v10791_v11 }
0x168e   : > { %14227 = vtanh.f32 %v10792_v60 }
0x1698   : > { %v14228_v63 = vpop.eup %14227 }
0x1699   : > { %v10794_v0 = vadd.f32 1.0, %v14228_v63 }
0x169b   : > { %v10795_v1 = vmul.f32 %v10794_v0, %v10787_v14 }
0x169d   : > { %v10804_v51 = vpack.c.bf16 %v10795_v1, %v10795_v1 }
0x169f   : > { %12786 = vmatmul.mubr.msk.bf16.vlgmr.msra.gmra.mrb[112].mxu0 %vm10830_vm2, %v10804_v51 }
0x1772   : > { %v10868_v47 = vpop.f32.mrb[112].mxu0 }
0x1773   : > { %v10869_v44 = vadd.f32 %v10868_v47, %v10805_v6  ;;  %v12787_v7 = vpop.f32.mrb[113].mxu0 }
0x1774   : > { %v10871_v23 = vpop.f32.mrb[114].mxu0 }
0x1775   : > { %10874 = vst [vmem:[%s890_s16] sm:$0x1] %v10869_v44  ;;  %v12788_v45 = vpop.f32.mrb[115].mxu0 }
0x1776   : > { %14390 = shalt.err (!%p14387_p5)
}
0x1777   : > { %s14391_s3 = scalar_lea.hbm %s17118_s5, 16  ;;  %s14395_s29 = scalar_lea.hbm %s17292_s1, 32 }
0x1778   : > { %p14392_p12 = scmp.ne.s32.totalorder %s17118_s5, %s14391_s3  ;;  %p14396_p13 = scmp.lt.u32.totalorder %s17118_s5, %s17292_s1 }
0x1779   : > { %p14397_p1 = scmp.lt.u32.totalorder %s14395_s29, %s14391_s3  ;;  %p14399_p10 = scmp.lt.u32.totalorder %s14391_s3, %s17118_s5 }
0x177a   : > { %p14393_p3 = pnand %p14392_p12, %p17293_p4 }
0x177b   : > { %p14398_p6 = por %p14397_p1, %p14396_p13 }
0x177c   : > { %p14394_p0 = pneg %p14393_p3 }
0x177d   : > { %p14400_p9 = por %p14399_p10, %p14398_p6 }
0x177f   : > { %p14401_p8 = pnand %p14400_p9, %p14394_p0 }
0x1781   : > { %14404 = shalt.err (!%p14401_p8)
}
0x1782   : > { %12835 = dma.vmem_to_hbm [thread:$0]  (%p17293_p4), %s17120_s6, 16, %s17118_s5, %s10876_s0  }
0x1783 PF: > { %s17294_s7 = sld [smem:[#allocation17_spill]]  ;;  %s17295_s4 = sld [smem:[#allocation19_spill]] }
0x1784   : > { %p17297_p11 = scmp.ge.s32.totalorder %s14451_s30, 2 }
0x1789   : > { %s10900_s23 = sand.u32 1, %s17294_s7   ;;  %p17296_p7 = scmp.ne.s32.totalorder %s17295_s4, 0 }
0x178a   : > { %s10901_s16 = scalar_lea.sflag [#allocation5], %s10900_s23 }
0x178b   : > { %p12855_p2 = pnand %p17297_p11, %p17296_p7 }
0x178d   : > { %14434 = dma.done.wait (!%p12855_p2), %s10901_s16, 16  }
0x178e   : > { %14436 = vsyncadd (!%p12855_p2), %s10901_s16, 4294967280  ;;  %s17298_s30 = sld [smem:[#allocation20_spill]]  ;;  %s17299_s3 = sld [smem:[#allocation18_spill]] }
0x178f   : > { %s17300_s6 = sld [smem:[#allocation21_spill]]  ;;  %s17301_s29 = smov %s14443_s2 }
0x1794   : > { %p42_p5 = scmp.ge.s32.totalorder %s17298_s30, 4   ;;  %s17302_s2 = smov %s17299_s3 }
0x1796   :  { %44 = sbr.rel (!%p42_p5) target bundleno = 27 (0x1b), region = 200 }
0x179d   :  { %10905 = vsyncpa [#allocation4], 1 }
0x179e   :  { %10907 = vsyncpa [#allocation4 + $0x1], 1 }
0x179f   :  { %10908 = vsyncpa [#allocation7], 1 }
0x17a0   :  { %10910 = vsyncpa [#allocation7 + $0x1], 1 }
0x17a1   :  { %10911 = vsyncpa [#allocation10], 1 }
0x17a2   :  { %10912 = vsyncpa [#allocation5], 1 }
0x17a3   :  { %10914 = vsyncpa [#allocation5 + $0x1], 1 }

</bundles_post_ra>
